<compile_context>
chip_gen: v7x
topology: tpu7x:2x2x1
jax: 0.10.0
libtpu: 0.0.40
codegen_flags: <defaults>
</compile_context>

<pallas_src>
import functools

import jax
import jax.numpy as jnp
from jax.experimental import pallas as pl
from jax.experimental.pallas import tpu as pltpu


# ----------------------------------------------------------------------------
# Fused ConvBlock kernel.
# Grid: (batch, output-row-strip).  Per-image work (conv1 into padded scratch)
# is gated on strip index 0; the scratch persists across the strip axis.
# ----------------------------------------------------------------------------
def _convblock_kernel(x_ref, w1_ref, s1_ref, b1_ref,
                      w2_ref, s2_ref, b2_ref,
                      w3_ref, s3_ref, b3_ref,
                      *rest, stride, RS, Wo, H, W, res_conv):
    # x_ref : (1, H, W, Cin) bf16  raw input image for this batch (VMEM resident)
    # w1    : (Cin, c)  bf16 ; s1/b1 : (1, c)    f32 (folded BN)
    # w2    : (9, c, c) bf16 ; s2/b2 : (1, c)    f32
    # w3    : (c, Cout) bf16 ; s3/b3 : (1, Cout) f32
    # [wr   : (Cin, Cout) bf16 ; sr/br : (1, Cout) f32]   (if res_conv)
    # out   : (1, RS, Wo, Cout) f32 ;  x2 : (1, RS, Wo, c) bf16
    # x1p   : (H+2, W+2, c) bf16 scratch (padded conv1 output, persists over i)
    # acc   : (RS*Wo, c)    f32  scratch (3x3-conv accumulator)
    if res_conv:
        wr_ref, sr_ref, br_ref, out_ref, x2_ref, x1p_ref, acc_ref = rest
    else:
        out_ref, x2_ref, x1p_ref, acc_ref = rest

    i = pl.program_id(1)
    Cin = x_ref.shape[-1]
    c = w1_ref.shape[-1]
    Cout = w3_ref.shape[-1]
    rs_in = (RS - 1) * stride + 1

    # -- stage 1 (once per image): conv1 (1x1) + bn1 + SiLU -> padded scratch.
    @pl.when(i == 0)
    def _():
        xf = x_ref[...].reshape(H * W, Cin)
        y = jnp.dot(xf, w1_ref[...], preferred_element_type=jnp.float32)
        y = y * s1_ref[...] + b1_ref[...]
        y = y * jax.nn.sigmoid(y)                                  # SiLU (act1)
        y = y.reshape(H, W, c)                                     # f32
        zc = jnp.zeros((H, 1, c), jnp.float32)
        zr = jnp.zeros((1, W + 2, c), jnp.float32)
        yp = jnp.concatenate([zc, y, zc], axis=1)                  # (H, W+2, c)
        yp = jnp.concatenate([zr, yp, zr], axis=0)                 # (H+2, W+2, c)
        x1p_ref[...] = yp.astype(x1p_ref.dtype)

    # -- stage 2 (per row strip): 3x3 conv (pad=1, stride) + bn2 + SiLU -> x2.
    row0 = i * RS * stride
    acc_ref[...] = jnp.zeros_like(acc_ref)
    for kh in range(3):
        rows = x1p_ref[pl.ds(row0 + kh, rs_in), :, :]              # (rs_in, W+2, c)
        if stride > 1:
            rows = rows[::stride]                                  # (RS, W+2, c)
        for kw in range(3):
            cols = rows[:, kw: kw + (Wo - 1) * stride + 1: stride, :]   # (RS, Wo, c)
            acc_ref[...] += jnp.dot(cols.reshape(RS * Wo, c),
                                    w2_ref[kh * 3 + kw],
                                    preferred_element_type=jnp.float32)
    x2f = acc_ref[...] * s2_ref[...] + b2_ref[...]
    x2f = x2f * jax.nn.sigmoid(x2f)                                # SiLU (act2)
    x2_bf = x2f.astype(jnp.bfloat16)
    x2_ref[...] = x2_bf.reshape(1, RS, Wo, c)

    # -- stage 3: conv3 (1x1) + bn3 + residual (1x1 conv + bn, or identity)
    #             + SiLU -> out (all on the VMEM-resident strip).
    y3 = jnp.dot(x2_bf, w3_ref[...], preferred_element_type=jnp.float32)
    y3 = y3 * s3_ref[...] + b3_ref[...]

    xr = x_ref[0, pl.ds(row0, rs_in), :, :]                        # (rs_in, W, Cin)
    if stride > 1:
        # TODO(synk): the PyTorch reference's residual conv is stride-1, so
        # stride>1 + residual add would shape-error there; we subsample the
        # residual spatially to keep the kernel runnable for stride>1.
        xr = xr[::stride][:, ::stride, :]                          # (RS, Wo, Cin)
    xr2d = xr.reshape(RS * Wo, Cin)
    if res_conv:
        r = jnp.dot(xr2d, wr_ref[...], preferred_element_type=jnp.float32)
        r = r * sr_ref[...] + br_ref[...]
    else:
        r = xr2d.astype(jnp.float32)                               # identity (Cin==Cout)
    y3 = y3 + r
    y3 = y3 * jax.nn.sigmoid(y3)                                   # SiLU (act3)
    out_ref[...] = y3.reshape(1, RS, Wo, Cout).astype(out_ref.dtype)


def fused_conv_block(x_nhwc, params, *, stride, res_conv):
    """x_nhwc: [N,H,W,Cin] bf16 -> (out [N,Ho,Wo,Cout] f32, x2 [N,Ho,Wo,c] bf16)."""
    N, H, W, Cin = x_nhwc.shape
    c = params["w1"].shape[1]
    Cout = params["w3"].shape[1]
    Ho = (H - 1) // stride + 1
    Wo = (W - 1) // stride + 1

    # Output rows per grid step: largest divisor of Ho up to 16, so each 3x3
    # tap matmul has M = RS*Wo rows and the output stores are dense slabs.
    RS = 1
    for cand in range(min(16, Ho), 0, -1):
        if Ho % cand == 0:
            RS = cand
            break

    in_specs = [
        pl.BlockSpec((1, H, W, Cin), lambda n, i: (n, 0, 0, 0)),
        pl.BlockSpec((Cin, c), lambda n, i: (0, 0)),
        pl.BlockSpec((1, c), lambda n, i: (0, 0)),
        pl.BlockSpec((1, c), lambda n, i: (0, 0)),
        pl.BlockSpec((9, c, c), lambda n, i: (0, 0, 0)),
        pl.BlockSpec((1, c), lambda n, i: (0, 0)),
        pl.BlockSpec((1, c), lambda n, i: (0, 0)),
        pl.BlockSpec((c, Cout), lambda n, i: (0, 0)),
        pl.BlockSpec((1, Cout), lambda n, i: (0, 0)),
        pl.BlockSpec((1, Cout), lambda n, i: (0, 0)),
    ]
    args = [x_nhwc,
            params["w1"], params["s1"], params["b1"],
            params["w2"], params["s2"], params["b2"],
            params["w3"], params["s3"], params["b3"]]
    if res_conv:
        in_specs += [
            pl.BlockSpec((Cin, Cout), lambda n, i: (0, 0)),
            pl.BlockSpec((1, Cout), lambda n, i: (0, 0)),
            pl.BlockSpec((1, Cout), lambda n, i: (0, 0)),
        ]
        args += [params["wr"], params["sr"], params["br"]]

    flops = (2 * N * H * W * Cin * c
             + 2 * N * Ho * Wo * 9 * c * c
             + 2 * N * Ho * Wo * c * Cout
             + (2 * N * Ho * Wo * Cin * Cout if res_conv else 0))
    trans = N * H * W * c + N * Ho * Wo * (c + Cout)
    wbytes = 2 * (Cin * c + 9 * c * c + c * Cout + (Cin * Cout if res_conv else 0))
    bytes_accessed = (N * H * W * Cin * 2 + wbytes
                      + N * Ho * Wo * Cout * 4 + N * Ho * Wo * c * 2)

    kernel = functools.partial(_convblock_kernel, stride=stride, RS=RS, Wo=Wo,
                               H=H, W=W, res_conv=res_conv)
    # TODO(synk): for very large H*W*c switch the per-image padded scratch /
    # resident input block to halo row-strip tiling (manual DMA) instead of
    # whole-image VMEM residency.
    return pl.pallas_call(
        kernel,
        out_shape=(jax.ShapeDtypeStruct((N, Ho, Wo, Cout), jnp.float32),
                   jax.ShapeDtypeStruct((N, Ho, Wo, c), jnp.bfloat16)),
        grid_spec=pltpu.PrefetchScalarGridSpec(
            num_scalar_prefetch=0,
            grid=(N, Ho // RS),
            in_specs=in_specs,
            out_specs=[
                pl.BlockSpec((1, RS, Wo, Cout), lambda n, i: (n, i, 0, 0)),
                pl.BlockSpec((1, RS, Wo, c), lambda n, i: (n, i, 0, 0)),
            ],
            scratch_shapes=[
                pltpu.VMEM((H + 2, W + 2, c), jnp.bfloat16),
                pltpu.VMEM((RS * Wo, c), jnp.float32),
            ]),
        compiler_params=pltpu.CompilerParams(
            dimension_semantics=("parallel", "arbitrary"),
            vmem_limit_bytes=64 * 1024 * 1024),
        cost_estimate=pl.CostEstimate(flops=flops, transcendentals=trans,
                                      bytes_accessed=bytes_accessed),
    )(*args)


# ----------------------------------------------------------------------------
# Parameter construction (deterministic) + BN folding (eps=1e-6 per the module).
# ----------------------------------------------------------------------------
def _fold_bn(gamma, beta, mean, var, eps=1e-6):
    scale = gamma / jnp.sqrt(var + eps)
    bias = beta - mean * scale
    return (scale.reshape(1, -1).astype(jnp.float32),
            bias.reshape(1, -1).astype(jnp.float32))


def make_params(key, in_channels, out_channels):
    c = out_channels // 4  # expansion = 4
    ks = jax.random.split(key, 20)

    def conv_w(k, cout, cin, kh, kw):          # PyTorch layout (Cout, Cin, kh, kw)
        return jax.random.normal(k, (cout, cin, kh, kw), jnp.float32) * 0.1

    def bn(k, ch):
        k1, k2, k3, k4 = jax.random.split(k, 4)
        gamma = jax.random.uniform(k1, (ch,), jnp.float32, 0.5, 1.5)
        beta = jax.random.normal(k2, (ch,), jnp.float32) * 0.1
        mean = jax.random.normal(k3, (ch,), jnp.float32) * 0.1
        var = jax.random.uniform(k4, (ch,), jnp.float32, 0.5, 1.5)
        return _fold_bn(gamma, beta, mean, var)

    bf16 = jnp.bfloat16
    p = {}
    # conv1: 1x1 in->c
    w1 = conv_w(ks[0], c, in_channels, 1, 1)
    p["w1"] = jnp.transpose(w1[:, :, 0, 0], (1, 0)).astype(bf16)          # (Cin, c)
    p["s1"], p["b1"] = bn(ks[1], c)
    # conv2: 3x3 c->c  -> (kh,kw,Cin,Cout) flattened to (9, Cin, Cout)
    w2 = conv_w(ks[2], c, c, 3, 3)
    p["w2"] = jnp.transpose(w2, (2, 3, 1, 0)).reshape(9, c, c).astype(bf16)
    p["s2"], p["b2"] = bn(ks[3], c)
    # conv3: 1x1 c->out
    w3 = conv_w(ks[4], out_channels, c, 1, 1)
    p["w3"] = jnp.transpose(w3[:, :, 0, 0], (1, 0)).astype(bf16)          # (c, Cout)
    p["s3"], p["b3"] = bn(ks[5], out_channels)
    # residual_conv: 1x1 in->out
    wr = conv_w(ks[6], out_channels, in_channels, 1, 1)
    p["wr"] = jnp.transpose(wr[:, :, 0, 0], (1, 0)).astype(bf16)          # (Cin, Cout)
    p["sr"], p["br"] = bn(ks[7], out_channels)
    return p


# ----------------------------------------------------------------------------
# ConvBlock forward (NCHW in / out, matching the PyTorch module interface).
# ----------------------------------------------------------------------------
def conv_block_forward(x_nchw, params, *, stride=1, res_conv=True, return_x_2=True):
    x = jnp.transpose(x_nchw, (0, 2, 3, 1)).astype(jnp.bfloat16)          # (N,H,W,Cin)
    out, x2 = fused_conv_block(x, params, stride=stride, res_conv=res_conv)
    out_nchw = jnp.transpose(out, (0, 3, 1, 2)).astype(jnp.float32)
    x2_nchw = jnp.transpose(x2, (0, 3, 1, 2)).astype(jnp.float32)
    if return_x_2:
        return out_nchw, x2_nchw
    return out_nchw


# ----------------------------------------------------------------------------
# Pure-JAX reference (same folded-BN params, f32 math) for a loose check.
# ----------------------------------------------------------------------------
def _reference_forward(x_nchw, params, *, stride=1, res_conv=True):
    silu = lambda v: v * jax.nn.sigmoid(v)
    x = jnp.transpose(x_nchw, (0, 2, 3, 1)).astype(jnp.bfloat16).astype(jnp.float32)
    w1 = params["w1"].astype(jnp.float32)
    c = w1.shape[1]
    x1 = silu(jnp.einsum("nhwi,io->nhwo", x, w1) * params["s1"] + params["b1"])
    x1p = jnp.pad(x1, ((0, 0), (1, 1), (1, 1), (0, 0)))
    w2 = params["w2"].astype(jnp.float32).reshape(3, 3, c, c)             # HWIO
    y2 = jax.lax.conv_general_dilated(x1p, w2, (stride, stride), "VALID",
                                      dimension_numbers=("NHWC", "HWIO", "NHWC"))
    x2 = silu(y2 * params["s2"] + params["b2"])
    w3 = params["w3"].astype(jnp.float32)
    out = jnp.einsum("nhwi,io->nhwo", x2, w3) * params["s3"] + params["b3"]
    if res_conv:
        wr = params["wr"].astype(jnp.float32)
        res = jnp.einsum("nhwi,io->nhwo", x, wr) * params["sr"] + params["br"]
    else:
        res = x
    if stride != 1:
        res = res[:, ::stride, ::stride, :]
    out = silu(out + res)
    return jnp.transpose(out, (0, 3, 1, 2)), jnp.transpose(x2, (0, 3, 1, 2))


if __name__ == "__main__":
    key = jax.random.PRNGKey(0)
    k_x, k_p = jax.random.split(key)

    N, Cin, H, W = 2, 8, 16, 16
    Cout = 16            # expansion=4 -> hidden c = 4
    stride = 1
    res_conv = True

    x = jax.random.normal(k_x, (N, Cin, H, W), jnp.float32)
    params = make_params(k_p, Cin, Cout)

    fwd = jax.jit(functools.partial(conv_block_forward, stride=stride,
                                    res_conv=res_conv, return_x_2=True))
    y, x2 = fwd(x, params)
    jax.block_until_ready((y, x2))

    assert y.shape == (N, Cout, H // stride, W // stride)
    assert x2.shape == (N, Cout // 4, H // stride, W // stride)

    # Loose numerical check (bf16 intermediates in the Pallas path -> small drift).
    y_ref, x2_ref = _reference_forward(x, params, stride=stride, res_conv=res_conv)
    err_y = float(jnp.max(jnp.abs(y - y_ref)))
    err_x2 = float(jnp.max(jnp.abs(x2 - x2_ref)))
    assert err_y < 8e-2 and err_x2 < 8e-2, (err_y, err_x2)

    print("KERNEL_OK")
</pallas_src>

<mosaic_0001>
module attributes {stable_mosaic.version = 11 : i64} {
  func.func @_convblock_kernel(%arg0: i32, %arg1: i32, %arg2: memref<1x16x16x8xbf16, #tpu.memory_space<vmem>>, %arg3: memref<8x4xbf16, #tpu.memory_space<vmem>>, %arg4: memref<1x4xf32, #tpu.memory_space<vmem>>, %arg5: memref<1x4xf32, #tpu.memory_space<vmem>>, %arg6: memref<9x4x4xbf16, #tpu.memory_space<vmem>>, %arg7: memref<1x4xf32, #tpu.memory_space<vmem>>, %arg8: memref<1x4xf32, #tpu.memory_space<vmem>>, %arg9: memref<4x16xbf16, #tpu.memory_space<vmem>>, %arg10: memref<1x16xf32, #tpu.memory_space<vmem>>, %arg11: memref<1x16xf32, #tpu.memory_space<vmem>>, %arg12: memref<8x16xbf16, #tpu.memory_space<vmem>>, %arg13: memref<1x16xf32, #tpu.memory_space<vmem>>, %arg14: memref<1x16xf32, #tpu.memory_space<vmem>>, %arg15: memref<1x16x16x16xf32, #tpu.memory_space<vmem>>, %arg16: memref<1x16x16x4xbf16, #tpu.memory_space<vmem>>, %arg17: memref<18x18x4xbf16, #tpu.memory_space<vmem>>, %arg18: memref<256x4xf32, #tpu.memory_space<vmem>>) attributes {dimension_semantics = [#tpu.dimension_semantics<parallel>, #tpu.dimension_semantics<arbitrary>], iteration_bounds = array<i64: 2, 1>, scalar_prefetch = 0 : i64, scratch_operands = 2 : i64, tpu.core_type = #tpu.core_type<tc>, window_params = [{transform_indices = @transform_0, window_bounds = array<i64: 1, 16, 16, 8>}, {pipeline_mode = #tpu.pipeline_mode<synchronous>, transform_indices = @transform_1, window_bounds = array<i64: 8, 4>}, {pipeline_mode = #tpu.pipeline_mode<synchronous>, transform_indices = @transform_2, window_bounds = array<i64: 1, 4>}, {pipeline_mode = #tpu.pipeline_mode<synchronous>, transform_indices = @transform_3, window_bounds = array<i64: 1, 4>}, {pipeline_mode = #tpu.pipeline_mode<synchronous>, transform_indices = @transform_4, window_bounds = array<i64: 9, 4, 4>}, {pipeline_mode = #tpu.pipeline_mode<synchronous>, transform_indices = @transform_5, window_bounds = array<i64: 1, 4>}, {pipeline_mode = #tpu.pipeline_mode<synchronous>, transform_indices = @transform_6, window_bounds = array<i64: 1, 4>}, {pipeline_mode = #tpu.pipeline_mode<synchronous>, transform_indices = @transform_7, window_bounds = array<i64: 4, 16>}, {pipeline_mode = #tpu.pipeline_mode<synchronous>, transform_indices = @transform_8, window_bounds = array<i64: 1, 16>}, {pipeline_mode = #tpu.pipeline_mode<synchronous>, transform_indices = @transform_9, window_bounds = array<i64: 1, 16>}, {pipeline_mode = #tpu.pipeline_mode<synchronous>, transform_indices = @transform_10, window_bounds = array<i64: 8, 16>}, {pipeline_mode = #tpu.pipeline_mode<synchronous>, transform_indices = @transform_11, window_bounds = array<i64: 1, 16>}, {pipeline_mode = #tpu.pipeline_mode<synchronous>, transform_indices = @transform_12, window_bounds = array<i64: 1, 16>}, {transform_indices = @transform_13, window_bounds = array<i64: 1, 16, 16, 16>}, {transform_indices = @transform_14, window_bounds = array<i64: 1, 16, 16, 4>}]} {
    %c0_i32 = arith.constant 0 : i32
    %0 = arith.cmpi eq, %arg1, %c0_i32 : i32
    %1 = arith.extui %0 : i1 to i32
    %c0_i32_0 = arith.constant 0 : i32
    %2 = arith.cmpi ne, %1, %c0_i32_0 : i32
    scf.if %2 {
      %c0_107 = arith.constant 0 : index
      %c0_108 = arith.constant 0 : index
      %c0_109 = arith.constant 0 : index
      %c0_110 = arith.constant 0 : index
      %133 = vector.load %arg2[%c0_107, %c0_108, %c0_109, %c0_110] : memref<1x16x16x8xbf16, #tpu.memory_space<vmem>>, vector<1x16x16x8xbf16>
      %134 = vector.shape_cast %133 : vector<1x16x16x8xbf16> to vector<256x8xbf16>
      %c0_111 = arith.constant 0 : index
      %c0_112 = arith.constant 0 : index
      %135 = vector.load %arg3[%c0_111, %c0_112] : memref<8x4xbf16, #tpu.memory_space<vmem>>, vector<8x4xbf16>
      %cst_113 = arith.constant dense<0.000000e+00> : vector<256x4xf32>
      %136 = tpu.matmul %134, %135, %cst_113 {dimension_numbers = #tpu.dot_dimension_numbers<[1], [0], [0], [1], [0, 0, 1, 1], [], []>} : vector<256x8xbf16>, vector<8x4xbf16>, vector<256x4xf32> -> vector<256x4xf32>
      %c0_114 = arith.constant 0 : index
      %c0_115 = arith.constant 0 : index
      %137 = vector.load %arg4[%c0_114, %c0_115] : memref<1x4xf32, #tpu.memory_space<vmem>>, vector<1x4xf32>
      %138 = vector.broadcast %137 : vector<1x4xf32> to vector<256x4xf32>
      %139 = arith.mulf %136, %138 : vector<256x4xf32>
      %c0_116 = arith.constant 0 : index
      %c0_117 = arith.constant 0 : index
      %140 = vector.load %arg5[%c0_116, %c0_117] : memref<1x4xf32, #tpu.memory_space<vmem>>, vector<1x4xf32>
      %141 = vector.broadcast %140 : vector<1x4xf32> to vector<256x4xf32>
      %142 = arith.addf %139, %141 : vector<256x4xf32>
      %143 = arith.negf %142 : vector<256x4xf32>
      %144 = math.exp %143 : vector<256x4xf32>
      %cst_118 = arith.constant 1.000000e+00 : f32
      %145 = vector.broadcast %cst_118 : f32 to vector<256x4xf32>
      %146 = arith.addf %145, %144 : vector<256x4xf32>
      %147 = arith.divf %145, %146 : vector<256x4xf32>
      %148 = arith.mulf %142, %147 : vector<256x4xf32>
      %149 = vector.shape_cast %148 : vector<256x4xf32> to vector<16x16x4xf32>
      %cst_119 = arith.constant 0.000000e+00 : f32
      %150 = vector.broadcast %cst_119 : f32 to vector<16x1x4xf32>
      %cst_120 = arith.constant 0.000000e+00 : f32
      %151 = vector.broadcast %cst_120 : f32 to vector<1x18x4xf32>
      %152 = tpu.concatenate %150, %149, %150 in 1 : vector<16x1x4xf32>, vector<16x16x4xf32>, vector<16x1x4xf32> -> vector<16x18x4xf32>
      %153 = tpu.concatenate %151, %152, %151 in 0 : vector<1x18x4xf32>, vector<16x18x4xf32>, vector<1x18x4xf32> -> vector<18x18x4xf32>
      %154 = arith.truncf %153 : vector<18x18x4xf32> to vector<18x18x4xbf16>
      %c0_121 = arith.constant 0 : index
      %c0_122 = arith.constant 0 : index
      %c0_123 = arith.constant 0 : index
      %155 = vector.load %arg17[%c0_121, %c0_122, %c0_123] : memref<18x18x4xbf16, #tpu.memory_space<vmem>>, vector<18x18x4xbf16>
      tpu.vector_store %arg17[%c0_121, %c0_122, %c0_123], %154 {strides = array<i32>} : memref<18x18x4xbf16, #tpu.memory_space<vmem>>, vector<18x18x4xbf16>,
    } else {
    }
    %c16_i32 = arith.constant 16 : i32
    %3 = arith.muli %arg1, %c16_i32 : i32
    %c1_i32 = arith.constant 1 : i32
    %4 = arith.muli %3, %c1_i32 : i32
    %cst = arith.constant 0.000000e+00 : f32
    %5 = vector.broadcast %cst : f32 to vector<256x4xf32>
    %c0 = arith.constant 0 : index
    %c0_1 = arith.constant 0 : index
    %6 = vector.load %arg18[%c0, %c0_1] : memref<256x4xf32, #tpu.memory_space<vmem>>, vector<256x4xf32>
    tpu.vector_store %arg18[%c0, %c0_1], %5 {strides = array<i32>} : memref<256x4xf32, #tpu.memory_space<vmem>>, vector<256x4xf32>,
    %c0_i32_2 = arith.constant 0 : i32
    %7 = arith.addi %4, %c0_i32_2 : i32
    %8 = arith.index_cast %7 : i32 to index
    %c0_3 = arith.constant 0 : index
    %c0_4 = arith.constant 0 : index
    %9 = vector.load %arg17[%8, %c0_3, %c0_4] : memref<18x18x4xbf16, #tpu.memory_space<vmem>>, vector<16x18x4xbf16>
    %10 = vector.extract_strided_slice %9 {offsets = [0, 0, 0], sizes = [16, 16, 4], strides = [1, 1, 1]} : vector<16x18x4xbf16> to vector<16x16x4xbf16>
    %c0_5 = arith.constant 0 : index
    %c0_6 = arith.constant 0 : index
    %11 = vector.load %arg18[%c0_5, %c0_6] : memref<256x4xf32, #tpu.memory_space<vmem>>, vector<256x4xf32>
    %12 = vector.shape_cast %10 : vector<16x16x4xbf16> to vector<256x4xbf16>
    %c0_7 = arith.constant 0 : index
    %c0_8 = arith.constant 0 : index
    %c0_9 = arith.constant 0 : index
    %13 = vector.load %arg6[%c0_7, %c0_8, %c0_9] : memref<9x4x4xbf16, #tpu.memory_space<vmem>>, vector<1x4x4xbf16>
    %14 = vector.shape_cast %13 : vector<1x4x4xbf16> to vector<4x4xbf16>
    %cst_10 = arith.constant dense<0.000000e+00> : vector<256x4xf32>
    %15 = tpu.matmul %12, %14, %cst_10 {dimension_numbers = #tpu.dot_dimension_numbers<[1], [0], [0], [1], [0, 0, 1, 1], [], []>} : vector<256x4xbf16>, vector<4x4xbf16>, vector<256x4xf32> -> vector<256x4xf32>
    %16 = arith.addf %11, %15 : vector<256x4xf32>
    %c0_11 = arith.constant 0 : index
    %c0_12 = arith.constant 0 : index
    %17 = vector.load %arg18[%c0_11, %c0_12] : memref<256x4xf32, #tpu.memory_space<vmem>>, vector<256x4xf32>
    tpu.vector_store %arg18[%c0_11, %c0_12], %16 {strides = array<i32>} : memref<256x4xf32, #tpu.memory_space<vmem>>, vector<256x4xf32>,
    %18 = vector.extract_strided_slice %9 {offsets = [0, 1, 0], sizes = [16, 16, 4], strides = [1, 1, 1]} : vector<16x18x4xbf16> to vector<16x16x4xbf16>
    %c0_13 = arith.constant 0 : index
    %c0_14 = arith.constant 0 : index
    %19 = vector.load %arg18[%c0_13, %c0_14] : memref<256x4xf32, #tpu.memory_space<vmem>>, vector<256x4xf32>
    %20 = vector.shape_cast %18 : vector<16x16x4xbf16> to vector<256x4xbf16>
    %c1 = arith.constant 1 : index
    %c0_15 = arith.constant 0 : index
    %c0_16 = arith.constant 0 : index
    %21 = vector.load %arg6[%c1, %c0_15, %c0_16] : memref<9x4x4xbf16, #tpu.memory_space<vmem>>, vector<1x4x4xbf16>
    %22 = vector.shape_cast %21 : vector<1x4x4xbf16> to vector<4x4xbf16>
    %cst_17 = arith.constant dense<0.000000e+00> : vector<256x4xf32>
    %23 = tpu.matmul %20, %22, %cst_17 {dimension_numbers = #tpu.dot_dimension_numbers<[1], [0], [0], [1], [0, 0, 1, 1], [], []>} : vector<256x4xbf16>, vector<4x4xbf16>, vector<256x4xf32> -> vector<256x4xf32>
    %24 = arith.addf %19, %23 : vector<256x4xf32>
    %c0_18 = arith.constant 0 : index
    %c0_19 = arith.constant 0 : index
    %25 = vector.load %arg18[%c0_18, %c0_19] : memref<256x4xf32, #tpu.memory_space<vmem>>, vector<256x4xf32>
    tpu.vector_store %arg18[%c0_18, %c0_19], %24 {strides = array<i32>} : memref<256x4xf32, #tpu.memory_space<vmem>>, vector<256x4xf32>,
    %26 = vector.extract_strided_slice %9 {offsets = [0, 2, 0], sizes = [16, 16, 4], strides = [1, 1, 1]} : vector<16x18x4xbf16> to vector<16x16x4xbf16>
    %c0_20 = arith.constant 0 : index
    %c0_21 = arith.constant 0 : index
    %27 = vector.load %arg18[%c0_20, %c0_21] : memref<256x4xf32, #tpu.memory_space<vmem>>, vector<256x4xf32>
    %28 = vector.shape_cast %26 : vector<16x16x4xbf16> to vector<256x4xbf16>
    %c2 = arith.constant 2 : index
    %c0_22 = arith.constant 0 : index
    %c0_23 = arith.constant 0 : index
    %29 = vector.load %arg6[%c2, %c0_22, %c0_23] : memref<9x4x4xbf16, #tpu.memory_space<vmem>>, vector<1x4x4xbf16>
    %30 = vector.shape_cast %29 : vector<1x4x4xbf16> to vector<4x4xbf16>
    %cst_24 = arith.constant dense<0.000000e+00> : vector<256x4xf32>
    %31 = tpu.matmul %28, %30, %cst_24 {dimension_numbers = #tpu.dot_dimension_numbers<[1], [0], [0], [1], [0, 0, 1, 1], [], []>} : vector<256x4xbf16>, vector<4x4xbf16>, vector<256x4xf32> -> vector<256x4xf32>
    %32 = arith.addf %27, %31 : vector<256x4xf32>
    %c0_25 = arith.constant 0 : index
    %c0_26 = arith.constant 0 : index
    %33 = vector.load %arg18[%c0_25, %c0_26] : memref<256x4xf32, #tpu.memory_space<vmem>>, vector<256x4xf32>
    tpu.vector_store %arg18[%c0_25, %c0_26], %32 {strides = array<i32>} : memref<256x4xf32, #tpu.memory_space<vmem>>, vector<256x4xf32>,
    %c1_i32_27 = arith.constant 1 : i32
    %34 = arith.addi %4, %c1_i32_27 : i32
    %35 = arith.index_cast %34 : i32 to index
    %c0_28 = arith.constant 0 : index
    %c0_29 = arith.constant 0 : index
    %36 = vector.load %arg17[%35, %c0_28, %c0_29] : memref<18x18x4xbf16, #tpu.memory_space<vmem>>, vector<16x18x4xbf16>
    %37 = vector.extract_strided_slice %36 {offsets = [0, 0, 0], sizes = [16, 16, 4], strides = [1, 1, 1]} : vector<16x18x4xbf16> to vector<16x16x4xbf16>
    %c0_30 = arith.constant 0 : index
    %c0_31 = arith.constant 0 : index
    %38 = vector.load %arg18[%c0_30, %c0_31] : memref<256x4xf32, #tpu.memory_space<vmem>>, vector<256x4xf32>
    %39 = vector.shape_cast %37 : vector<16x16x4xbf16> to vector<256x4xbf16>
    %c3 = arith.constant 3 : index
    %c0_32 = arith.constant 0 : index
    %c0_33 = arith.constant 0 : index
    %40 = vector.load %arg6[%c3, %c0_32, %c0_33] : memref<9x4x4xbf16, #tpu.memory_space<vmem>>, vector<1x4x4xbf16>
    %41 = vector.shape_cast %40 : vector<1x4x4xbf16> to vector<4x4xbf16>
    %cst_34 = arith.constant dense<0.000000e+00> : vector<256x4xf32>
    %42 = tpu.matmul %39, %41, %cst_34 {dimension_numbers = #tpu.dot_dimension_numbers<[1], [0], [0], [1], [0, 0, 1, 1], [], []>} : vector<256x4xbf16>, vector<4x4xbf16>, vector<256x4xf32> -> vector<256x4xf32>
    %43 = arith.addf %38, %42 : vector<256x4xf32>
    %c0_35 = arith.constant 0 : index
    %c0_36 = arith.constant 0 : index
    %44 = vector.load %arg18[%c0_35, %c0_36] : memref<256x4xf32, #tpu.memory_space<vmem>>, vector<256x4xf32>
    tpu.vector_store %arg18[%c0_35, %c0_36], %43 {strides = array<i32>} : memref<256x4xf32, #tpu.memory_space<vmem>>, vector<256x4xf32>,
    %45 = vector.extract_strided_slice %36 {offsets = [0, 1, 0], sizes = [16, 16, 4], strides = [1, 1, 1]} : vector<16x18x4xbf16> to vector<16x16x4xbf16>
    %c0_37 = arith.constant 0 : index
    %c0_38 = arith.constant 0 : index
    %46 = vector.load %arg18[%c0_37, %c0_38] : memref<256x4xf32, #tpu.memory_space<vmem>>, vector<256x4xf32>
    %47 = vector.shape_cast %45 : vector<16x16x4xbf16> to vector<256x4xbf16>
    %c4 = arith.constant 4 : index
    %c0_39 = arith.constant 0 : index
    %c0_40 = arith.constant 0 : index
    %48 = vector.load %arg6[%c4, %c0_39, %c0_40] : memref<9x4x4xbf16, #tpu.memory_space<vmem>>, vector<1x4x4xbf16>
    %49 = vector.shape_cast %48 : vector<1x4x4xbf16> to vector<4x4xbf16>
    %cst_41 = arith.constant dense<0.000000e+00> : vector<256x4xf32>
    %50 = tpu.matmul %47, %49, %cst_41 {dimension_numbers = #tpu.dot_dimension_numbers<[1], [0], [0], [1], [0, 0, 1, 1], [], []>} : vector<256x4xbf16>, vector<4x4xbf16>, vector<256x4xf32> -> vector<256x4xf32>
    %51 = arith.addf %46, %50 : vector<256x4xf32>
    %c0_42 = arith.constant 0 : index
    %c0_43 = arith.constant 0 : index
    %52 = vector.load %arg18[%c0_42, %c0_43] : memref<256x4xf32, #tpu.memory_space<vmem>>, vector<256x4xf32>
    tpu.vector_store %arg18[%c0_42, %c0_43], %51 {strides = array<i32>} : memref<256x4xf32, #tpu.memory_space<vmem>>, vector<256x4xf32>,
    %53 = vector.extract_strided_slice %36 {offsets = [0, 2, 0], sizes = [16, 16, 4], strides = [1, 1, 1]} : vector<16x18x4xbf16> to vector<16x16x4xbf16>
    %c0_44 = arith.constant 0 : index
    %c0_45 = arith.constant 0 : index
    %54 = vector.load %arg18[%c0_44, %c0_45] : memref<256x4xf32, #tpu.memory_space<vmem>>, vector<256x4xf32>
    %55 = vector.shape_cast %53 : vector<16x16x4xbf16> to vector<256x4xbf16>
    %c5 = arith.constant 5 : index
    %c0_46 = arith.constant 0 : index
    %c0_47 = arith.constant 0 : index
    %56 = vector.load %arg6[%c5, %c0_46, %c0_47] : memref<9x4x4xbf16, #tpu.memory_space<vmem>>, vector<1x4x4xbf16>
    %57 = vector.shape_cast %56 : vector<1x4x4xbf16> to vector<4x4xbf16>
    %cst_48 = arith.constant dense<0.000000e+00> : vector<256x4xf32>
    %58 = tpu.matmul %55, %57, %cst_48 {dimension_numbers = #tpu.dot_dimension_numbers<[1], [0], [0], [1], [0, 0, 1, 1], [], []>} : vector<256x4xbf16>, vector<4x4xbf16>, vector<256x4xf32> -> vector<256x4xf32>
    %59 = arith.addf %54, %58 : vector<256x4xf32>
    %c0_49 = arith.constant 0 : index
    %c0_50 = arith.constant 0 : index
    %60 = vector.load %arg18[%c0_49, %c0_50] : memref<256x4xf32, #tpu.memory_space<vmem>>, vector<256x4xf32>
    tpu.vector_store %arg18[%c0_49, %c0_50], %59 {strides = array<i32>} : memref<256x4xf32, #tpu.memory_space<vmem>>, vector<256x4xf32>,
    %c2_i32 = arith.constant 2 : i32
    %61 = arith.addi %4, %c2_i32 : i32
    %62 = arith.index_cast %61 : i32 to index
    %c0_51 = arith.constant 0 : index
    %c0_52 = arith.constant 0 : index
    %63 = vector.load %arg17[%62, %c0_51, %c0_52] : memref<18x18x4xbf16, #tpu.memory_space<vmem>>, vector<16x18x4xbf16>
    %64 = vector.extract_strided_slice %63 {offsets = [0, 0, 0], sizes = [16, 16, 4], strides = [1, 1, 1]} : vector<16x18x4xbf16> to vector<16x16x4xbf16>
    %c0_53 = arith.constant 0 : index
    %c0_54 = arith.constant 0 : index
    %65 = vector.load %arg18[%c0_53, %c0_54] : memref<256x4xf32, #tpu.memory_space<vmem>>, vector<256x4xf32>
    %66 = vector.shape_cast %64 : vector<16x16x4xbf16> to vector<256x4xbf16>
    %c6 = arith.constant 6 : index
    %c0_55 = arith.constant 0 : index
    %c0_56 = arith.constant 0 : index
    %67 = vector.load %arg6[%c6, %c0_55, %c0_56] : memref<9x4x4xbf16, #tpu.memory_space<vmem>>, vector<1x4x4xbf16>
    %68 = vector.shape_cast %67 : vector<1x4x4xbf16> to vector<4x4xbf16>
    %cst_57 = arith.constant dense<0.000000e+00> : vector<256x4xf32>
    %69 = tpu.matmul %66, %68, %cst_57 {dimension_numbers = #tpu.dot_dimension_numbers<[1], [0], [0], [1], [0, 0, 1, 1], [], []>} : vector<256x4xbf16>, vector<4x4xbf16>, vector<256x4xf32> -> vector<256x4xf32>
    %70 = arith.addf %65, %69 : vector<256x4xf32>
    %c0_58 = arith.constant 0 : index
    %c0_59 = arith.constant 0 : index
    %71 = vector.load %arg18[%c0_58, %c0_59] : memref<256x4xf32, #tpu.memory_space<vmem>>, vector<256x4xf32>
    tpu.vector_store %arg18[%c0_58, %c0_59], %70 {strides = array<i32>} : memref<256x4xf32, #tpu.memory_space<vmem>>, vector<256x4xf32>,
    %72 = vector.extract_strided_slice %63 {offsets = [0, 1, 0], sizes = [16, 16, 4], strides = [1, 1, 1]} : vector<16x18x4xbf16> to vector<16x16x4xbf16>
    %c0_60 = arith.constant 0 : index
    %c0_61 = arith.constant 0 : index
    %73 = vector.load %arg18[%c0_60, %c0_61] : memref<256x4xf32, #tpu.memory_space<vmem>>, vector<256x4xf32>
    %74 = vector.shape_cast %72 : vector<16x16x4xbf16> to vector<256x4xbf16>
    %c7 = arith.constant 7 : index
    %c0_62 = arith.constant 0 : index
    %c0_63 = arith.constant 0 : index
    %75 = vector.load %arg6[%c7, %c0_62, %c0_63] : memref<9x4x4xbf16, #tpu.memory_space<vmem>>, vector<1x4x4xbf16>
    %76 = vector.shape_cast %75 : vector<1x4x4xbf16> to vector<4x4xbf16>
    %cst_64 = arith.constant dense<0.000000e+00> : vector<256x4xf32>
    %77 = tpu.matmul %74, %76, %cst_64 {dimension_numbers = #tpu.dot_dimension_numbers<[1], [0], [0], [1], [0, 0, 1, 1], [], []>} : vector<256x4xbf16>, vector<4x4xbf16>, vector<256x4xf32> -> vector<256x4xf32>
    %78 = arith.addf %73, %77 : vector<256x4xf32>
    %c0_65 = arith.constant 0 : index
    %c0_66 = arith.constant 0 : index
    %79 = vector.load %arg18[%c0_65, %c0_66] : memref<256x4xf32, #tpu.memory_space<vmem>>, vector<256x4xf32>
    tpu.vector_store %arg18[%c0_65, %c0_66], %78 {strides = array<i32>} : memref<256x4xf32, #tpu.memory_space<vmem>>, vector<256x4xf32>,
    %80 = vector.extract_strided_slice %63 {offsets = [0, 2, 0], sizes = [16, 16, 4], strides = [1, 1, 1]} : vector<16x18x4xbf16> to vector<16x16x4xbf16>
    %c0_67 = arith.constant 0 : index
    %c0_68 = arith.constant 0 : index
    %81 = vector.load %arg18[%c0_67, %c0_68] : memref<256x4xf32, #tpu.memory_space<vmem>>, vector<256x4xf32>
    %82 = vector.shape_cast %80 : vector<16x16x4xbf16> to vector<256x4xbf16>
    %c8 = arith.constant 8 : index
    %c0_69 = arith.constant 0 : index
    %c0_70 = arith.constant 0 : index
    %83 = vector.load %arg6[%c8, %c0_69, %c0_70] : memref<9x4x4xbf16, #tpu.memory_space<vmem>>, vector<1x4x4xbf16>
    %84 = vector.shape_cast %83 : vector<1x4x4xbf16> to vector<4x4xbf16>
    %cst_71 = arith.constant dense<0.000000e+00> : vector<256x4xf32>
    %85 = tpu.matmul %82, %84, %cst_71 {dimension_numbers = #tpu.dot_dimension_numbers<[1], [0], [0], [1], [0, 0, 1, 1], [], []>} : vector<256x4xbf16>, vector<4x4xbf16>, vector<256x4xf32> -> vector<256x4xf32>
    %86 = arith.addf %81, %85 : vector<256x4xf32>
    %c0_72 = arith.constant 0 : index
    %c0_73 = arith.constant 0 : index
    %87 = vector.load %arg18[%c0_72, %c0_73] : memref<256x4xf32, #tpu.memory_space<vmem>>, vector<256x4xf32>
    tpu.vector_store %arg18[%c0_72, %c0_73], %86 {strides = array<i32>} : memref<256x4xf32, #tpu.memory_space<vmem>>, vector<256x4xf32>,
    %c0_74 = arith.constant 0 : index
    %c0_75 = arith.constant 0 : index
    %88 = vector.load %arg18[%c0_74, %c0_75] : memref<256x4xf32, #tpu.memory_space<vmem>>, vector<256x4xf32>
    %c0_76 = arith.constant 0 : index
    %c0_77 = arith.constant 0 : index
    %89 = vector.load %arg7[%c0_76, %c0_77] : memref<1x4xf32, #tpu.memory_space<vmem>>, vector<1x4xf32>
    %90 = vector.broadcast %89 : vector<1x4xf32> to vector<256x4xf32>
    %91 = arith.mulf %88, %90 : vector<256x4xf32>
    %c0_78 = arith.constant 0 : index
    %c0_79 = arith.constant 0 : index
    %92 = vector.load %arg8[%c0_78, %c0_79] : memref<1x4xf32, #tpu.memory_space<vmem>>, vector<1x4xf32>
    %93 = vector.broadcast %92 : vector<1x4xf32> to vector<256x4xf32>
    %94 = arith.addf %91, %93 : vector<256x4xf32>
    %95 = arith.negf %94 : vector<256x4xf32>
    %96 = math.exp %95 : vector<256x4xf32>
    %cst_80 = arith.constant 1.000000e+00 : f32
    %97 = vector.broadcast %cst_80 : f32 to vector<256x4xf32>
    %98 = arith.addf %97, %96 : vector<256x4xf32>
    %99 = arith.divf %97, %98 : vector<256x4xf32>
    %100 = arith.mulf %94, %99 : vector<256x4xf32>
    %101 = arith.truncf %100 : vector<256x4xf32> to vector<256x4xbf16>
    %102 = vector.shape_cast %101 : vector<256x4xbf16> to vector<1x16x16x4xbf16>
    %c0_81 = arith.constant 0 : index
    %c0_82 = arith.constant 0 : index
    %c0_83 = arith.constant 0 : index
    %c0_84 = arith.constant 0 : index
    %103 = vector.load %arg16[%c0_81, %c0_82, %c0_83, %c0_84] : memref<1x16x16x4xbf16, #tpu.memory_space<vmem>>, vector<1x16x16x4xbf16>
    tpu.vector_store %arg16[%c0_81, %c0_82, %c0_83, %c0_84], %102 {strides = array<i32>} : memref<1x16x16x4xbf16, #tpu.memory_space<vmem>>, vector<1x16x16x4xbf16>,
    %c0_85 = arith.constant 0 : index
    %c0_86 = arith.constant 0 : index
    %104 = vector.load %arg9[%c0_85, %c0_86] : memref<4x16xbf16, #tpu.memory_space<vmem>>, vector<4x16xbf16>
    %cst_87 = arith.constant dense<0.000000e+00> : vector<256x16xf32>
    %105 = tpu.matmul %101, %104, %cst_87 {dimension_numbers = #tpu.dot_dimension_numbers<[1], [0], [0], [1], [0, 0, 1, 1], [], []>} : vector<256x4xbf16>, vector<4x16xbf16>, vector<256x16xf32> -> vector<256x16xf32>
    %c0_88 = arith.constant 0 : index
    %c0_89 = arith.constant 0 : index
    %106 = vector.load %arg10[%c0_88, %c0_89] : memref<1x16xf32, #tpu.memory_space<vmem>>, vector<1x16xf32>
    %107 = vector.broadcast %106 : vector<1x16xf32> to vector<256x16xf32>
    %108 = arith.mulf %105, %107 : vector<256x16xf32>
    %c0_90 = arith.constant 0 : index
    %c0_91 = arith.constant 0 : index
    %109 = vector.load %arg11[%c0_90, %c0_91] : memref<1x16xf32, #tpu.memory_space<vmem>>, vector<1x16xf32>
    %110 = vector.broadcast %109 : vector<1x16xf32> to vector<256x16xf32>
    %111 = arith.addf %108, %110 : vector<256x16xf32>
    %c0_92 = arith.constant 0 : index
    %112 = arith.index_cast %4 : i32 to index
    %c0_93 = arith.constant 0 : index
    %c0_94 = arith.constant 0 : index
    %113 = vector.load %arg2[%c0_92, %112, %c0_93, %c0_94] : memref<1x16x16x8xbf16, #tpu.memory_space<vmem>>, vector<1x16x16x8xbf16>
    %114 = vector.shape_cast %113 : vector<1x16x16x8xbf16> to vector<16x16x8xbf16>
    %115 = vector.shape_cast %114 : vector<16x16x8xbf16> to vector<256x8xbf16>
    %c0_95 = arith.constant 0 : index
    %c0_96 = arith.constant 0 : index
    %116 = vector.load %arg12[%c0_95, %c0_96] : memref<8x16xbf16, #tpu.memory_space<vmem>>, vector<8x16xbf16>
    %cst_97 = arith.constant dense<0.000000e+00> : vector<256x16xf32>
    %117 = tpu.matmul %115, %116, %cst_97 {dimension_numbers = #tpu.dot_dimension_numbers<[1], [0], [0], [1], [0, 0, 1, 1], [], []>} : vector<256x8xbf16>, vector<8x16xbf16>, vector<256x16xf32> -> vector<256x16xf32>
    %c0_98 = arith.constant 0 : index
    %c0_99 = arith.constant 0 : index
    %118 = vector.load %arg13[%c0_98, %c0_99] : memref<1x16xf32, #tpu.memory_space<vmem>>, vector<1x16xf32>
    %119 = vector.broadcast %118 : vector<1x16xf32> to vector<256x16xf32>
    %120 = arith.mulf %117, %119 : vector<256x16xf32>
    %c0_100 = arith.constant 0 : index
    %c0_101 = arith.constant 0 : index
    %121 = vector.load %arg14[%c0_100, %c0_101] : memref<1x16xf32, #tpu.memory_space<vmem>>, vector<1x16xf32>
    %122 = vector.broadcast %121 : vector<1x16xf32> to vector<256x16xf32>
    %123 = arith.addf %120, %122 : vector<256x16xf32>
    %124 = arith.addf %111, %123 : vector<256x16xf32>
    %125 = arith.negf %124 : vector<256x16xf32>
    %126 = math.exp %125 : vector<256x16xf32>
    %cst_102 = arith.constant 1.000000e+00 : f32
    %127 = vector.broadcast %cst_102 : f32 to vector<256x16xf32>
    %128 = arith.addf %127, %126 : vector<256x16xf32>
    %129 = arith.divf %127, %128 : vector<256x16xf32>
    %130 = arith.mulf %124, %129 : vector<256x16xf32>
    %131 = vector.shape_cast %130 : vector<256x16xf32> to vector<1x16x16x16xf32>
    %c0_103 = arith.constant 0 : index
    %c0_104 = arith.constant 0 : index
    %c0_105 = arith.constant 0 : index
    %c0_106 = arith.constant 0 : index
    %132 = vector.load %arg15[%c0_103, %c0_104, %c0_105, %c0_106] : memref<1x16x16x16xf32, #tpu.memory_space<vmem>>, vector<1x16x16x16xf32>
    tpu.vector_store %arg15[%c0_103, %c0_104, %c0_105, %c0_106], %131 {strides = array<i32>} : memref<1x16x16x16xf32, #tpu.memory_space<vmem>>, vector<1x16x16x16xf32>,
    return
  }
  func.func @transform_0(%arg0: i32, %arg1: i32) -> (i32, i32, i32, i32) {
    %c0_i32 = arith.constant 0 : i32
    %c0_i32_0 = arith.constant 0 : i32
    %c0_i32_1 = arith.constant 0 : i32
    %c0_i32_2 = arith.constant 0 : i32
    return %arg0, %c0_i32, %c0_i32_0, %c0_i32_1 : i32, i32, i32, i32
  }
  func.func @transform_1(%arg0: i32, %arg1: i32) -> (i32, i32) {
    %c0_i32 = arith.constant 0 : i32
    %c0_i32_0 = arith.constant 0 : i32
    %c0_i32_1 = arith.constant 0 : i32
    return %c0_i32, %c0_i32_0 : i32, i32
  }
  func.func @transform_2(%arg0: i32, %arg1: i32) -> (i32, i32) {
    %c0_i32 = arith.constant 0 : i32
    %c0_i32_0 = arith.constant 0 : i32
    %c0_i32_1 = arith.constant 0 : i32
    return %c0_i32, %c0_i32_0 : i32, i32
  }
  func.func @transform_3(%arg0: i32, %arg1: i32) -> (i32, i32) {
    %c0_i32 = arith.constant 0 : i32
    %c0_i32_0 = arith.constant 0 : i32
    %c0_i32_1 = arith.constant 0 : i32
    return %c0_i32, %c0_i32_0 : i32, i32
  }
  func.func @transform_4(%arg0: i32, %arg1: i32) -> (i32, i32, i32) {
    %c0_i32 = arith.constant 0 : i32
    %c0_i32_0 = arith.constant 0 : i32
    %c0_i32_1 = arith.constant 0 : i32
    %c0_i32_2 = arith.constant 0 : i32
    return %c0_i32, %c0_i32_0, %c0_i32_1 : i32, i32, i32
  }
  func.func @transform_5(%arg0: i32, %arg1: i32) -> (i32, i32) {
    %c0_i32 = arith.constant 0 : i32
    %c0_i32_0 = arith.constant 0 : i32
    %c0_i32_1 = arith.constant 0 : i32
    return %c0_i32, %c0_i32_0 : i32, i32
  }
  func.func @transform_6(%arg0: i32, %arg1: i32) -> (i32, i32) {
    %c0_i32 = arith.constant 0 : i32
    %c0_i32_0 = arith.constant 0 : i32
    %c0_i32_1 = arith.constant 0 : i32
    return %c0_i32, %c0_i32_0 : i32, i32
  }
  func.func @transform_7(%arg0: i32, %arg1: i32) -> (i32, i32) {
    %c0_i32 = arith.constant 0 : i32
    %c0_i32_0 = arith.constant 0 : i32
    %c0_i32_1 = arith.constant 0 : i32
    return %c0_i32, %c0_i32_0 : i32, i32
  }
  func.func @transform_8(%arg0: i32, %arg1: i32) -> (i32, i32) {
    %c0_i32 = arith.constant 0 : i32
    %c0_i32_0 = arith.constant 0 : i32
    %c0_i32_1 = arith.constant 0 : i32
    return %c0_i32, %c0_i32_0 : i32, i32
  }
  func.func @transform_9(%arg0: i32, %arg1: i32) -> (i32, i32) {
    %c0_i32 = arith.constant 0 : i32
    %c0_i32_0 = arith.constant 0 : i32
    %c0_i32_1 = arith.constant 0 : i32
    return %c0_i32, %c0_i32_0 : i32, i32
  }
  func.func @transform_10(%arg0: i32, %arg1: i32) -> (i32, i32) {
    %c0_i32 = arith.constant 0 : i32
    %c0_i32_0 = arith.constant 0 : i32
    %c0_i32_1 = arith.constant 0 : i32
    return %c0_i32, %c0_i32_0 : i32, i32
  }
  func.func @transform_11(%arg0: i32, %arg1: i32) -> (i32, i32) {
    %c0_i32 = arith.constant 0 : i32
    %c0_i32_0 = arith.constant 0 : i32
    %c0_i32_1 = arith.constant 0 : i32
    return %c0_i32, %c0_i32_0 : i32, i32
  }
  func.func @transform_12(%arg0: i32, %arg1: i32) -> (i32, i32) {
    %c0_i32 = arith.constant 0 : i32
    %c0_i32_0 = arith.constant 0 : i32
    %c0_i32_1 = arith.constant 0 : i32
    return %c0_i32, %c0_i32_0 : i32, i32
  }
  func.func @transform_13(%arg0: i32, %arg1: i32) -> (i32, i32, i32, i32) {
    %c0_i32 = arith.constant 0 : i32
    %c0_i32_0 = arith.constant 0 : i32
    %c0_i32_1 = arith.constant 0 : i32
    return %arg0, %arg1, %c0_i32, %c0_i32_0 : i32, i32, i32, i32
  }
  func.func @transform_14(%arg0: i32, %arg1: i32) -> (i32, i32, i32, i32) {
    %c0_i32 = arith.constant 0 : i32
    %c0_i32_0 = arith.constant 0 : i32
    %c0_i32_1 = arith.constant 0 : i32
    return %arg0, %arg1, %c0_i32, %c0_i32_0 : i32, i32, i32, i32
  }
}

</mosaic_0001>

<bundles_post_ra>
// kernel: conv_block_forward.1
= control target key start
LH: loop header
LB: loop body
LE: loop exit
PB: predicated region body
PF: predicated region fallthrough
CT: control target
= control target key end

     0   :  { %s15258_s0 = inlined_call_operand.hbm [shape: bf16[2,16,16,8], index: 0, kind: input, shape index: {}]   ;;  %s15259_s1 = inlined_call_operand.hbm [shape: bf16[8,4], index: 1, kind: input, shape index: {}]   ;;  %s15260_s2 = inlined_call_operand.hbm [shape: f32[1,4], index: 2, kind: input, shape index: {}]   ;;  %s15261_s3 = inlined_call_operand.hbm [shape: f32[1,4], index: 3, kind: input, shape index: {}]   ;;  %s15262_s4 = inlined_call_operand.hbm [shape: bf16[9,4,4], index: 4, kind: input, shape index: {}]   ;;  %s15263_s5 = inlined_call_operand.hbm [shape: f32[1,4], index: 5, kind: input, shape index: {}]   ;;  %s15264_s6 = inlined_call_operand.hbm [shape: f32[1,4], index: 6, kind: input, shape index: {}]   ;;  %s15265_s7 = inlined_call_operand.hbm [shape: bf16[4,16], index: 7, kind: input, shape index: {}]   ;;  %s15266_s8 = inlined_call_operand.hbm [shape: f32[1,16], index: 8, kind: input, shape index: {}]   ;;  %s15267_s9 = inlined_call_operand.hbm [shape: f32[1,16], index: 9, kind: input, shape index: {}]   ;;  %s15268_s10 = inlined_call_operand.hbm [shape: bf16[8,16], index: 10, kind: input, shape index: {}]   ;;  %s15269_s11 = inlined_call_operand.hbm [shape: f32[1,16], index: 11, kind: input, shape index: {}]   ;;  %s15270_s12 = inlined_call_operand.hbm [shape: f32[1,16], index: 12, kind: input, shape index: {}]   ;;  %s15271_s13 = inlined_call_operand.hbm [shape: f32[2,16,16,16], index: 13, kind: output, shape index: {0}]   ;;  %s15272_s14 = inlined_call_operand.hbm [shape: bf16[2,16,16,4], index: 14, kind: output, shape index: {1}]  }
   0x1   :  { %15304 = sst [smem:[#allocation54_spill]] %s15258_s0 }
   0x2   :  { %15305 = sst [smem:[#allocation55_spill]] %s15259_s1 }
   0x3   :  { %15306 = sst [smem:[#allocation56_spill]] %s15260_s2 }
   0x4   :  { %15307 = sst [smem:[#allocation57_spill]] %s15261_s3 }
   0x5   :  { %15308 = sst [smem:[#allocation58_spill]] %s15262_s4 }
   0x6   :  { %15309 = sst [smem:[#allocation59_spill]] %s15263_s5 }
   0x7   :  { %15310 = sst [smem:[#allocation60_spill]] %s15271_s13 }
   0x8   :  { %15311 = sst [smem:[#allocation61_spill]] %s15272_s14 }
   0x9   :  { %20 = vsyncpa [#allocation5], 0 }
   0xa   :  { %22 = vsyncpa [#allocation5 + $0x1], 0 }
   0xb   :  { %23 = vsyncpa [#allocation8], 0 }
   0xc   :  { %24 = vsyncpa [#allocation11], 0 }
   0xd   :  { %25 = vsyncpa [#allocation14], 0 }
   0xe   :  { %26 = vsyncpa [#allocation17], 0 }
   0xf   :  { %27 = vsyncpa [#allocation20], 0 }
  0x10   :  { %28 = vsyncpa [#allocation23], 0 }
  0x11   :  { %29 = vsyncpa [#allocation6], 0 }
  0x12   :  { %31 = vsyncpa [#allocation6 + $0x1], 0 }
  0x13   :  { %32 = vsyncpa [#allocation27], 0 }
  0x14   :  { %34 = vsyncpa [#allocation27 + $0x1], 0  ;;  %s11300_s29 = smov 0   ;;  %s11302_s30 = smov 0  }
  0x15   :  { %s11304_s15 = smov 0   ;;  %s11306_s16 = smov 0  }
  0x16   :  { %s11308_s17 = smov 0   ;;  %s11310_s18 = smov 0  }
  0x17 LB: > { %15312 = sst [smem:[#allocation37_spill]] %s11190_s16  ;;  %s15273_s19 = sadd.s32 4294967295, %s11198_s18   ;;  %s11198_s18 = sphi %s11310_s18, %s40_s18   ;;  %s11194_s17 = sphi %s11308_s17, %s15449_s17   ;;  %s11190_s16 = sphi %s11306_s16, %s15448_s16   ;;  %s11186_s15 = sphi %s11304_s15, %s15447_s15   ;;  %s11182_s30 = sphi %s11302_s30, %s15446_s30   ;;  %s11178_s29 = sphi %s11300_s29, %s15445_s29  }
  0x18   : > { %p8554_p0 = scmp.ge.s32.totalorder %s11198_s18, 1  ;;  %p11334_p1 = scmp.eq.s32.totalorder %s15273_s19, 0 }
  0x19   : > { %p391_p2 = scmp.lt.s32.totalorder %s11198_s18, 3  ;;  %s11200_s22 = smov [#allocation7]  }
  0x1a   : > { %s15313_s20 = scalar_select %p11334_p1, 1, 0 }
  0x1b   : > { %p11339_p3 = pnand %p8554_p0, %p391_p2  ;;  %s404_s23 = sshll.u32 %s11200_s22, 4  ;;  %s405_s23 = int_to_ptr.vmem [resolvable:$true] %s404_s23 }
  0x1c   : > { %15314 = sst [smem:[#allocation38_spill]] %s15313_s20  ;;  %s11201_s24 = smov [#allocation10]  }
  0x1d   : > { %s15315_s21 = scalar_select %p11339_p3, 1, 0 }
  0x1e   : > { %p10054_p5 = pneg %p11339_p3  ;;  %s426_s25 = sshll.u32 %s11201_s24, 4  ;;  %s11352_s25 = int_to_ptr.vmem [resolvable:$true] %s426_s25 }
  0x1f   : > { %15316 = sst [smem:[#allocation39_spill]] %s15315_s21  ;;  %s11202_s27 = smov [#allocation13]  }
  0x20   : > { %p11348_p6 = pnand %p10054_p5, %p11334_p1  ;;  %s450_s28 = sshll.u32 %s11202_s27, 4  ;;  %s11354_s28 = int_to_ptr.vmem [resolvable:$true] %s450_s28 }
  0x21   : > { %s15318_s1 = sld [smem:[#allocation55_spill]] }
  0x22   : > { %p11364_p8 = pneg %p11348_p6 }
  0x27   : > { %s10694_s13 = scalar_lea.hbm %s15318_s1, 64 }
  0x28   : > { %p10695_p7 = scmp.ne.s32.totalorder %s15318_s1, %s10694_s13  ;;  %p10701_p11 = scmp.lt.u32.totalorder %s10694_s13, %s15318_s1 }
  0x2a   : > { %p10697_p9 = pnand %p11364_p8, %p10695_p7 }
  0x2c   : > { %p10698_p10 = pneg %p10697_p9 }
  0x2e   : > { %p10703_p12 = pnand %p10701_p11, %p10698_p10 }
  0x30   : > { %10706 = shalt.err (!%p10703_p12)
}
  0x31   : > { %s10707_s19 = scalar_lea.vmem %s405_s23, 64  ;;  %p10715_p5 = scmp.lt.s32.totalorder %s405_s23, %s405_s23 }
  0x32   : > { %p10708_p13 = scmp.ne.s32.totalorder %s405_s23, %s10707_s19  ;;  %p10716_p4 = scmp.lt.s32.totalorder %s10707_s19, %s10707_s19 }
  0x34   : > { %p10710_p0 = pnand %p10708_p13, %p11364_p8  ;;  %p10717_p3 = por %p10716_p4, %p10715_p5 }
  0x36   : > { %p10711_p2 = pneg %p10710_p0 }
  0x38   : > { %p10718_p1 = pnand %p10717_p3, %p10711_p2 }
  0x3a   : > { %10721 = shalt.err (!%p10718_p1)
}
  0x3b   : > { %10057 = dma.hbm_to_vmem [thread:$0]  (!%p11348_p6), %s15318_s1, 64, %s405_s23, [#allocation8]  }
  0x3c   : > { %s15320_s3 = sld [smem:[#allocation57_spill]] }
  0x42   : > { %s10722_s22 = scalar_lea.hbm %s15320_s3, 16 }
  0x43   : > { %p10723_p7 = scmp.ne.s32.totalorder %s15320_s3, %s10722_s22  ;;  %p10729_p1 = scmp.lt.u32.totalorder %s10722_s22, %s15320_s3 }
  0x45   : > { %p10725_p9 = pnand %p10723_p7, %p11364_p8 }
  0x47   : > { %p10726_p4 = pneg %p10725_p9 }
  0x49   : > { %p10731_p3 = pnand %p10729_p1, %p10726_p4 }
  0x4b   : > { %10734 = shalt.err (!%p10731_p3)
}
  0x4c   : > { %s10735_s23 = scalar_lea.vmem %s11352_s25, 16  ;;  %s10742_s0 = scalar_lea.vmem %s11352_s25, 32 }
  0x4d   : > { %p10736_p10 = scmp.ne.s32.totalorder %s11352_s25, %s10735_s23  ;;  %p10743_p13 = scmp.lt.s32.totalorder %s11352_s25, %s11352_s25 }
  0x4e   : > { %p10744_p0 = scmp.lt.s32.totalorder %s10742_s0, %s10735_s23 }
  0x4f   : > { %p10738_p11 = pnand %p10736_p10, %p11364_p8 }
  0x50   : > { %p10745_p2 = por %p10744_p0, %p10743_p13 }
  0x51   : > { %p10739_p12 = pneg %p10738_p11 }
  0x53   : > { %p10746_p5 = pnand %p10745_p2, %p10739_p12 }
  0x55   : > { %10749 = shalt.err (!%p10746_p5)
}
  0x56   : > { %10063 = dma.hbm_to_vmem [thread:$0]  (!%p11348_p6), %s15320_s3, 16, %s11352_s25, [#allocation11]  }
  0x57   : > { %s15321_s5 = sld [smem:[#allocation59_spill]] }
  0x5d   : > { %s10750_s21 = scalar_lea.hbm %s15321_s5, 16 }
  0x5e   : > { %p10751_p7 = scmp.ne.s32.totalorder %s15321_s5, %s10750_s21  ;;  %p10757_p1 = scmp.lt.u32.totalorder %s10750_s21, %s15321_s5 }
  0x60   : > { %p10753_p9 = pnand %p10751_p7, %p11364_p8 }
  0x62   : > { %p10754_p4 = pneg %p10753_p9 }
  0x64   : > { %p10759_p3 = pnand %p10757_p1, %p10754_p4 }
  0x66   : > { %10762 = shalt.err (!%p10759_p3)
}
  0x67   : > { %s10763_s25 = scalar_lea.vmem %s11354_s28, 16  ;;  %s10770_s0 = scalar_lea.vmem %s11354_s28, 32 }
  0x68   : > { %p10764_p10 = scmp.ne.s32.totalorder %s11354_s28, %s10763_s25  ;;  %p10771_p13 = scmp.lt.s32.totalorder %s11354_s28, %s11354_s28 }
  0x69   : > { %p10772_p0 = scmp.lt.s32.totalorder %s10770_s0, %s10763_s25 }
  0x6a   : > { %p10766_p11 = pnand %p10764_p10, %p11364_p8 }
  0x6b   : > { %p10773_p2 = por %p10772_p0, %p10771_p13 }
  0x6c   : > { %p10767_p12 = pneg %p10766_p11 }
  0x6e   : > { %p10774_p5 = pnand %p10773_p2, %p10767_p12 }
  0x70   : > { %10777 = shalt.err (!%p10774_p5)
}
  0x71   : > { %10069 = dma.hbm_to_vmem [thread:$0]  (!%p11348_p6), %s15321_s5, 16, %s11354_s28, [#allocation14]  }
  0x72   : > { %s11203_s16 = smov [#allocation16]   ;;  %s11204_s21 = smov [#allocation19]  }
  0x73   : > { %s472_s13 = sshll.u32 %s11203_s16, 4  ;;  %s494_s22 = sshll.u32 %s11204_s21, 4  ;;  %s473_s13 = int_to_ptr.vmem [resolvable:$true] %s472_s13  ;;  %s495_s22 = int_to_ptr.vmem [resolvable:$true] %s494_s22 }
  0x74   : > { %s10778_s23 = scalar_lea.hbm %s15265_s7, 32 }
  0x75   : > { %p10779_p7 = scmp.ne.s32.totalorder %s15265_s7, %s10778_s23  ;;  %p10785_p1 = scmp.lt.u32.totalorder %s10778_s23, %s15265_s7 }
  0x77   : > { %p10781_p9 = pnand %p10779_p7, %p11364_p8 }
  0x79   : > { %p10782_p4 = pneg %p10781_p9 }
  0x7b   : > { %p10787_p3 = pnand %p10785_p1, %p10782_p4 }
  0x7d   : > { %10790 = shalt.err (!%p10787_p3)
}
  0x7e   : > { %s10791_s28 = scalar_lea.vmem %s473_s13, 32  ;;  %p10799_p13 = scmp.lt.s32.totalorder %s473_s13, %s473_s13 }
  0x7f   : > { %p10792_p10 = scmp.ne.s32.totalorder %s473_s13, %s10791_s28  ;;  %p10800_p0 = scmp.lt.s32.totalorder %s10791_s28, %s10791_s28 }
  0x81   : > { %p10794_p11 = pnand %p10792_p10, %p11364_p8  ;;  %p10801_p2 = por %p10800_p0, %p10799_p13 }
  0x83   : > { %p10795_p12 = pneg %p10794_p11 }
  0x85   : > { %p10802_p5 = pnand %p10801_p2, %p10795_p12 }
  0x87   : > { %10805 = shalt.err (!%p10802_p5)
}
  0x88   : > { %10075 = dma.hbm_to_vmem [thread:$0]  (!%p11348_p6), %s15265_s7, 32, %s473_s13, [#allocation17]  }
  0x89   : > { %s10806_s27 = scalar_lea.hbm %s15267_s9, 16 }
  0x8a   : > { %p10807_p7 = scmp.ne.s32.totalorder %s15267_s9, %s10806_s27  ;;  %p10813_p1 = scmp.lt.u32.totalorder %s10806_s27, %s15267_s9 }
  0x8c   : > { %p10809_p9 = pnand %p10807_p7, %p11364_p8 }
  0x8e   : > { %p10810_p4 = pneg %p10809_p9 }
  0x90   : > { %p10815_p3 = pnand %p10813_p1, %p10810_p4 }
  0x92   : > { %10818 = shalt.err (!%p10815_p3)
}
  0x93   : > { %s10819_s20 = scalar_lea.vmem %s495_s22, 16  ;;  %s10826_s13 = scalar_lea.vmem %s495_s22, 32 }
  0x94   : > { %p10820_p10 = scmp.ne.s32.totalorder %s495_s22, %s10819_s20  ;;  %p10827_p13 = scmp.lt.s32.totalorder %s495_s22, %s495_s22 }
  0x95   : > { %p10828_p0 = scmp.lt.s32.totalorder %s10826_s13, %s10819_s20 }
  0x96   : > { %p10822_p11 = pnand %p10820_p10, %p11364_p8 }
  0x97   : > { %p10829_p2 = por %p10828_p0, %p10827_p13 }
  0x98   : > { %p10823_p12 = pneg %p10822_p11 }
  0x9a   : > { %p10830_p5 = pnand %p10829_p2, %p10823_p12 }
  0x9c   : > { %10833 = shalt.err (!%p10830_p5)
}
  0x9d   : > { %10081 = dma.hbm_to_vmem [thread:$0]  (!%p11348_p6), %s15267_s9, 16, %s495_s22, [#allocation20]  }
  0x9e   : > { %s11205_s16 = smov [#allocation22]   ;;  %s11206_s21 = smov [#allocation9]  }
  0x9f   : > { %s516_s1 = sshll.u32 %s11205_s16, 4  ;;  %s415_s27 = sshll.u32 %s11206_s21, 4  ;;  %s517_s1 = int_to_ptr.vmem [resolvable:$true] %s516_s1  ;;  %s416_s27 = int_to_ptr.vmem [resolvable:$true] %s415_s27 }
  0xa0   : > { %s10834_s25 = scalar_lea.hbm %s15269_s11, 16 }
  0xa1   : > { %p10835_p7 = scmp.ne.s32.totalorder %s15269_s11, %s10834_s25  ;;  %p10841_p1 = scmp.lt.u32.totalorder %s10834_s25, %s15269_s11 }
  0xa3   : > { %p10837_p9 = pnand %p10835_p7, %p11364_p8 }
  0xa5   : > { %p10838_p4 = pneg %p10837_p9 }
  0xa7   : > { %p10843_p3 = pnand %p10841_p1, %p10838_p4 }
  0xa9   : > { %10846 = shalt.err (!%p10843_p3)
}
  0xaa   : > { %s10847_s22 = scalar_lea.vmem %s517_s1, 16  ;;  %s10854_s14 = scalar_lea.vmem %s517_s1, 32 }
  0xab   : > { %p10848_p10 = scmp.ne.s32.totalorder %s517_s1, %s10847_s22  ;;  %p10855_p13 = scmp.lt.s32.totalorder %s517_s1, %s517_s1 }
  0xac   : > { %p10856_p0 = scmp.lt.s32.totalorder %s10854_s14, %s10847_s22 }
  0xad   : > { %p10850_p11 = pnand %p10848_p10, %p11364_p8 }
  0xae   : > { %p10857_p2 = por %p10856_p0, %p10855_p13 }
  0xaf   : > { %p10851_p12 = pneg %p10850_p11 }
  0xb1   : > { %p10858_p5 = pnand %p10857_p2, %p10851_p12 }
  0xb3   : > { %10861 = shalt.err (!%p10858_p5)
}
  0xb4   : > { %10087 = dma.hbm_to_vmem [thread:$0]  (!%p11348_p6), %s15269_s11, 16, %s517_s1, [#allocation23]  }
  0xb5   : > { %s15322_s2 = sld [smem:[#allocation56_spill]] }
  0xbb   : > { %s10862_s25 = scalar_lea.hbm %s15322_s2, 16 }
  0xbc   : > { %p10863_p7 = scmp.ne.s32.totalorder %s15322_s2, %s10862_s25  ;;  %p10869_p1 = scmp.lt.u32.totalorder %s10862_s25, %s15322_s2 }
  0xbe   : > { %p10865_p9 = pnand %p10863_p7, %p11364_p8 }
  0xc0   : > { %p10866_p4 = pneg %p10865_p9 }
  0xc2   : > { %p10871_p3 = pnand %p10869_p1, %p10866_p4 }
  0xc4   : > { %10874 = shalt.err (!%p10871_p3)
}
  0xc5   : > { %s10875_s22 = scalar_lea.vmem %s416_s27, 16  ;;  %s10882_s1 = scalar_lea.vmem %s416_s27, 32 }
  0xc6   : > { %p10876_p10 = scmp.ne.s32.totalorder %s416_s27, %s10875_s22  ;;  %p10883_p13 = scmp.lt.s32.totalorder %s416_s27, %s416_s27 }
  0xc7   : > { %p10884_p0 = scmp.lt.s32.totalorder %s10882_s1, %s10875_s22 }
  0xc8   : > { %p10878_p11 = pnand %p10876_p10, %p11364_p8 }
  0xc9   : > { %p10885_p2 = por %p10884_p0, %p10883_p13 }
  0xca   : > { %p10879_p12 = pneg %p10878_p11 }
  0xcc   : > { %p10886_p5 = pnand %p10885_p2, %p10879_p12 }
  0xce   : > { %10889 = shalt.err (!%p10886_p5)
}
  0xcf   : > { %10060 = dma.hbm_to_vmem [thread:$0]  (!%p11348_p6), %s15322_s2, 16, %s416_s27, [#allocation8]  }
  0xd0   : > { %s11207_s21 = smov [#allocation12]   ;;  %s15323_s4 = sld [smem:[#allocation58_spill]] }
  0xd1   : > { %s436_s19 = sshll.u32 %s11207_s21, 4  ;;  %s437_s19 = int_to_ptr.vmem [resolvable:$true] %s436_s19 }
  0xd6   : > { %s10890_s0 = scalar_lea.hbm %s15323_s4, 288 }
  0xd7   : > { %p10891_p7 = scmp.ne.s32.totalorder %s15323_s4, %s10890_s0  ;;  %p10897_p1 = scmp.lt.u32.totalorder %s10890_s0, %s15323_s4 }
  0xd9   : > { %p10893_p9 = pnand %p10891_p7, %p11364_p8 }
  0xdb   : > { %p10894_p4 = pneg %p10893_p9 }
  0xdd   : > { %p10899_p3 = pnand %p10897_p1, %p10894_p4 }
  0xdf   : > { %10902 = shalt.err (!%p10899_p3)
}
  0xe0   : > { %s10903_s27 = scalar_lea.vmem %s437_s19, 288  ;;  %p10911_p13 = scmp.lt.s32.totalorder %s437_s19, %s437_s19 }
  0xe1   : > { %p10904_p10 = scmp.ne.s32.totalorder %s437_s19, %s10903_s27  ;;  %p10912_p0 = scmp.lt.s32.totalorder %s10903_s27, %s10903_s27 }
  0xe3   : > { %p10906_p11 = pnand %p10904_p10, %p11364_p8  ;;  %p10913_p2 = por %p10912_p0, %p10911_p13 }
  0xe5   : > { %p10907_p12 = pneg %p10906_p11 }
  0xe7   : > { %p10914_p5 = pnand %p10913_p2, %p10907_p12 }
  0xe9   : > { %10917 = shalt.err (!%p10914_p5)
}
  0xea   : > { %s11208_s1 = smov 32   ;;  %s11209_s14 = smov 2  }
  0xeb   : > { %10066 = dma.hbm_to_vmem [thread:$0]  (!%p11348_p6), %s15323_s4, 288, %s437_s19, [#allocation11], %s11208_s1, %s11208_s1, %s11209_s14  }
  0xec   : > { %s11210_s23 = smov [#allocation15]   ;;  %s11211_s0 = smov [#allocation18]  }
  0xed   : > { %s461_s25 = sshll.u32 %s11210_s23, 4  ;;  %s483_s20 = sshll.u32 %s11211_s0, 4  ;;  %s462_s25 = int_to_ptr.vmem [resolvable:$true] %s461_s25  ;;  %s11518_s20 = int_to_ptr.vmem [resolvable:$true] %s483_s20 }
  0xee   : > { %s10918_s22 = scalar_lea.hbm %s15264_s6, 16 }
  0xef   : > { %p10919_p7 = scmp.ne.s32.totalorder %s15264_s6, %s10918_s22  ;;  %p10925_p1 = scmp.lt.u32.totalorder %s10918_s22, %s15264_s6 }
  0xf1   : > { %p10921_p9 = pnand %p10919_p7, %p11364_p8 }
  0xf3   : > { %p10922_p4 = pneg %p10921_p9 }
  0xf5   : > { %p10927_p3 = pnand %p10925_p1, %p10922_p4 }
  0xf7   : > { %10930 = shalt.err (!%p10927_p3)
}
  0xf8   : > { %s10931_s1 = scalar_lea.vmem %s462_s25, 16  ;;  %s10938_s14 = scalar_lea.vmem %s462_s25, 32 }
  0xf9   : > { %p10932_p10 = scmp.ne.s32.totalorder %s462_s25, %s10931_s1  ;;  %p10939_p13 = scmp.lt.s32.totalorder %s462_s25, %s462_s25 }
  0xfa   : > { %p10940_p0 = scmp.lt.s32.totalorder %s10938_s14, %s10931_s1 }
  0xfb   : > { %p10934_p11 = pnand %p10932_p10, %p11364_p8 }
  0xfc   : > { %p10941_p2 = por %p10940_p0, %p10939_p13 }
  0xfd   : > { %p10935_p12 = pneg %p10934_p11 }
  0xff   : > { %p10942_p5 = pnand %p10941_p2, %p10935_p12 }
 0x101   : > { %10945 = shalt.err (!%p10942_p5)
}
 0x102   : > { %10072 = dma.hbm_to_vmem [thread:$0]  (!%p11348_p6), %s15264_s6, 16, %s462_s25, [#allocation14]  }
 0x103   : > { %s10946_s13 = scalar_lea.hbm %s15266_s8, 16 }
 0x104   : > { %p10947_p7 = scmp.ne.s32.totalorder %s15266_s8, %s10946_s13  ;;  %p10953_p1 = scmp.lt.u32.totalorder %s10946_s13, %s15266_s8 }
 0x106   : > { %p10949_p9 = pnand %p10947_p7, %p11364_p8 }
 0x108   : > { %p10950_p4 = pneg %p10949_p9 }
 0x10a   : > { %p10955_p3 = pnand %p10953_p1, %p10950_p4 }
 0x10c   : > { %10958 = shalt.err (!%p10955_p3)
}
 0x10d   : > { %s10959_s25 = scalar_lea.vmem %s11518_s20, 16  ;;  %s10966_s19 = scalar_lea.vmem %s11518_s20, 32 }
 0x10e   : > { %p10960_p10 = scmp.ne.s32.totalorder %s11518_s20, %s10959_s25  ;;  %p10967_p13 = scmp.lt.s32.totalorder %s11518_s20, %s11518_s20 }
 0x10f   : > { %p10968_p0 = scmp.lt.s32.totalorder %s10966_s19, %s10959_s25 }
 0x110   : > { %p10962_p11 = pnand %p10960_p10, %p11364_p8 }
 0x111   : > { %p10969_p2 = por %p10968_p0, %p10967_p13 }
 0x112   : > { %p10963_p12 = pneg %p10962_p11 }
 0x114   : > { %p10970_p5 = pnand %p10969_p2, %p10963_p12 }
 0x116   : > { %10973 = shalt.err (!%p10970_p5)
}
 0x117   : > { %10078 = dma.hbm_to_vmem [thread:$0]  (!%p11348_p6), %s15266_s8, 16, %s11518_s20, [#allocation17]  }
 0x118   : > { %s11212_s2 = smov [#allocation21]   ;;  %s11213_s23 = smov [#allocation24]  }
 0x119   : > { %s505_s21 = sshll.u32 %s11212_s2, 4  ;;  %s527_s0 = sshll.u32 %s11213_s23, 4  ;;  %s506_s21 = int_to_ptr.vmem [resolvable:$true] %s505_s21  ;;  %s11562_s0 = int_to_ptr.vmem [resolvable:$true] %s527_s0 }
 0x11a   : > { %s10974_s22 = scalar_lea.hbm %s15268_s10, 64 }
 0x11b   : > { %p10975_p7 = scmp.ne.s32.totalorder %s15268_s10, %s10974_s22  ;;  %p10981_p1 = scmp.lt.u32.totalorder %s10974_s22, %s15268_s10 }
 0x11d   : > { %p10977_p9 = pnand %p10975_p7, %p11364_p8 }
 0x11f   : > { %p10978_p4 = pneg %p10977_p9 }
 0x121   : > { %p10983_p3 = pnand %p10981_p1, %p10978_p4 }
 0x123   : > { %10986 = shalt.err (!%p10983_p3)
}
 0x124   : > { %s10987_s19 = scalar_lea.vmem %s506_s21, 64  ;;  %p10995_p13 = scmp.lt.s32.totalorder %s506_s21, %s506_s21 }
 0x125   : > { %p10988_p10 = scmp.ne.s32.totalorder %s506_s21, %s10987_s19  ;;  %p10996_p0 = scmp.lt.s32.totalorder %s10987_s19, %s10987_s19 }
 0x127   : > { %p10990_p11 = pnand %p10988_p10, %p11364_p8  ;;  %p10997_p2 = por %p10996_p0, %p10995_p13 }
 0x129   : > { %p10991_p12 = pneg %p10990_p11 }
 0x12b   : > { %p10998_p5 = pnand %p10997_p2, %p10991_p12 }
 0x12d   : > { %11001 = shalt.err (!%p10998_p5)
}
 0x12e   : > { %10084 = dma.hbm_to_vmem [thread:$0]  (!%p11348_p6), %s15268_s10, 64, %s506_s21, [#allocation20]  }
 0x12f   : > { %s11002_s13 = scalar_lea.hbm %s15270_s12, 16 }
 0x130   : > { %p11003_p7 = scmp.ne.s32.totalorder %s15270_s12, %s11002_s13  ;;  %p11009_p1 = scmp.lt.u32.totalorder %s11002_s13, %s15270_s12 }
 0x132   : > { %p11005_p9 = pnand %p11003_p7, %p11364_p8 }
 0x134   : > { %p11006_p4 = pneg %p11005_p9 }
 0x136   : > { %p11011_p3 = pnand %p11009_p1, %p11006_p4 }
 0x138   : > { %11014 = shalt.err (!%p11011_p3)
}
 0x139   : > { %s11015_s21 = scalar_lea.vmem %s11562_s0, 16  ;;  %s11022_s25 = scalar_lea.vmem %s11562_s0, 32 }
 0x13a   : > { %p11016_p10 = scmp.ne.s32.totalorder %s11562_s0, %s11015_s21  ;;  %p11023_p13 = scmp.lt.s32.totalorder %s11562_s0, %s11562_s0 }
 0x13b   : > { %p11024_p0 = scmp.lt.s32.totalorder %s11022_s25, %s11015_s21 }
 0x13c   : > { %p11018_p11 = pnand %p11016_p10, %p11364_p8 }
 0x13d   : > { %p11025_p2 = por %p11024_p0, %p11023_p13 }
 0x13e   : > { %p11019_p12 = pneg %p11018_p11 }
 0x140   : > { %p11026_p5 = pnand %p11025_p2, %p11019_p12 }
 0x142   : > { %11029 = shalt.err (!%p11026_p5)
}
 0x143   : > { %s15324_s24 = sld [smem:[#allocation38_spill]]  ;;  %s8553_s1 = sadd.s32 4294967294, %s11198_s18  }
 0x144   : > { %10090 = dma.hbm_to_vmem [thread:$0]  (!%p11348_p6), %s15270_s12, 16, %s11562_s0, [#allocation23]  }
 0x145   : > { %s52_s14 = sadd.s32 1, %s11194_s17  ;;  %s59_s26 = sadd.s32 1, %s11186_s15 }
 0x146   : > { %p54_p8 = scmp.ge.s32.totalorder %s52_s14, 2  ;;  %p66_p7 = scmp.ne.s32.totalorder %s11186_s15, %s11182_s30 }
 0x147   : > { %p67_p9 = scmp.eq.s32.totalorder %s11198_s18, 0  ;;  %p72_p1 = scmp.ne.s32.totalorder %s11182_s30, %s11178_s29 }
 0x148   : > { %s15451_s14 = smov (%p54_p8, %s52_s14), 0  ;;  %s15326_s23 = sadd.s32 4294967295, %s11198_s18  }
 0x149   : > { %p11614_p4 = por %p67_p9, %p66_p7  ;;  %s56_s0 = ssub.s32 %s11194_s17, %s15451_s14 }
 0x14a   : > { %p350_p6 = scmp.eq.s32.totalorder %s15326_s23, 1  ;;  %p57_p3 = scmp.eq.s32.totalorder %s56_s0, 0 }
 0x14b   : > { %p15327_p10 = scmp.ne.s32.totalorder %s15324_s24, 0  ;;  %p356_p13 = scmp.eq.s32.totalorder %s8553_s1, 1 }
 0x14c   : > { %p11630_p12 = por %p350_p6, %p66_p7  ;;  %p10114_p2 = scmp.lt.s32.totalorder %s11198_s18, 2 }
 0x14d   : > { %p11626_p11 = por %p15327_p10, %p72_p1  ;;  %p11637_p0 = por %p356_p13, %p72_p1 }
 0x14e   : > { %s15329_s28 = scalar_select %p11630_p12, 1, 0 }
 0x14f   : > { %s11635_s22 = scalar_select %p57_p3, %s11186_s15, %s59_s26  }
 0x150   : > { %s15330_s27 = scalar_select %p11637_p0, 1, 0 }
 0x151   : > { %s538_s16 = sand.u32 1, %s11186_s15   ;;  %s9293_s21 = sshll.u32 %s11194_s17, 11 }
 0x152   : > { %s8568_s25 = sshll.u32 %s538_s16, 7  ;;  %s15331_s24 = sld [smem:[#allocation54_spill]] }
 0x153   : > { %s542_s1 = scalar_lea.vmem [#allocation4], %s8568_s25  ;;  %p11651_p5 = pnand %p10114_p2, %p11614_p4 }
 0x154   : > { %s549_s26 = sshll.u32 %s542_s1, 4  ;;  %s11657_s3 = scalar_lea.sflag [#allocation5], %s538_s16  ;;  %s11655_s26 = int_to_ptr.vmem [resolvable:$true] %s549_s26 }
 0x155   : > { %p11032_p7 = pneg %p11651_p5 }
 0x158   : > { %s11647_s0 = scalar_lea.hbm %s15331_s24, %s9293_s21  ;;  %s11035_s25 = scalar_lea.hbm %s15331_s24, 4096 }
 0x159   : > { %s11030_s20 = scalar_lea.hbm %s11647_s0, 2048  ;;  %p11036_p4 = scmp.lt.u32.totalorder %s11647_s0, %s15331_s24 }
 0x15a   : > { %p11031_p8 = scmp.ne.s32.totalorder %s11647_s0, %s11030_s20  ;;  %p11037_p6 = scmp.lt.u32.totalorder %s11035_s25, %s11030_s20 }
 0x15b   : > { %p11039_p10 = scmp.lt.u32.totalorder %s11030_s20, %s11647_s0 }
 0x15c   : > { %p11033_p9 = pnand %p11032_p7, %p11031_p8  ;;  %p11038_p3 = por %p11037_p6, %p11036_p4 }
 0x15e   : > { %p11034_p1 = pneg %p11033_p9  ;;  %p11040_p13 = por %p11039_p10, %p11038_p3 }
 0x160   : > { %p11041_p2 = pnand %p11040_p13, %p11034_p1 }
 0x162   : > { %11044 = shalt.err (!%p11041_p2)
}
 0x163   : > { %s11045_s16 = scalar_lea.vmem %s11655_s26, 2048  ;;  %s11214_s21 = smov [#allocation4]  }
 0x164   : > { %p11046_p8 = scmp.ne.s32.totalorder %s11655_s26, %s11045_s16  ;;  %s11050_s2 = sshll.u32 %s11214_s21, 4  ;;  %s11051_s2 = int_to_ptr.vmem [resolvable:$false] %s11050_s2 }
 0x165   : > { %s11052_s19 = scalar_lea.vmem %s11051_s2, 4096  ;;  %p11053_p12 = scmp.lt.s32.totalorder %s11655_s26, %s11051_s2 }
 0x166   : > { %p11048_p9 = pnand %p11046_p8, %p11032_p7  ;;  %p11054_p4 = scmp.lt.s32.totalorder %s11052_s19, %s11045_s16 }
 0x168   : > { %p11049_p0 = pneg %p11048_p9  ;;  %p11055_p6 = por %p11054_p4, %p11053_p12 }
 0x16a   : > { %p11056_p3 = pnand %p11055_p6, %p11049_p0 }
 0x16c   : > { %11059 = shalt.err (!%p11056_p3)
}
 0x16d   : > { %s11215_s20 = smov 64   ;;  %s11216_s25 = smov 4  }
 0x16e   : > { %10094 = dma.hbm_to_vmem [thread:$0]  (!%p11651_p5), %s11647_s0, 2048, %s11655_s26, %s11657_s3, %s11215_s20, %s11215_s20, %s11216_s25  }
 0x16f   : > { %s15333_s1 = sld [smem:[#allocation39_spill]] }
 0x175   : > { %p15334_p7 = scmp.ne.s32.totalorder %s15333_s1, 0 }
 0x177   : > { %561 = sbr.rel (%p15334_p7) target bundleno = 1612 (0x64c), region = 72 }
 0x17e   : > { %s11688_s21 = sand.u32 1, %s11182_s30  }
 0x17f   : > { %s8572_s16 = sshll.u32 %s11688_s21, 7  ;;  %s564_s2 = scalar_lea.sflag [#allocation5], %s11688_s21 }
 0x180   : > { %s11694_s19 = scalar_lea.vmem [#allocation4], %s8572_s16 }
 0x181   : > { %11141 = dma.done.wait (%p11626_p11), %s564_s2, 2048  }
 0x182   : > { %11143 = vsyncadd (%p11626_p11), %s564_s2, 4294965248  ;;  %s15335_s3 = sld [smem:[#allocation38_spill]] }
 0x188   : > { %p15336_p12 = scmp.ne.s32.totalorder %s15335_s3, 0 }
 0x18a   : > { %11145 = dma.done.wait (%p15336_p12), [#allocation8], 80  }
 0x18b   : > { %11147 = vsyncadd (%p15336_p12), [#allocation8], 4294967216 }
 0x18c   : > { %11149 = dma.done.wait (%p15336_p12), [#allocation11], 304  }
 0x18d   : > { %11151 = vsyncadd (%p15336_p12), [#allocation11], 4294966992 }
 0x18e   : > { %11153 = dma.done.wait (%p15336_p12), [#allocation14], 32  }
 0x18f   : > { %11155 = vsyncadd (%p15336_p12), [#allocation14], 4294967264 }
 0x190   : > { %11157 = dma.done.wait (%p15336_p12), [#allocation17], 48  }
 0x191   : > { %11159 = vsyncadd (%p15336_p12), [#allocation17], 4294967248 }
 0x192   : > { %11161 = dma.done.wait (%p15336_p12), [#allocation20], 80  }
 0x193   : > { %11163 = vsyncadd (%p15336_p12), [#allocation20], 4294967216 }
 0x194   : > { %11165 = dma.done.wait (%p15336_p12), [#allocation23], 32  }
 0x195   : > { %11167 = vsyncadd (%p15336_p12), [#allocation23], 4294967264  ;;  %vm834_vm0 = vcmask 1043456   ;;  %vm785_vm1 = vcmask 64512   ;;  %v704_v0 = vld [vmem:[#allocation7] sm:$0xf] }
 0x196   : > { %9988 = vmatprep.subr.msk.bf16.mxu0 %vm834_vm0, %v704_v0  ;;  %v836_v1 = vsel %vm834_vm0, %v704_v0, 0  ;;  %v10198_v2 = vld [vmem:[%s11694_s19] sm:$0xff]   ;;  %v10199_v3 = vld [vmem:[%s11694_s19 + $0x8] sm:$0xff]   ;;  %v10200_v4 = vld [vmem:[%s11694_s19 + $0x10] sm:$0xff]   ;;  %v11217_v18 = vmov 0.0|0.0   ;;  %vm1678_vm2 = vcmask 27648  }
 0x197   : > { %9581 = vmatpush3.bf16.msra.mxu0 %v836_v1  ;;  %9582 = vmatprep.mubr.msk.bf16.mxu0 %vm785_vm1, %v10198_v2  ;;  %v10201_v5 = vld [vmem:[%s11694_s19 + $0x18] sm:$0xff]   ;;  %v10202_v6 = vld [vmem:[%s11694_s19 + $0x20] sm:$0xff]   ;;  %v10203_v7 = vld [vmem:[%s11694_s19 + $0x28] sm:$0xff]   ;;  %v8653_v19 = vcombine.low %v11217_v18, %v11217_v18  ;;  %v8654_v20 = vcombine.high %v11217_v18, %v11217_v18  ;;  %vm1681_vm3 = vcmask 24576   ;;  %vm1980_vm4 = vcmask 1041408   ;;  %s14511_s13 = scalar_lea.vmem [#allocation26], %s8572_s16 }
 0x198   : > { %v10204_v8 = vld [vmem:[%s11694_s19 + $0x30] sm:$0xff]   ;;  %v10205_v9 = vld [vmem:[%s11694_s19 + $0x38] sm:$0xff]   ;;  %v10206_v10 = vld [vmem:[%s11694_s19 + $0x40] sm:$0xff]   ;;  %vm1735_vm5 = vcmask 31744   ;;  %vm2241_vm6 = vsmask.f32 3328 }
 0x199   : > { %v10207_v11 = vld [vmem:[%s11694_s19 + $0x48] sm:$0xff]   ;;  %v10208_v12 = vld [vmem:[%s11694_s19 + $0x50] sm:$0xff]   ;;  %v10209_v13 = vld [vmem:[%s11694_s19 + $0x58] sm:$0xff]   ;;  %1679 = vst.msk [vmem:[#allocation2] sm:$0xf] %vm1678_vm2, %v8653_v19  ;;  %vm1333_vm9 = vcmask 1040384  }
 0x19a   : > { %9583 = vmatmul.mubr.msk.bf16.vlgmr.msra.gmra.mrb[0].mxu0 %vm785_vm1, %v10199_v3  ;;  %v10210_v14 = vld [vmem:[%s11694_s19 + $0x60] sm:$0xff]   ;;  %v10211_v15 = vld [vmem:[%s11694_s19 + $0x68] sm:$0xff]   ;;  %v10212_v16 = vld [vmem:[%s11694_s19 + $0x70] sm:$0xff]   ;;  %1680 = vst.msk [vmem:[#allocation2 + $0x4] sm:$0xf] %vm1678_vm2, %v8654_v20  ;;  %vm3002_vm10 = vcmask 1042432  }
 0x19b   : > { %9586 = vmatprep.mubr.msk.bf16.mxu0 %vm785_vm1, %v10200_v4  ;;  %v10213_v17 = vld [vmem:[%s11694_s19 + $0x78] sm:$0xff]   ;;  %1682 = vst.msk [vmem:[#allocation2 + $0x8] sm:$0x1] %vm1681_vm3, %v8653_v19  ;;  %1733 = vst.msk [vmem:[#allocation2 + $0xd4] sm:$0x1] %vm1681_vm3, %v8653_v19  ;;  %vm3003_vm11 = vcmask 1046532  }
 0x19c   : > { %1731 = vst.msk [vmem:[#allocation2 + $0xcc] sm:$0xf] %vm1678_vm2, %v8653_v19  ;;  %1732 = vst.msk [vmem:[#allocation2 + $0xd0] sm:$0xf] %vm1678_vm2, %v8654_v20  ;;  %v1851_v21 = vld [vmem:[#allocation12] sm:$0x3] }
 0x19d   : > { %9989 = vmatprep.subr.msk.bf16.mxu1 %vm1980_vm4, %v1851_v21  ;;  %v1982_v22 = vsel %vm1980_vm4, %v1851_v21, 0  ;;  %v2629_v26 = vld [vmem:[#allocation12 + $0x2] sm:$0x3]  ;;  %vm2242_vm7 = vsmask.f32 7440  ;;  %vm12481_vm12 = vmor %vm3002_vm10, %vm3003_vm11  ;;  %s15438_s0 = sld [smem:[#allocation37_spill]] }
 0x19e   : > { %9615 = vmatpush3.bf16.msra.mxu1 %v1982_v22  ;;  %9990 = vmatprep.subr.msk.bf16.mxu0 %vm1980_vm4, %v2629_v26  ;;  %v2727_v27 = vsel %vm1980_vm4, %v2629_v26, 0  ;;  %vm11779_vm8 = vmor %vm2241_vm6, %vm2242_vm7  ;;  %v11788_v47 = vld [vmem:[#allocation12 + $0x4] sm:$0x3]  ;;  %v11792_v48 = vld [vmem:[#allocation9] ss:$0 sm:$0xff]  ;;  %s8307_s23 = sshll.u32 %s14511_s13, 4  ;;  %s14784_s23 = int_to_ptr.vmem [resolvable:$true] %s8307_s23 }
 0x19f   : > { %9649 = vmatpush3.bf16.msra.mxu0 %v2727_v27  ;;  %9991 = vmatprep.subr.msk.bf16.mxu1 %vm1980_vm4, %v11788_v47  ;;  %v11794_v50 = vld [vmem:[#allocation10] ss:$0 sm:$0xff]  ;;  %s15439_s1 = sld [smem:[#allocation61_spill]]  ;;  %p15440_p0 = scmp.ne.s32.totalorder %s15329_s28, 0 }
 0x1a0   : > { %v11766_v23 = vld [vmem:[#allocation2] sm:$0xf]  ;;  %s11219_s3 = smov [#allocation26]  }
 0x1a1   : > { %v11768_v24 = vld [vmem:[#allocation2 + $0x4] sm:$0xf]  ;;  %v2245_v28 = vshrl.u32 %v11766_v23, 16  ;;  %v2248_v29 = vshll.u32 %v11766_v23, 16  ;;  %s11064_s4 = sshll.u32 %s11219_s3, 4  ;;  %s11065_s4 = int_to_ptr.vmem [resolvable:$false] %s11064_s4 }
 0x1a2   : > { %9587 = vmatmul.mubr.msk.bf16.gmra.mrb[4].mxu0 %vm785_vm1, %v10201_v5  ;;  %v8703_v25 = vcombine.low %v11766_v23, %v11768_v24  ;;  %v2254_v30 = vshll.u32 %v11768_v24, 16  ;;  %v2258_v31 = vshrl.u32 %v11768_v24, 16  ;;  %v1773_v39 = vld [vmem:[#allocation2 + $0x8] sm:$0x1]  ;;  %p11067_p10 = scmp.lt.s32.totalorder %s14784_s23, %s11065_s4 }
 0x1a3   : > { %9590 = vmatprep.mubr.msk.bf16.mxu0 %vm785_vm1, %v10202_v6  ;;  %v2247_v32 = vrot.slane %v2245_v28, 4  ;;  %v2250_v33 = vrot.slane %v2248_v29, 5  ;;  %v2264_v41 = vshll.u32 %v1773_v39, 16  ;;  %s9375_s26 = sshll.u32 %s15438_s0, 11 }
 0x1a4   : > { %9616 = vmatprep.mubr.msk.bf16.mxu1 %vm1735_vm5, %v8703_v25  ;;  %v2256_v34 = vrot.slane %v2254_v30, 5  ;;  %v2260_v35 = vrot.slane %v2258_v31, 4 }
 0x1a5   : > { %v2251_v36 = vor.u32 %v2250_v33, %v2247_v32  ;;  %v2266_v42 = vrot.slane %v2264_v41, 5  ;;  %s14782_s16 = scalar_lea.hbm %s15439_s1, %s9375_s26 }
 0x1a6   : > { %v2261_v37 = vor.u32 %v2260_v35, %v2256_v34 }
 0x1a7   : > { %v2252_v38 = vrot.slane %v2251_v36, 4 }
 0x1a8   : > { %v2262_v40 = vrot.slane %v2261_v37, 4 }
 0x1a9   : > { %v2257_v44 = vsel %vm11779_vm8, %v2252_v38, %v2256_v34 }
 0x1aa   : > { %9591 = vmatmul.mubr.msk.bf16.gmra.mrb[8].mxu0 %vm785_vm1, %v10203_v7  ;;  %v2267_v45 = vsel %vm11779_vm8, %v2262_v40, %v2266_v42 }
 0x1ab   : > { %9594 = vmatprep.mubr.msk.bf16.mxu0 %vm785_vm1, %v10204_v8  ;;  %v8735_v46 = vcombine.low %v2257_v44, %v2267_v45 }
 0x1b2   : > { %9595 = vmatmul.mubr.msk.bf16.gmra.mrb[12].mxu0 %vm785_vm1, %v10205_v9 }
 0x1b3   : > { %9598 = vmatprep.mubr.msk.bf16.mxu0 %vm785_vm1, %v10206_v10 }
 0x1ba   : > { %9599 = vmatmul.mubr.msk.bf16.gmra.mrb[16].mxu0 %vm785_vm1, %v10207_v11 }
 0x1bb   : > { %9602 = vmatprep.mubr.msk.bf16.mxu0 %vm785_vm1, %v10208_v12 }
 0x1c2   : > { %9603 = vmatmul.mubr.msk.bf16.gmra.mrb[20].mxu0 %vm785_vm1, %v10209_v13 }
 0x1c3   : > { %9606 = vmatprep.mubr.msk.bf16.mxu0 %vm785_vm1, %v10210_v14 }
 0x1ca   : > { %9607 = vmatmul.mubr.msk.bf16.gmra.mrb[24].mxu0 %vm785_vm1, %v10211_v15 }
 0x1cb   : > { %9610 = vmatprep.mubr.msk.bf16.mxu0 %vm785_vm1, %v10212_v16 }
 0x1d2   : > { %9611 = vmatmul.mubr.msk.bf16.gmra.mrb[28].mxu0 %vm785_vm1, %v10213_v17 }
 0x1d3   : > { %9650 = vmatprep.mubr.msk.bf16.mxu0 %vm1735_vm5, %v8735_v46 }
 0x26d   : > { %v9584_v49 = vpop.f32.mrb[0].mxu0 }
 0x26e   : > { %v1008_v51 = vmul.f32 %v9584_v49, %v11792_v48  ;;  %v872_v52 = vpop.f32.mrb[1].mxu0 }
 0x26f   : > { %v1006_v53 = vmul.f32 %v11792_v48, %v872_v52  ;;  %v9585_v54 = vpop.f32.mrb[2].mxu0 }
 0x270   : > { %v11799_v55 = vadd.f32 %v11794_v50, %v1008_v51  ;;  %v1009_v56 = vmul.f32 %v9585_v54, %v11792_v48  ;;  %v875_v57 = vpop.f32.mrb[3].mxu0 }
 0x271   : > { %v11803_v58 = vadd.f32 %v11794_v50, %v1006_v53  ;;  %v1007_v59 = vmul.f32 %v11792_v48, %v875_v57  ;;  %v15286_v57 = vrot.slane %v11768_v24, 5 }
 0x272   : > { %v8623_v60 = vmul.f32 -1.442695, %v11799_v55  ;;  %v11808_v61 = vadd.f32 %v11794_v50, %v1009_v56 }
 0x273   : > { %v8621_v62 = vmul.f32 -1.442695, %v11803_v58  ;;  %v11812_v63 = vadd.f32 %v11794_v50, %v1007_v59 }
 0x274   : > { %10278 = vpow2.f32 %v8623_v60  ;;  %v8624_v0 = vmul.f32 -1.442695, %v11808_v61 }
 0x275   : > { %10280 = vpow2.f32 %v8621_v62  ;;  %v8622_v1 = vmul.f32 -1.442695, %v11812_v63  ;;  %v9588_v2 = vpop.f32.mrb[4].mxu0 }
 0x276   : > { %10282 = vpow2.f32 %v8624_v0  ;;  %v1012_v3 = vmul.f32 %v9588_v2, %v11792_v48  ;;  %v888_v4 = vpop.f32.mrb[5].mxu0 }
 0x277   : > { %10284 = vpow2.f32 %v8622_v1  ;;  %v1010_v5 = vmul.f32 %v11792_v48, %v888_v4  ;;  %v9589_v6 = vpop.f32.mrb[6].mxu0 }
 0x278   : > { %v11819_v7 = vadd.f32 %v11794_v50, %v1012_v3  ;;  %v1013_v8 = vmul.f32 %v9589_v6, %v11792_v48  ;;  %v891_v9 = vpop.f32.mrb[7].mxu0 }
 0x279   : > { %v11823_v10 = vadd.f32 %v11794_v50, %v1010_v5  ;;  %v1011_v11 = vmul.f32 %v11792_v48, %v891_v9 }
 0x27a   : > { %v8627_v12 = vmul.f32 -1.442695, %v11819_v7  ;;  %v11828_v13 = vadd.f32 %v11794_v50, %v1013_v8 }
 0x27b   : > { %v8625_v14 = vmul.f32 -1.442695, %v11823_v10  ;;  %v11832_v15 = vadd.f32 %v11794_v50, %v1011_v11 }
 0x27c   : > { %10286 = vpow2.f32 %v8627_v12  ;;  %v8628_v16 = vmul.f32 -1.442695, %v11828_v13 }
 0x27d   : > { %10288 = vpow2.f32 %v8625_v14  ;;  %v8626_v17 = vmul.f32 -1.442695, %v11832_v15  ;;  %v9592_v18 = vpop.f32.mrb[8].mxu0 }
 0x27e   : > { %v10279_v19 = vpop.eup %10278  ;;  %10290 = vpow2.f32 %v8628_v16  ;;  %v1016_v20 = vmul.f32 %v9592_v18, %v11792_v48  ;;  %v904_v21 = vpop.f32.mrb[9].mxu0 }
 0x27f   : > { %v10281_v22 = vpop.eup %10280  ;;  %v1175_v25 = vadd.f32 1.0, %v10279_v19  ;;  %10292 = vpow2.f32 %v8626_v17  ;;  %v1014_v26 = vmul.f32 %v11792_v48, %v904_v21  ;;  %v9593_v27 = vpop.f32.mrb[10].mxu0 }
 0x280   : > { %v10283_v28 = vpop.eup %10282  ;;  %v1173_v29 = vadd.f32 1.0, %v10281_v22  ;;  %v11839_v30 = vadd.f32 %v11794_v50, %v1016_v20  ;;  %v1017_v31 = vmul.f32 %v9593_v27, %v11792_v48  ;;  %v907_v32 = vpop.f32.mrb[11].mxu0  ;;  %v11880_v20 = vsel %vm1980_vm4, %v11788_v47, 0 }
 0x281   : > { %v10285_v33 = vpop.eup %10284  ;;  %10294 = vrcp.f32 %v1175_v25  ;;  %v1176_v34 = vadd.f32 1.0, %v10283_v28  ;;  %v11843_v35 = vadd.f32 %v11794_v50, %v1014_v26  ;;  %v1015_v36 = vmul.f32 %v11792_v48, %v907_v32 }
 0x282   : > { %10296 = vrcp.f32 %v1173_v29  ;;  %v1174_v37 = vadd.f32 1.0, %v10285_v33  ;;  %v8631_v38 = vmul.f32 -1.442695, %v11839_v30  ;;  %v11848_v39 = vadd.f32 %v11794_v50, %v1017_v31 }
 0x283   : > { %10298 = vrcp.f32 %v1176_v34  ;;  %v8629_v40 = vmul.f32 -1.442695, %v11843_v35  ;;  %v11852_v41 = vadd.f32 %v11794_v50, %v1015_v36  ;;  %v11886_v27 = vrot.slane %v15286_v57, 4 }
 0x284   : > { %10300 = vrcp.f32 %v1174_v37  ;;  %v8632_v42 = vmul.f32 -1.442695, %v11848_v39 }
 0x285   : > { %10302 = vpow2.f32 %v8631_v38  ;;  %v8630_v44 = vmul.f32 -1.442695, %v11852_v41  ;;  %v9596_v45 = vpop.f32.mrb[12].mxu0 }
 0x286   : > { %v10287_v46 = vpop.eup %10286  ;;  %10304 = vpow2.f32 %v8629_v40  ;;  %v1020_v49 = vmul.f32 %v9596_v45, %v11792_v48  ;;  %v920_v51 = vpop.f32.mrb[13].mxu0 }
 0x287   : > { %v10289_v52 = vpop.eup %10288  ;;  %v1179_v53 = vadd.f32 1.0, %v10287_v46  ;;  %10306 = vpow2.f32 %v8632_v42  ;;  %v1018_v54 = vmul.f32 %v11792_v48, %v920_v51  ;;  %v9597_v56 = vpop.f32.mrb[14].mxu0 }
 0x288   : > { %v10291_v59 = vpop.eup %10290  ;;  %v1177_v60 = vadd.f32 1.0, %v10289_v52  ;;  %10308 = vpow2.f32 %v8630_v44  ;;  %v11860_v62 = vadd.f32 %v11794_v50, %v1020_v49  ;;  %v1021_v0 = vmul.f32 %v9597_v56, %v11792_v48  ;;  %v923_v1 = vpop.f32.mrb[15].mxu0 }
 0x289   : > { %v10293_v2 = vpop.eup %10292  ;;  %10310 = vrcp.f32 %v1179_v53  ;;  %v1180_v3 = vadd.f32 1.0, %v10291_v59  ;;  %v11864_v4 = vadd.f32 %v11794_v50, %v1018_v54  ;;  %v1019_v5 = vmul.f32 %v11792_v48, %v923_v1 }
 0x28a   : > { %10312 = vrcp.f32 %v1177_v60  ;;  %v1178_v6 = vadd.f32 1.0, %v10293_v2  ;;  %v8635_v8 = vmul.f32 -1.442695, %v11860_v62  ;;  %v11869_v9 = vadd.f32 %v11794_v50, %v1021_v0 }
 0x28b   : > { %v10295_v11 = vpop.eup %10294  ;;  %10314 = vrcp.f32 %v1180_v3  ;;  %v8633_v12 = vmul.f32 -1.442695, %v11864_v4  ;;  %v11873_v14 = vadd.f32 %v11794_v50, %v1019_v5 }
 0x28c   : > { %v10297_v17 = vpop.eup %10296  ;;  %v1271_v18 = vmul.f32 %v10295_v11, %v11799_v55  ;;  %10316 = vrcp.f32 %v1178_v6  ;;  %v8636_v19 = vmul.f32 -1.442695, %v11869_v9 }
 0x28d   : > { %v10299_v21 = vpop.eup %10298  ;;  %v1269_v22 = vmul.f32 %v10297_v17, %v11803_v58  ;;  %10318 = vpow2.f32 %v8635_v8  ;;  %v8634_v25 = vmul.f32 -1.442695, %v11873_v14  ;;  %v9600_v26 = vpop.f32.mrb[16].mxu0 }
 0x28e   : > { %v10301_v28 = vpop.eup %10300  ;;  %v1337_v55 = vrot.slane %v1271_v18, 7  ;;  %v1272_v29 = vmul.f32 %v10299_v21, %v11808_v61  ;;  %10320 = vpow2.f32 %v8633_v12  ;;  %v1024_v31 = vmul.f32 %v9600_v26, %v11792_v48  ;;  %v936_v47 = vpop.f32.mrb[17].mxu0  ;;  %v3528_v61 = vld [vmem:[#allocation12 + $0x6] sm:$0x3] }
 0x28f   : > { %v10303_v32 = vpop.eup %10302  ;;  %v1334_v33 = vrot.slane %v1269_v22, 7  ;;  %v1270_v58 = vmul.f32 %v10301_v28, %v11812_v63  ;;  %10322 = vpow2.f32 %v8636_v19  ;;  %v1022_v34 = vmul.f32 %v11792_v48, %v936_v47  ;;  %v9601_v36 = vpop.f32.mrb[18].mxu0  ;;  %9992 = vmatprep.subr.msk.bf16.mxu0 %vm1980_vm4, %v3528_v61 }
 0x290   : > { %v10305_v37 = vpop.eup %10304  ;;  %v1431_v38 = vsel %vm1333_vm9, 0.0, %v1337_v55  ;;  %v1338_v40 = vrot.slane %v1272_v29, 7  ;;  %v1183_v42 = vadd.f32 1.0, %v10303_v32  ;;  %10324 = vpow2.f32 %v8634_v25  ;;  %v11893_v44 = vpop.f32.mrb[19].mxu0 }
 0x291   : > { %v10307_v45 = vpop.eup %10306  ;;  %v9297_v46 = vpack.c.bf16 %v1431_v38, %v1431_v38  ;;  %v1430_v49 = vsel %vm1333_vm9, 0.0, %v1334_v33  ;;  %v1335_v51 = vrot.slane %v1270_v58, 7  ;;  %v1181_v52 = vadd.f32 1.0, %v10305_v37 }
 0x292   : > { %v10309_v63 = vpop.eup %10308  ;;  %v9294_v53 = vpack.c.bf16 %v1430_v49, %v1430_v49  ;;  %v1339_v54 = vsel %vm1333_vm9, %v1337_v55, %v1338_v40  ;;  %v1447_v56 = vsel %vm1333_vm9, %v1338_v40, 0.0  ;;  %10326 = vrcp.f32 %v1183_v42 }
 0x293   : > { %v10311_v59 = vpop.eup %10310  ;;  %1686 = vst.msk [vmem:[#allocation2 + $0x18] sm:$0xf] %vm1678_vm2, %v9297_v46  ;;  %v9298_v60 = vpack.c.bf16 %v1339_v54, %v1339_v54  ;;  %v9299_v0 = vpack.c.bf16 %v1447_v56, %v1447_v56  ;;  %v1336_v1 = vsel %vm1333_vm9, %v1334_v33, %v1335_v51  ;;  %v1446_v2 = vsel %vm1333_vm9, %v1335_v51, 0.0 }
 0x294   : > { %v10313_v3 = vpop.eup %10312  ;;  %1683 = vst.msk [vmem:[#allocation2 + $0xc] sm:$0xf] %vm1678_vm2, %v9294_v53  ;;  %v9295_v5 = vpack.c.bf16 %v1336_v1, %v1336_v1  ;;  %v9296_v6 = vpack.c.bf16 %v1446_v2, %v1446_v2  ;;  %v1275_v8 = vmul.f32 %v10311_v59, %v11819_v7  ;;  %10328 = vrcp.f32 %v1181_v52 }
 0x295   : > { %v10315_v11 = vpop.eup %10314  ;;  %1687 = vst.msk [vmem:[#allocation2 + $0x1c] sm:$0xf] %vm1678_vm2, %v9298_v60  ;;  %v1273_v12 = vmul.f32 %v10313_v3, %v11823_v10  ;;  %v1184_v17 = vadd.f32 1.0, %v10307_v45  ;;  %v1182_v18 = vadd.f32 1.0, %v10309_v63  ;;  %v11908_v19 = vadd.f32 %v11794_v50, %v1024_v31  ;;  %v9604_v21 = vpop.f32.mrb[20].mxu0 }
 0x296   : > { %1688 = vst.msk [vmem:[#allocation2 + $0x20] sm:$0x1] %vm1681_vm3, %v9299_v0  ;;  %v10317_v22 = vpop.eup %10316  ;;  %1685 = vst.msk [vmem:[#allocation2 + $0x14] sm:$0x1] %vm1681_vm3, %v9296_v6  ;;  %v1343_v7 = vrot.slane %v1275_v8, 7  ;;  %v1276_v25 = vmul.f32 %v10315_v11, %v11828_v13  ;;  %v11914_v26 = vadd.f32 %v11794_v50, %v1022_v34  ;;  %v1025_v28 = vmul.f32 %v9601_v36, %v11792_v48  ;;  %v952_v10 = vpop.f32.mrb[21].mxu0 }
 0x297   : > { %1684 = vst.msk [vmem:[#allocation2 + $0x10] sm:$0xf] %vm1678_vm2, %v9295_v5  ;;  %v10319_v55 = vpop.eup %10318  ;;  %v1340_v29 = vrot.slane %v1273_v12, 7  ;;  %v1274_v31 = vmul.f32 %v10317_v22, %v11832_v15  ;;  %10330 = vrcp.f32 %v1184_v17  ;;  %v8639_v47 = vmul.f32 -1.442695, %v11908_v19  ;;  %v9605_v32 = vpop.f32.mrb[22].mxu0 }
 0x298   : > { %v10321_v33 = vpop.eup %10320  ;;  %v1433_v58 = vsel %vm1333_vm9, 0.0, %v1343_v7  ;;  %v1344_v37 = vrot.slane %v1276_v25, 7  ;;  %10332 = vrcp.f32 %v1182_v18  ;;  %v1187_v13 = vadd.f32 1.0, %v10319_v55  ;;  %v11920_v38 = vpop.f32.mrb[23].mxu0 }
 0x299   : > { %v10323_v34 = vpop.eup %10322  ;;  %v9303_v40 = vpack.c.bf16 %v1433_v58, %v1433_v58  ;;  %v1432_v36 = vsel %vm1333_vm9, 0.0, %v1340_v29  ;;  %v1341_v42 = vrot.slane %v1274_v31, 7  ;;  %v1185_v61 = vadd.f32 1.0, %v10321_v33 }
 0x29a   : > { %v10325_v45 = vpop.eup %10324  ;;  %v9300_v15 = vpack.c.bf16 %v1432_v36, %v1432_v36  ;;  %v1345_v46 = vsel %vm1333_vm9, %v1343_v7, %v1344_v37  ;;  %v1449_v49 = vsel %vm1333_vm9, %v1344_v37, 0.0  ;;  %10334 = vrcp.f32 %v1187_v13 }
 0x29b   : > { %1692 = vst.msk [vmem:[#allocation2 + $0x30] sm:$0xf] %vm1678_vm2, %v9303_v40  ;;  %v9304_v51 = vpack.c.bf16 %v1345_v46, %v1345_v46  ;;  %v9305_v52 = vpack.c.bf16 %v1449_v49, %v1449_v49  ;;  %v1342_v63 = vsel %vm1333_vm9, %v1340_v29, %v1341_v42  ;;  %v1448_v53 = vsel %vm1333_vm9, %v1341_v42, 0.0 }
 0x29c   : > { %v10327_v54 = vpop.eup %10326  ;;  %1689 = vst.msk [vmem:[#allocation2 + $0x24] sm:$0xf] %vm1678_vm2, %v9300_v15  ;;  %v9301_v56 = vpack.c.bf16 %v1342_v63, %v1342_v63  ;;  %v9302_v59 = vpack.c.bf16 %v1448_v53, %v1448_v53  ;;  %10336 = vrcp.f32 %v1185_v61  ;;  %v1188_v60 = vadd.f32 1.0, %v10323_v34 }
 0x29d   : > { %1693 = vst.msk [vmem:[#allocation2 + $0x34] sm:$0xf] %vm1678_vm2, %v9304_v51  ;;  %v1279_v0 = vmul.f32 %v10327_v54, %v11839_v30  ;;  %v1186_v1 = vadd.f32 1.0, %v10325_v45  ;;  %10338 = vpow2.f32 %v8639_v47  ;;  %v8637_v2 = vmul.f32 -1.442695, %v11914_v26  ;;  %v11933_v3 = vpop.f32.mrb[24].mxu0 }
 0x29e   : > { %1694 = vst.msk [vmem:[#allocation2 + $0x38] sm:$0x1] %vm1681_vm3, %v9305_v52  ;;  %v10329_v5 = vpop.eup %10328  ;;  %1691 = vst.msk [vmem:[#allocation2 + $0x2c] sm:$0x1] %vm1681_vm3, %v9302_v59  ;;  %10340 = vrcp.f32 %v1188_v60  ;;  %v11938_v6 = vadd.f32 %v11794_v50, %v1025_v28  ;;  %v1023_v8 = vmul.f32 %v11792_v48, %v11893_v44  ;;  %v1028_v30 = vmul.f32 %v9604_v21, %v11792_v48  ;;  %v11943_v11 = vpop.f32.mrb[25].mxu0 }
 0x29f   : > { %1690 = vst.msk [vmem:[#allocation2 + $0x28] sm:$0xf] %vm1678_vm2, %v9301_v56  ;;  %v1349_v12 = vrot.slane %v1279_v0, 7  ;;  %v1277_v17 = vmul.f32 %v10329_v5, %v11843_v35  ;;  %10342 = vrcp.f32 %v1186_v1  ;;  %v1026_v18 = vmul.f32 %v11792_v48, %v952_v10  ;;  %v11947_v22 = vpop.f32.mrb[26].mxu0 }
 0x2a0   : > { %10344 = vpow2.f32 %v8637_v2  ;;  %v8640_v7 = vmul.f32 -1.442695, %v11938_v6  ;;  %v11951_v25 = vadd.f32 %v11794_v50, %v1023_v8  ;;  %v11954_v44 = vadd.f32 %v11794_v50, %v1028_v30  ;;  %v11956_v21 = vpop.f32.mrb[27].mxu0 }
 0x2a1   : > { %v10331_v28 = vpop.eup %10330  ;;  %v1435_v55 = vsel %vm1333_vm9, 0.0, %v1349_v12  ;;  %v1346_v35 = vrot.slane %v1277_v17, 7  ;;  %v11960_v29 = vadd.f32 %v11794_v50, %v1026_v18  ;;  %v1029_v10 = vmul.f32 %v9605_v32, %v11792_v48 }
 0x2a2   : > { %v10333_v31 = vpop.eup %10332  ;;  %v9309_v47 = vpack.c.bf16 %v1435_v55, %v1435_v55  ;;  %v1280_v33 = vmul.f32 %v10331_v28, %v11848_v39  ;;  %10346 = vpow2.f32 %v8640_v7  ;;  %v8638_v58 = vmul.f32 -1.442695, %v11951_v25 }
 0x2a3   : > { %v1434_v37 = vsel %vm1333_vm9, 0.0, %v1346_v35  ;;  %v1278_v13 = vmul.f32 %v10333_v31, %v11852_v41  ;;  %v8643_v34 = vmul.f32 -1.442695, %v11954_v44  ;;  %v8641_v40 = vmul.f32 -1.442695, %v11960_v29 }
 0x2a4   : > { %v10335_v36 = vpop.eup %10334  ;;  %1698 = vst.msk [vmem:[#allocation2 + $0x48] sm:$0xf] %vm1678_vm2, %v9309_v47  ;;  %v9306_v42 = vpack.c.bf16 %v1434_v37, %v1434_v37  ;;  %v1350_v32 = vrot.slane %v1280_v33, 7  ;;  %10348 = vpow2.f32 %v8638_v58  ;;  %v11971_v61 = vadd.f32 %v11794_v50, %v1029_v10 }
 0x2a5   : > { %v1347_v39 = vrot.slane %v1278_v13, 7  ;;  %v1283_v45 = vmul.f32 %v10335_v36, %v11860_v62  ;;  %10350 = vpow2.f32 %v8643_v34  ;;  %v1027_v41 = vmul.f32 %v11792_v48, %v11920_v38  ;;  %v11976_v15 = vpop.f32.mrb[28].mxu0 }
 0x2a6   : > { %v10337_v46 = vpop.eup %10336  ;;  %1695 = vst.msk [vmem:[#allocation2 + $0x3c] sm:$0xf] %vm1678_vm2, %v9306_v42  ;;  %v1351_v49 = vsel %vm1333_vm9, %v1349_v12, %v1350_v32  ;;  %v1451_v51 = vsel %vm1333_vm9, %v1350_v32, 0.0  ;;  %10352 = vpow2.f32 %v8641_v40  ;;  %v8644_v52 = vmul.f32 -1.442695, %v11971_v61  ;;  %v11982_v63 = vpop.f32.mrb[29].mxu0 }
 0x2a7   : > { %v10339_v53 = vpop.eup %10338  ;;  %v9310_v62 = vpack.c.bf16 %v1351_v49, %v1351_v49  ;;  %v9311_v54 = vpack.c.bf16 %v1451_v51, %v1451_v51  ;;  %v1348_v56 = vsel %vm1333_vm9, %v1346_v35, %v1347_v39  ;;  %v1450_v38 = vsel %vm1333_vm9, %v1347_v39, 0.0  ;;  %v11986_v59 = vpop.f32.mrb[30].mxu0 }
 0x2a8   : > { %v10341_v60 = vpop.eup %10340  ;;  %v9307_v0 = vpack.c.bf16 %v1348_v56, %v1348_v56  ;;  %v9308_v1 = vpack.c.bf16 %v1450_v38, %v1450_v38  ;;  %v1355_v2 = vrot.slane %v1283_v45, 7  ;;  %v1281_v5 = vmul.f32 %v10337_v46, %v11864_v4  ;;  %v11989_v8 = vpop.f32.mrb[31].mxu0 }
 0x2a9   : > { %v10343_v30 = vpop.eup %10342  ;;  %1699 = vst.msk [vmem:[#allocation2 + $0x4c] sm:$0xf] %vm1678_vm2, %v9310_v62  ;;  %v1284_v12 = vmul.f32 %v10341_v60, %v11869_v9  ;;  %v1191_v17 = vadd.f32 1.0, %v10339_v53  ;;  %10354 = vpow2.f32 %v8644_v52  ;;  %v11995_v18 = vadd.f32 %v11794_v50, %v1027_v41  ;;  %v12014_v52 = vld [vmem:[#allocation2 + $0xc] sm:$0xf] }
 0x2aa   : > { %1700 = vst.msk [vmem:[#allocation2 + $0x50] sm:$0x1] %vm1681_vm3, %v9311_v54  ;;  %v10345_v7 = vpop.eup %10344  ;;  %1697 = vst.msk [vmem:[#allocation2 + $0x44] sm:$0x1] %vm1681_vm3, %v9308_v1  ;;  %v1437_v4 = vsel %vm1333_vm9, 0.0, %v1355_v2  ;;  %v1352_v28 = vrot.slane %v1281_v5, 7  ;;  %v1282_v55 = vmul.f32 %v10343_v30, %v11873_v14  ;;  %v1032_v35 = vmul.f32 %v11933_v3, %v11792_v48 }
 0x2ab   : > { %1696 = vst.msk [vmem:[#allocation2 + $0x40] sm:$0xf] %vm1678_vm2, %v9307_v0  ;;  %v9315_v10 = vpack.c.bf16 %v1437_v4, %v1437_v4  ;;  %v1356_v9 = vrot.slane %v1284_v12, 7  ;;  %10356 = vrcp.f32 %v1191_v17  ;;  %v1189_v31 = vadd.f32 1.0, %v10345_v7  ;;  %v12016_v53 = vld [vmem:[#allocation2 + $0x10] sm:$0xf] }
 0x2ac   : > { %v10347_v47 = vpop.eup %10346  ;;  %v1436_v33 = vsel %vm1333_vm9, 0.0, %v1352_v28  ;;  %v1353_v58 = vrot.slane %v1282_v55, 7  ;;  %v8642_v37 = vmul.f32 -1.442695, %v11995_v18  ;;  %v12006_v13 = vadd.f32 %v11794_v50, %v1032_v35 }
 0x2ad   : > { %1704 = vst.msk [vmem:[#allocation2 + $0x60] sm:$0xf] %vm1678_vm2, %v9315_v10  ;;  %v9312_v34 = vpack.c.bf16 %v1436_v33, %v1436_v33  ;;  %v1357_v14 = vsel %vm1333_vm9, %v1355_v2, %v1356_v9  ;;  %v1453_v3 = vsel %vm1333_vm9, %v1356_v9, 0.0  ;;  %10358 = vrcp.f32 %v1189_v31 }
 0x2ae   : > { %v10349_v40 = vpop.eup %10348  ;;  %v9316_v36 = vpack.c.bf16 %v1357_v14, %v1357_v14  ;;  %v9317_v42 = vpack.c.bf16 %v1453_v3, %v1453_v3  ;;  %v1354_v32 = vsel %vm1333_vm9, %v1352_v28, %v1353_v58  ;;  %v1452_v39 = vsel %vm1333_vm9, %v1353_v58, 0.0  ;;  %v12056_v3 = vld [vmem:[#allocation2 + $0x18] sm:$0xf] }
 0x2af   : > { %v10351_v45 = vpop.eup %10350  ;;  %1701 = vst.msk [vmem:[#allocation2 + $0x54] sm:$0xf] %vm1678_vm2, %v9312_v34  ;;  %v9313_v41 = vpack.c.bf16 %v1354_v32, %v1354_v32  ;;  %v9314_v46 = vpack.c.bf16 %v1452_v39, %v1452_v39  ;;  %v1192_v49 = vadd.f32 1.0, %v10347_v47  ;;  %v1190_v51 = vadd.f32 1.0, %v10349_v40 }
 0x2b0   : > { %v10353_v62 = vpop.eup %10352  ;;  %1705 = vst.msk [vmem:[#allocation2 + $0x64] sm:$0xf] %vm1678_vm2, %v9316_v36  ;;  %v1195_v54 = vadd.f32 1.0, %v10351_v45  ;;  %10360 = vpow2.f32 %v8642_v37  ;;  %v8647_v56 = vmul.f32 -1.442695, %v12006_v13  ;;  %v1030_v38 = vmul.f32 %v11792_v48, %v11943_v11 }
 0x2b1   : > { %1706 = vst.msk [vmem:[#allocation2 + $0x68] sm:$0x1] %vm1681_vm3, %v9317_v42  ;;  %1703 = vst.msk [vmem:[#allocation2 + $0x5c] sm:$0x1] %vm1681_vm3, %v9314_v46  ;;  %10362 = vrcp.f32 %v1192_v49  ;;  %v1193_v60 = vadd.f32 1.0, %v10353_v62  ;;  %v1033_v0 = vmul.f32 %v11947_v22, %v11792_v48  ;;  %v1031_v1 = vmul.f32 %v11792_v48, %v11956_v21 }
 0x2b2   : > { %1702 = vst.msk [vmem:[#allocation2 + $0x58] sm:$0xf] %vm1678_vm2, %v9313_v41  ;;  %10364 = vrcp.f32 %v1190_v51  ;;  %v12030_v2 = vadd.f32 %v11794_v50, %v1030_v38  ;;  %v8704_v5 = vcombine.low %v12014_v52, %v12016_v53  ;;  %v2269_v11 = vshrl.u32 %v12014_v52, 16  ;;  %v12042_v21 = vld [vmem:[#allocation12 + $0x8] sm:$0x3] }
 0x2b3   : > { %v10355_v30 = vpop.eup %10354  ;;  %10366 = vrcp.f32 %v1195_v54  ;;  %v12036_v12 = vadd.f32 %v11794_v50, %v1033_v0  ;;  %v12039_v17 = vadd.f32 %v11794_v50, %v1031_v1  ;;  %v2272_v22 = vshll.u32 %v12014_v52, 16 }
 0x2b4   : > { %10368 = vrcp.f32 %v1193_v60  ;;  %v1196_v7 = vadd.f32 1.0, %v10355_v30  ;;  %v8645_v4 = vmul.f32 -1.442695, %v12030_v2  ;;  %9617 = vmatmul.mubr.msk.bf16.vlgmr.msra.gmra.mrb[0].mxu1 %vm1735_vm5, %v8704_v5  ;;  %v2271_v28 = vrot.slane %v2269_v11, 4 }
 0x2b5   : > { %v10357_v55 = vpop.eup %10356  ;;  %10370 = vpow2.f32 %v8647_v56  ;;  %v8648_v35 = vmul.f32 -1.442695, %v12036_v12  ;;  %v8646_v10 = vmul.f32 -1.442695, %v12039_v17  ;;  %v2274_v9 = vrot.slane %v2272_v22, 5  ;;  %9683 = vmatpush3.bf16.msra.mxu1 %v11880_v20 }
 0x2b6   : > { %v1287_v31 = vmul.f32 %v10357_v55, %v11908_v19  ;;  %10372 = vrcp.f32 %v1196_v7  ;;  %v2278_v47 = vshll.u32 %v12016_v53, 16  ;;  %v2282_v33 = vshrl.u32 %v12016_v53, 16  ;;  %9993 = vmatprep.subr.msk.bf16.mxu1 %vm1980_vm4, %v12042_v21  ;;  %v12058_v20 = vld [vmem:[#allocation2 + $0x1c] sm:$0xf] }
 0x2b7   : > { %v10359_v58 = vpop.eup %10358  ;;  %10374 = vpow2.f32 %v8645_v4  ;;  %v2275_v37 = vor.u32 %v2274_v9, %v2271_v28  ;;  %v15285_v14 = vrot.slane %v12016_v53, 5  ;;  %v8705_v49 = vcombine.low %v12056_v3, %v12058_v20 }
 0x2b8   : > { %v1361_v19 = vrot.slane %v1287_v31, 7  ;;  %v1285_v40 = vmul.f32 %v10359_v58, %v11914_v26  ;;  %10376 = vpow2.f32 %v8648_v35  ;;  %v12061_v36 = vrot.slane %v2278_v47, 5  ;;  %v12339_v34 = vld [vmem:[#allocation2 + $0x68] sm:$0x1] }
 0x2b9   : > { %10378 = vpow2.f32 %v8646_v10  ;;  %v12063_v42 = vrot.slane %v2275_v37, 4  ;;  %v2284_v32 = vrot.slane %v2282_v33, 4  ;;  %v12067_v39 = vrot.slane %v15285_v14, 4  ;;  %9620 = vmatprep.mubr.msk.bf16.mxu1 %vm1735_vm5, %v8705_v49 }
 0x2ba   : > { %v10361_v45 = vpop.eup %10360  ;;  %v1439_v41 = vsel %vm1333_vm9, 0.0, %v1361_v19  ;;  %v1358_v46 = vrot.slane %v1285_v40, 7  ;;  %v2293_v26 = vshrl.u32 %v12056_v3, 16  ;;  %v2296_v38 = vshll.u32 %v12056_v3, 16 }
 0x2bb   : > { %v10363_v51 = vpop.eup %10362  ;;  %v9321_v62 = vpack.c.bf16 %v1439_v41, %v1439_v41  ;;  %v1194_v54 = vadd.f32 1.0, %v10361_v45  ;;  %v2285_v56 = vor.u32 %v2284_v32, %v12061_v36  ;;  %v2306_v5 = vshrl.u32 %v12058_v20, 16 }
 0x2bc   : > { %v10365_v60 = vpop.eup %10364  ;;  %v1438_v0 = vsel %vm1333_vm9, 0.0, %v1358_v46  ;;  %v1288_v1 = vmul.f32 %v10363_v51, %v11938_v6  ;;  %v1036_v11 = vmul.f32 %v11976_v15, %v11792_v48  ;;  %v1034_v10 = vmul.f32 %v11792_v48, %v11982_v63 }
 0x2bd   : > { %v10367_v30 = vpop.eup %10366  ;;  %1710 = vst.msk [vmem:[#allocation2 + $0x78] sm:$0xf] %vm1678_vm2, %v9321_v62  ;;  %v9318_v22 = vpack.c.bf16 %v1438_v0, %v1438_v0  ;;  %v1286_v7 = vmul.f32 %v10365_v60, %v11951_v25  ;;  %10380 = vrcp.f32 %v1194_v54  ;;  %v12083_v4 = vrot.slane %v2285_v56, 4 }
 0x2be   : > { %v10369_v28 = vpop.eup %10368  ;;  %v1362_v55 = vrot.slane %v1288_v1, 7  ;;  %v1291_v6 = vmul.f32 %v10367_v30, %v11954_v44  ;;  %v12087_v35 = vadd.f32 %v11794_v50, %v1036_v11  ;;  %v1037_v25 = vmul.f32 %v11986_v59, %v11792_v48 }
 0x2bf   : > { %v10371_v15 = vpop.eup %10370  ;;  %1707 = vst.msk [vmem:[#allocation2 + $0x6c] sm:$0xf] %vm1678_vm2, %v9318_v22  ;;  %v1359_v9 = vrot.slane %v1286_v7, 7  ;;  %v12093_v31 = vmul.f32 %v10369_v28, %v11960_v29  ;;  %v1035_v47 = vmul.f32 %v11792_v48, %v11989_v8  ;;  %v12118_v7 = vld [vmem:[#allocation2 + $0x24] sm:$0xf] }
 0x2c0   : > { %v10373_v44 = vpop.eup %10372  ;;  %v1363_v33 = vsel %vm1333_vm9, %v1361_v19, %v1362_v55  ;;  %v1455_v58 = vsel %vm1333_vm9, %v1362_v55, 0.0  ;;  %v1367_v37 = vrot.slane %v1291_v6, 7  ;;  %v1199_v63 = vadd.f32 1.0, %v10371_v15 }
 0x2c1   : > { %v10375_v40 = vpop.eup %10374  ;;  %v9322_v32 = vpack.c.bf16 %v1363_v33, %v1363_v33  ;;  %v9323_v45 = vpack.c.bf16 %v1455_v58, %v1455_v58  ;;  %v1360_v41 = vsel %vm1333_vm9, %v1358_v46, %v1359_v9  ;;  %v1454_v29 = vsel %vm1333_vm9, %v1359_v9, 0.0  ;;  %v12108_v46 = vld [vmem:[#allocation2 + $0x28] sm:$0xf] }
 0x2c2   : > { %v10377_v49 = vpop.eup %10376  ;;  %v9319_v51 = vpack.c.bf16 %v1360_v41, %v1360_v41  ;;  %v9320_v59 = vpack.c.bf16 %v1454_v29, %v1454_v29  ;;  %v1441_v62 = vsel %vm1333_vm9, 0.0, %v1367_v37  ;;  %v1364_v48 = vrot.slane %v12093_v31, 7  ;;  %v12147_v41 = vld [vmem:[#allocation2 + $0x14] sm:$0x1] }
 0x2c3   : > { %v10379_v8 = vpop.eup %10378  ;;  %1711 = vst.msk [vmem:[#allocation2 + $0x7c] sm:$0xf] %vm1678_vm2, %v9322_v32  ;;  %v9327_v19 = vpack.c.bf16 %v1441_v62, %v1441_v62  ;;  %v1292_v54 = vmul.f32 %v10373_v44, %v11971_v61  ;;  %10382 = vrcp.f32 %v1199_v63  ;;  %v1197_v56 = vadd.f32 1.0, %v10375_v40  ;;  %v12132_v44 = vld [vmem:[#allocation2 + $0x34] sm:$0xf] }
 0x2c4   : > { %1712 = vst.msk [vmem:[#allocation2 + $0x80] sm:$0x1] %vm1681_vm3, %v9323_v45  ;;  %1709 = vst.msk [vmem:[#allocation2 + $0x74] sm:$0x1] %vm1681_vm3, %v9320_v59  ;;  %v1440_v60 = vsel %vm1333_vm9, 0.0, %v1364_v48  ;;  %v1200_v0 = vadd.f32 1.0, %v10377_v49  ;;  %v12116_v61 = vadd.f32 %v11794_v50, %v1034_v10  ;;  %v12121_v28 = vadd.f32 %v11794_v50, %v1037_v25 }
 0x2c5   : > { %1708 = vst.msk [vmem:[#allocation2 + $0x70] sm:$0xf] %vm1678_vm2, %v9319_v51  ;;  %v1198_v1 = vadd.f32 1.0, %v10379_v8  ;;  %v8651_v11 = vmul.f32 -1.442695, %v12087_v35  ;;  %v9324_v30 = vpack.c.bf16 %v1440_v60, %v1440_v60  ;;  %v1368_v22 = vrot.slane %v1292_v54, 7 }
 0x2c6   : > { %1716 = vst.msk [vmem:[#allocation2 + $0x90] sm:$0xf] %vm1678_vm2, %v9327_v19  ;;  %10384 = vrcp.f32 %v1197_v56  ;;  %v12124_v55 = vadd.f32 %v11794_v50, %v1035_v47  ;;  %v8706_v6 = vcombine.low %v12118_v7, %v12108_v46  ;;  %v8649_v31 = vmul.f32 -1.442695, %v12116_v61  ;;  %v12136_v47 = vld [vmem:[#allocation2 + $0x30] sm:$0xf] }
 0x2c7   : > { %10386 = vrcp.f32 %v1200_v0  ;;  %v10381_v15 = vpop.eup %10380  ;;  %1713 = vst.msk [vmem:[#allocation2 + $0x84] sm:$0xf] %vm1678_vm2, %v9324_v30  ;;  %v1369_v9 = vsel %vm1333_vm9, %v1367_v37, %v1368_v22  ;;  %v1457_v10 = vsel %vm1333_vm9, %v1368_v22, 0.0  ;;  %v8652_v58 = vmul.f32 -1.442695, %v12121_v28 }
 0x2c8   : > { %10388 = vrcp.f32 %v1198_v1  ;;  %v9328_v25 = vpack.c.bf16 %v1369_v9, %v1369_v9  ;;  %v9329_v33 = vpack.c.bf16 %v1457_v10, %v1457_v10  ;;  %v1290_v50 = vmul.f32 %v10381_v15, %v11995_v18  ;;  %9621 = vmatmul.mubr.msk.bf16.gmra.mrb[4].mxu1 %vm1735_vm5, %v8706_v6  ;;  %v12152_v59 = vld [vmem:[#allocation2 + $0x20] sm:$0x1]  ;;  %v12161_v54 = vld [vmem:[#allocation2 + $0x3c] sm:$0xf] }
 0x2c9   : > { %10390 = vpow2.f32 %v8651_v11  ;;  %v8650_v37 = vmul.f32 -1.442695, %v12124_v55  ;;  %v2317_v63 = vshrl.u32 %v12118_v7, 16  ;;  %v2320_v32 = vshll.u32 %v12118_v7, 16  ;;  %v12163_v56 = vld [vmem:[#allocation2 + $0x40] sm:$0xf] }
 0x2ca   : > { %10392 = vpow2.f32 %v8649_v31  ;;  %1717 = vst.msk [vmem:[#allocation2 + $0x94] sm:$0xf] %vm1678_vm2, %v9328_v25  ;;  %v1365_v40 = vrot.slane %v1290_v50, 7  ;;  %v2330_v18 = vshrl.u32 %v12108_v46, 16  ;;  %v8707_v45 = vcombine.low %v12136_v47, %v12132_v44 }
 0x2cb   : > { %1718 = vst.msk [vmem:[#allocation2 + $0x98] sm:$0x1] %vm1681_vm3, %v9329_v33  ;;  %10394 = vpow2.f32 %v8652_v58  ;;  %v2341_v29 = vshrl.u32 %v12136_v47, 16  ;;  %v2344_v49 = vshll.u32 %v12136_v47, 16  ;;  %v2354_v51 = vshrl.u32 %v12132_v44, 16 }
 0x2cc   : > { %v1366_v62 = vsel %vm1333_vm9, %v1364_v48, %v1365_v40  ;;  %v1456_v8 = vsel %vm1333_vm9, %v1365_v40, 0.0  ;;  %10396 = vpow2.f32 %v8650_v37  ;;  %9624 = vmatprep.mubr.msk.bf16.mxu1 %vm1735_vm5, %v8707_v45  ;;  %v2281_v19 = vsel %vm11779_vm8, %v12063_v42, %v12061_v36  ;;  %v12372_v57 = vld [vmem:[#allocation2 + $0x74] sm:$0x1] }
 0x2cd   : > { %v10383_v60 = vpop.eup %10382  ;;  %v9325_v0 = vpack.c.bf16 %v1366_v62, %v1366_v62  ;;  %v9326_v1 = vpack.c.bf16 %v1456_v8, %v1456_v8  ;;  %v2288_v11 = vshll.u32 %v12147_v41, 16  ;;  %v2295_v48 = vrot.slane %v2293_v26, 4  ;;  %15345 = vst [vmem:[#allocation46_spill] sm:$0xff] %v12372_v57 }
 0x2ce   : > { %v1295_v30 = vmul.f32 %v10383_v60, %v12006_v13  ;;  %v2298_v22 = vrot.slane %v2296_v38, 5  ;;  %v2302_v6 = vshll.u32 %v12058_v20, 16  ;;  %v2308_v36 = vrot.slane %v2306_v5, 4 }
 0x2cf   : > { %1714 = vst.msk [vmem:[#allocation2 + $0x88] sm:$0xf] %vm1678_vm2, %v9325_v0  ;;  %v2290_v15 = vrot.slane %v2288_v11, 5  ;;  %v2312_v9 = vshll.u32 %v12152_v59, 16  ;;  %v8708_v26 = vcombine.low %v12161_v54, %v12163_v56  ;;  %v2365_v13 = vshrl.u32 %v12161_v54, 16 }
 0x2d0   : > { %v10385_v42 = vpop.eup %10384  ;;  %1715 = vst.msk [vmem:[#allocation2 + $0x8c] sm:$0x1] %vm1681_vm3, %v9326_v1  ;;  %v1373_v38 = vrot.slane %v1295_v30, 7  ;;  %v2299_v25 = vor.u32 %v2298_v22, %v2295_v48  ;;  %v2304_v33 = vrot.slane %v2302_v6, 5  ;;  %v2368_v40 = vshll.u32 %v12161_v54, 16 }
 0x2d1   : > { %v10387_v10 = vpop.eup %10386  ;;  %v1293_v31 = vmul.f32 %v10385_v42, %v12030_v2  ;;  %v2291_v58 = vsel %vm11779_vm8, %v12083_v4, %v2290_v15  ;;  %v2314_v37 = vrot.slane %v2312_v9, 5  ;;  %9625 = vmatmul.mubr.msk.bf16.gmra.mrb[8].mxu1 %vm1735_vm5, %v8708_v26 }
 0x2d2   : > { %v10389_v5 = vpop.eup %10388  ;;  %v1296_v50 = vmul.f32 %v10387_v10, %v12036_v12  ;;  %v1443_v62 = vsel %vm1333_vm9, 0.0, %v1373_v38  ;;  %v8736_v60 = vcombine.low %v2281_v19, %v2291_v58  ;;  %v2300_v48 = vrot.slane %v2299_v25, 4 }
 0x2d3   : > { %v10391_v45 = vpop.eup %10390  ;;  %v1370_v8 = vrot.slane %v1293_v31, 7  ;;  %v1294_v2 = vmul.f32 %v10389_v5, %v12039_v17  ;;  %v9333_v1 = vpack.c.bf16 %v1443_v62, %v1443_v62  ;;  %v2309_v6 = vor.u32 %v2308_v36, %v2304_v33  ;;  %v12196_v5 = vld [vmem:[#allocation2 + $0x48] sm:$0xf] }
 0x2d4   : > { %v10393_v0 = vpop.eup %10392  ;;  %v1374_v11 = vrot.slane %v1296_v50, 7  ;;  %v1203_v12 = vadd.f32 1.0, %v10391_v45  ;;  %9651 = vmatmul.mubr.msk.bf16.vlgmr.msra.gmra.mrb[32].mxu0 %vm1735_vm5, %v8736_v60  ;;  %v12198_v50 = vld [vmem:[#allocation2 + $0x4c] sm:$0xf]  ;;  %v2305_v62 = vsel %vm11779_vm8, %v2300_v48, %v2304_v33  ;;  %v2319_v48 = vrot.slane %v2317_v63, 4 }
 0x2d5   : > { %v1442_v30 = vsel %vm1333_vm9, 0.0, %v1370_v8  ;;  %v1371_v4 = vrot.slane %v1294_v2, 7  ;;  %v1201_v22 = vadd.f32 1.0, %v10393_v0  ;;  %v10395_v42 = vpop.eup %10394  ;;  %1722 = vst.msk [vmem:[#allocation2 + $0xa8] sm:$0xf] %vm1678_vm2, %v9333_v1  ;;  %v2378_v2 = vshrl.u32 %v12163_v56, 16 }
 0x2d6   : > { %v9330_v15 = vpack.c.bf16 %v1442_v30, %v1442_v30  ;;  %v1375_v9 = vsel %vm1333_vm9, %v1373_v38, %v1374_v11  ;;  %v1459_v17 = vsel %vm1333_vm9, %v1374_v11, 0.0  ;;  %10398 = vrcp.f32 %v1203_v12  ;;  %v10397_v19 = vpop.eup %10396  ;;  %v12212_v11 = vld [vmem:[#allocation2 + $0x2c] sm:$0x1]  ;;  %v12219_v30 = vld [vmem:[#allocation2 + $0x38] sm:$0x1] }
 0x2d7   : > { %v9334_v26 = vpack.c.bf16 %v1375_v9, %v1375_v9  ;;  %v9335_v10 = vpack.c.bf16 %v1459_v17, %v1459_v17  ;;  %v1372_v31 = vsel %vm1333_vm9, %v1370_v8, %v1371_v4  ;;  %v1458_v25 = vsel %vm1333_vm9, %v1371_v4, 0.0 }
 0x2d8   : > { %1719 = vst.msk [vmem:[#allocation2 + $0x9c] sm:$0xf] %vm1678_vm2, %v9330_v15  ;;  %v9331_v36 = vpack.c.bf16 %v1372_v31, %v1372_v31  ;;  %v9332_v58 = vpack.c.bf16 %v1458_v25, %v1458_v25  ;;  %10400 = vrcp.f32 %v1201_v22  ;;  %v1204_v38 = vadd.f32 1.0, %v10395_v42  ;;  %v12227_v15 = vld [vmem:[#allocation2 + $0x58] sm:$0xf] }
 0x2d9   : > { %1723 = vst.msk [vmem:[#allocation2 + $0xac] sm:$0xf] %vm1678_vm2, %v9334_v26  ;;  %v1202_v45 = vadd.f32 1.0, %v10397_v19  ;;  %v2310_v8 = vrot.slane %v2309_v6, 4  ;;  %v8709_v60 = vcombine.low %v12196_v5, %v12198_v50  ;;  %v2389_v0 = vshrl.u32 %v12196_v5, 16 }
 0x2da   : > { %1724 = vst.msk [vmem:[#allocation2 + $0xb0] sm:$0x1] %vm1681_vm3, %v9335_v10  ;;  %1721 = vst.msk [vmem:[#allocation2 + $0xa4] sm:$0x1] %vm1681_vm3, %v9332_v58  ;;  %10402 = vrcp.f32 %v1204_v38  ;;  %v2392_v1 = vshll.u32 %v12196_v5, 16  ;;  %v2402_v12 = vshrl.u32 %v12198_v50, 16 }
 0x2db   : > { %1720 = vst.msk [vmem:[#allocation2 + $0xa0] sm:$0xf] %vm1678_vm2, %v9331_v36  ;;  %10404 = vrcp.f32 %v1202_v45  ;;  %v2315_v33 = vsel %vm11779_vm8, %v2310_v8, %v2314_v37  ;;  %9628 = vmatprep.mubr.msk.bf16.mxu1 %vm1735_vm5, %v8709_v60  ;;  %v2322_v22 = vrot.slane %v2320_v32, 5  ;;  %v2326_v6 = vshll.u32 %v12108_v46, 16  ;;  %v12235_v19 = vld [vmem:[#allocation2 + $0x54] sm:$0xf] }
 0x2dc   : > { %v8737_v4 = vcombine.low %v2305_v62, %v2315_v33  ;;  %v2332_v42 = vrot.slane %v2330_v18, 4  ;;  %v2336_v37 = vshll.u32 %v12212_v11, 16  ;;  %v2343_v63 = vrot.slane %v2341_v29, 4 }
 0x2dd   : > { %v2346_v9 = vrot.slane %v2344_v49, 5  ;;  %v2350_v17 = vshll.u32 %v12132_v44, 16  ;;  %v2323_v32 = vor.u32 %v2322_v22, %v2319_v48  ;;  %v2328_v26 = vrot.slane %v2326_v6, 5  ;;  %v12243_v49 = vld [vmem:[#allocation2 + $0x64] sm:$0xf] }
 0x2de   : > { %9654 = vmatprep.mubr.msk.bf16.mxu0 %vm1735_vm5, %v8737_v4  ;;  %v2356_v18 = vrot.slane %v2354_v51, 4  ;;  %v2360_v10 = vshll.u32 %v12219_v30, 16  ;;  %v2338_v31 = vrot.slane %v2336_v37, 5  ;;  %v8710_v29 = vcombine.low %v12235_v19, %v12227_v15  ;;  %v12249_v4 = vld [vmem:[#allocation2 + $0x60] sm:$0xf] }
 0x2df   : > { %v2347_v25 = vor.u32 %v2346_v9, %v2343_v63  ;;  %v2352_v36 = vrot.slane %v2350_v17, 5  ;;  %v2324_v38 = vrot.slane %v2323_v32, 4  ;;  %v2333_v45 = vor.u32 %v2332_v42, %v2328_v26 }
 0x2e0   : > { %v10399_v58 = vpop.eup %10398  ;;  %v2362_v62 = vrot.slane %v2360_v10, 5  ;;  %v2413_v8 = vshrl.u32 %v12235_v19, 16  ;;  %9629 = vmatmul.mubr.msk.bf16.gmra.mrb[12].mxu1 %vm1735_vm5, %v8710_v29  ;;  %v2416_v48 = vshll.u32 %v12235_v19, 16  ;;  %v2426_v42 = vshrl.u32 %v12227_v15, 16 }
 0x2e1   : > { %v1299_v60 = vmul.f32 %v10399_v58, %v12087_v35  ;;  %v2348_v33 = vrot.slane %v2347_v25, 4  ;;  %v2357_v51 = vor.u32 %v2356_v18, %v2352_v36  ;;  %v2329_v6 = vsel %vm11779_vm8, %v2324_v38, %v2328_v26 }
 0x2e2   : > { %v10401_v22 = vpop.eup %10400  ;;  %v2334_v37 = vrot.slane %v2333_v45, 4  ;;  %v8711_v63 = vcombine.low %v12249_v4, %v12243_v49  ;;  %v2437_v26 = vshrl.u32 %v12249_v4, 16  ;;  %v2440_v25 = vshll.u32 %v12249_v4, 16 }
 0x2e3   : > { %v1379_v9 = vrot.slane %v1299_v60, 7  ;;  %v1297_v35 = vmul.f32 %v10401_v22, %v12116_v61  ;;  %v2353_v17 = vsel %vm11779_vm8, %v2348_v33, %v2352_v36  ;;  %v2358_v32 = vrot.slane %v2357_v51, 4  ;;  %v12270_v51 = vld [vmem:[#allocation2 + $0x44] sm:$0x1] }
 0x2e4   : > { %v10403_v18 = vpop.eup %10402  ;;  %v2339_v10 = vsel %vm11779_vm8, %v2334_v37, %v2338_v31  ;;  %9632 = vmatprep.mubr.msk.bf16.mxu1 %vm1735_vm5, %v8711_v63  ;;  %v2450_v29 = vshrl.u32 %v12243_v49, 16  ;;  %v2367_v22 = vrot.slane %v2365_v13, 4 }
 0x2e5   : > { %v10405_v58 = vpop.eup %10404  ;;  %v1445_v38 = vsel %vm1333_vm9, 0.0, %v1379_v9  ;;  %v1376_v61 = vrot.slane %v1297_v35, 7  ;;  %v1300_v45 = vmul.f32 %v10403_v18, %v12121_v28  ;;  %v8738_v36 = vcombine.low %v2329_v6, %v2339_v10 }
 0x2e6   : > { %v9339_v60 = vpack.c.bf16 %v1445_v38, %v1445_v38  ;;  %v1298_v33 = vmul.f32 %v10405_v58, %v12124_v55  ;;  %v2363_v31 = vsel %vm11779_vm8, %v2358_v32, %v2362_v62  ;;  %v2370_v28 = vrot.slane %v2368_v40, 5 }
 0x2e7   : > { %v1444_v37 = vsel %vm1333_vm9, 0.0, %v1376_v61  ;;  %v1380_v63 = vrot.slane %v1300_v45, 7  ;;  %9655 = vmatmul.mubr.msk.bf16.gmra.mrb[36].mxu0 %vm1735_vm5, %v8738_v36  ;;  %v8739_v35 = vcombine.low %v2353_v17, %v2363_v31  ;;  %v2374_v62 = vshll.u32 %v12163_v56, 16  ;;  %v12289_v36 = vld [vmem:[#allocation2 + $0x50] sm:$0x1] }
 0x2e8   : > { %1728 = vst.msk [vmem:[#allocation2 + $0xc0] sm:$0xf] %vm1678_vm2, %v9339_v60  ;;  %v9336_v55 = vpack.c.bf16 %v1444_v37, %v1444_v37  ;;  %v1377_v6 = vrot.slane %v1298_v33, 7  ;;  %v2380_v32 = vrot.slane %v2378_v2, 4  ;;  %v2371_v10 = vor.u32 %v2370_v28, %v2367_v22  ;;  %v12291_v31 = vld [vmem:[#allocation2 + $0x6c] sm:$0xf] }
 0x2e9   : > { %v1381_v13 = vsel %vm1333_vm9, %v1379_v9, %v1380_v63  ;;  %v1461_v18 = vsel %vm1333_vm9, %v1380_v63, 0.0  ;;  %9658 = vmatprep.mubr.msk.bf16.mxu0 %vm1735_vm5, %v8739_v35  ;;  %v2384_v17 = vshll.u32 %v12270_v51, 16  ;;  %v2376_v33 = vrot.slane %v2374_v62, 5  ;;  %15339 = vst [vmem:[#allocation40_spill] sm:$0xff] %v12291_v31  ;;  %v12293_v37 = vld [vmem:[#allocation2 + $0x70] sm:$0xf] }
 0x2ea   : > { %1725 = vst.msk [vmem:[#allocation2 + $0xb4] sm:$0xf] %vm1678_vm2, %v9336_v55  ;;  %v9340_v40 = vpack.c.bf16 %v1381_v13, %v1381_v13  ;;  %v9341_v58 = vpack.c.bf16 %v1461_v18, %v1461_v18  ;;  %v1378_v38 = vsel %vm1333_vm9, %v1376_v61, %v1377_v6  ;;  %v1460_v45 = vsel %vm1333_vm9, %v1377_v6, 0.0  ;;  %15340 = vst [vmem:[#allocation41_spill] sm:$0xff] %v12293_v37  ;;  %v12309_v13 = vld [vmem:[#allocation2 + $0x78] sm:$0xf] }
 0x2eb   : > { %v9337_v2 = vpack.c.bf16 %v1378_v38, %v1378_v38  ;;  %v9338_v60 = vpack.c.bf16 %v1460_v45, %v1460_v45  ;;  %v2372_v9 = vrot.slane %v2371_v10, 4  ;;  %v2386_v22 = vrot.slane %v2384_v17, 5  ;;  %15341 = vst [vmem:[#allocation42_spill] sm:$0xff] %v12309_v13 }
 0x2ec   : > { %1729 = vst.msk [vmem:[#allocation2 + $0xc4] sm:$0xf] %vm1678_vm2, %v9340_v40  ;;  %v2391_v61 = vrot.slane %v2389_v0, 4  ;;  %v2394_v63 = vrot.slane %v2392_v1, 5  ;;  %v2398_v35 = vshll.u32 %v12198_v50, 16  ;;  %v2381_v55 = vor.u32 %v2380_v32, %v2376_v33 }
 0x2ed   : > { %1730 = vst.msk [vmem:[#allocation2 + $0xc8] sm:$0x1] %vm1681_vm3, %v9341_v58  ;;  %1727 = vst.msk [vmem:[#allocation2 + $0xbc] sm:$0x1] %vm1681_vm3, %v9338_v60  ;;  %v2377_v28 = vsel %vm11779_vm8, %v2372_v9, %v2376_v33  ;;  %v2404_v6 = vrot.slane %v2402_v12, 4  ;;  %v2408_v62 = vshll.u32 %v12289_v36, 16  ;;  %v8712_v10 = vcombine.low %v12291_v31, %v12293_v37 }
 0x2ee   : > { %1726 = vst.msk [vmem:[#allocation2 + $0xb8] sm:$0xf] %vm1678_vm2, %v9337_v2  ;;  %v12311_v0 = vld [vmem:[#allocation2 + $0x7c] sm:$0xf]  ;;  %v2395_v1 = vor.u32 %v2394_v63, %v2391_v61  ;;  %v2400_v18 = vrot.slane %v2398_v35, 5  ;;  %v2461_v17 = vshrl.u32 %v12291_v31, 16 }
 0x2ef   : > { %15342 = vst [vmem:[#allocation43_spill] sm:$0xff] %v12311_v0  ;;  %v2382_v40 = vrot.slane %v2381_v55, 4  ;;  %v2410_v58 = vrot.slane %v2408_v62, 5  ;;  %v2464_v32 = vshll.u32 %v12291_v31, 16  ;;  %v2474_v38 = vshrl.u32 %v12293_v37, 16  ;;  %9633 = vmatmul.mubr.msk.bf16.gmra.mrb[16].mxu1 %vm1735_vm5, %v8712_v10 }
 0x2f0   : > { %v2396_v12 = vrot.slane %v2395_v1, 4  ;;  %v2405_v45 = vor.u32 %v2404_v6, %v2400_v18  ;;  %v8713_v2 = vcombine.low %v12309_v13, %v12311_v0  ;;  %v2485_v60 = vshrl.u32 %v12309_v13, 16  ;;  %v12322_v9 = vld [vmem:[#allocation2 + $0x5c] sm:$0x1] }
 0x2f1   : > { %v2387_v33 = vsel %vm11779_vm8, %v2382_v40, %v2386_v22  ;;  %v2488_v61 = vshll.u32 %v12309_v13, 16  ;;  %v2415_v35 = vrot.slane %v2413_v8, 4  ;;  %v2418_v1 = vrot.slane %v2416_v48, 5 }
 0x2f2   : > { %v8740_v55 = vcombine.low %v2377_v28, %v2387_v33  ;;  %v2401_v6 = vsel %vm11779_vm8, %v2396_v12, %v2400_v18  ;;  %v2406_v62 = vrot.slane %v2405_v45, 4  ;;  %9636 = vmatprep.mubr.msk.bf16.mxu1 %vm1735_vm5, %v8713_v2  ;;  %v2422_v10 = vshll.u32 %v12227_v15, 16  ;;  %v12349_v45 = vld [vmem:[#allocation2 + $0x84] sm:$0xf] }
 0x2f3   : > { %v2428_v22 = vrot.slane %v2426_v42, 4  ;;  %v2432_v40 = vshll.u32 %v12322_v9, 16  ;;  %v2439_v8 = vrot.slane %v2437_v26, 4  ;;  %v2419_v18 = vor.u32 %v2418_v1, %v2415_v35  ;;  %15343 = vst [vmem:[#allocation44_spill] sm:$0xff] %v12349_v45  ;;  %v12351_v42 = vld [vmem:[#allocation2 + $0x88] sm:$0xf] }
 0x2f4   : > { %9659 = vmatmul.mubr.msk.bf16.gmra.mrb[40].mxu0 %vm1735_vm5, %v8740_v55  ;;  %v2411_v28 = vsel %vm11779_vm8, %v2406_v62, %v2410_v58  ;;  %v2442_v48 = vrot.slane %v2440_v25, 5  ;;  %v2446_v12 = vshll.u32 %v12243_v49, 16  ;;  %15344 = vst [vmem:[#allocation45_spill] sm:$0xff] %v12351_v42  ;;  %v2424_v33 = vrot.slane %v2422_v10, 5  ;;  %v12355_v55 = vld [vmem:[#allocation2 + $0x90] sm:$0xf] }
 0x2f5   : > { %v8741_v2 = vcombine.low %v2401_v6, %v2411_v28  ;;  %v2434_v14 = vrot.slane %v2432_v40, 5  ;;  %v2452_v26 = vrot.slane %v2450_v29, 4  ;;  %v2420_v16 = vrot.slane %v2419_v18, 4  ;;  %v12358_v25 = vld [vmem:[#allocation2 + $0x94] sm:$0xf] }
 0x2f6   : > { %v2443_v58 = vor.u32 %v2442_v48, %v2439_v8  ;;  %v2448_v35 = vrot.slane %v2446_v12, 5  ;;  %v2456_v62 = vshll.u32 %v12339_v34, 16  ;;  %v2429_v1 = vor.u32 %v2428_v22, %v2424_v33 }
 0x2f7   : > { %9662 = vmatprep.mubr.msk.bf16.mxu0 %vm1735_vm5, %v8741_v2  ;;  %v8714_v6 = vcombine.low %v12349_v45, %v12351_v42  ;;  %v2509_v10 = vshrl.u32 %v12349_v45, 16  ;;  %v2425_v29 = vsel %vm11779_vm8, %v2420_v16, %v2424_v33  ;;  %v2522_v12 = vshrl.u32 %v12351_v42, 16  ;;  %v12389_v33 = vld [vmem:[#allocation2 + $0x80] sm:$0x1] }
 0x2f8   : > { %v2444_v28 = vrot.slane %v2443_v58, 4  ;;  %v2453_v8 = vor.u32 %v2452_v26, %v2448_v35  ;;  %v2458_v18 = vrot.slane %v2456_v62, 5  ;;  %v2430_v48 = vrot.slane %v2429_v1, 4  ;;  %15346 = vst [vmem:[#allocation47_spill] sm:$0xff] %v12389_v33 }
 0x2f9   : > { %9637 = vmatmul.mubr.msk.bf16.gmra.mrb[20].mxu1 %vm1735_vm5, %v8714_v6  ;;  %v8715_v22 = vcombine.low %v12355_v55, %v12358_v25  ;;  %v2533_v2 = vshrl.u32 %v12355_v55, 16  ;;  %v2463_v58 = vrot.slane %v2461_v17, 4  ;;  %v2466_v62 = vrot.slane %v2464_v32, 5  ;;  %v12395_v32 = vld [vmem:[#allocation2 + $0x9c] sm:$0xf] }
 0x2fa   : > { %v2449_v40 = vsel %vm11779_vm8, %v2444_v28, %v2448_v35  ;;  %v2454_v63 = vrot.slane %v2453_v8, 4  ;;  %v2435_v26 = vsel %vm11779_vm8, %v2430_v48, %v2434_v14  ;;  %v2470_v1 = vshll.u32 %v12293_v37, 16  ;;  %v12391_v14 = vld [vmem:[#allocation2 + $0xa0] sm:$0xf]  ;;  %15348 = vst [vmem:[#allocation49_spill] sm:$0xff] %v12395_v32 }
 0x2fb   : > { %9640 = vmatprep.mubr.msk.bf16.mxu1 %vm1735_vm5, %v8715_v22  ;;  %v8742_v6 = vcombine.low %v2425_v29, %v2435_v26  ;;  %v2476_v28 = vrot.slane %v2474_v38, 4  ;;  %v2480_v8 = vshll.u32 %v12372_v57, 16  ;;  %15347 = vst [vmem:[#allocation48_spill] sm:$0xff] %v12391_v14  ;;  %v2467_v22 = vor.u32 %v2466_v62, %v2463_v58 }
 0x2fc   : > { %v2459_v35 = vsel %vm11779_vm8, %v2454_v63, %v2458_v18  ;;  %v2472_v16 = vrot.slane %v2470_v1, 5  ;;  %v2487_v17 = vrot.slane %v2485_v60, 4  ;;  %v2490_v38 = vrot.slane %v2488_v61, 5  ;;  %v12407_v1 = vld [vmem:[#allocation2 + $0xa8] sm:$0xf] }
 0x2fd   : > { %v8743_v48 = vcombine.low %v2449_v40, %v2459_v35  ;;  %9663 = vmatmul.mubr.msk.bf16.gmra.mrb[44].mxu0 %vm1735_vm5, %v8742_v6  ;;  %v2482_v63 = vrot.slane %v2480_v8, 5  ;;  %v2494_v29 = vshll.u32 %v12311_v0, 16  ;;  %v15349_v18 = vshrl.u32 %v12311_v0, 16  ;;  %v12409_v6 = vld [vmem:[#allocation2 + $0xac] sm:$0xf] }
 0x2fe   : > { %v2468_v40 = vrot.slane %v2467_v22, 4  ;;  %v2477_v58 = vor.u32 %v2476_v28, %v2472_v16  ;;  %v2504_v62 = vshll.u32 %v12389_v33, 16  ;;  %v8716_v60 = vcombine.low %v12395_v32, %v12391_v14 }
 0x2ff   : > { %v2500_v26 = vrot.slane %v15349_v18, 4  ;;  %9666 = vmatprep.mubr.msk.bf16.mxu0 %vm1735_vm5, %v8743_v48  ;;  %v2491_v35 = vor.u32 %v2490_v38, %v2487_v17  ;;  %v2496_v61 = vrot.slane %v2494_v29, 5  ;;  %v2557_v8 = vshrl.u32 %v12395_v32, 16  ;;  %v12420_v38 = vld [vmem:[#allocation2 + $0x8c] sm:$0x1] }
 0x300   : > { %v2473_v48 = vsel %vm11779_vm8, %v2468_v40, %v2472_v16  ;;  %v2478_v22 = vrot.slane %v2477_v58, 4  ;;  %v2506_v28 = vrot.slane %v2504_v62, 5  ;;  %v2570_v18 = vshrl.u32 %v12391_v14, 16  ;;  %15350 = vst [vmem:[#allocation50_spill] sm:$0xff] %v12420_v38  ;;  %v12433_v16 = vld [vmem:[#allocation2 + $0x98] sm:$0x1] }
 0x301   : > { %9641 = vmatmul.mubr.msk.bf16.gmra.mrb[24].mxu1 %vm1735_vm5, %v8716_v60  ;;  %v2492_v33 = vrot.slane %v2491_v35, 4  ;;  %v2501_v13 = vor.u32 %v2500_v26, %v2496_v61  ;;  %v8717_v57 = vcombine.low %v12407_v1, %v12409_v6  ;;  %v2581_v17 = vshrl.u32 %v12407_v1, 16  ;;  %15352 = vst [vmem:[#allocation51_spill] sm:$0xff] %v12433_v16 }
 0x302   : > { %v2483_v29 = vsel %vm11779_vm8, %v2478_v22, %v2482_v63  ;;  %v2511_v58 = vrot.slane %v2509_v10, 4  ;;  %v15351_v35 = vshll.u32 %v12349_v45, 16  ;;  %v2518_v37 = vshll.u32 %v12351_v42, 16 }
 0x303   : > { %v8744_v62 = vcombine.low %v2473_v48, %v2483_v29  ;;  %v2497_v60 = vsel %vm11779_vm8, %v2492_v33, %v2496_v61  ;;  %v2502_v26 = vrot.slane %v2501_v13, 4  ;;  %9644 = vmatprep.mubr.msk.bf16.mxu1 %vm1735_vm5, %v8717_v57  ;;  %v2524_v63 = vrot.slane %v2522_v12, 4  ;;  %v12441_v29 = vld [vmem:[#allocation2 + $0xb4] sm:$0xf] }
 0x304   : > { %v2514_v0 = vrot.slane %v15351_v35, 5  ;;  %v2528_v22 = vshll.u32 %v12420_v38, 16  ;;  %v2535_v10 = vrot.slane %v2533_v2, 4  ;;  %v15353_v57 = vshll.u32 %v12355_v55, 16  ;;  %15354 = vst [vmem:[#allocation52_spill] sm:$0xff] %v12441_v29 }
 0x305   : > { %9667 = vmatmul.mubr.msk.bf16.gmra.mrb[48].mxu0 %vm1735_vm5, %v8744_v62  ;;  %v2507_v13 = vsel %vm11779_vm8, %v2502_v26, %v2506_v28  ;;  %v2542_v48 = vshll.u32 %v12358_v25, 16  ;;  %v12443_v35 = vld [vmem:[#allocation2 + $0xb8] sm:$0xf]  ;;  %v2520_v40 = vrot.slane %v2518_v37, 5  ;;  %v15355_v2 = vshrl.u32 %v12358_v25, 16 }
 0x306   : > { %v2515_v33 = vor.u32 %v2514_v0, %v2511_v58  ;;  %v2538_v61 = vrot.slane %v15353_v57, 5  ;;  %v8745_v12 = vcombine.low %v2497_v60, %v2507_v13  ;;  %v2530_v38 = vrot.slane %v2528_v22, 5  ;;  %v12448_v28 = vld [vmem:[#allocation12 + $0xa] sm:$0x3]  ;;  %v10662_v26 = vld [vmem:[#allocation12 + $0x6] sm:$0x3] }
 0x307   : > { %v2548_v42 = vrot.slane %v15355_v2, 4  ;;  %v2544_v31 = vrot.slane %v2542_v48, 5  ;;  %v2552_v0 = vshll.u32 %v12433_v16, 16  ;;  %15356 = vst [vmem:[#allocation53_spill] sm:$0xff] %v12448_v28  ;;  %v2525_v58 = vor.u32 %v2524_v63, %v2520_v40 }
 0x308   : > { %v2516_v62 = vrot.slane %v2515_v33, 4  ;;  %v2539_v45 = vor.u32 %v2538_v61, %v2535_v10  ;;  %9670 = vmatprep.mubr.msk.bf16.mxu0 %vm1735_vm5, %v8745_v12  ;;  %v3658_v57 = vsel %vm1980_vm4, %v10662_v26, 0  ;;  %v8718_v37 = vcombine.low %v12441_v29, %v12443_v35  ;;  %v12457_v61 = vld [vmem:[#allocation2 + $0xa4] sm:$0x1] }
 0x309   : > { %v2605_v60 = vshrl.u32 %v12441_v29, 16  ;;  %v2549_v13 = vor.u32 %v2548_v42, %v2544_v31  ;;  %v2554_v33 = vrot.slane %v2552_v0, 5  ;;  %9717 = vmatpush3.bf16.msra.mxu0 %v3658_v57  ;;  %v2526_v48 = vrot.slane %v2525_v58, 4 }
 0x30a   : > { %v2521_v22 = vsel %vm11779_vm8, %v2516_v62, %v2520_v40  ;;  %v2540_v10 = vrot.slane %v2539_v45, 4  ;;  %9645 = vmatmul.mubr.msk.bf16.gmra.mrb[28].mxu1 %vm1735_vm5, %v8718_v37  ;;  %v2608_v63 = vshll.u32 %v12441_v29, 16  ;;  %v2618_v12 = vshrl.u32 %v12443_v35, 16  ;;  %9994 = vmatprep.subr.msk.bf16.mxu0 %vm1980_vm4, %v12448_v28  ;;  %v12472_v37 = vld [vmem:[#allocation2 + $0xb0] sm:$0x1] }
 0x30b   : > { %v2559_v2 = vrot.slane %v2557_v8, 4  ;;  %v2550_v45 = vrot.slane %v2549_v13, 4  ;;  %v15357_v42 = vshll.u32 %v12395_v32, 16  ;;  %v2566_v0 = vshll.u32 %v12391_v14, 16 }
 0x30c   : > { %v2545_v40 = vsel %vm11779_vm8, %v2540_v10, %v2544_v31  ;;  %v2531_v58 = vsel %vm11779_vm8, %v2526_v48, %v2530_v38  ;;  %v2572_v26 = vrot.slane %v2570_v18, 4  ;;  %v2576_v57 = vshll.u32 %v12457_v61, 16 }
 0x30d   : > { %v2562_v62 = vrot.slane %v15357_v42, 5  ;;  %v2583_v8 = vrot.slane %v2581_v17, 4  ;;  %v8746_v29 = vcombine.low %v2521_v22, %v2531_v58  ;;  %v2555_v28 = vsel %vm11779_vm8, %v2550_v45, %v2554_v33 }
 0x30e   : > { %v2568_v10 = vrot.slane %v2566_v0, 5  ;;  %v8747_v13 = vcombine.low %v2545_v40, %v2555_v28  ;;  %v2578_v32 = vrot.slane %v2576_v57, 5  ;;  %v15358_v42 = vshll.u32 %v12407_v1, 16  ;;  %v10663_v0 = vld [vmem:[#allocation2 + $0x8] sm:$0x1] }
 0x30f   : > { %v2563_v31 = vor.u32 %v2562_v62, %v2559_v2  ;;  %v2590_v16 = vshll.u32 %v12409_v6, 16  ;;  %9671 = vmatmul.mubr.msk.bf16.gmra.mrb[52].mxu0 %vm1735_vm5, %v8746_v29  ;;  %v15361_v22 = vshrl.u32 %v12409_v6, 16  ;;  %v2600_v28 = vshll.u32 %v12472_v37, 16 }
 0x310   : > { %v2586_v14 = vrot.slane %v15358_v42, 5  ;;  %v2573_v38 = vor.u32 %v2572_v26, %v2568_v10  ;;  %9674 = vmatprep.mubr.msk.bf16.mxu0 %vm1735_vm5, %v8747_v13  ;;  %v15362_v40 = vrot.slane %v11768_v24, 5  ;;  %v15363_v45 = vrot.slane %v11766_v23, 9 }
 0x311   : > { %v2564_v17 = vrot.slane %v2563_v31, 4  ;;  %v2596_v33 = vrot.slane %v15361_v22, 4  ;;  %v2592_v2 = vrot.slane %v2590_v16, 5  ;;  %v3010_v29 = vrot.slane %v10663_v0, 5 }
 0x312   : > { %v2587_v48 = vor.u32 %v2586_v14, %v2583_v8  ;;  %v3008_v62 = vsel %vm12481_vm12, %v15363_v45, %v15362_v40  ;;  %v2574_v26 = vrot.slane %v2573_v38, 4  ;;  %v2602_v57 = vrot.slane %v2600_v28, 5  ;;  %v12523_v40 = vld [vmem:[#allocation2 + $0x10] sm:$0xf] }
 0x313   : > { %v2569_v58 = vsel %vm11779_vm8, %v2564_v17, %v2568_v10  ;;  %v15364_v31 = vrot.slane %v12016_v53, 5  ;;  %v15365_v13 = vrot.slane %v12014_v52, 9  ;;  %v2597_v16 = vor.u32 %v2596_v33, %v2592_v2  ;;  %v12512_v17 = vld [vmem:[#allocation2 + $0xbc] sm:$0x1] }
 0x314   : > { %v2588_v24 = vrot.slane %v2587_v48, 4  ;;  %v3011_v23 = vsel %vm12481_vm12, %v11886_v27, %v3010_v29  ;;  %v3017_v8 = vrot.slane %v12147_v41, 5  ;;  %v2579_v10 = vsel %vm11779_vm8, %v2574_v26, %v2578_v32  ;;  %v12519_v41 = vld [vmem:[#allocation2 + $0xc] sm:$0xf] }
 0x315   : > { %v3015_v14 = vsel %vm12481_vm12, %v15365_v13, %v15364_v31  ;;  %v8783_v42 = vcombine.low %v3008_v62, %v3011_v23  ;;  %v4400_v53 = vsel %vm1980_vm4, %v12042_v21, 0  ;;  %v2607_v52 = vrot.slane %v2605_v60, 4  ;;  %v12530_v62 = vld [vmem:[#allocation12 + $0xc] sm:$0x3] }
 0x316   : > { %v8748_v38 = vcombine.low %v2569_v58, %v2579_v10  ;;  %v2593_v22 = vsel %vm11779_vm8, %v2588_v24, %v2592_v2  ;;  %v2598_v33 = vrot.slane %v2597_v16, 4  ;;  %v3018_v27 = vsel %vm12481_vm12, %v12067_v39, %v3017_v8  ;;  %v12542_v24 = vld [vmem:[#allocation2 + $0x18] sm:$0xf]  ;;  %v12551_v10 = vld [vmem:[#allocation2 + $0x1c] sm:$0xf] }
 0x317   : > { %9684 = vmatprep.mubr.msk.bf16.mxu1 %vm1735_vm5, %v8783_v42  ;;  %v8784_v32 = vcombine.low %v3015_v14, %v3018_v27  ;;  %v2610_v28 = vrot.slane %v2608_v63, 5  ;;  %v2614_v21 = vshll.u32 %v12443_v35, 16  ;;  %v2620_v48 = vrot.slane %v2618_v12, 4 }
 0x318   : > { %v2603_v60 = vsel %vm11779_vm8, %v2598_v33, %v2602_v57  ;;  %v2624_v2 = vshll.u32 %v12512_v17, 16  ;;  %v8769_v45 = vrot.slane %v12056_v3, 9  ;;  %v3021_v39 = vrot.slane %v12058_v20, 5  ;;  %9675 = vmatmul.mubr.msk.bf16.gmra.mrb[56].mxu0 %vm1735_vm5, %v8748_v38 }
 0x319   : > { %v8749_v0 = vcombine.low %v2593_v22, %v2603_v60  ;;  %9685 = vmatmul.mubr.msk.bf16.vlgmr.msra.gmra.mrb[32].mxu1 %vm1735_vm5, %v8784_v32  ;;  %v2611_v63 = vor.u32 %v2610_v28, %v2607_v52  ;;  %v2616_v12 = vrot.slane %v2614_v21, 5  ;;  %v3024_v29 = vrot.slane %v12152_v59, 5 }
 0x31a   : > { %9751 = vmatpush3.bf16.msra.mxu1 %v4400_v53  ;;  %v2626_v58 = vrot.slane %v2624_v2, 5  ;;  %v3022_v26 = vsel %vm12481_vm12, %v8769_v45, %v3021_v39  ;;  %v3023_v57 = vrot.slane %v3021_v39, 4  ;;  %v8863_v3 = vcombine.low %v12519_v41, %v12523_v40 }
 0x31b   : > { %9678 = vmatprep.mubr.msk.bf16.mxu0 %vm1735_vm5, %v8749_v0  ;;  %v2612_v20 = vrot.slane %v2611_v63, 4  ;;  %v2621_v31 = vor.u32 %v2620_v48, %v2616_v12  ;;  %v3918_v13 = vshrl.u32 %v12519_v41, 16  ;;  %v3921_v14 = vshll.u32 %v12519_v41, 16  ;;  %9995 = vmatprep.subr.msk.bf16.mxu1 %vm1980_vm4, %v12530_v62  ;;  %v12569_v48 = vld [vmem:[#allocation2 + $0x24] sm:$0xf] }
 0x31c   : > { %v3025_v59 = vsel %vm12481_vm12, %v3023_v57, %v3024_v29  ;;  %v3931_v16 = vshrl.u32 %v12523_v40, 16  ;;  %v8770_v23 = vrot.slane %v12118_v7, 9  ;;  %v3028_v8 = vrot.slane %v12108_v46, 5  ;;  %v12560_v7 = vld [vmem:[#allocation2 + $0x28] sm:$0xf] }
 0x31d   : > { %v2617_v42 = vsel %vm11779_vm8, %v2612_v20, %v2616_v12  ;;  %v2622_v53 = vrot.slane %v2621_v31, 4  ;;  %v8785_v52 = vcombine.low %v3022_v26, %v3025_v59  ;;  %v3031_v38 = vrot.slane %v12212_v11, 5  ;;  %v12579_v63 = vld [vmem:[#allocation2 + $0x34] sm:$0xf]  ;;  %v12587_v57 = vld [vmem:[#allocation2 + $0x30] sm:$0xf] }
 0x31e   : > { %v3029_v22 = vsel %vm12481_vm12, %v8770_v23, %v3028_v8  ;;  %v3030_v33 = vrot.slane %v3028_v8, 4  ;;  %v8771_v27 = vrot.slane %v12136_v47, 9  ;;  %v3035_v32 = vrot.slane %v12132_v44, 5  ;;  %v12594_v8 = vld [vmem:[#allocation2 + $0x40] sm:$0xf] }
 0x31f   : > { %v2627_v46 = vsel %vm11779_vm8, %v2622_v53, %v2626_v58  ;;  %9688 = vmatprep.mubr.msk.bf16.mxu1 %vm1735_vm5, %v8785_v52  ;;  %v3038_v28 = vrot.slane %v12219_v30, 5  ;;  %v8864_v11 = vcombine.low %v12542_v24, %v12551_v10  ;;  %v3942_v21 = vshrl.u32 %v12542_v24, 16  ;;  %v12803_v26 = vld [vmem:[#allocation2 + $0x14] sm:$0x1]  ;;  %v12881_v29 = vld [vmem:[#allocation2 + $0x2c] sm:$0x1] }
 0x320   : > { %v8750_v60 = vcombine.low %v2617_v42, %v2627_v46  ;;  %v3032_v44 = vsel %vm12481_vm12, %v3030_v33, %v3031_v38  ;;  %v3036_v47 = vsel %vm12481_vm12, %v8771_v27, %v3035_v32  ;;  %v3037_v2 = vrot.slane %v3035_v32, 4  ;;  %v12601_v38 = vld [vmem:[#allocation2 + $0x3c] sm:$0xf]  ;;  %v15375_v32 = vld [vmem:[#allocation50_spill] sm:$0xff] }
 0x321   : > { %v8786_v45 = vcombine.low %v3029_v22, %v3032_v44  ;;  %v3945_v39 = vshll.u32 %v12542_v24, 16  ;;  %v3955_v30 = vshrl.u32 %v12551_v10, 16  ;;  %v8865_v0 = vcombine.low %v12569_v48, %v12560_v7  ;;  %v15378_v22 = vld [vmem:[#allocation48_spill] sm:$0xff] }
 0x322   : > { %9679 = vmatmul.mubr.msk.bf16.gmra.mrb[60].mxu0 %vm1735_vm5, %v8750_v60  ;;  %v3039_v12 = vsel %vm12481_vm12, %v3037_v2, %v3038_v28  ;;  %v8772_v31 = vrot.slane %v12161_v54, 9  ;;  %v3042_v59 = vrot.slane %v12163_v56, 5  ;;  %v3045_v23 = vrot.slane %v12270_v51, 5  ;;  %v12618_v60 = vld [vmem:[#allocation2 + $0x4c] sm:$0xf] }
 0x323   : > { %9718 = vmatprep.mubr.msk.bf16.mxu0 %vm1735_vm5, %v8863_v3  ;;  %9689 = vmatmul.mubr.msk.bf16.gmra.mrb[36].mxu1 %vm1735_vm5, %v8786_v45  ;;  %v8787_v20 = vcombine.low %v3036_v47, %v3039_v12  ;;  %v8773_v42 = vrot.slane %v12196_v5, 9  ;;  %v3049_v53 = vrot.slane %v12198_v50, 5  ;;  %v3052_v52 = vrot.slane %v12289_v36, 5  ;;  %v12624_v12 = vld [vmem:[#allocation2 + $0x48] sm:$0xf] }
 0x324   : > { %v8866_v3 = vcombine.low %v12587_v57, %v12579_v63  ;;  %v3043_v54 = vsel %vm12481_vm12, %v8772_v31, %v3042_v59  ;;  %v3044_v56 = vrot.slane %v3042_v59, 4  ;;  %v8867_v33 = vcombine.low %v12601_v38, %v12594_v8 }
 0x325   : > { %9692 = vmatprep.mubr.msk.bf16.mxu1 %vm1735_vm5, %v8787_v20  ;;  %v3050_v5 = vsel %vm12481_vm12, %v8773_v42, %v3049_v53  ;;  %v3051_v50 = vrot.slane %v3049_v53, 4  ;;  %v8774_v2 = vrot.slane %v12235_v19, 9  ;;  %v3056_v45 = vrot.slane %v12227_v15, 5  ;;  %v12626_v20 = vld [vmem:[#allocation2 + $0x54] sm:$0xf] }
 0x326   : > { %v3046_v27 = vsel %vm12481_vm12, %v3044_v56, %v3045_v23  ;;  %v3059_v59 = vrot.slane %v12322_v9, 5  ;;  %v8775_v23 = vrot.slane %v12249_v4, 9  ;;  %v3063_v42 = vrot.slane %v12243_v49, 5  ;;  %v12631_v53 = vld [vmem:[#allocation2 + $0x58] sm:$0xf] }
 0x327   : > { %v8788_v44 = vcombine.low %v3043_v54, %v3046_v27  ;;  %v3053_v47 = vsel %vm12481_vm12, %v3051_v50, %v3052_v52  ;;  %v3057_v19 = vsel %vm12481_vm12, %v8774_v2, %v3056_v45  ;;  %v3058_v52 = vrot.slane %v3056_v45, 4  ;;  %v12652_v50 = vld [vmem:[#allocation2 + $0x64] sm:$0xf]  ;;  %v12658_v45 = vld [vmem:[#allocation2 + $0x60] sm:$0xf]  ;;  %v15368_v56 = vld [vmem:[#allocation46_spill] sm:$0xff] }
 0x328   : > { %v8789_v31 = vcombine.low %v3050_v5, %v3053_v47  ;;  %v3066_v15 = vrot.slane %v12339_v34, 5  ;;  %v8868_v54 = vcombine.low %v12624_v12, %v12618_v60  ;;  %v3064_v49 = vsel %vm12481_vm12, %v8775_v23, %v3063_v42  ;;  %v12663_v5 = vld [vmem:[#allocation2 + $0x70] sm:$0xf]  ;;  %v15370_v9 = vld [vmem:[#allocation42_spill] sm:$0xff]  ;;  %v12670_v47 = vld [vmem:[#allocation2 + $0x6c] sm:$0xf] }
 0x329   : > { %v3065_v4 = vrot.slane %v3063_v42, 4  ;;  %v3060_v34 = vsel %vm12481_vm12, %v3058_v52, %v3059_v59  ;;  %v15366_v59 = vld [vmem:[#allocation40_spill] sm:$0xff]  ;;  %v15367_v42 = vld [vmem:[#allocation41_spill] sm:$0xff]  ;;  %v8870_v2 = vcombine.low %v12658_v45, %v12652_v50  ;;  %v3087_v36 = vrot.slane %v15375_v32, 5 }
 0x32a   : > { %9719 = vmatmul.mubr.msk.bf16.vlgmr.msra.gmra.mrb[64].mxu0 %vm1735_vm5, %v8864_v11  ;;  %v8790_v27 = vcombine.low %v3057_v19, %v3060_v34  ;;  %v8776_v23 = vrot.slane %v15366_v59, 9  ;;  %v3070_v52 = vrot.slane %v15367_v42, 5  ;;  %v3073_v11 = vrot.slane %v15368_v56, 5  ;;  %15369 = vst [vmem:[#allocation40_spill] sm:$0xff] %v12663_v5  ;;  %v15371_v34 = vld [vmem:[#allocation43_spill] sm:$0xff] }
 0x32b   : > { %9722 = vmatprep.mubr.msk.bf16.mxu0 %vm1735_vm5, %v8865_v0  ;;  %9693 = vmatmul.mubr.msk.bf16.gmra.mrb[40].mxu1 %vm1735_vm5, %v8788_v44  ;;  %v8869_v0 = vcombine.low %v12626_v20, %v12631_v53  ;;  %v3067_v44 = vsel %vm12481_vm12, %v3065_v4, %v3066_v15  ;;  %v8777_v19 = vrot.slane %v15370_v9, 9  ;;  %v3077_v28 = vrot.slane %v15371_v34, 5  ;;  %v15372_v15 = vld [vmem:[#allocation47_spill] sm:$0xff]  ;;  %v12701_v56 = vld [vmem:[#allocation2 + $0x78] sm:$0xf] }
 0x32c   : > { %9696 = vmatprep.mubr.msk.bf16.mxu1 %vm1735_vm5, %v8789_v31  ;;  %v8791_v31 = vcombine.low %v3064_v49, %v3067_v44  ;;  %v3080_v4 = vrot.slane %v15372_v15, 5  ;;  %v3071_v49 = vsel %vm12481_vm12, %v8776_v23, %v3070_v52  ;;  %v3072_v44 = vrot.slane %v3070_v52, 4  ;;  %v15374_v52 = vld [vmem:[#allocation45_spill] sm:$0xff] }
 0x32d   : > { %v3078_v9 = vsel %vm12481_vm12, %v8777_v19, %v3077_v28  ;;  %v3079_v42 = vrot.slane %v3077_v28, 4  ;;  %v8871_v15 = vcombine.low %v12670_v47, %v12663_v5  ;;  %v12690_v28 = vld [vmem:[#allocation2 + $0x7c] sm:$0xf]  ;;  %v3084_v59 = vrot.slane %v15374_v52, 5  ;;  %v12703_v19 = vld [vmem:[#allocation2 + $0x84] sm:$0xf] }
 0x32e   : > { %v3074_v23 = vsel %vm12481_vm12, %v3072_v44, %v3073_v11  ;;  %v15373_v11 = vld [vmem:[#allocation44_spill] sm:$0xff]  ;;  %v3098_v51 = vrot.slane %v15378_v22, 5  ;;  %v3937_v58 = vshll.u32 %v12803_v26, 16  ;;  %v15382_v5 = vshrl.u32 %v12569_v48, 16 }
 0x32f   : > { %v8792_v34 = vcombine.low %v3071_v49, %v3074_v23  ;;  %v8778_v44 = vrot.slane %v15373_v11, 9  ;;  %v12709_v49 = vld [vmem:[#allocation2 + $0x88] sm:$0xf]  ;;  %v15376_v23 = vld [vmem:[#allocation51_spill] sm:$0xff] }
 0x330   : > { %v3094_v52 = vrot.slane %v15376_v23, 5  ;;  %v12732_v23 = vld [vmem:[#allocation2 + $0x94] sm:$0xf] }
 0x332   : > { %9723 = vmatmul.mubr.msk.bf16.gmra.mrb[68].mxu0 %vm1735_vm5, %v8866_v3  ;;  %v3081_v3 = vsel %vm12481_vm12, %v3079_v42, %v3080_v4  ;;  %v12713_v4 = vsel %vm12481_vm12, %v8778_v44, %v3084_v59  ;;  %v3086_v42 = vrot.slane %v3084_v59, 4 }
 0x333   : > { %9726 = vmatprep.mubr.msk.bf16.mxu0 %vm1735_vm5, %v8867_v33  ;;  %9697 = vmatmul.mubr.msk.bf16.gmra.mrb[44].mxu1 %vm1735_vm5, %v8790_v27  ;;  %v8793_v46 = vcombine.low %v3078_v9, %v3081_v3  ;;  %v8779_v33 = vrot.slane %v12355_v55, 9  ;;  %v3091_v27 = vrot.slane %v12358_v25, 5  ;;  %v15377_v55 = vld [vmem:[#allocation49_spill] sm:$0xff]  ;;  %v3101_v3 = vrot.slane %v12457_v61, 5  ;;  %v12781_v25 = vld [vmem:[#allocation2 + $0xa8] sm:$0xf] }
 0x334   : > { %9700 = vmatprep.mubr.msk.bf16.mxu1 %vm1735_vm5, %v8791_v31  ;;  %v12726_v9 = vsel %vm12481_vm12, %v3086_v42, %v3087_v36  ;;  %v12742_v42 = vld [vmem:[#allocation2 + $0x90] sm:$0xf]  ;;  %v8780_v44 = vrot.slane %v15377_v55, 9  ;;  %v12760_v36 = vld [vmem:[#allocation2 + $0x9c] sm:$0xf] }
 0x335   : > { %v12720_v31 = vsel %vm12481_vm12, %v8779_v33, %v3091_v27  ;;  %v3093_v32 = vrot.slane %v3091_v27, 4  ;;  %v8794_v33 = vcombine.low %v12713_v4, %v12726_v9  ;;  %v12749_v4 = vld [vmem:[#allocation2 + $0xa0] sm:$0xf]  ;;  %v3108_v9 = vrot.slane %v12472_v37, 5 }
 0x336   : > { %v12769_v61 = vsel %vm12481_vm12, %v8780_v44, %v3098_v51  ;;  %v12783_v44 = vld [vmem:[#allocation2 + $0xac] sm:$0xf]  ;;  %v12849_v37 = vld [vmem:[#allocation2 + $0x20] sm:$0x1] }
 0x337   : > { %v12738_v27 = vsel %vm12481_vm12, %v3093_v32, %v3094_v52  ;;  %v8781_v52 = vrot.slane %v12407_v1, 9  ;;  %v3105_v32 = vrot.slane %v12409_v6, 5  ;;  %v3100_v1 = vrot.slane %v3098_v51, 4 }
 0x338   : > { %v8795_v59 = vcombine.low %v12720_v31, %v12738_v27  ;;  %v3957_v31 = vrot.slane %v3955_v30, 4 }
 0x339   : > { %v12776_v22 = vsel %vm12481_vm12, %v8781_v52, %v3105_v32  ;;  %v12787_v51 = vsel %vm12481_vm12, %v3100_v1, %v3101_v3  ;;  %v15381_v3 = vld [vmem:[#allocation52_spill] sm:$0xff]  ;;  %v3112_v52 = vrot.slane %v12443_v35, 5 }
 0x33a   : > { %9727 = vmatmul.mubr.msk.bf16.gmra.mrb[72].mxu0 %vm1735_vm5, %v8868_v54  ;;  %v3107_v54 = vrot.slane %v3105_v32, 4  ;;  %v12792_v32 = vld [vmem:[#allocation12 + $0xe] sm:$0x3]  ;;  %v8782_v1 = vrot.slane %v15381_v3, 9  ;;  %v3951_v3 = vshll.u32 %v12551_v10, 16 }
 0x33b   : > { %9730 = vmatprep.mubr.msk.bf16.mxu0 %vm1735_vm5, %v8869_v0  ;;  %9701 = vmatmul.mubr.msk.bf16.gmra.mrb[48].mxu1 %vm1735_vm5, %v8792_v34  ;;  %15379 = vst [vmem:[#allocation41_spill] sm:$0xff] %v12792_v32  ;;  %v15380_v34 = vld [vmem:[#allocation53_spill] sm:$0xff]  ;;  %v3923_v0 = vrot.slane %v3921_v14, 5 }
 0x33c   : > { %9704 = vmatprep.mubr.msk.bf16.mxu1 %vm1735_vm5, %v8793_v46  ;;  %v12798_v6 = vsel %vm12481_vm12, %v3107_v54, %v3108_v9  ;;  %v4886_v55 = vsel %vm1980_vm4, %v15380_v34, 0  ;;  %v3115_v46 = vrot.slane %v12512_v17, 5  ;;  %v12811_v9 = vld [vmem:[#allocation2 + $0xb4] sm:$0xf]  ;;  %v12813_v54 = vld [vmem:[#allocation2 + $0xb8] sm:$0xf]  ;;  %v12824_v35 = vsel %vm12481_vm12, %v8782_v1, %v3112_v52 }
 0x33d   : > { %9785 = vmatpush3.bf16.msra.mxu0 %v4886_v55  ;;  %v3920_v55 = vrot.slane %v3918_v13, 4  ;;  %v3114_v17 = vrot.slane %v3112_v52, 4  ;;  %v3927_v34 = vshll.u32 %v12523_v40, 16  ;;  %v3933_v13 = vrot.slane %v3931_v16, 4  ;;  %v12851_v1 = vld [vmem:[#allocation2 + $0xc4] sm:$0xf] }
 0x33e   : > { %9996 = vmatprep.subr.msk.bf16.mxu0 %vm1980_vm4, %v12792_v32  ;;  %v12865_v52 = vld [vmem:[#allocation2 + $0xc0] sm:$0xf] }
 0x33f   : > { %v12846_v14 = vsel %vm12481_vm12, %v3114_v17, %v3115_v46  ;;  %v3929_v16 = vrot.slane %v3927_v34, 5  ;;  %v3947_v17 = vrot.slane %v3945_v39, 5 }
 0x342   : > { %9731 = vmatmul.mubr.msk.bf16.gmra.mrb[76].mxu0 %vm1735_vm5, %v8870_v2  ;;  %v3924_v2 = vor.u32 %v3923_v0, %v3920_v55  ;;  %v3944_v0 = vrot.slane %v3942_v21, 4  ;;  %v3934_v55 = vor.u32 %v3933_v13, %v3929_v16 }
 0x343   : > { %9734 = vmatprep.mubr.msk.bf16.mxu0 %vm1735_vm5, %v8871_v15  ;;  %9705 = vmatmul.mubr.msk.bf16.gmra.mrb[52].mxu1 %vm1735_vm5, %v8794_v33  ;;  %v3939_v33 = vrot.slane %v3937_v58, 5  ;;  %v12872_v58 = vsel %vm1980_vm4, %v12530_v62, 0 }
 0x344   : > { %9708 = vmatprep.mubr.msk.bf16.mxu1 %vm1735_vm5, %v8795_v59  ;;  %v3925_v34 = vrot.slane %v3924_v2, 4  ;;  %v3961_v59 = vshll.u32 %v12849_v37, 16  ;;  %v3935_v39 = vrot.slane %v3934_v55, 4  ;;  %v3948_v13 = vor.u32 %v3947_v17, %v3944_v0 }
 0x345   : > { %v3953_v2 = vrot.slane %v3951_v3, 5  ;;  %v15383_v3 = vcombine.low %v12701_v56, %v12690_v28  ;;  %v3975_v17 = vshll.u32 %v12560_v7, 16 }
 0x346   : > { %v3930_v27 = vsel %vm11779_vm8, %v3925_v34, %v3929_v16  ;;  %v3963_v46 = vrot.slane %v3961_v59, 5  ;;  %v3940_v62 = vsel %vm11779_vm8, %v3935_v39, %v3939_v33  ;;  %v3949_v32 = vrot.slane %v3948_v13, 4 }
 0x347   : > { %v3958_v21 = vor.u32 %v3957_v31, %v3953_v2  ;;  %v3968_v16 = vrot.slane %v15382_v5, 4  ;;  %v8895_v0 = vcombine.low %v3930_v27, %v3940_v62  ;;  %v15384_v34 = vshll.u32 %v12569_v48, 16 }
 0x348   : > { %v15385_v59 = vshrl.u32 %v12560_v7, 16  ;;  %v15386_v33 = vcombine.low %v12703_v19, %v12709_v49  ;;  %v15387_v5 = vcombine.low %v12769_v61, %v12787_v51  ;;  %v3954_v31 = vsel %vm11779_vm8, %v3949_v32, %v3953_v2 }
 0x349   : > { %v3971_v55 = vrot.slane %v15384_v34, 5  ;;  %v3959_v27 = vrot.slane %v3958_v21, 4  ;;  %v3985_v39 = vshll.u32 %v12881_v29, 16  ;;  %v8927_v13 = vrot.slane %v12519_v41, 9  ;;  %v12916_v21 = vld [vmem:[#allocation2 + $0x38] sm:$0x1] }
 0x34a   : > { %9735 = vmatmul.mubr.msk.bf16.gmra.mrb[80].mxu0 %vm1735_vm5, %v15383_v3  ;;  %v3981_v11 = vrot.slane %v15385_v59, 4  ;;  %v15388_v62 = vcombine.low %v12776_v22, %v12798_v6  ;;  %v3977_v34 = vrot.slane %v3975_v17, 5  ;;  %v4677_v59 = vrot.slane %v12523_v40, 5 }
 0x34b   : > { %9738 = vmatprep.mubr.msk.bf16.mxu0 %vm1735_vm5, %v15386_v33  ;;  %9709 = vmatmul.mubr.msk.bf16.gmra.mrb[56].mxu1 %vm1735_vm5, %v15387_v5  ;;  %v3972_v3 = vor.u32 %v3971_v55, %v3968_v16  ;;  %v4680_v61 = vrot.slane %v12803_v26, 5  ;;  %v3964_v51 = vsel %vm11779_vm8, %v3959_v27, %v3963_v46  ;;  %v3987_v32 = vrot.slane %v3985_v39, 5 }
 0x34c   : > { %9712 = vmatprep.mubr.msk.bf16.mxu1 %vm1735_vm5, %v15388_v62  ;;  %v15389_v2 = vshrl.u32 %v12587_v57, 16  ;;  %v15390_v33 = vshll.u32 %v12587_v57, 16  ;;  %v8896_v22 = vcombine.low %v3954_v31, %v3964_v51  ;;  %v3982_v16 = vor.u32 %v3981_v11, %v3977_v34  ;;  %v12938_v51 = vld [vmem:[#allocation2 + $0x44] sm:$0x1] }
 0x34d   : > { %v3973_v5 = vrot.slane %v3972_v3, 4  ;;  %v12924_v40 = vsel %vm12481_vm12, %v8927_v13, %v4677_v59  ;;  %v4679_v26 = vrot.slane %v4677_v59, 4  ;;  %v3999_v46 = vshll.u32 %v12579_v63, 16 }
 0x34e   : > { %v3992_v41 = vrot.slane %v15389_v2, 4  ;;  %v3995_v6 = vrot.slane %v15390_v33, 5  ;;  %v15391_v17 = vshrl.u32 %v12579_v63, 16  ;;  %v3983_v62 = vrot.slane %v3982_v16, 4 }
 0x34f   : > { %v3978_v39 = vsel %vm11779_vm8, %v3973_v5, %v3977_v34  ;;  %v4009_v2 = vshll.u32 %v12916_v21, 16  ;;  %v15392_v31 = vshrl.u32 %v12601_v38, 16  ;;  %v12936_v13 = vsel %vm12481_vm12, %v4679_v26, %v4680_v61 }
 0x350   : > { %v3996_v55 = vor.u32 %v3995_v6, %v3992_v41  ;;  %v4005_v27 = vrot.slane %v15391_v17, 4  ;;  %v4001_v59 = vrot.slane %v3999_v46, 5  ;;  %v15393_v41 = vshll.u32 %v12601_v38, 16 }
 0x351   : > { %v4016_v11 = vrot.slane %v15392_v31, 4  ;;  %v15394_v34 = vcombine.low %v12742_v42, %v12732_v23  ;;  %v3988_v6 = vsel %vm11779_vm8, %v3983_v62, %v3987_v32  ;;  %v8943_v5 = vcombine.low %v12924_v40, %v12936_v13 }
 0x352   : > { %v3997_v3 = vrot.slane %v3996_v55, 4  ;;  %v4019_v33 = vrot.slane %v15393_v41, 5  ;;  %v4011_v61 = vrot.slane %v4009_v2, 5  ;;  %v4023_v16 = vshll.u32 %v12594_v8, 16 }
 0x353   : > { %9739 = vmatmul.mubr.msk.bf16.gmra.mrb[84].mxu0 %vm1735_vm5, %v15394_v34  ;;  %v15395_v26 = vcombine.low %v12760_v36, %v12749_v4  ;;  %v15396_v55 = vcombine.low %v12824_v35, %v12846_v14  ;;  %v8897_v46 = vcombine.low %v3978_v39, %v3988_v6  ;;  %v4006_v17 = vor.u32 %v4005_v27, %v4001_v59 }
 0x354   : > { %v4002_v32 = vsel %vm11779_vm8, %v3997_v3, %v4001_v59  ;;  %v15397_v62 = vshrl.u32 %v12594_v8, 16  ;;  %v4020_v31 = vor.u32 %v4019_v33, %v4016_v11  ;;  %v4025_v41 = vrot.slane %v4023_v16, 5 }
 0x355   : > { %9742 = vmatprep.mubr.msk.bf16.mxu0 %vm1735_vm5, %v15395_v26  ;;  %9713 = vmatmul.mubr.msk.bf16.gmra.mrb[60].mxu1 %vm1735_vm5, %v15396_v55  ;;  %v4033_v34 = vshll.u32 %v12938_v51, 16  ;;  %v8928_v26 = vrot.slane %v12542_v24, 9  ;;  %v4007_v30 = vrot.slane %v4006_v17, 4  ;;  %v4684_v35 = vrot.slane %v12551_v10, 5 }
 0x356   : > { %v4029_v2 = vrot.slane %v15397_v62, 4  ;;  %9752 = vmatprep.mubr.msk.bf16.mxu1 %vm1735_vm5, %v8895_v0  ;;  %v4687_v14 = vrot.slane %v12849_v37, 5  ;;  %v8929_v39 = vrot.slane %v12569_v48, 9  ;;  %v4021_v3 = vrot.slane %v4020_v31, 4 }
 0x357   : > { %v4035_v59 = vrot.slane %v4033_v34, 5  ;;  %v4691_v6 = vrot.slane %v12560_v7, 5  ;;  %v4012_v0 = vsel %vm11779_vm8, %v4007_v30, %v4011_v61  ;;  %v12974_v11 = vsel %vm12481_vm12, %v8928_v26, %v4684_v35  ;;  %v12983_v7 = vld [vmem:[#allocation2 + $0x50] sm:$0x1] }
 0x358   : > { %v4030_v27 = vor.u32 %v4029_v2, %v4025_v41  ;;  %v4686_v24 = vrot.slane %v4684_v35, 4  ;;  %v4694_v33 = vrot.slane %v12881_v29, 5  ;;  %v8898_v10 = vcombine.low %v4002_v32, %v4012_v0  ;;  %v13004_v35 = vld [vmem:[#allocation12 + $0x10] sm:$0x3] }
 0x359   : > { %v4026_v37 = vsel %vm11779_vm8, %v4021_v3, %v4025_v41  ;;  %v12981_v16 = vsel %vm12481_vm12, %v8929_v39, %v4691_v6  ;;  %v4693_v61 = vrot.slane %v4691_v6, 4  ;;  %v15398_v55 = vshrl.u32 %v12624_v12, 16  ;;  %v13016_v6 = vld [vmem:[#allocation2 + $0x5c] sm:$0x1] }
 0x35a   : > { %v4031_v48 = vrot.slane %v4030_v27, 4  ;;  %v12987_v30 = vsel %vm12481_vm12, %v4686_v24, %v4687_v14  ;;  %v15399_v29 = vshll.u32 %v12624_v12, 16  ;;  %v15400_v62 = vcombine.low %v12781_v25, %v12783_v44 }
 0x35b   : > { %v4040_v17 = vrot.slane %v15398_v55, 4  ;;  %v8944_v31 = vcombine.low %v12974_v11, %v12987_v30  ;;  %v4047_v41 = vshll.u32 %v12618_v60, 16  ;;  %v15401_v34 = vshrl.u32 %v12618_v60, 16 }
 0x35c   : > { %v4043_v32 = vrot.slane %v15399_v29, 5  ;;  %9743 = vmatmul.mubr.msk.bf16.gmra.mrb[88].mxu0 %vm1735_vm5, %v15400_v62  ;;  %v4036_v2 = vsel %vm11779_vm8, %v4031_v48, %v4035_v59  ;;  %v15402_v14 = vcombine.low %v12811_v9, %v12813_v54  ;;  %v13013_v3 = vsel %vm12481_vm12, %v4693_v61, %v4694_v33 }
 0x35d   : > { %v4053_v26 = vrot.slane %v15401_v34, 4  ;;  %9753 = vmatmul.mubr.msk.bf16.vlgmr.msra.gmra.mrb[64].mxu1 %vm1735_vm5, %v8896_v22  ;;  %v8899_v39 = vcombine.low %v4026_v37, %v4036_v2  ;;  %v4057_v59 = vshll.u32 %v12983_v7, 16  ;;  %v8945_v0 = vcombine.low %v12981_v16, %v13013_v3 }
 0x35e   : > { %9746 = vmatprep.mubr.msk.bf16.mxu0 %vm1735_vm5, %v15402_v14  ;;  %v4044_v27 = vor.u32 %v4043_v32, %v4040_v17  ;;  %9819 = vmatpush3.bf16.msra.mxu1 %v12872_v58  ;;  %v4049_v24 = vrot.slane %v4047_v41, 5  ;;  %v15403_v22 = vshrl.u32 %v12626_v20, 16  ;;  %v15404_v48 = vshll.u32 %v12626_v20, 16 }
 0x35f   : > { %9756 = vmatprep.mubr.msk.bf16.mxu1 %vm1735_vm5, %v8897_v46  ;;  %v4059_v55 = vrot.slane %v4057_v59, 5  ;;  %v4071_v17 = vshll.u32 %v12631_v53, 16  ;;  %v15405_v29 = vshrl.u32 %v12631_v53, 16  ;;  %9997 = vmatprep.subr.msk.bf16.mxu1 %vm1980_vm4, %v13004_v35  ;;  %v4081_v62 = vshll.u32 %v13016_v6, 16 }
 0x360   : > { %v4064_v37 = vrot.slane %v15403_v22, 4  ;;  %v4067_v33 = vrot.slane %v15404_v48, 5  ;;  %v4045_v61 = vrot.slane %v4044_v27, 4  ;;  %v4054_v58 = vor.u32 %v4053_v26, %v4049_v24 }
 0x361   : > { %v4077_v32 = vrot.slane %v15405_v29, 4  ;;  %v8930_v2 = vrot.slane %v12587_v57, 9  ;;  %v4073_v34 = vrot.slane %v4071_v17, 5  ;;  %v4698_v14 = vrot.slane %v12579_v63, 5 }
 0x362   : > { %v4068_v46 = vor.u32 %v4067_v33, %v4064_v37  ;;  %v4050_v41 = vsel %vm11779_vm8, %v4045_v61, %v4049_v24  ;;  %v4701_v27 = vrot.slane %v12916_v21, 5  ;;  %v4055_v59 = vrot.slane %v4054_v58, 4  ;;  %v13052_v33 = vld [vmem:[#allocation2 + $0x68] sm:$0x1] }
 0x363   : > { %v4083_v48 = vrot.slane %v4081_v62, 5  ;;  %v8931_v29 = vrot.slane %v12601_v38, 9  ;;  %v4078_v15 = vor.u32 %v4077_v32, %v4073_v34  ;;  %v13040_v26 = vsel %vm12481_vm12, %v8930_v2, %v4698_v14 }
 0x364   : > { %v4069_v22 = vrot.slane %v4068_v46, 4  ;;  %v4700_v37 = vrot.slane %v4698_v14, 4  ;;  %v4705_v57 = vrot.slane %v12594_v8, 5  ;;  %v15406_v24 = vcombine.low %v12865_v52, %v12851_v1 }
 0x365   : > { %v4060_v63 = vsel %vm11779_vm8, %v4055_v59, %v4059_v55  ;;  %v4708_v38 = vrot.slane %v12938_v51, 5  ;;  %v15407_v61 = vshrl.u32 %v12658_v45, 16  ;;  %9757 = vmatmul.mubr.msk.bf16.gmra.mrb[68].mxu1 %vm1735_vm5, %v8898_v10  ;;  %v4079_v32 = vrot.slane %v4078_v15, 4 }
 0x366   : > { %9747 = vmatmul.mubr.msk.bf16.gmra.mrb[92].mxu0 %vm1735_vm5, %v15406_v24  ;;  %v4074_v21 = vsel %vm11779_vm8, %v4069_v22, %v4073_v34  ;;  %v8900_v8 = vcombine.low %v4050_v41, %v4060_v63  ;;  %v13063_v55 = vsel %vm12481_vm12, %v4700_v37, %v4701_v27  ;;  %v13067_v51 = vsel %vm12481_vm12, %v8931_v29, %v4705_v57  ;;  %v13080_v41 = vld [vmem:[#allocation2 + $0x74] sm:$0x1]  ;;  %v15412_v24 = vld [vmem:[#allocation40_spill] sm:$0xff] }
 0x367   : > { %v4088_v17 = vrot.slane %v15407_v61, 4  ;;  %9786 = vmatprep.mubr.msk.bf16.mxu0 %vm1735_vm5, %v8943_v5  ;;  %9760 = vmatprep.mubr.msk.bf16.mxu1 %vm1735_vm5, %v8899_v39  ;;  %v8946_v58 = vcombine.low %v13040_v26, %v13063_v55  ;;  %v4707_v40 = vrot.slane %v4705_v57, 4  ;;  %v15408_v13 = vshll.u32 %v12658_v45, 16 }
 0x368   : > { %v4095_v10 = vshll.u32 %v12652_v50, 16  ;;  %v4084_v15 = vsel %vm11779_vm8, %v4079_v32, %v4083_v48  ;;  %v15409_v46 = vshrl.u32 %v12652_v50, 16  ;;  %v4105_v2 = vshll.u32 %v13052_v33, 16 }
 0x369   : > { %v4091_v5 = vrot.slane %v15408_v13, 5  ;;  %v15410_v39 = vshrl.u32 %v12670_v47, 16  ;;  %v8901_v14 = vcombine.low %v4074_v21, %v4084_v15  ;;  %v4709_v27 = vsel %vm12481_vm12, %v4707_v40, %v4708_v38 }
 0x36a   : > { %v4101_v62 = vrot.slane %v15409_v46, 4  ;;  %v4097_v22 = vrot.slane %v4095_v10, 5  ;;  %v8947_v29 = vcombine.low %v13067_v51, %v4709_v27  ;;  %v4107_v37 = vrot.slane %v4105_v2, 5 }
 0x36b   : > { %v4112_v34 = vrot.slane %v15410_v39, 4  ;;  %v4092_v59 = vor.u32 %v4091_v5, %v4088_v17  ;;  %v15411_v48 = vshll.u32 %v12670_v47, 16  ;;  %v4119_v63 = vshll.u32 %v15412_v24, 16 }
 0x36c   : > { %v4102_v32 = vor.u32 %v4101_v62, %v4097_v22  ;;  %v15413_v13 = vshrl.u32 %v15412_v24, 16  ;;  %v4129_v21 = vshll.u32 %v13080_v41, 16  ;;  %v8932_v38 = vrot.slane %v12624_v12, 9 }
 0x36d   : > { %v4115_v57 = vrot.slane %v15411_v48, 5  ;;  %v4093_v61 = vrot.slane %v4092_v59, 4  ;;  %v4121_v39 = vrot.slane %v4119_v63, 5  ;;  %v4712_v17 = vrot.slane %v12618_v60, 5  ;;  %9761 = vmatmul.mubr.msk.bf16.gmra.mrb[72].mxu1 %vm1735_vm5, %v8900_v8 }
 0x36e   : > { %v4125_v46 = vrot.slane %v15413_v13, 4  ;;  %9787 = vmatmul.mubr.msk.bf16.vlgmr.msra.gmra.mrb[96].mxu0 %vm1735_vm5, %v8944_v31  ;;  %v4103_v40 = vrot.slane %v4102_v32, 4  ;;  %v4131_v5 = vrot.slane %v4129_v21, 5  ;;  %v4715_v10 = vrot.slane %v12983_v7, 5  ;;  %9764 = vmatprep.mubr.msk.bf16.mxu1 %vm1735_vm5, %v8901_v14 }
 0x36f   : > { %v4116_v15 = vor.u32 %v4115_v57, %v4112_v34  ;;  %v4098_v51 = vsel %vm11779_vm8, %v4093_v61, %v4097_v22  ;;  %9790 = vmatprep.mubr.msk.bf16.mxu0 %vm1735_vm5, %v8945_v0  ;;  %v13109_v11 = vsel %vm12481_vm12, %v8932_v38, %v4712_v17  ;;  %v4714_v30 = vrot.slane %v4712_v17, 4  ;;  %v13121_v34 = vld [vmem:[#allocation2 + $0x80] sm:$0x1]  ;;  %v13135_v61 = vld [vmem:[#allocation2 + $0x8c] sm:$0x1] }
 0x370   : > { %v4126_v12 = vor.u32 %v4125_v46, %v4121_v39  ;;  %v4108_v31 = vsel %vm11779_vm8, %v4103_v40, %v4107_v37  ;;  %v8933_v7 = vrot.slane %v12626_v20, 9  ;;  %v4719_v16 = vrot.slane %v12631_v53, 5 }
 0x371   : > { %v4117_v60 = vrot.slane %v4116_v15, 4  ;;  %v4722_v3 = vrot.slane %v13016_v6, 5  ;;  %v8902_v0 = vcombine.low %v4098_v51, %v4108_v31  ;;  %v4716_v2 = vsel %vm12481_vm12, %v4714_v30, %v4715_v10 }
 0x372   : > { %v4127_v62 = vrot.slane %v4126_v12, 4  ;;  %v8948_v14 = vcombine.low %v13109_v11, %v4716_v2  ;;  %v4720_v27 = vsel %vm12481_vm12, %v8933_v7, %v4719_v16  ;;  %v4721_v20 = vrot.slane %v4719_v16, 4 }
 0x373   : > { %v4122_v8 = vsel %vm11779_vm8, %v4117_v60, %v4121_v39  ;;  %v15414_v53 = vshrl.u32 %v12701_v56, 16  ;;  %v15415_v22 = vshll.u32 %v12701_v56, 16  ;;  %v4143_v48 = vshll.u32 %v12690_v28, 16 }
 0x374   : > { %v4132_v6 = vsel %vm11779_vm8, %v4127_v62, %v4131_v5  ;;  %v15416_v57 = vshrl.u32 %v12690_v28, 16  ;;  %v4723_v13 = vsel %vm12481_vm12, %v4721_v20, %v4722_v3  ;;  %v4153_v46 = vshll.u32 %v13121_v34, 16 }
 0x375   : > { %v4136_v59 = vrot.slane %v15414_v53, 4  ;;  %v4139_v37 = vrot.slane %v15415_v22, 5  ;;  %v8903_v32 = vcombine.low %v4122_v8, %v4132_v6  ;;  %v15417_v21 = vshrl.u32 %v12703_v19, 16  ;;  %9765 = vmatmul.mubr.msk.bf16.gmra.mrb[76].mxu1 %vm1735_vm5, %v8902_v0 }
 0x376   : > { %v4149_v63 = vrot.slane %v15416_v57, 4  ;;  %v8949_v39 = vcombine.low %v4720_v27, %v4723_v13  ;;  %v4145_v17 = vrot.slane %v4143_v48, 5  ;;  %v15418_v51 = vshll.u32 %v12703_v19, 16  ;;  %9791 = vmatmul.mubr.msk.bf16.gmra.mrb[100].mxu0 %vm1735_vm5, %v8946_v58 }
 0x377   : > { %v4160_v15 = vrot.slane %v15417_v21, 4  ;;  %v4140_v38 = vor.u32 %v4139_v37, %v4136_v59  ;;  %v4155_v5 = vrot.slane %v4153_v46, 5  ;;  %v4167_v10 = vshll.u32 %v12709_v49, 16  ;;  %9794 = vmatprep.mubr.msk.bf16.mxu0 %vm1735_vm5, %v8947_v29  ;;  %9768 = vmatprep.mubr.msk.bf16.mxu1 %vm1735_vm5, %v8903_v32  ;;  %v13169_v59 = vld [vmem:[#allocation2 + $0x98] sm:$0x1] }
 0x378   : > { %v4163_v40 = vrot.slane %v15418_v51, 5  ;;  %v15419_v60 = vshrl.u32 %v12709_v49, 16  ;;  %v4177_v11 = vshll.u32 %v13135_v61, 16  ;;  %v4150_v31 = vor.u32 %v4149_v63, %v4145_v17 }
 0x379   : > { %v4141_v30 = vrot.slane %v4140_v38, 4  ;;  %v8934_v16 = vrot.slane %v12658_v45, 9  ;;  %v4169_v26 = vrot.slane %v4167_v10, 5  ;;  %v4726_v58 = vrot.slane %v12652_v50, 5 }
 0x37a   : > { %v4173_v12 = vrot.slane %v15419_v60, 4  ;;  %v4164_v7 = vor.u32 %v4163_v40, %v4160_v15  ;;  %v4179_v55 = vrot.slane %v4177_v11, 5  ;;  %v4729_v3 = vrot.slane %v13052_v33, 5 }
 0x37b   : > { %v4146_v8 = vsel %vm11779_vm8, %v4141_v30, %v4145_v17  ;;  %v4151_v62 = vrot.slane %v4150_v31, 4  ;;  %v8935_v0 = vrot.slane %v12670_v47, 9  ;;  %v4727_v27 = vsel %vm12481_vm12, %v8934_v16, %v4726_v58  ;;  %v13186_v17 = vld [vmem:[#allocation2 + $0xa4] sm:$0x1] }
 0x37c   : > { %v4165_v29 = vrot.slane %v4164_v7, 4  ;;  %v4174_v2 = vor.u32 %v4173_v12, %v4169_v26  ;;  %v4728_v45 = vrot.slane %v4726_v58, 4  ;;  %v4733_v20 = vrot.slane %v15412_v24, 5 }
 0x37d   : > { %v4156_v53 = vsel %vm11779_vm8, %v4151_v62, %v4155_v5  ;;  %v4736_v33 = vrot.slane %v13080_v41, 5  ;;  %v15420_v6 = vshrl.u32 %v12742_v42, 16  ;;  %v15421_v32 = vshll.u32 %v12742_v42, 16 }
 0x37e   : > { %v4170_v50 = vsel %vm11779_vm8, %v4165_v29, %v4169_v26  ;;  %v8904_v22 = vcombine.low %v4146_v8, %v4156_v53  ;;  %v4175_v37 = vrot.slane %v4174_v2, 4  ;;  %v4730_v48 = vsel %vm12481_vm12, %v4728_v45, %v4729_v3  ;;  %9795 = vmatmul.mubr.msk.bf16.gmra.mrb[104].mxu0 %vm1735_vm5, %v8948_v14 }
 0x37f   : > { %v4184_v47 = vrot.slane %v15420_v6, 4  ;;  %v4734_v24 = vsel %vm12481_vm12, %v8935_v0, %v4733_v20  ;;  %v8950_v57 = vcombine.low %v4727_v27, %v4730_v48  ;;  %v4735_v63 = vrot.slane %v4733_v20, 4  ;;  %9798 = vmatprep.mubr.msk.bf16.mxu0 %vm1735_vm5, %v8949_v39 }
 0x380   : > { %v4187_v13 = vrot.slane %v15421_v32, 5  ;;  %v4191_v41 = vshll.u32 %v12732_v23, 16  ;;  %v4180_v46 = vsel %vm11779_vm8, %v4175_v37, %v4179_v55  ;;  %v15422_v21 = vshrl.u32 %v12732_v23, 16  ;;  %9769 = vmatmul.mubr.msk.bf16.gmra.mrb[80].mxu1 %vm1735_vm5, %v8904_v22 }
 0x381   : > { %v4201_v38 = vshll.u32 %v13169_v59, 16  ;;  %v15423_v51 = vshrl.u32 %v12760_v36, 16  ;;  %v8905_v5 = vcombine.low %v4170_v50, %v4180_v46  ;;  %v4737_v14 = vsel %vm12481_vm12, %v4735_v63, %v4736_v33 }
 0x382   : > { %v4197_v15 = vrot.slane %v15422_v21, 4  ;;  %v4188_v10 = vor.u32 %v4187_v13, %v4184_v47  ;;  %v4193_v60 = vrot.slane %v4191_v41, 5  ;;  %v8951_v12 = vcombine.low %v4734_v24, %v4737_v14  ;;  %v13218_v24 = vld [vmem:[#allocation2 + $0xb0] sm:$0x1] }
 0x383   : > { %v4208_v40 = vrot.slane %v15423_v51, 4  ;;  %v4203_v11 = vrot.slane %v4201_v38, 5  ;;  %v15424_v30 = vshll.u32 %v12760_v36, 16  ;;  %v4215_v7 = vshll.u32 %v12749_v4, 16  ;;  %9772 = vmatprep.mubr.msk.bf16.mxu1 %vm1735_vm5, %v8905_v5  ;;  %v13233_v38 = vld [vmem:[#allocation2 + $0xbc] sm:$0x1] }
 0x384   : > { %v4189_v16 = vrot.slane %v4188_v10, 4  ;;  %v4198_v26 = vor.u32 %v4197_v15, %v4193_v60  ;;  %v15425_v39 = vshrl.u32 %v12749_v4, 16  ;;  %v4225_v58 = vshll.u32 %v13186_v17, 16 }
 0x385   : > { %v4211_v31 = vrot.slane %v15424_v30, 5  ;;  %v4217_v8 = vrot.slane %v4215_v7, 5  ;;  %v8936_v62 = vrot.slane %v12701_v56, 9  ;;  %v4740_v29 = vrot.slane %v12690_v28, 5 }
 0x386   : > { %v4221_v55 = vrot.slane %v15425_v39, 4  ;;  %v4194_v0 = vsel %vm11779_vm8, %v4189_v16, %v4193_v60  ;;  %v4199_v2 = vrot.slane %v4198_v26, 4  ;;  %v4227_v27 = vrot.slane %v4225_v58, 5  ;;  %9799 = vmatmul.mubr.msk.bf16.gmra.mrb[108].mxu0 %vm1735_vm5, %v8950_v57 }
 0x387   : > { %v4212_v3 = vor.u32 %v4211_v31, %v4208_v40  ;;  %v4743_v45 = vrot.slane %v13121_v34, 5  ;;  %v4741_v50 = vsel %vm12481_vm12, %v8936_v62, %v4740_v29  ;;  %v4742_v33 = vrot.slane %v4740_v29, 4  ;;  %9802 = vmatprep.mubr.msk.bf16.mxu0 %vm1735_vm5, %v8951_v12 }
 0x388   : > { %v4222_v53 = vor.u32 %v4221_v55, %v4217_v8  ;;  %v4204_v6 = vsel %vm11779_vm8, %v4199_v2, %v4203_v11  ;;  %v8937_v56 = vrot.slane %v12703_v19, 9  ;;  %v4747_v28 = vrot.slane %v12709_v49, 5 }
 0x389   : > { %v4213_v20 = vrot.slane %v4212_v3, 4  ;;  %v4750_v47 = vrot.slane %v13135_v61, 5  ;;  %v8906_v22 = vcombine.low %v4194_v0, %v4204_v6  ;;  %v4744_v48 = vsel %vm12481_vm12, %v4742_v33, %v4743_v45  ;;  %v13250_v45 = vpop.f32.mrb[0].mxu1 }
 0x38a   : > { %v4223_v37 = vrot.slane %v4222_v53, 4  ;;  %v8952_v63 = vcombine.low %v4741_v50, %v4744_v48  ;;  %v4748_v19 = vsel %vm12481_vm12, %v8937_v56, %v4747_v28  ;;  %v4749_v49 = vrot.slane %v4747_v28, 4  ;;  %v13256_v6 = vpop.f32.mrb[1].mxu1  ;;  %v13271_v48 = vld [vmem:[#allocation2 + $0xc8] sm:$0x1] }
 0x38b   : > { %v4218_v34 = vsel %vm11779_vm8, %v4213_v20, %v4217_v8  ;;  %v15426_v61 = vshrl.u32 %v12781_v25, 16  ;;  %9773 = vmatmul.mubr.msk.bf16.gmra.mrb[84].mxu1 %vm1735_vm5, %v8906_v22  ;;  %v15427_v13 = vshll.u32 %v12781_v25, 16  ;;  %v4239_v46 = vshll.u32 %v12783_v44, 16  ;;  %v13262_v28 = vpop.f32.mrb[2].mxu1 }
 0x38c   : > { %v4228_v32 = vsel %vm11779_vm8, %v4223_v37, %v4227_v27  ;;  %v15428_v21 = vshrl.u32 %v12783_v44, 16  ;;  %v4751_v40 = vsel %vm12481_vm12, %v4749_v49, %v4750_v47  ;;  %v4249_v5 = vshll.u32 %v13218_v24, 16 }
 0x38d   : > { %v4232_v57 = vrot.slane %v15426_v61, 4  ;;  %v4235_v41 = vrot.slane %v15427_v13, 5  ;;  %v8907_v51 = vcombine.low %v4218_v34, %v4228_v32  ;;  %v15429_v14 = vshrl.u32 %v12811_v9, 16  ;;  %v15432_v34 = vld [vmem:[#allocation41_spill] sm:$0xff] }
 0x38e   : > { %v4245_v15 = vrot.slane %v15428_v21, 4  ;;  %v8953_v60 = vcombine.low %v4748_v19, %v4751_v40  ;;  %v4241_v11 = vrot.slane %v4239_v46, 5  ;;  %v15430_v30 = vshll.u32 %v12811_v9, 16  ;;  %9803 = vmatmul.mubr.msk.bf16.gmra.mrb[112].mxu0 %vm1735_vm5, %v8952_v63  ;;  %v13273_v63 = vpop.f32.mrb[3].mxu1  ;;  %v13283_v21 = vld [vmem:[#allocation2 + $0x18] sm:$0xf] }
 0x38f   : > { %v4256_v10 = vrot.slane %v15429_v14, 4  ;;  %v4236_v12 = vor.u32 %v4235_v41, %v4232_v57  ;;  %9776 = vmatprep.mubr.msk.bf16.mxu1 %vm1735_vm5, %v8907_v51  ;;  %v4251_v7 = vrot.slane %v4249_v5, 5  ;;  %v4263_v16 = vshll.u32 %v12813_v54, 16 }
 0x390   : > { %v4259_v31 = vrot.slane %v15430_v30, 5  ;;  %v15431_v26 = vshrl.u32 %v12813_v54, 16  ;;  %v4273_v55 = vshll.u32 %v13233_v38, 16  ;;  %v4246_v3 = vor.u32 %v4245_v15, %v4241_v11  ;;  %9806 = vmatprep.mubr.msk.bf16.mxu0 %vm1735_vm5, %v8953_v60 }
 0x391   : > { %v4237_v58 = vrot.slane %v4236_v12, 4  ;;  %v8938_v62 = vrot.slane %v12742_v42, 9  ;;  %v4265_v29 = vrot.slane %v4263_v16, 5  ;;  %v4754_v2 = vrot.slane %v12732_v23, 5 }
 0x392   : > { %v4269_v39 = vrot.slane %v15431_v26, 4  ;;  %v4260_v8 = vor.u32 %v4259_v31, %v4256_v10  ;;  %v4275_v0 = vrot.slane %v4273_v55, 5  ;;  %v4757_v27 = vrot.slane %v13169_v59, 5  ;;  %v13292_v10 = vld [vmem:[#allocation2 + $0x1c] sm:$0xf] }
 0x393   : > { %v4242_v20 = vsel %vm11779_vm8, %v4237_v58, %v4241_v11  ;;  %v4247_v53 = vrot.slane %v4246_v3, 4  ;;  %v8939_v33 = vrot.slane %v12760_v36, 9  ;;  %v4755_v23 = vsel %vm12481_vm12, %v8938_v62, %v4754_v2 }
 0x394   : > { %v4261_v50 = vrot.slane %v4260_v8, 4  ;;  %v4270_v42 = vor.u32 %v4269_v39, %v4265_v29  ;;  %v4756_v59 = vrot.slane %v4754_v2, 4  ;;  %v4761_v56 = vrot.slane %v12749_v4, 5  ;;  %v13304_v8 = vld [vmem:[#allocation2 + $0x28] sm:$0xf] }
 0x395   : > { %v4252_v47 = vsel %vm11779_vm8, %v4247_v53, %v4251_v7  ;;  %v4764_v36 = vrot.slane %v13186_v17, 5  ;;  %v6070_v37 = vsel %vm1980_vm4, %v15432_v34, 0  ;;  %v15433_v17 = vshrl.u32 %v12865_v52, 16 }
 0x396   : > { %v4266_v22 = vsel %vm11779_vm8, %v4261_v50, %v4265_v29  ;;  %v8908_v19 = vcombine.low %v4242_v20, %v4252_v47  ;;  %v4271_v49 = vrot.slane %v4270_v42, 4  ;;  %v4758_v4 = vsel %vm12481_vm12, %v4756_v59, %v4757_v27  ;;  %9853 = vmatpush3.bf16.msra.mxu0 %v6070_v37 }
 0x397   : > { %v4762_v61 = vsel %vm12481_vm12, %v8939_v33, %v4761_v56  ;;  %v8954_v57 = vcombine.low %v4755_v23, %v4758_v4  ;;  %v4763_v32 = vrot.slane %v4761_v56, 4  ;;  %v4280_v13 = vrot.slane %v15433_v17, 4 }
 0x398   : > { %v15434_v41 = vshll.u32 %v12865_v52, 16  ;;  %9777 = vmatmul.mubr.msk.bf16.gmra.mrb[88].mxu1 %vm1735_vm5, %v8908_v19  ;;  %v4276_v15 = vsel %vm11779_vm8, %v4271_v49, %v4275_v0  ;;  %v4287_v51 = vshll.u32 %v12851_v1, 16  ;;  %v15435_v40 = vshrl.u32 %v12851_v1, 16  ;;  %v13310_v0 = vld [vmem:[#allocation2 + $0x24] sm:$0xf] }
 0x399   : > { %v4297_v14 = vshll.u32 %v13271_v48, 16  ;;  %v8909_v60 = vcombine.low %v4266_v22, %v4276_v15  ;;  %v4765_v12 = vsel %vm12481_vm12, %v4763_v32, %v4764_v36  ;;  %v8940_v30 = vrot.slane %v12781_v25, 9  ;;  %9807 = vmatmul.mubr.msk.bf16.gmra.mrb[116].mxu0 %vm1735_vm5, %v8954_v57  ;;  %v13325_v22 = vld [vmem:[#allocation2 + $0x30] sm:$0xf] }
 0x39a   : > { %v4283_v46 = vrot.slane %v15434_v41, 5  ;;  %v4293_v5 = vrot.slane %v15435_v40, 4  ;;  %v8955_v31 = vcombine.low %v4762_v61, %v4765_v12  ;;  %v4289_v7 = vrot.slane %v4287_v51, 5  ;;  %v8977_v61 = vld [vmem:[#allocation2 + $0x20] sm:$0x1] }
 0x39b   : > { %v4299_v16 = vrot.slane %v4297_v14, 5  ;;  %v4768_v26 = vrot.slane %v12783_v44, 5  ;;  %9780 = vmatprep.mubr.msk.bf16.mxu1 %vm1735_vm5, %v8909_v60  ;;  %v4771_v55 = vrot.slane %v13218_v24, 5  ;;  %v9023_v58 = vcombine.low %v13283_v21, %v13292_v10  ;;  %v13345_v41 = vld [vmem:[#allocation2 + $0x3c] sm:$0xf] }
 0x39c   : > { %v4284_v11 = vor.u32 %v4283_v46, %v4280_v13  ;;  %v5588_v3 = vshrl.u32 %v13283_v21, 16  ;;  %9810 = vmatprep.mubr.msk.bf16.mxu0 %vm1735_vm5, %v8955_v31  ;;  %v4294_v25 = vor.u32 %v4293_v5, %v4289_v7  ;;  %v5591_v29 = vshll.u32 %v13283_v21, 16  ;;  %v13355_v21 = vld [vmem:[#allocation2 + $0x48] sm:$0xf]  ;;  %v13360_v14 = vld [vmem:[#allocation2 + $0x4c] sm:$0xf] }
 0x39d   : > { %v4769_v44 = vsel %vm12481_vm12, %v8940_v30, %v4768_v26  ;;  %v4770_v62 = vrot.slane %v4768_v26, 4  ;;  %v5601_v2 = vshrl.u32 %v13292_v10, 16  ;;  %v8941_v27 = vrot.slane %v12811_v9, 9  ;;  %v13327_v9 = vld [vmem:[#allocation2 + $0x34] sm:$0xf] }
 0x39e   : > { %v4285_v39 = vrot.slane %v4284_v11, 4  ;;  %v4775_v20 = vrot.slane %v12813_v54, 5  ;;  %v4295_v53 = vrot.slane %v4294_v25, 4  ;;  %v4778_v33 = vrot.slane %v13233_v38, 5  ;;  %v8980_v25 = vld [vmem:[#allocation2 + $0x2c] sm:$0x1] }
 0x39f   : > { %v4772_v50 = vsel %vm12481_vm12, %v4770_v62, %v4771_v55  ;;  %v9024_v42 = vcombine.low %v13310_v0, %v13304_v8  ;;  %v5612_v47 = vshrl.u32 %v13310_v0, 16  ;;  %v5615_v36 = vshll.u32 %v13310_v0, 16 }
 0x3a0   : > { %v4290_v24 = vsel %vm11779_vm8, %v4285_v39, %v4289_v7  ;;  %v8956_v23 = vcombine.low %v4769_v44, %v4772_v50  ;;  %v4776_v59 = vsel %vm12481_vm12, %v8941_v27, %v4775_v20  ;;  %v4777_v56 = vrot.slane %v4775_v20, 4  ;;  %v13368_v39 = vpop.f32.mrb[4].mxu1  ;;  %v8983_v27 = vld [vmem:[#allocation2 + $0x38] sm:$0x1] }
 0x3a1   : > { %v4300_v54 = vsel %vm11779_vm8, %v4295_v53, %v4299_v16  ;;  %v5625_v38 = vshrl.u32 %v13304_v8, 16  ;;  %v13335_v34 = vsel %vm1980_vm4, %v13004_v35, 0  ;;  %v8942_v49 = vrot.slane %v12865_v52, 9  ;;  %v13347_v35 = vld [vmem:[#allocation2 + $0x40] sm:$0xf]  ;;  %v13374_v44 = vpop.f32.mrb[5].mxu1 }
 0x3a2   : > { %v8910_v37 = vcombine.low %v4290_v24, %v4300_v54  ;;  %v4779_v19 = vsel %vm12481_vm12, %v4777_v56, %v4778_v33  ;;  %v4782_v4 = vrot.slane %v12851_v1, 5  ;;  %v4785_v32 = vrot.slane %v13271_v48, 5  ;;  %9811 = vmatmul.mubr.msk.bf16.gmra.mrb[120].mxu0 %vm1735_vm5, %v8956_v23  ;;  %v13378_v20 = vpop.f32.mrb[6].mxu1 }
 0x3a3   : > { %v8957_v57 = vcombine.low %v4776_v59, %v4779_v19  ;;  %v9025_v17 = vcombine.low %v13325_v22, %v13327_v9  ;;  %v5636_v13 = vshrl.u32 %v13325_v22, 16  ;;  %v5639_v46 = vshll.u32 %v13325_v22, 16  ;;  %v13381_v59 = vpop.f32.mrb[7].mxu1  ;;  %v13385_v19 = vld [vmem:[#allocation2 + $0x54] sm:$0xf] }
 0x3a4   : > { %9781 = vmatmul.mubr.msk.bf16.gmra.mrb[92].mxu1 %vm1735_vm5, %v8910_v37  ;;  %v4783_v1 = vsel %vm12481_vm12, %v8942_v49, %v4782_v4  ;;  %v4784_v52 = vrot.slane %v4782_v4, 4  ;;  %v5649_v48 = vshrl.u32 %v13327_v9, 16  ;;  %v5590_v15 = vrot.slane %v5588_v3, 4  ;;  %v13393_v4 = vld [vmem:[#allocation2 + $0x58] sm:$0xf] }
 0x3a5   : > { %9820 = vmatprep.mubr.msk.bf16.mxu1 %vm1735_vm5, %v9023_v58  ;;  %9814 = vmatprep.mubr.msk.bf16.mxu0 %vm1735_vm5, %v8957_v57  ;;  %v5593_v51 = vrot.slane %v5591_v29, 5  ;;  %v5597_v40 = vshll.u32 %v13292_v10, 16  ;;  %v5603_v5 = vrot.slane %v5601_v2, 4  ;;  %v5607_v12 = vshll.u32 %v8977_v61, 16 }
 0x3a6   : > { %v4786_v60 = vsel %vm12481_vm12, %v4784_v52, %v4785_v32  ;;  %v9026_v11 = vcombine.low %v13345_v41, %v13347_v35  ;;  %v5660_v30 = vshrl.u32 %v13345_v41, 16  ;;  %v5663_v26 = vshll.u32 %v13345_v41, 16  ;;  %v13399_v52 = vld [vmem:[#allocation2 + $0x60] sm:$0xf] }
 0x3a7   : > { %v8958_v31 = vcombine.low %v4783_v1, %v4786_v60  ;;  %v5594_v7 = vor.u32 %v5593_v51, %v5590_v15  ;;  %v5599_v16 = vrot.slane %v5597_v40, 5  ;;  %v5609_v10 = vrot.slane %v5607_v12, 5  ;;  %v13410_v60 = vpop.f32.mrb[8].mxu1 }
 0x3a8   : > { %v5673_v55 = vshrl.u32 %v13347_v35, 16  ;;  %v9027_v58 = vcombine.low %v13355_v21, %v13360_v14  ;;  %v5684_v3 = vshrl.u32 %v13355_v21, 16  ;;  %v5687_v24 = vshll.u32 %v13355_v21, 16 }
 0x3a9   : > { %v5595_v62 = vrot.slane %v5594_v7, 4  ;;  %v5604_v29 = vor.u32 %v5603_v5, %v5599_v16  ;;  %v5697_v2 = vshrl.u32 %v13360_v14, 16  ;;  %v5614_v53 = vrot.slane %v5612_v47, 4 }
 0x3aa   : > { %v5617_v50 = vrot.slane %v5615_v36, 5  ;;  %v5621_v33 = vshll.u32 %v13304_v8, 16  ;;  %v5627_v23 = vrot.slane %v5625_v38, 4  ;;  %v5631_v54 = vshll.u32 %v8980_v25, 16  ;;  %9815 = vmatmul.mubr.msk.bf16.gmra.mrb[124].mxu0 %vm1735_vm5, %v8958_v31  ;;  %v13416_v25 = vpop.f32.mrb[9].mxu1 }
 0x3ab   : > { %v5600_v56 = vsel %vm11779_vm8, %v5595_v62, %v5599_v16  ;;  %v5605_v22 = vrot.slane %v5604_v29, 4  ;;  %v5638_v37 = vrot.slane %v5636_v13, 4  ;;  %v5641_v38 = vrot.slane %v5639_v46, 5  ;;  %v13401_v46 = vld [vmem:[#allocation2 + $0x64] sm:$0xf] }
 0x3ac   : > { %9821 = vmatmul.mubr.msk.bf16.vlgmr.msra.gmra.mrb[96].mxu1 %vm1735_vm5, %v9024_v42  ;;  %v5618_v47 = vor.u32 %v5617_v50, %v5614_v53  ;;  %v5623_v36 = vrot.slane %v5621_v33, 5  ;;  %v5645_v49 = vshll.u32 %v13327_v9, 16  ;;  %v5633_v57 = vrot.slane %v5631_v54, 5  ;;  %v8989_v50 = vld [vmem:[#allocation2 + $0x50] sm:$0x1]  ;;  %v13424_v33 = vpop.f32.mrb[10].mxu1 }
 0x3ad   : > { %9887 = vmatpush3.bf16.msra.mxu1 %v13335_v34  ;;  %9824 = vmatprep.mubr.msk.bf16.mxu1 %vm1735_vm5, %v9025_v17  ;;  %v5610_v61 = vsel %vm11779_vm8, %v5605_v22, %v5609_v10  ;;  %v5651_v8 = vrot.slane %v5649_v48, 4  ;;  %v5655_v0 = vshll.u32 %v8983_v27, 16  ;;  %v5642_v1 = vor.u32 %v5641_v38, %v5638_v37  ;;  %v8986_v10 = vld [vmem:[#allocation2 + $0x44] sm:$0x1]  ;;  %v13430_v37 = vld [vmem:[#allocation2 + $0x6c] sm:$0xf] }
 0x3ae   : > { %v9055_v42 = vcombine.low %v5600_v56, %v5610_v61  ;;  %v5619_v32 = vrot.slane %v5618_v47, 4  ;;  %v5628_v13 = vor.u32 %v5627_v23, %v5623_v36  ;;  %v5647_v9 = vrot.slane %v5645_v49, 5  ;;  %v13432_v47 = vpop.f32.mrb[32].mxu0 }
 0x3af   : > { %v5657_v15 = vrot.slane %v5655_v0, 5  ;;  %v9028_v34 = vcombine.low %v13385_v19, %v13393_v4  ;;  %v5708_v17 = vshrl.u32 %v13385_v19, 16  ;;  %v5643_v40 = vrot.slane %v5642_v1, 4  ;;  %v13447_v61 = vpop.f32.mrb[33].mxu0 }
 0x3b0   : > { %9854 = vmatprep.mubr.msk.bf16.mxu0 %vm1735_vm5, %v9055_v42  ;;  %v5624_v48 = vsel %vm11779_vm8, %v5619_v32, %v5623_v36  ;;  %v5629_v51 = vrot.slane %v5628_v13, 4  ;;  %v5711_v5 = vshll.u32 %v13385_v19, 16  ;;  %v5652_v12 = vor.u32 %v5651_v8, %v5647_v9  ;;  %v13434_v36 = vpop.f32.mrb[11].mxu1 }
 0x3b1   : > { %v5721_v31 = vshrl.u32 %v13393_v4, 16  ;;  %v9029_v7 = vcombine.low %v13399_v52, %v13401_v46  ;;  %v5732_v16 = vshrl.u32 %v13399_v52, 16  ;;  %v5648_v29 = vsel %vm11779_vm8, %v5643_v40, %v5647_v9  ;;  %v13475_v9 = vld [vmem:[#allocation2 + $0x7c] sm:$0xf] }
 0x3b2   : > { %v5634_v62 = vsel %vm11779_vm8, %v5629_v51, %v5633_v57  ;;  %v5735_v27 = vshll.u32 %v13399_v52, 16  ;;  %v5745_v53 = vshrl.u32 %v13401_v46, 16  ;;  %v5653_v56 = vrot.slane %v5652_v12, 4  ;;  %v13459_v57 = vld [vmem:[#allocation2 + $0x70] sm:$0xf] }
 0x3b3   : > { %v9056_v23 = vcombine.low %v5624_v48, %v5634_v62  ;;  %v5662_v22 = vrot.slane %v5660_v30, 4  ;;  %v5665_v54 = vrot.slane %v5663_v26, 5  ;;  %v5669_v38 = vshll.u32 %v13347_v35, 16 }
 0x3b4   : > { %9825 = vmatmul.mubr.msk.bf16.gmra.mrb[100].mxu1 %vm1735_vm5, %v9026_v11  ;;  %v13443_v49 = vrot.slane %v5673_v55, 4  ;;  %v5679_v30 = vshll.u32 %v8986_v10, 16  ;;  %v5686_v26 = vrot.slane %v5684_v3, 4  ;;  %v5658_v41 = vsel %vm11779_vm8, %v5653_v56, %v5657_v15  ;;  %v13461_v3 = vpop.f32.mrb[34].mxu0 }
 0x3b5   : > { %9828 = vmatprep.mubr.msk.bf16.mxu1 %vm1735_vm5, %v9027_v58  ;;  %9855 = vmatmul.mubr.msk.bf16.vlgmr.msra.gmra.mrb[128].mxu0 %vm1735_vm5, %v9056_v23  ;;  %v5666_v11 = vor.u32 %v5665_v54, %v5662_v22  ;;  %v5689_v35 = vrot.slane %v5687_v24, 5  ;;  %v5693_v55 = vshll.u32 %v13360_v14, 16  ;;  %v9057_v8 = vcombine.low %v5648_v29, %v5658_v41  ;;  %v13469_v32 = vpop.f32.mrb[35].mxu0 }
 0x3b6   : > { %v13463_v0 = vrot.slane %v5669_v38, 5  ;;  %v13465_v42 = vrot.slane %v5679_v30, 5  ;;  %v5699_v58 = vrot.slane %v5697_v2, 4  ;;  %v5703_v1 = vshll.u32 %v8989_v50, 16  ;;  %v13483_v2 = vld [vmem:[#allocation2 + $0x78] sm:$0xf] }
 0x3b7   : > { %v13471_v13 = vrot.slane %v5666_v11, 4  ;;  %v5690_v21 = vor.u32 %v5689_v35, %v5686_v26  ;;  %v13473_v24 = vrot.slane %v5693_v55, 5  ;;  %9858 = vmatprep.mubr.msk.bf16.mxu0 %vm1735_vm5, %v9057_v8  ;;  %v9030_v48 = vcombine.low %v13430_v37, %v13459_v57  ;;  %v8992_v30 = vld [vmem:[#allocation2 + $0x5c] sm:$0x1] }
 0x3b8   : > { %v5676_v15 = vor.u32 %v13443_v49, %v13463_v0  ;;  %v5756_v14 = vshrl.u32 %v13430_v37, 16  ;;  %v5705_v10 = vrot.slane %v5703_v1, 5  ;;  %v11218_v62 = vmov 0.0   ;;  %v13566_v1 = vpop.f32.mrb[12].mxu1 }
 0x3b9   : > { %v5672_v51 = vsel %vm11779_vm8, %v13471_v13, %v13463_v0  ;;  %v5691_v40 = vrot.slane %v5690_v21, 4  ;;  %v5700_v12 = vor.u32 %v5699_v58, %v13473_v24  ;;  %1738 = vst.msk [vmem:[#allocation3 + $0x10] sm:$0xff] %vm1735_vm5, %v11218_v62  ;;  %1736 = vst.msk [vmem:[#allocation3] sm:$0xff] %vm1735_vm5, %v11218_v62  ;;  %v5759_v50 = vshll.u32 %v13430_v37, 16 }
 0x3ba   : > { %1737 = vst.msk [vmem:[#allocation3 + $0x8] sm:$0xff] %vm1735_vm5, %v11218_v62  ;;  %1739 = vst.msk [vmem:[#allocation3 + $0x18] sm:$0xff] %vm1735_vm5, %v11218_v62  ;;  %v5677_v29 = vrot.slane %v5676_v15, 4  ;;  %v5769_v23 = vshrl.u32 %v13459_v57, 16  ;;  %v9031_v56 = vcombine.low %v13483_v2, %v13475_v9  ;;  %v5780_v38 = vshrl.u32 %v13483_v2, 16 }
 0x3bb   : > { %1740 = vst.msk [vmem:[#allocation3 + $0x20] sm:$0xff] %vm1735_vm5, %v11218_v62  ;;  %1741 = vst.msk [vmem:[#allocation3 + $0x28] sm:$0xff] %vm1735_vm5, %v11218_v62  ;;  %v5696_v22 = vsel %vm11779_vm8, %v5691_v40, %v13473_v24  ;;  %v5701_v54 = vrot.slane %v5700_v12, 4  ;;  %v5783_v49 = vshll.u32 %v13483_v2, 16  ;;  %v5793_v41 = vshrl.u32 %v13475_v9, 16 }
 0x3bc   : > { %1742 = vst.msk [vmem:[#allocation3 + $0x30] sm:$0xff] %vm1735_vm5, %v11218_v62  ;;  %1743 = vst.msk [vmem:[#allocation3 + $0x38] sm:$0xff] %vm1735_vm5, %v11218_v62  ;;  %9829 = vmatmul.mubr.msk.bf16.gmra.mrb[104].mxu1 %vm1735_vm5, %v9028_v34  ;;  %v5682_v26 = vsel %vm11779_vm8, %v5677_v29, %v13465_v42  ;;  %v5710_v11 = vrot.slane %v5708_v17, 4  ;;  %v5713_v35 = vrot.slane %v5711_v5, 5  ;;  %v5717_v8 = vshll.u32 %v13393_v4, 16 }
 0x3bd   : > { %1744 = vst.msk [vmem:[#allocation3 + $0x40] sm:$0xff] %vm1735_vm5, %v11218_v62  ;;  %1745 = vst.msk [vmem:[#allocation3 + $0x48] sm:$0xff] %vm1735_vm5, %v11218_v62  ;;  %9832 = vmatprep.mubr.msk.bf16.mxu1 %vm1735_vm5, %v9029_v7  ;;  %v9058_v55 = vcombine.low %v5672_v51, %v5682_v26  ;;  %v5706_v34 = vsel %vm11779_vm8, %v5701_v54, %v5705_v10  ;;  %v5723_v0 = vrot.slane %v5721_v31, 4  ;;  %v13552_v42 = vld [vmem:[#allocation2 + $0x68] sm:$0x1]  ;;  %v5727_v58 = vshll.u32 %v8992_v30, 16 }
 0x3be   : > { %1746 = vst.msk [vmem:[#allocation3 + $0x50] sm:$0xff] %vm1735_vm5, %v11218_v62  ;;  %1747 = vst.msk [vmem:[#allocation3 + $0x58] sm:$0xff] %vm1735_vm5, %v11218_v62  ;;  %v13554_v17 = vld [vmem:[#allocation2 + $0x88] sm:$0xf]  ;;  %v9059_v19 = vcombine.low %v5696_v22, %v5706_v34  ;;  %v5714_v5 = vor.u32 %v5713_v35, %v5710_v11  ;;  %v5734_v13 = vrot.slane %v5732_v16, 4  ;;  %v5719_v21 = vrot.slane %v5717_v8, 5 }
 0x3bf   : > { %1748 = vst.msk [vmem:[#allocation3 + $0x60] sm:$0xff] %vm1735_vm5, %v11218_v62  ;;  %1749 = vst.msk [vmem:[#allocation3 + $0x68] sm:$0xff] %vm1735_vm5, %v11218_v62  ;;  %v13558_v7 = vld [vmem:[#allocation2 + $0x84] sm:$0xf]  ;;  %9859 = vmatmul.mubr.msk.bf16.gmra.mrb[132].mxu0 %vm1735_vm5, %v9058_v55  ;;  %v5737_v24 = vrot.slane %v5735_v27, 5  ;;  %v5741_v4 = vshll.u32 %v13401_v46, 16 }
 0x3c0   : > { %1750 = vst.msk [vmem:[#allocation3 + $0x70] sm:$0xff] %vm1735_vm5, %v11218_v62  ;;  %1751 = vst.msk [vmem:[#allocation3 + $0x78] sm:$0xff] %vm1735_vm5, %v11218_v62  ;;  %v5747_v31 = vrot.slane %v5745_v53, 4  ;;  %9862 = vmatprep.mubr.msk.bf16.mxu0 %vm1735_vm5, %v9059_v19  ;;  %v1821_v15 = vld [vmem:[#allocation3 + $0x10] sm:$0xff]  ;;  %v1819_v51 = vld [vmem:[#allocation3] sm:$0xff]  ;;  %v5715_v40 = vrot.slane %v5714_v5, 4  ;;  %v9032_v52 = vcombine.low %v13558_v7, %v13554_v17  ;;  %v5724_v29 = vor.u32 %v5723_v0, %v5719_v21 }
 0x3c1   : > { %1752 = vst.msk [vmem:[#allocation3 + $0x80] sm:$0xff] %vm1735_vm5, %v11218_v62  ;;  %1753 = vst.msk [vmem:[#allocation3 + $0x88] sm:$0xff] %vm1735_vm5, %v11218_v62  ;;  %v1822_v16 = vld [vmem:[#allocation3 + $0x18] sm:$0xff]  ;;  %v5729_v12 = vrot.slane %v5727_v58, 5  ;;  %v5751_v10 = vshll.u32 %v13552_v42, 16  ;;  %v2147_v27 = vadd.f32 %v13250_v45, %v1821_v15  ;;  %v1820_v53 = vld [vmem:[#allocation3 + $0x8] sm:$0xff]  ;;  %v5738_v35 = vor.u32 %v5737_v24, %v5734_v13 }
 0x3c2   : > { %1754 = vst.msk [vmem:[#allocation3 + $0x90] sm:$0xff] %vm1735_vm5, %v11218_v62  ;;  %1755 = vst.msk [vmem:[#allocation3 + $0x98] sm:$0xff] %vm1735_vm5, %v11218_v62  ;;  %v2148_v46 = vadd.f32 %v13262_v28, %v1822_v16  ;;  %v1823_v54 = vld [vmem:[#allocation3 + $0x20] sm:$0xff]  ;;  %v13575_v30 = vpop.f32.mrb[13].mxu1  ;;  %v2146_v26 = vadd.f32 %v13273_v63, %v1820_v53  ;;  %v5720_v11 = vsel %vm11779_vm8, %v5715_v40, %v5719_v21  ;;  %v5743_v55 = vrot.slane %v5741_v4, 5  ;;  %v1824_v8 = vld [vmem:[#allocation3 + $0x28] sm:$0xff] }
 0x3c3   : > { %1756 = vst.msk [vmem:[#allocation3 + $0xa0] sm:$0xff] %vm1735_vm5, %v11218_v62  ;;  %1757 = vst.msk [vmem:[#allocation3 + $0xa8] sm:$0xff] %vm1735_vm5, %v11218_v62  ;;  %v1825_v22 = vld [vmem:[#allocation3 + $0x30] sm:$0xff]  ;;  %v1826_v34 = vld [vmem:[#allocation3 + $0x38] sm:$0xff]  ;;  %v13580_v45 = vpop.f32.mrb[14].mxu1  ;;  %v5753_v28 = vrot.slane %v5751_v10, 5  ;;  %v2149_v63 = vadd.f32 %v13374_v44, %v1823_v54  ;;  %v2150_v24 = vadd.f32 %v13381_v59, %v1824_v8 }
 0x3c4   : > { %1758 = vst.msk [vmem:[#allocation3 + $0xb0] sm:$0xff] %vm1735_vm5, %v11218_v62  ;;  %1759 = vst.msk [vmem:[#allocation3 + $0xb8] sm:$0xff] %vm1735_vm5, %v11218_v62  ;;  %v2151_v0 = vadd.f32 %v13368_v39, %v1825_v22  ;;  %v13587_v19 = vld [vmem:[#allocation2 + $0x94] sm:$0xf]  ;;  %v13589_v5 = vpop.f32.mrb[15].mxu1  ;;  %9833 = vmatmul.mubr.msk.bf16.gmra.mrb[108].mxu1 %vm1735_vm5, %v9030_v48  ;;  %v5739_v58 = vrot.slane %v5738_v35, 4  ;;  %v5748_v13 = vor.u32 %v5747_v31, %v5743_v55 }
 0x3c5   : > { %1760 = vst.msk [vmem:[#allocation3 + $0xc0] sm:$0xff] %vm1735_vm5, %v11218_v62  ;;  %1761 = vst.msk [vmem:[#allocation3 + $0xc8] sm:$0xff] %vm1735_vm5, %v11218_v62  ;;  %v2152_v21 = vadd.f32 %v13378_v20, %v1826_v34  ;;  %v13598_v39 = vld [vmem:[#allocation2 + $0x90] sm:$0xf]  ;;  %9836 = vmatprep.mubr.msk.bf16.mxu1 %vm1735_vm5, %v9031_v56  ;;  %v5804_v48 = vshrl.u32 %v13558_v7, 16  ;;  %v5807_v20 = vshll.u32 %v13558_v7, 16 }
 0x3c6   : > { %1762 = vst.msk [vmem:[#allocation3 + $0xd0] sm:$0xff] %vm1735_vm5, %v11218_v62  ;;  %1763 = vst.msk [vmem:[#allocation3 + $0xd8] sm:$0xff] %vm1735_vm5, %v11218_v62  ;;  %v5817_v59 = vshrl.u32 %v13554_v17, 16  ;;  %v9656_v4 = vpop.f32.mrb[36].mxu0  ;;  %v5744_v15 = vsel %vm11779_vm8, %v5739_v58, %v5743_v55  ;;  %v9033_v56 = vcombine.low %v13598_v39, %v13587_v19  ;;  %v13617_v16 = vld [vmem:[#allocation2 + $0x74] sm:$0x1] }
 0x3c7   : > { %1764 = vst.msk [vmem:[#allocation3 + $0xe0] sm:$0xff] %vm1735_vm5, %v11218_v62  ;;  %1765 = vst.msk [vmem:[#allocation3 + $0xe8] sm:$0xff] %vm1735_vm5, %v11218_v62  ;;  %v13619_v40 = vpop.f32.mrb[37].mxu0  ;;  %v5831_v10 = vshll.u32 %v13598_v39, 16  ;;  %v5765_v22 = vshll.u32 %v13459_v57, 16  ;;  %v5771_v54 = vrot.slane %v5769_v23, 4 }
 0x3c8   : > { %1766 = vst.msk [vmem:[#allocation3 + $0xf0] sm:$0xff] %vm1735_vm5, %v11218_v62  ;;  %1767 = vst.msk [vmem:[#allocation3 + $0xf8] sm:$0xff] %vm1735_vm5, %v11218_v62  ;;  %v2145_v62 = vadd.f32 %v13256_v6, %v1819_v51  ;;  %v5725_v6 = vrot.slane %v5724_v29, 4  ;;  %v5749_v51 = vrot.slane %v5748_v13, 4  ;;  %v5761_v29 = vrot.slane %v5759_v50, 5  ;;  %v1829_v37 = vld [vmem:[#allocation3 + $0x50] sm:$0xff] }
 0x3c9   : > { %2179 = vst.msk [vmem:[#allocation3 + $0x10] sm:$0xff] %vm1735_vm5, %v2147_v27  ;;  %2180 = vst.msk [vmem:[#allocation3 + $0x18] sm:$0xff] %vm1735_vm5, %v2148_v46  ;;  %v5841_v27 = vshrl.u32 %v13587_v19, 16  ;;  %v13626_v46 = vpop.f32.mrb[38].mxu0  ;;  %v5775_v35 = vshll.u32 %v13617_v16, 16  ;;  %v5782_v55 = vrot.slane %v5780_v38, 4 }
 0x3ca   : > { %2177 = vst.msk [vmem:[#allocation3] sm:$0xff] %vm1735_vm5, %v2145_v62  ;;  %2178 = vst.msk [vmem:[#allocation3 + $0x8] sm:$0xff] %vm1735_vm5, %v2146_v26  ;;  %v5730_v44 = vsel %vm11779_vm8, %v5725_v6, %v5729_v12  ;;  %v5828_v12 = vshrl.u32 %v13598_v39, 16  ;;  %v5758_v62 = vrot.slane %v5756_v14, 4  ;;  %v5754_v53 = vsel %vm11779_vm8, %v5749_v51, %v5753_v28  ;;  %v13636_v26 = vld [vmem:[#allocation2 + $0x80] sm:$0x1] }
 0x3cb   : > { %2183 = vst.msk [vmem:[#allocation3 + $0x30] sm:$0xff] %vm1735_vm5, %v2151_v0  ;;  %2181 = vst.msk [vmem:[#allocation3 + $0x20] sm:$0xff] %vm1735_vm5, %v2149_v63  ;;  %v9060_v31 = vcombine.low %v5720_v11, %v5730_v44  ;;  %v13638_v11 = vpop.f32.mrb[39].mxu0  ;;  %v9061_v14 = vcombine.low %v5744_v15, %v5754_v53  ;;  %v5785_v34 = vrot.slane %v5783_v49, 5  ;;  %v1827_v50 = vld [vmem:[#allocation3 + $0x40] sm:$0xff]  ;;  %v5767_v23 = vrot.slane %v5765_v22, 5 }
 0x3cc   : > { %2184 = vst.msk [vmem:[#allocation3 + $0x38] sm:$0xff] %vm1735_vm5, %v2152_v21  ;;  %2182 = vst.msk [vmem:[#allocation3 + $0x28] sm:$0xff] %vm1735_vm5, %v2150_v24  ;;  %v5762_v57 = vor.u32 %v5761_v29, %v5758_v62  ;;  %v5789_v0 = vshll.u32 %v13475_v9, 16  ;;  %v5795_v63 = vrot.slane %v5793_v41, 4  ;;  %v5777_v13 = vrot.slane %v5775_v35, 5  ;;  %9837 = vmatmul.mubr.msk.bf16.gmra.mrb[112].mxu1 %vm1735_vm5, %v9032_v52  ;;  %v1828_v52 = vld [vmem:[#allocation3 + $0x48] sm:$0xff] }
 0x3cd   : > { %9863 = vmatmul.mubr.msk.bf16.gmra.mrb[136].mxu0 %vm1735_vm5, %v9060_v31  ;;  %v5772_v9 = vor.u32 %v5771_v54, %v5767_v23  ;;  %v5786_v41 = vor.u32 %v5785_v34, %v5782_v55  ;;  %v1830_v31 = vld [vmem:[#allocation3 + $0x58] sm:$0xff]  ;;  %9840 = vmatprep.mubr.msk.bf16.mxu1 %vm1735_vm5, %v9033_v56  ;;  %v13669_v56 = vpop.f32.mrb[16].mxu1  ;;  %v13675_v34 = vld [vmem:[#allocation2 + $0x9c] sm:$0xf] }
 0x3ce   : > { %9866 = vmatprep.mubr.msk.bf16.mxu0 %vm1735_vm5, %v9061_v14  ;;  %v5763_v24 = vrot.slane %v5762_v57, 4  ;;  %v13667_v14 = vld [vmem:[#allocation2 + $0xa0] sm:$0xf] }
 0x3cf   : > { %v5773_v53 = vrot.slane %v5772_v9, 4  ;;  %v5787_v29 = vrot.slane %v5786_v41, 4  ;;  %v13715_v41 = vld [vmem:[#allocation2 + $0x98] sm:$0x1] }
 0x3d0   : > { %v2211_v8 = vld [vmem:[#allocation3 + $0x10] sm:$0xff]  ;;  %v2212_v28 = vld [vmem:[#allocation3 + $0x18] sm:$0xff]  ;;  %v5768_v62 = vsel %vm11779_vm8, %v5763_v24, %v5767_v23 }
 0x3d1   : > { %v2209_v6 = vld [vmem:[#allocation3] sm:$0xff]  ;;  %v2892_v58 = vadd.f32 %v13432_v47, %v2211_v8  ;;  %v2893_v2 = vadd.f32 %v13461_v3, %v2212_v28  ;;  %v2210_v49 = vld [vmem:[#allocation3 + $0x8] sm:$0xff]  ;;  %v5791_v47 = vrot.slane %v5789_v0, 5  ;;  %v2155_v3 = vadd.f32 %v13410_v60, %v1829_v37  ;;  %v13677_v37 = vld [vmem:[#allocation2 + $0xac] sm:$0xf] }
 0x3d2   : > { %v2890_v38 = vadd.f32 %v13447_v61, %v2209_v6  ;;  %v2891_v21 = vadd.f32 %v13469_v32, %v2210_v49  ;;  %v2215_v44 = vld [vmem:[#allocation3 + $0x30] sm:$0xff]  ;;  %v2213_v15 = vld [vmem:[#allocation3 + $0x20] sm:$0xff]  ;;  %v5799_v61 = vshll.u32 %v13636_v26, 16  ;;  %v2153_v32 = vadd.f32 %v13416_v25, %v1827_v50 }
 0x3d3   : > { %2924 = vst.msk [vmem:[#allocation3 + $0x10] sm:$0xff] %vm1735_vm5, %v2892_v58  ;;  %2925 = vst.msk [vmem:[#allocation3 + $0x18] sm:$0xff] %vm1735_vm5, %v2893_v2  ;;  %v2216_v51 = vld [vmem:[#allocation3 + $0x38] sm:$0xff]  ;;  %v2896_v22 = vadd.f32 %v9656_v4, %v2215_v44  ;;  %v2214_v54 = vld [vmem:[#allocation3 + $0x28] sm:$0xff]  ;;  %v5796_v35 = vor.u32 %v5795_v63, %v5791_v47  ;;  %v2156_v60 = vadd.f32 %v13424_v33, %v1830_v31  ;;  %v13679_v4 = vpop.f32.mrb[17].mxu1  ;;  %v5889_v9 = vshrl.u32 %v13677_v37, 16 }
 0x3d4   : > { %2922 = vst.msk [vmem:[#allocation3] sm:$0xff] %vm1735_vm5, %v2890_v38  ;;  %2923 = vst.msk [vmem:[#allocation3 + $0x8] sm:$0xff] %vm1735_vm5, %v2891_v21  ;;  %v5801_v55 = vrot.slane %v5799_v61, 5  ;;  %v2894_v25 = vadd.f32 %v13619_v40, %v2213_v15  ;;  %v5778_v50 = vsel %vm11779_vm8, %v5773_v53, %v5777_v13  ;;  %v5792_v8 = vsel %vm11779_vm8, %v5787_v29, %v5791_v47  ;;  %v13688_v28 = vld [vmem:[#allocation2 + $0xa8] sm:$0xf]  ;;  %v13690_v40 = vpop.f32.mrb[18].mxu1 }
 0x3d5   : > { %2187 = vst.msk [vmem:[#allocation3 + $0x50] sm:$0xff] %vm1735_vm5, %v2155_v3  ;;  %2185 = vst.msk [vmem:[#allocation3 + $0x40] sm:$0xff] %vm1735_vm5, %v2153_v32  ;;  %v2154_v6 = vadd.f32 %v13434_v36, %v1828_v52  ;;  %v2897_v33 = vadd.f32 %v13626_v46, %v2216_v51  ;;  %v9062_v57 = vcombine.low %v5768_v62, %v5778_v50  ;;  %v5797_v23 = vrot.slane %v5796_v35, 4  ;;  %v13697_v58 = vpop.f32.mrb[19].mxu1  ;;  %v13706_v49 = vld [vmem:[#allocation2 + $0x8c] sm:$0x1] }
 0x3d6   : > { %2928 = vst.msk [vmem:[#allocation3 + $0x30] sm:$0xff] %vm1735_vm5, %v2896_v22  ;;  %2188 = vst.msk [vmem:[#allocation3 + $0x58] sm:$0xff] %vm1735_vm5, %v2156_v60  ;;  %v2895_v0 = vadd.f32 %v13638_v11, %v2214_v54  ;;  %v9034_v63 = vcombine.low %v13675_v34, %v13667_v14  ;;  %v5852_v36 = vshrl.u32 %v13675_v34, 16  ;;  %v5855_v46 = vshll.u32 %v13675_v34, 16  ;;  %v9660_v11 = vpop.f32.mrb[40].mxu0  ;;  %v1833_v3 = vld [vmem:[#allocation3 + $0x70] sm:$0xff] }
 0x3d7   : > { %2926 = vst.msk [vmem:[#allocation3 + $0x20] sm:$0xff] %vm1735_vm5, %v2894_v25  ;;  %2186 = vst.msk [vmem:[#allocation3 + $0x48] sm:$0xff] %vm1735_vm5, %v2154_v6  ;;  %v5865_v38 = vshrl.u32 %v13667_v14, 16  ;;  %v9035_v2 = vcombine.low %v13688_v28, %v13677_v37  ;;  %9867 = vmatmul.mubr.msk.bf16.gmra.mrb[140].mxu0 %vm1735_vm5, %v9062_v57  ;;  %v5802_v13 = vsel %vm11779_vm8, %v5797_v23, %v5801_v55  ;;  %v5876_v21 = vshrl.u32 %v13688_v28, 16  ;;  %v2795_v44 = vpop.f32.mrb[41].mxu0  ;;  %v1831_v53 = vld [vmem:[#allocation3 + $0x60] sm:$0xff] }
 0x3d8   : > { %2929 = vst.msk [vmem:[#allocation3 + $0x38] sm:$0xff] %vm1735_vm5, %v2897_v33  ;;  %2927 = vst.msk [vmem:[#allocation3 + $0x28] sm:$0xff] %vm1735_vm5, %v2895_v0  ;;  %v5879_v24 = vshll.u32 %v13688_v28, 16  ;;  %v9063_v31 = vcombine.low %v5792_v8, %v5802_v13  ;;  %9841 = vmatmul.mubr.msk.bf16.gmra.mrb[116].mxu1 %vm1735_vm5, %v9034_v63  ;;  %v5806_v15 = vrot.slane %v5804_v48, 4  ;;  %v5809_v47 = vrot.slane %v5807_v20, 5  ;;  %v9661_v32 = vpop.f32.mrb[42].mxu0 }
 0x3d9   : > { %v5813_v61 = vshll.u32 %v13554_v17, 16  ;;  %9844 = vmatprep.mubr.msk.bf16.mxu1 %vm1735_vm5, %v9035_v2  ;;  %v5819_v52 = vrot.slane %v5817_v59, 4  ;;  %v5823_v51 = vshll.u32 %v13706_v49, 16  ;;  %v5830_v62 = vrot.slane %v5828_v12, 4  ;;  %v2798_v7 = vpop.f32.mrb[43].mxu0  ;;  %v1834_v54 = vld [vmem:[#allocation3 + $0x78] sm:$0xff] }
 0x3da   : > { %v5833_v48 = vrot.slane %v5831_v10, 5  ;;  %9870 = vmatprep.mubr.msk.bf16.mxu0 %vm1735_vm5, %v9063_v31  ;;  %v5810_v20 = vor.u32 %v5809_v47, %v5806_v15  ;;  %v5837_v22 = vshll.u32 %v13587_v19, 16  ;;  %v5843_v17 = vrot.slane %v5841_v27, 4  ;;  %v13737_v60 = vld [vmem:[#allocation2 + $0xb4] sm:$0xf]  ;;  %v13739_v25 = vpop.f32.mrb[20].mxu1 }
 0x3db   : > { %v5815_v29 = vrot.slane %v5813_v61, 5  ;;  %v5825_v35 = vrot.slane %v5823_v51, 5  ;;  %v5847_v12 = vshll.u32 %v13715_v41, 16  ;;  %v2159_v39 = vadd.f32 %v13566_v1, %v1833_v3  ;;  %v1832_v19 = vld [vmem:[#allocation3 + $0x68] sm:$0xff]  ;;  %v13742_v57 = vpop.f32.mrb[21].mxu1 }
 0x3dc   : > { %v2219_v59 = vld [vmem:[#allocation3 + $0x50] sm:$0xff]  ;;  %v5834_v55 = vor.u32 %v5833_v48, %v5830_v62  ;;  %v2217_v10 = vld [vmem:[#allocation3 + $0x40] sm:$0xff]  ;;  %v5811_v50 = vrot.slane %v5810_v20, 4  ;;  %v5839_v6 = vrot.slane %v5837_v22, 5  ;;  %v2157_v33 = vadd.f32 %v13575_v30, %v1831_v53  ;;  %v13748_v31 = vpop.f32.mrb[22].mxu1  ;;  %v9664_v22 = vpop.f32.mrb[44].mxu0 }
 0x3dd   : > { %v5820_v8 = vor.u32 %v5819_v52, %v5815_v29  ;;  %v2220_v27 = vld [vmem:[#allocation3 + $0x58] sm:$0xff]  ;;  %v5849_v0 = vrot.slane %v5847_v12, 5  ;;  %2191 = vst.msk [vmem:[#allocation3 + $0x70] sm:$0xff] %vm1735_vm5, %v2159_v39  ;;  %v2900_v63 = vadd.f32 %v9660_v11, %v2219_v59  ;;  %v2160_v1 = vadd.f32 %v13580_v45, %v1834_v54  ;;  %v13746_v13 = vld [vmem:[#allocation2 + $0xb8] sm:$0xf]  ;;  %v13755_v52 = vpop.f32.mrb[23].mxu1 }
 0x3de   : > { %v5835_v23 = vrot.slane %v5834_v55, 4  ;;  %v2218_v2 = vld [vmem:[#allocation3 + $0x48] sm:$0xff]  ;;  %v5816_v15 = vsel %vm11779_vm8, %v5811_v50, %v5815_v29  ;;  %v5844_v47 = vor.u32 %v5843_v17, %v5839_v6  ;;  %2189 = vst.msk [vmem:[#allocation3 + $0x60] sm:$0xff] %vm1735_vm5, %v2157_v33  ;;  %v2898_v61 = vadd.f32 %v2795_v44, %v2217_v10  ;;  %v2811_v54 = vpop.f32.mrb[45].mxu0  ;;  %v13785_v10 = vld [vmem:[#allocation2 + $0xb0] sm:$0x1] }
 0x3df   : > { %v5821_v30 = vrot.slane %v5820_v8, 4  ;;  %v13753_v3 = vld [vmem:[#allocation2 + $0xc4] sm:$0xf]  ;;  %2932 = vst.msk [vmem:[#allocation3 + $0x50] sm:$0xff] %vm1735_vm5, %v2900_v63  ;;  %2192 = vst.msk [vmem:[#allocation3 + $0x78] sm:$0xff] %vm1735_vm5, %v2160_v1  ;;  %v2158_v11 = vadd.f32 %v13589_v5, %v1832_v19  ;;  %v2901_v51 = vadd.f32 %v9661_v32, %v2220_v27  ;;  %v2899_v62 = vadd.f32 %v2798_v7, %v2218_v2  ;;  %v9665_v50 = vpop.f32.mrb[46].mxu0 }
 0x3e0   : > { %v5840_v45 = vsel %vm11779_vm8, %v5835_v23, %v5839_v6  ;;  %v13762_v48 = vld [vmem:[#allocation2 + $0xc0] sm:$0xf]  ;;  %v5845_v53 = vrot.slane %v5844_v47, 4  ;;  %2930 = vst.msk [vmem:[#allocation3 + $0x40] sm:$0xff] %vm1735_vm5, %v2898_v61  ;;  %v9036_v20 = vcombine.low %v13737_v60, %v13746_v13  ;;  %v5900_v29 = vshrl.u32 %v13737_v60, 16  ;;  %v1837_v27 = vld [vmem:[#allocation3 + $0x90] sm:$0xff] }
 0x3e1   : > { %v5826_v44 = vsel %vm11779_vm8, %v5821_v30, %v5825_v35  ;;  %2190 = vst.msk [vmem:[#allocation3 + $0x68] sm:$0xff] %vm1735_vm5, %v2158_v11  ;;  %2933 = vst.msk [vmem:[#allocation3 + $0x58] sm:$0xff] %vm1735_vm5, %v2901_v51  ;;  %v5903_v5 = vshll.u32 %v13737_v60, 16  ;;  %v5913_v32 = vshrl.u32 %v13746_v13, 16  ;;  %v9037_v7 = vcombine.low %v13762_v48, %v13753_v3  ;;  %v13777_v59 = vld [vmem:[#allocation2 + $0xa4] sm:$0x1] }
 0x3e2   : > { %v9064_v17 = vcombine.low %v5816_v15, %v5826_v44  ;;  %2931 = vst.msk [vmem:[#allocation3 + $0x48] sm:$0xff] %vm1735_vm5, %v2899_v62  ;;  %v5850_v35 = vsel %vm11779_vm8, %v5845_v53, %v5849_v0  ;;  %9845 = vmatmul.mubr.msk.bf16.gmra.mrb[120].mxu1 %vm1735_vm5, %v9036_v20  ;;  %v5924_v55 = vshrl.u32 %v13762_v48, 16  ;;  %v5927_v12 = vshll.u32 %v13762_v48, 16  ;;  %v2814_v23 = vpop.f32.mrb[47].mxu0  ;;  %v13794_v0 = vpop.f32.mrb[24].mxu1  ;;  %v1835_v15 = vld [vmem:[#allocation3 + $0x80] sm:$0xff] }
 0x3e3   : > { %v5937_v39 = vshrl.u32 %v13753_v3, 16  ;;  %v9065_v8 = vcombine.low %v5840_v45, %v5850_v35  ;;  %9848 = vmatprep.mubr.msk.bf16.mxu1 %vm1735_vm5, %v9037_v7  ;;  %v5854_v6 = vrot.slane %v5852_v36, 4  ;;  %v5857_v33 = vrot.slane %v5855_v46, 5  ;;  %v13803_v34 = vpop.f32.mrb[25].mxu1  ;;  %v1838_v45 = vld [vmem:[#allocation3 + $0x98] sm:$0xff]  ;;  %v1836_v35 = vld [vmem:[#allocation3 + $0x88] sm:$0xff] }
 0x3e4   : > { %9871 = vmatmul.mubr.msk.bf16.gmra.mrb[144].mxu0 %vm1735_vm5, %v9064_v17  ;;  %v5861_v19 = vshll.u32 %v13667_v14, 16  ;;  %v5867_v63 = vrot.slane %v5865_v38, 4  ;;  %v5871_v1 = vshll.u32 %v13777_v59, 16  ;;  %v5878_v2 = vrot.slane %v5876_v21, 4  ;;  %v2223_v61 = vld [vmem:[#allocation3 + $0x70] sm:$0xff]  ;;  %v13809_v11 = vpop.f32.mrb[26].mxu1 }
 0x3e5   : > { %v5881_v36 = vrot.slane %v5879_v24, 5  ;;  %9874 = vmatprep.mubr.msk.bf16.mxu0 %vm1735_vm5, %v9065_v8  ;;  %v5858_v46 = vor.u32 %v5857_v33, %v5854_v6  ;;  %v5885_v47 = vshll.u32 %v13677_v37, 16  ;;  %v5891_v38 = vrot.slane %v5889_v9, 4  ;;  %v2221_v62 = vld [vmem:[#allocation3 + $0x60] sm:$0xff]  ;;  %v13813_v44 = vpop.f32.mrb[27].mxu1 }
 0x3e6   : > { %v5863_v30 = vrot.slane %v5861_v19, 5  ;;  %v5873_v21 = vrot.slane %v5871_v1, 5  ;;  %v5895_v28 = vshll.u32 %v13785_v10, 16  ;;  %v2163_v24 = vadd.f32 %v13669_v56, %v1837_v27  ;;  %v2224_v9 = vld [vmem:[#allocation3 + $0x78] sm:$0xff]  ;;  %v13816_v8 = vld [vmem:[#allocation2 + $0xcc] sm:$0xf] }
 0x3e7   : > { %v5882_v51 = vor.u32 %v5881_v36, %v5878_v2  ;;  %v5859_v53 = vrot.slane %v5858_v46, 4  ;;  %v5887_v17 = vrot.slane %v5885_v47, 5  ;;  %v2161_v7 = vadd.f32 %v13679_v4, %v1835_v15  ;;  %v13820_v27 = vld [vmem:[#allocation2 + $0xd0] sm:$0xf]  ;;  %v13822_v2 = vpop.f32.mrb[48].mxu0 }
 0x3e8   : > { %v5868_v20 = vor.u32 %v5867_v63, %v5863_v30  ;;  %v5897_v33 = vrot.slane %v5895_v28, 5  ;;  %2195 = vst.msk [vmem:[#allocation3 + $0x90] sm:$0xff] %vm1735_vm5, %v2163_v24  ;;  %v2904_v19 = vadd.f32 %v9664_v22, %v2223_v61  ;;  %v2164_v1 = vadd.f32 %v13690_v40, %v1838_v45  ;;  %v2222_v56 = vld [vmem:[#allocation3 + $0x68] sm:$0xff]  ;;  %v13827_v46 = vpop.f32.mrb[49].mxu0  ;;  %v13842_v28 = vld [vmem:[#allocation2 + $0xbc] sm:$0x1] }
 0x3e9   : > { %v5883_v6 = vrot.slane %v5882_v51, 4  ;;  %v5864_v63 = vsel %vm11779_vm8, %v5859_v53, %v5863_v30  ;;  %v5892_v36 = vor.u32 %v5891_v38, %v5887_v17  ;;  %2193 = vst.msk [vmem:[#allocation3 + $0x80] sm:$0xff] %vm1735_vm5, %v2161_v7  ;;  %v2902_v15 = vadd.f32 %v2811_v54, %v2221_v62  ;;  %v13834_v45 = vpop.f32.mrb[50].mxu0  ;;  %v13861_v7 = vpop.f32.mrb[28].mxu1 }
 0x3ea   : > { %v5869_v4 = vrot.slane %v5868_v20, 4  ;;  %2936 = vst.msk [vmem:[#allocation3 + $0x70] sm:$0xff] %vm1735_vm5, %v2904_v19  ;;  %2196 = vst.msk [vmem:[#allocation3 + $0x98] sm:$0xff] %vm1735_vm5, %v2164_v1  ;;  %v2162_v40 = vadd.f32 %v13697_v58, %v1836_v35  ;;  %v2905_v47 = vadd.f32 %v9665_v50, %v2224_v9  ;;  %v2903_v61 = vadd.f32 %v2814_v23, %v2222_v56  ;;  %v13844_v24 = vpop.f32.mrb[51].mxu0  ;;  %v10664_v9 = vld [vmem:[#allocation2 + $0x18] sm:$0xf] }
 0x3eb   : > { %v5888_v22 = vsel %vm11779_vm8, %v5883_v6, %v5887_v17  ;;  %v5893_v38 = vrot.slane %v5892_v36, 4  ;;  %2934 = vst.msk [vmem:[#allocation3 + $0x60] sm:$0xff] %vm1735_vm5, %v2902_v15  ;;  %v9038_v54 = vcombine.low %v13816_v8, %v13820_v27  ;;  %v5948_v51 = vshrl.u32 %v13816_v8, 16  ;;  %v13865_v1 = vld [vmem:[#allocation2 + $0xc8] sm:$0x1]  ;;  %v13867_v56 = vpop.f32.mrb[29].mxu1 }
 0x3ec   : > { %v5874_v30 = vsel %vm11779_vm8, %v5869_v4, %v5873_v21  ;;  %2194 = vst.msk [vmem:[#allocation3 + $0x88] sm:$0xff] %vm1735_vm5, %v2162_v40  ;;  %2937 = vst.msk [vmem:[#allocation3 + $0x78] sm:$0xff] %vm1735_vm5, %v2905_v47  ;;  %v5902_v21 = vrot.slane %v5900_v29, 4  ;;  %v5905_v53 = vrot.slane %v5903_v5, 5  ;;  %v5909_v20 = vshll.u32 %v13746_v13, 16  ;;  %v1841_v15 = vld [vmem:[#allocation3 + $0xb0] sm:$0xff] }
 0x3ed   : > { %v9066_v58 = vcombine.low %v5864_v63, %v5874_v30  ;;  %2935 = vst.msk [vmem:[#allocation3 + $0x68] sm:$0xff] %vm1735_vm5, %v2903_v61  ;;  %v5898_v62 = vsel %vm11779_vm8, %v5893_v38, %v5897_v33  ;;  %9849 = vmatmul.mubr.msk.bf16.gmra.mrb[124].mxu1 %vm1735_vm5, %v9038_v54  ;;  %v5915_v17 = vrot.slane %v5913_v32, 4  ;;  %v5919_v29 = vshll.u32 %v13842_v28, 16  ;;  %v10665_v33 = vld [vmem:[#allocation2 + $0x1c] sm:$0xf]  ;;  %v13871_v40 = vpop.f32.mrb[30].mxu1 }
 0x3ee   : > { %v9067_v35 = vcombine.low %v5888_v22, %v5898_v62  ;;  %v9087_v6 = vrot.slane %v10664_v9, 9  ;;  %v6347_v19 = vrot.slane %v10665_v33, 5  ;;  %v5906_v5 = vor.u32 %v5905_v53, %v5902_v21  ;;  %v10666_v4 = vld [vmem:[#allocation2 + $0x20] sm:$0x1]  ;;  %v13878_v38 = vpop.f32.mrb[31].mxu1  ;;  %v1839_v62 = vld [vmem:[#allocation3 + $0xa0] sm:$0xff] }
 0x3ef   : > { %9875 = vmatmul.mubr.msk.bf16.gmra.mrb[148].mxu0 %vm1735_vm5, %v9066_v58  ;;  %v5911_v63 = vrot.slane %v5909_v20, 5  ;;  %v6350_v36 = vrot.slane %v10666_v4, 5  ;;  %v5926_v32 = vrot.slane %v5924_v55, 4  ;;  %v5921_v22 = vrot.slane %v5919_v29, 5  ;;  %v2227_v53 = vld [vmem:[#allocation3 + $0x90] sm:$0xff]  ;;  %v13887_v33 = vpop.f32.mrb[52].mxu0 }
 0x3f0   : > { %9878 = vmatprep.mubr.msk.bf16.mxu0 %vm1735_vm5, %v9067_v35  ;;  %v6348_v47 = vsel %vm12481_vm12, %v9087_v6, %v6347_v19  ;;  %v6349_v61 = vrot.slane %v6347_v19, 4  ;;  %v5929_v30 = vrot.slane %v5927_v12, 5  ;;  %v5907_v54 = vrot.slane %v5906_v5, 4  ;;  %v1842_v12 = vld [vmem:[#allocation3 + $0xb8] sm:$0xff]  ;;  %v2225_v6 = vld [vmem:[#allocation3 + $0x80] sm:$0xff]  ;;  %v1840_v4 = vld [vmem:[#allocation3 + $0xa8] sm:$0xff] }
 0x3f1   : > { %v5916_v58 = vor.u32 %v5915_v17, %v5911_v63  ;;  %v5933_v21 = vshll.u32 %v13753_v3, 16  ;;  %v5939_v55 = vrot.slane %v5937_v39, 4  ;;  %v5943_v29 = vshll.u32 %v13865_v1, 16  ;;  %v2228_v23 = vld [vmem:[#allocation3 + $0x98] sm:$0xff]  ;;  %v13891_v50 = vpop.f32.mrb[53].mxu0 }
 0x3f2   : > { %v6351_v20 = vsel %vm12481_vm12, %v6349_v61, %v6350_v36  ;;  %v5930_v35 = vor.u32 %v5929_v30, %v5926_v32  ;;  %v2167_v9 = vadd.f32 %v13739_v25, %v1841_v15  ;;  %v5912_v17 = vsel %vm11779_vm8, %v5907_v54, %v5911_v63  ;;  %v13896_v30 = vpop.f32.mrb[54].mxu0 }
 0x3f3   : > { %v5917_v19 = vrot.slane %v5916_v58, 4  ;;  %v9103_v5 = vcombine.low %v6348_v47, %v6351_v20  ;;  %v5935_v39 = vrot.slane %v5933_v21, 5  ;;  %v5945_v32 = vrot.slane %v5943_v29, 5  ;;  %v2226_v61 = vld [vmem:[#allocation3 + $0x88] sm:$0xff]  ;;  %v13903_v21 = vpop.f32.mrb[55].mxu0 }
 0x3f4   : > { %v5931_v36 = vrot.slane %v5930_v35, 4  ;;  %2199 = vst.msk [vmem:[#allocation3 + $0xb0] sm:$0xff] %vm1735_vm5, %v2167_v9  ;;  %v2165_v25 = vadd.f32 %v13742_v57, %v1839_v62  ;;  %v2908_v15 = vadd.f32 %v13822_v2, %v2227_v53  ;;  %v2168_v54 = vadd.f32 %v13748_v31, %v1842_v12  ;;  %v10668_v53 = vld [vmem:[#allocation2 + $0x28] sm:$0xf]  ;;  %v10671_v9 = vld [vmem:[#allocation2 + $0x34] sm:$0xf] }
 0x3f5   : > { %v5922_v63 = vsel %vm11779_vm8, %v5917_v19, %v5921_v22  ;;  %9888 = vmatprep.mubr.msk.bf16.mxu1 %vm1735_vm5, %v9103_v5  ;;  %v5940_v47 = vor.u32 %v5939_v55, %v5935_v39  ;;  %v2906_v58 = vadd.f32 %v13827_v46, %v2225_v6  ;;  %v2166_v2 = vadd.f32 %v13755_v52, %v1840_v4  ;;  %v10667_v46 = vld [vmem:[#allocation2 + $0x24] sm:$0xf]  ;;  %v10669_v52 = vld [vmem:[#allocation2 + $0x2c] sm:$0x1]  ;;  %v10672_v6 = vld [vmem:[#allocation2 + $0x38] sm:$0x1] }
 0x3f6   : > { %v9068_v20 = vcombine.low %v5912_v17, %v5922_v63  ;;  %v5936_v57 = vsel %vm11779_vm8, %v5931_v36, %v5935_v39  ;;  %2197 = vst.msk [vmem:[#allocation3 + $0xa0] sm:$0xff] %vm1735_vm5, %v2165_v25  ;;  %2940 = vst.msk [vmem:[#allocation3 + $0x90] sm:$0xff] %vm1735_vm5, %v2908_v15  ;;  %v2909_v22 = vadd.f32 %v13834_v45, %v2228_v23  ;;  %v9088_v55 = vrot.slane %v10667_v46, 9  ;;  %v10670_v45 = vld [vmem:[#allocation2 + $0x30] sm:$0xf]  ;;  %v1845_v36 = vld [vmem:[#allocation3 + $0xd0] sm:$0xff] }
 0x3f7   : > { %v5941_v62 = vrot.slane %v5940_v47, 4  ;;  %2200 = vst.msk [vmem:[#allocation3 + $0xb8] sm:$0xff] %vm1735_vm5, %v2168_v54  ;;  %2938 = vst.msk [vmem:[#allocation3 + $0x80] sm:$0xff] %vm1735_vm5, %v2906_v58  ;;  %v2907_v31 = vadd.f32 %v13844_v24, %v2226_v61  ;;  %v6354_v35 = vrot.slane %v10668_v53, 5  ;;  %v6357_v29 = vrot.slane %v10669_v52, 5  ;;  %v1843_v54 = vld [vmem:[#allocation3 + $0xc0] sm:$0xff] }
 0x3f8   : > { %9879 = vmatmul.mubr.msk.bf16.gmra.mrb[152].mxu0 %vm1735_vm5, %v9068_v20  ;;  %2198 = vst.msk [vmem:[#allocation3 + $0xa8] sm:$0xff] %vm1735_vm5, %v2166_v2  ;;  %2941 = vst.msk [vmem:[#allocation3 + $0x98] sm:$0xff] %vm1735_vm5, %v2909_v22  ;;  %v9089_v23 = vrot.slane %v10670_v45, 9  ;;  %v6361_v12 = vrot.slane %v10671_v9, 5  ;;  %v6364_v17 = vrot.slane %v10672_v6, 5  ;;  %v5950_v4 = vrot.slane %v5948_v51, 4 }
 0x3f9   : > { %v13917_v19 = vld [vmem:[#allocation2 + $0xd4] sm:$0x1]  ;;  %v5946_v24 = vsel %vm11779_vm8, %v5941_v62, %v5945_v32  ;;  %2939 = vst.msk [vmem:[#allocation3 + $0x88] sm:$0xff] %vm1735_vm5, %v2907_v31  ;;  %v6355_v5 = vsel %vm12481_vm12, %v9088_v55, %v6354_v35  ;;  %v6356_v39 = vrot.slane %v6354_v35, 4  ;;  %v15436_v63 = vshll.u32 %v13816_v8, 16  ;;  %v13930_v58 = vpop.f32.mrb[56].mxu0 }
 0x3fa   : > { %v9069_v25 = vcombine.low %v5936_v57, %v5946_v24  ;;  %v6362_v15 = vsel %vm12481_vm12, %v9089_v23, %v6361_v12  ;;  %v6363_v61 = vrot.slane %v6361_v12, 4  ;;  %v1846_v32 = vld [vmem:[#allocation3 + $0xd8] sm:$0xff]  ;;  %v13932_v20 = vpop.f32.mrb[32].mxu1  ;;  %v5957_v51 = vshll.u32 %v13820_v27, 16  ;;  %v13940_v46 = vpop.f32.mrb[57].mxu0  ;;  %v1844_v45 = vld [vmem:[#allocation3 + $0xc8] sm:$0xff] }
 0x3fb   : > { %v5953_v47 = vrot.slane %v15436_v63, 5  ;;  %v6358_v2 = vsel %vm12481_vm12, %v6356_v39, %v6357_v29  ;;  %v15437_v57 = vshrl.u32 %v13820_v27, 16  ;;  %v5967_v62 = vshll.u32 %v13917_v19, 16  ;;  %v2231_v31 = vld [vmem:[#allocation3 + $0xb0] sm:$0xff]  ;;  %v13942_v55 = vpop.f32.mrb[33].mxu1  ;;  %v13948_v23 = vpop.f32.mrb[58].mxu0 }
 0x3fc   : > { %9882 = vmatprep.mubr.msk.bf16.mxu0 %vm1735_vm5, %v9069_v25  ;;  %v9104_v53 = vcombine.low %v6355_v5, %v6358_v2  ;;  %v6365_v35 = vsel %vm12481_vm12, %v6363_v61, %v6364_v17  ;;  %v2171_v29 = vadd.f32 %v13794_v0, %v1845_v36  ;;  %v13950_v9 = vpop.f32.mrb[34].mxu1  ;;  %v5959_v6 = vrot.slane %v5957_v51, 5  ;;  %v13953_v63 = vpop.f32.mrb[59].mxu0  ;;  %v1849_v2 = vld [vmem:[#allocation3 + $0xf0] sm:$0xff]  ;;  %v1847_v51 = vld [vmem:[#allocation3 + $0xe0] sm:$0xff] }
 0x3fd   : > { %v5963_v22 = vrot.slane %v15437_v57, 4  ;;  %v5954_v52 = vor.u32 %v5953_v47, %v5950_v4  ;;  %v9105_v12 = vcombine.low %v6362_v15, %v6365_v35  ;;  %v2169_v24 = vadd.f32 %v13803_v34, %v1843_v54  ;;  %v2229_v39 = vld [vmem:[#allocation3 + $0xa0] sm:$0xff]  ;;  %v13955_v25 = vpop.f32.mrb[35].mxu1 }
 0x3fe   : > { %9889 = vmatmul.mubr.msk.bf16.vlgmr.msra.gmra.mrb[128].mxu1 %vm1735_vm5, %v9104_v53  ;;  %2203 = vst.msk [vmem:[#allocation3 + $0xd0] sm:$0xff] %vm1735_vm5, %v2171_v29  ;;  %v2912_v0 = vadd.f32 %v13887_v33, %v2231_v31  ;;  %v2172_v5 = vadd.f32 %v13809_v11, %v1846_v32  ;;  %v2910_v4 = vadd.f32 %v13891_v50, %v2229_v39  ;;  %v2232_v36 = vld [vmem:[#allocation3 + $0xb8] sm:$0xff]  ;;  %v5969_v15 = vrot.slane %v5967_v62, 5  ;;  %v10673_v50 = vld [vmem:[#allocation2 + $0x3c] sm:$0xf] }
 0x3ff   : > { %v5955_v17 = vrot.slane %v5954_v52, 4  ;;  %9892 = vmatprep.mubr.msk.bf16.mxu1 %vm1735_vm5, %v9105_v12  ;;  %v5964_v34 = vor.u32 %v5963_v22, %v5959_v6  ;;  %2201 = vst.msk [vmem:[#allocation3 + $0xc0] sm:$0xff] %vm1735_vm5, %v2169_v24  ;;  %v2170_v61 = vadd.f32 %v13813_v44, %v1844_v45  ;;  %v2913_v47 = vadd.f32 %v13896_v30, %v2232_v36  ;;  %v2230_v54 = vld [vmem:[#allocation3 + $0xa8] sm:$0xff]  ;;  %v1850_v22 = vld [vmem:[#allocation3 + $0xf8] sm:$0xff]  ;;  %v10676_v53 = vld [vmem:[#allocation2 + $0x4c] sm:$0xf] }
 0x400   : > { %2944 = vst.msk [vmem:[#allocation3 + $0xb0] sm:$0xff] %vm1735_vm5, %v2912_v0  ;;  %2204 = vst.msk [vmem:[#allocation3 + $0xd8] sm:$0xff] %vm1735_vm5, %v2172_v5  ;;  %v2911_v11 = vadd.f32 %v13903_v21, %v2230_v54  ;;  %v9090_v33 = vrot.slane %v10673_v50, 9  ;;  %v10674_v32 = vld [vmem:[#allocation2 + $0x40] sm:$0xf]  ;;  %v6375_v35 = vrot.slane %v10676_v53, 5  ;;  %v2175_v12 = vadd.f32 %v13861_v7, %v1849_v2 }
 0x401   : > { %2942 = vst.msk [vmem:[#allocation3 + $0xa0] sm:$0xff] %vm1735_vm5, %v2910_v4  ;;  %v6368_v57 = vrot.slane %v10674_v32, 5  ;;  %v5960_v44 = vsel %vm11779_vm8, %v5955_v17, %v5959_v6  ;;  %v5965_v30 = vrot.slane %v5964_v34, 4  ;;  %2202 = vst.msk [vmem:[#allocation3 + $0xc8] sm:$0xff] %vm1735_vm5, %v2170_v61  ;;  %v10675_v62 = vld [vmem:[#allocation2 + $0x44] sm:$0x1]  ;;  %v2173_v24 = vadd.f32 %v13867_v56, %v1847_v51 }
 0x402   : > { %2945 = vst.msk [vmem:[#allocation3 + $0xb8] sm:$0xff] %vm1735_vm5, %v2913_v47  ;;  %v6371_v31 = vrot.slane %v10675_v62, 5  ;;  %v1848_v52 = vld [vmem:[#allocation3 + $0xe8] sm:$0xff]  ;;  %2943 = vst.msk [vmem:[#allocation3 + $0xa8] sm:$0xff] %vm1735_vm5, %v2911_v11  ;;  %v10677_v29 = vld [vmem:[#allocation2 + $0x48] sm:$0xf]  ;;  %v2176_v5 = vadd.f32 %v13871_v40, %v1850_v22 }
 0x403   : > { %v6370_v21 = vrot.slane %v6368_v57, 4  ;;  %v9091_v45 = vrot.slane %v10677_v29, 9  ;;  %v5970_v6 = vsel %vm11779_vm8, %v5965_v30, %v5969_v15  ;;  %v6377_v39 = vrot.slane %v6375_v35, 4  ;;  %v10678_v17 = vld [vmem:[#allocation2 + $0x50] sm:$0x1]  ;;  %v13980_v4 = vpop.f32.mrb[60].mxu0 }
 0x404   : > { %v6378_v0 = vrot.slane %v10678_v17, 5  ;;  %v9070_v36 = vcombine.low %v5960_v44, %v5970_v6  ;;  %v6369_v34 = vsel %vm12481_vm12, %v9090_v33, %v6368_v57  ;;  %2207 = vst.msk [vmem:[#allocation3 + $0xf0] sm:$0xff] %vm1735_vm5, %v2175_v12  ;;  %2205 = vst.msk [vmem:[#allocation3 + $0xe0] sm:$0xff] %vm1735_vm5, %v2173_v24  ;;  %v2174_v43 = vadd.f32 %v13878_v38, %v1848_v52  ;;  %v2875_v7 = vpop.f32.mrb[61].mxu0  ;;  %v13989_v56 = vpop.f32.mrb[36].mxu1  ;;  %v2957_v17 = vld [vmem:[#allocation3 + $0x18] sm:$0xff] }
 0x405   : > { %v6372_v61 = vsel %vm12481_vm12, %v6370_v21, %v6371_v31  ;;  %v6376_v40 = vsel %vm12481_vm12, %v9091_v45, %v6375_v35  ;;  %v2235_v54 = vld [vmem:[#allocation3 + $0xd0] sm:$0xff]  ;;  %2208 = vst.msk [vmem:[#allocation3 + $0xf8] sm:$0xff] %vm1735_vm5, %v2176_v5  ;;  %v10679_v2 = vld [vmem:[#allocation2 + $0x58] sm:$0xf]  ;;  %v9681_v11 = vpop.f32.mrb[62].mxu0  ;;  %v13996_v50 = vpop.f32.mrb[37].mxu1 }
 0x406   : > { %v9106_v15 = vcombine.low %v6369_v34, %v6372_v61  ;;  %v6379_v47 = vsel %vm12481_vm12, %v6377_v39, %v6378_v0  ;;  %v6382_v51 = vrot.slane %v10679_v2, 5  ;;  %9883 = vmatmul.mubr.msk.bf16.gmra.mrb[156].mxu0 %vm1735_vm5, %v9070_v36  ;;  %v2916_v33 = vadd.f32 %v13930_v58, %v2235_v54  ;;  %v2233_v32 = vld [vmem:[#allocation3 + $0xc0] sm:$0xff]  ;;  %2206 = vst.msk [vmem:[#allocation3 + $0xe8] sm:$0xff] %vm1735_vm5, %v2174_v43  ;;  %v10680_v57 = vld [vmem:[#allocation2 + $0x64] sm:$0xf]  ;;  %v14001_v44 = vpop.f32.mrb[63].mxu0 }
 0x407   : > { %v9107_v38 = vcombine.low %v6376_v40, %v6379_v47  ;;  %v6389_v22 = vrot.slane %v10680_v57, 5  ;;  %v14003_v30 = vpop.f32.mrb[38].mxu1  ;;  %v2914_v62 = vadd.f32 %v13940_v46, %v2233_v32  ;;  %v2236_v31 = vld [vmem:[#allocation3 + $0xd8] sm:$0xff]  ;;  %v2956_v21 = vld [vmem:[#allocation3 + $0x10] sm:$0xff]  ;;  %v10682_v12 = vld [vmem:[#allocation2 + $0x5c] sm:$0x1]  ;;  %v3382_v34 = vadd.f32 %v13950_v9, %v2957_v17 }
 0x408   : > { %9893 = vmatmul.mubr.msk.bf16.gmra.mrb[132].mxu1 %vm1735_vm5, %v9106_v15  ;;  %v10681_v53 = vld [vmem:[#allocation2 + $0x54] sm:$0xf]  ;;  %v6384_v52 = vrot.slane %v6382_v51, 4  ;;  %v14007_v29 = vpop.f32.mrb[39].mxu1  ;;  %2948 = vst.msk [vmem:[#allocation3 + $0xd0] sm:$0xff] %vm1735_vm5, %v2916_v33  ;;  %v2917_v58 = vadd.f32 %v13948_v23, %v2236_v31  ;;  %v2234_v45 = vld [vmem:[#allocation3 + $0xc8] sm:$0xff]  ;;  %v3381_v39 = vadd.f32 %v13932_v20, %v2956_v21 }
 0x409   : > { %v9092_v35 = vrot.slane %v10681_v53, 9  ;;  %9896 = vmatprep.mubr.msk.bf16.mxu1 %vm1735_vm5, %v9107_v38  ;;  %v6385_v24 = vrot.slane %v10682_v12, 5  ;;  %v6391_v6 = vrot.slane %v6389_v22, 4  ;;  %v2954_v46 = vld [vmem:[#allocation3] sm:$0xff]  ;;  %2946 = vst.msk [vmem:[#allocation3 + $0xc0] sm:$0xff] %vm1735_vm5, %v2914_v62  ;;  %v2915_v0 = vadd.f32 %v13953_v63, %v2234_v45  ;;  %v2955_v61 = vld [vmem:[#allocation3 + $0x8] sm:$0xff] }
 0x40a   : > { %v6392_v5 = vrot.slane %v13552_v42, 5  ;;  %v3379_v36 = vadd.f32 %v13942_v55, %v2954_v46  ;;  %2949 = vst.msk [vmem:[#allocation3 + $0xd8] sm:$0xff] %vm1735_vm5, %v2917_v58  ;;  %v10683_v43 = vld [vmem:[#allocation2 + $0x60] sm:$0xf]  ;;  %3413 = vst.msk [vmem:[#allocation3 + $0x10] sm:$0xff] %vm1735_vm5, %v3381_v39  ;;  %v3380_v15 = vadd.f32 %v13955_v25, %v2955_v61  ;;  %v9720_v54 = vpop.f32.mrb[64].mxu0 }
 0x40b   : > { %v6386_v23 = vsel %vm12481_vm12, %v6384_v52, %v6385_v24  ;;  %v9093_v20 = vrot.slane %v10683_v43, 9  ;;  %2947 = vst.msk [vmem:[#allocation3 + $0xc8] sm:$0xff] %vm1735_vm5, %v2915_v0  ;;  %v6383_v42 = vsel %vm12481_vm12, %v9092_v35, %v6382_v51  ;;  %v2239_v9 = vld [vmem:[#allocation3 + $0xf0] sm:$0xff]  ;;  %v2237_v63 = vld [vmem:[#allocation3 + $0xe0] sm:$0xff]  ;;  %3414 = vst.msk [vmem:[#allocation3 + $0x18] sm:$0xff] %vm1735_vm5, %v3382_v34  ;;  %v3694_v62 = vpop.f32.mrb[65].mxu0 }
 0x40c   : > { %v6393_v55 = vsel %vm12481_vm12, %v6391_v6, %v6392_v5  ;;  %3411 = vst.msk [vmem:[#allocation3] sm:$0xff] %vm1735_vm5, %v3379_v36  ;;  %v10684_v40 = vld [vmem:[#allocation2 + $0x70] sm:$0xf]  ;;  %v2920_v2 = vadd.f32 %v13980_v4, %v2239_v9  ;;  %v2918_v38 = vadd.f32 %v2875_v7, %v2237_v63  ;;  %3412 = vst.msk [vmem:[#allocation3 + $0x8] sm:$0xff] %vm1735_vm5, %v3380_v15  ;;  %v14034_v51 = vld [vmem:[#allocation2 + $0x7c] sm:$0xf] }
 0x40d   : > { %v6396_v47 = vrot.slane %v10684_v40, 5  ;;  %v6390_v25 = vsel %vm12481_vm12, %v9093_v20, %v6389_v22  ;;  %v2240_v33 = vld [vmem:[#allocation3 + $0xf8] sm:$0xff]  ;;  %v6403_v32 = vrot.slane %v14034_v51, 5  ;;  %v2960_v57 = vld [vmem:[#allocation3 + $0x30] sm:$0xff]  ;;  %v9694_v31 = vpop.f32.mrb[40].mxu1  ;;  %v9108_v53 = vcombine.low %v6383_v42, %v6386_v23  ;;  %v2238_v52 = vld [vmem:[#allocation3 + $0xe8] sm:$0xff] }
 0x40e   : > { %v2921_v35 = vadd.f32 %v9681_v11, %v2240_v33  ;;  %v3385_v58 = vadd.f32 %v13989_v56, %v2960_v57  ;;  %v2958_v22 = vld [vmem:[#allocation3 + $0x20] sm:$0xff]  ;;  %v9721_v45 = vpop.f32.mrb[66].mxu0  ;;  %v3284_v4 = vpop.f32.mrb[41].mxu1  ;;  %v9109_v7 = vcombine.low %v6390_v25, %v6393_v55  ;;  %2952 = vst.msk [vmem:[#allocation3 + $0xf0] sm:$0xff] %vm1735_vm5, %v2920_v2  ;;  %2950 = vst.msk [vmem:[#allocation3 + $0xe0] sm:$0xff] %vm1735_vm5, %v2918_v38  ;;  %v2961_v11 = vld [vmem:[#allocation3 + $0x38] sm:$0xff] }
 0x40f   : > { %v6398_v21 = vrot.slane %v6396_v47, 4  ;;  %v2919_v12 = vadd.f32 %v14001_v44, %v2238_v52  ;;  %v6405_v24 = vrot.slane %v6403_v32, 4  ;;  %v3383_v6 = vadd.f32 %v13996_v50, %v2958_v22  ;;  %v2959_v39 = vld [vmem:[#allocation3 + $0x28] sm:$0xff]  ;;  %v3697_v46 = vpop.f32.mrb[67].mxu0  ;;  %v9695_v17 = vpop.f32.mrb[42].mxu1  ;;  %v2964_v42 = vld [vmem:[#allocation3 + $0x50] sm:$0xff] }
 0x410   : > { %9897 = vmatmul.mubr.msk.bf16.gmra.mrb[136].mxu1 %vm1735_vm5, %v9108_v53  ;;  %2953 = vst.msk [vmem:[#allocation3 + $0xf8] sm:$0xff] %vm1735_vm5, %v2921_v35  ;;  %v10686_v56 = vld [vmem:[#allocation2 + $0x6c] sm:$0xf]  ;;  %v6399_v5 = vrot.slane %v13617_v16, 5  ;;  %3417 = vst.msk [vmem:[#allocation3 + $0x30] sm:$0xff] %vm1735_vm5, %v3385_v58  ;;  %v3386_v44 = vadd.f32 %v14003_v30, %v2961_v11  ;;  %v3384_v36 = vadd.f32 %v14007_v29, %v2959_v39  ;;  %v3287_v34 = vpop.f32.mrb[43].mxu1 }
 0x411   : > { %v9094_v0 = vrot.slane %v10686_v56, 9  ;;  %9900 = vmatprep.mubr.msk.bf16.mxu1 %vm1735_vm5, %v9109_v7  ;;  %2951 = vst.msk [vmem:[#allocation3 + $0xe8] sm:$0xff] %vm1735_vm5, %v2919_v12  ;;  %v6406_v50 = vrot.slane %v13636_v26, 5  ;;  %3415 = vst.msk [vmem:[#allocation3 + $0x20] sm:$0xff] %vm1735_vm5, %v3383_v6  ;;  %v14054_v61 = vld [vmem:[#allocation2 + $0x88] sm:$0xf]  ;;  %v3389_v25 = vadd.f32 %v9694_v31, %v2964_v42 }
 0x412   : > { %v6410_v23 = vrot.slane %v14054_v61, 5  ;;  %v6400_v30 = vsel %vm12481_vm12, %v6398_v21, %v6399_v5  ;;  %v10688_v29 = vld [vmem:[#allocation2 + $0x78] sm:$0xf]  ;;  %v3497_v20 = vld [vmem:[#allocation3 + $0x10] sm:$0xff]  ;;  %3418 = vst.msk [vmem:[#allocation3 + $0x38] sm:$0xff] %vm1735_vm5, %v3386_v44  ;;  %3416 = vst.msk [vmem:[#allocation3 + $0x28] sm:$0xff] %vm1735_vm5, %v3384_v36 }
 0x413   : > { %v6397_v16 = vsel %vm12481_vm12, %v9094_v0, %v6396_v47  ;;  %v9095_v43 = vrot.slane %v10688_v29, 9  ;;  %v14063_v26 = vld [vmem:[#allocation2 + $0x94] sm:$0xf]  ;;  %v6407_v55 = vsel %vm12481_vm12, %v6405_v24, %v6406_v50  ;;  %v3823_v9 = vadd.f32 %v9720_v54, %v3497_v20  ;;  %v3495_v63 = vld [vmem:[#allocation3] sm:$0xff]  ;;  %v3496_v33 = vld [vmem:[#allocation3 + $0x8] sm:$0xff]  ;;  %v9724_v52 = vpop.f32.mrb[68].mxu0 }
 0x414   : > { %v6417_v15 = vrot.slane %v14063_v26, 5  ;;  %v3498_v40 = vld [vmem:[#allocation3 + $0x18] sm:$0xff]  ;;  %v6412_v47 = vrot.slane %v6410_v23, 4  ;;  %v3821_v2 = vadd.f32 %v3694_v62, %v3495_v63  ;;  %v6413_v57 = vrot.slane %v13706_v49, 5  ;;  %v2962_v35 = vld [vmem:[#allocation3 + $0x40] sm:$0xff]  ;;  %3421 = vst.msk [vmem:[#allocation3 + $0x50] sm:$0xff] %vm1735_vm5, %v3389_v25 }
 0x415   : > { %v3824_v38 = vadd.f32 %v9721_v45, %v3498_v40  ;;  %v2965_v21 = vld [vmem:[#allocation3 + $0x58] sm:$0xff]  ;;  %3855 = vst.msk [vmem:[#allocation3 + $0x10] sm:$0xff] %vm1735_vm5, %v3823_v9  ;;  %v3822_v54 = vadd.f32 %v3697_v46, %v3496_v33  ;;  %v6420_v58 = vrot.slane %v13715_v41, 5  ;;  %v3387_v22 = vadd.f32 %v3284_v4, %v2962_v35  ;;  %v3710_v62 = vpop.f32.mrb[69].mxu0  ;;  %v2963_v45 = vld [vmem:[#allocation3 + $0x48] sm:$0xff]  ;;  %v9698_v7 = vpop.f32.mrb[44].mxu1 }
 0x416   : > { %v6419_v53 = vrot.slane %v6417_v15, 4  ;;  %v3390_v31 = vadd.f32 %v9695_v17, %v2965_v21  ;;  %v9110_v12 = vcombine.low %v6397_v16, %v6400_v30  ;;  %v6404_v49 = vsel %vm12481_vm12, %v9095_v43, %v6403_v32  ;;  %3853 = vst.msk [vmem:[#allocation3] sm:$0xff] %vm1735_vm5, %v3821_v2  ;;  %v10690_v24 = vld [vmem:[#allocation2 + $0x84] sm:$0xf]  ;;  %v9725_v11 = vpop.f32.mrb[70].mxu0  ;;  %v3300_v39 = vpop.f32.mrb[45].mxu1 }
 0x417   : > { %3856 = vst.msk [vmem:[#allocation3 + $0x18] sm:$0xff] %vm1735_vm5, %v3824_v38  ;;  %v9096_v6 = vrot.slane %v10690_v24, 9  ;;  %v3388_v41 = vadd.f32 %v3287_v34, %v2963_v45  ;;  %v9111_v4 = vcombine.low %v6404_v49, %v6407_v55  ;;  %3854 = vst.msk [vmem:[#allocation3 + $0x8] sm:$0xff] %vm1735_vm5, %v3822_v54  ;;  %v14085_v46 = vsel %vm12481_vm12, %v6412_v47, %v6413_v57  ;;  %v10691_v51 = vld [vmem:[#allocation2 + $0x90] sm:$0xf]  ;;  %v3501_v56 = vld [vmem:[#allocation3 + $0x30] sm:$0xff] }
 0x418   : > { %v9097_v17 = vrot.slane %v10691_v51, 9  ;;  %v14089_v32 = vsel %vm12481_vm12, %v6419_v53, %v6420_v58  ;;  %3419 = vst.msk [vmem:[#allocation3 + $0x40] sm:$0xff] %vm1735_vm5, %v3387_v22  ;;  %3422 = vst.msk [vmem:[#allocation3 + $0x58] sm:$0xff] %vm1735_vm5, %v3390_v31  ;;  %v3713_v0 = vpop.f32.mrb[71].mxu0  ;;  %v2968_v5 = vld [vmem:[#allocation3 + $0x70] sm:$0xff]  ;;  %v9699_v44 = vpop.f32.mrb[46].mxu1  ;;  %9901 = vmatmul.mubr.msk.bf16.gmra.mrb[140].mxu1 %vm1735_vm5, %v9110_v12  ;;  %v3827_v36 = vadd.f32 %v9724_v52, %v3501_v56 }
 0x419   : > { %v3499_v34 = vld [vmem:[#allocation3 + $0x20] sm:$0xff]  ;;  %3420 = vst.msk [vmem:[#allocation3 + $0x48] sm:$0xff] %vm1735_vm5, %v3388_v41  ;;  %v6424_v50 = vrot.slane %v13667_v14, 5  ;;  %v6431_v16 = vrot.slane %v13677_v37, 5  ;;  %v3393_v30 = vadd.f32 %v9698_v7, %v2968_v5  ;;  %v3303_v43 = vpop.f32.mrb[47].mxu1  ;;  %9904 = vmatprep.mubr.msk.bf16.mxu1 %vm1735_vm5, %v9111_v4  ;;  %v6411_v20 = vsel %vm12481_vm12, %v9096_v6, %v6410_v23  ;;  %v3502_v55 = vld [vmem:[#allocation3 + $0x38] sm:$0xff] }
 0x41a   : > { %v2966_v29 = vld [vmem:[#allocation3 + $0x60] sm:$0xff]  ;;  %v3825_v42 = vadd.f32 %v3710_v62, %v3499_v34  ;;  %v3500_v9 = vld [vmem:[#allocation3 + $0x28] sm:$0xff]  ;;  %v9112_v40 = vcombine.low %v6411_v20, %v14085_v46  ;;  %v6418_v47 = vsel %vm12481_vm12, %v9097_v17, %v6417_v15  ;;  %3859 = vst.msk [vmem:[#allocation3 + $0x30] sm:$0xff] %vm1735_vm5, %v3827_v36  ;;  %v3828_v25 = vadd.f32 %v9725_v11, %v3502_v55  ;;  %v2969_v61 = vld [vmem:[#allocation3 + $0x78] sm:$0xff]  ;;  %v9728_v52 = vpop.f32.mrb[72].mxu0  ;;  %v9702_v12 = vpop.f32.mrb[48].mxu1 }
 0x41b   : > { %v3391_v63 = vadd.f32 %v3300_v39, %v2966_v29  ;;  %v3826_v2 = vadd.f32 %v3713_v0, %v3500_v9  ;;  %3425 = vst.msk [vmem:[#allocation3 + $0x70] sm:$0xff] %vm1735_vm5, %v3393_v30  ;;  %v2967_v38 = vld [vmem:[#allocation3 + $0x68] sm:$0xff]  ;;  %v9113_v23 = vcombine.low %v6418_v47, %v14089_v32  ;;  %v6427_v33 = vrot.slane %v13777_v59, 5  ;;  %v3505_v35 = vld [vmem:[#allocation3 + $0x50] sm:$0xff]  ;;  %v3726_v22 = vpop.f32.mrb[73].mxu0  ;;  %v3316_v39 = vpop.f32.mrb[49].mxu1 }
 0x41c   : > { %3857 = vst.msk [vmem:[#allocation3 + $0x20] sm:$0xff] %vm1735_vm5, %v3825_v42  ;;  %v3394_v26 = vadd.f32 %v9699_v44, %v2969_v61  ;;  %v3392_v57 = vadd.f32 %v3303_v43, %v2967_v38  ;;  %3860 = vst.msk [vmem:[#allocation3 + $0x38] sm:$0xff] %vm1735_vm5, %v3828_v25  ;;  %v6426_v15 = vrot.slane %v6424_v50, 4  ;;  %v14119_v53 = vrot.slane %v6431_v16, 4  ;;  %v2972_v7 = vld [vmem:[#allocation3 + $0x90] sm:$0xff]  ;;  %v9729_v6 = vpop.f32.mrb[74].mxu0 }
 0x41d   : > { %3423 = vst.msk [vmem:[#allocation3 + $0x60] sm:$0xff] %vm1735_vm5, %v3391_v63  ;;  %3858 = vst.msk [vmem:[#allocation3 + $0x28] sm:$0xff] %vm1735_vm5, %v3826_v2  ;;  %v9100_v21 = vrot.slane %v13737_v60, 9  ;;  %v6438_v54 = vrot.slane %v13746_v13, 5  ;;  %v3831_v58 = vadd.f32 %v9728_v52, %v3505_v35  ;;  %v6441_v31 = vrot.slane %v13842_v28, 5  ;;  %v2970_v17 = vld [vmem:[#allocation3 + $0x80] sm:$0xff] }
 0x41e   : > { %3426 = vst.msk [vmem:[#allocation3 + $0x78] sm:$0xff] %vm1735_vm5, %v3394_v26  ;;  %3424 = vst.msk [vmem:[#allocation3 + $0x68] sm:$0xff] %vm1735_vm5, %v3392_v57  ;;  %v9101_v62 = vrot.slane %v13762_v48, 9  ;;  %v6445_v45 = vrot.slane %v13753_v3, 5  ;;  %v6448_v41 = vrot.slane %v13865_v1, 5  ;;  %v3397_v11 = vadd.f32 %v9702_v12, %v2972_v7  ;;  %v3729_v3 = vpop.f32.mrb[75].mxu0 }
 0x41f   : > { %v3503_v49 = vld [vmem:[#allocation3 + $0x40] sm:$0xff]  ;;  %v3506_v24 = vld [vmem:[#allocation3 + $0x58] sm:$0xff]  ;;  %v14130_v60 = vsel %vm12481_vm12, %v9100_v21, %v6438_v54  ;;  %v6440_v13 = vrot.slane %v6438_v54, 4  ;;  %3863 = vst.msk [vmem:[#allocation3 + $0x50] sm:$0xff] %vm1735_vm5, %v3831_v58  ;;  %v9703_v56 = vpop.f32.mrb[50].mxu1  ;;  %v3395_v5 = vadd.f32 %v3316_v39, %v2970_v17  ;;  %v2971_v36 = vld [vmem:[#allocation3 + $0x88] sm:$0xff] }
 0x420   : > { %v3829_v28 = vadd.f32 %v3726_v22, %v3503_v49  ;;  %v3832_v48 = vadd.f32 %v9729_v6, %v3506_v24  ;;  %v3504_v4 = vld [vmem:[#allocation3 + $0x48] sm:$0xff]  ;;  %v14136_v46 = vsel %vm12481_vm12, %v9101_v62, %v6445_v45  ;;  %v6447_v51 = vrot.slane %v6445_v45, 4  ;;  %v2973_v32 = vld [vmem:[#allocation3 + $0x98] sm:$0xff]  ;;  %9905 = vmatmul.mubr.msk.bf16.gmra.mrb[144].mxu1 %vm1735_vm5, %v9112_v40  ;;  %3429 = vst.msk [vmem:[#allocation3 + $0x90] sm:$0xff] %vm1735_vm5, %v3397_v11  ;;  %v3319_v34 = vpop.f32.mrb[51].mxu1  ;;  %v2976_v35 = vld [vmem:[#allocation3 + $0xb0] sm:$0xff] }
 0x421   : > { %v3830_v0 = vadd.f32 %v3729_v3, %v3504_v4  ;;  %v14141_v1 = vsel %vm12481_vm12, %v6440_v13, %v6441_v31  ;;  %v3398_v44 = vadd.f32 %v9703_v56, %v2973_v32  ;;  %9908 = vmatprep.mubr.msk.bf16.mxu1 %vm1735_vm5, %v9113_v23  ;;  %v3396_v43 = vadd.f32 %v3319_v34, %v2971_v36  ;;  %v10692_v47 = vld [vmem:[#allocation2 + $0x9c] sm:$0xf]  ;;  %v9732_v23 = vpop.f32.mrb[76].mxu0  ;;  %v9706_v52 = vpop.f32.mrb[52].mxu1  ;;  %v2977_v12 = vld [vmem:[#allocation3 + $0xb8] sm:$0xff]  ;;  %v2975_v6 = vld [vmem:[#allocation3 + $0xa8] sm:$0xff] }
 0x422   : > { %3861 = vst.msk [vmem:[#allocation3 + $0x40] sm:$0xff] %vm1735_vm5, %v3829_v28  ;;  %3864 = vst.msk [vmem:[#allocation3 + $0x58] sm:$0xff] %vm1735_vm5, %v3832_v48  ;;  %v9116_v30 = vcombine.low %v14130_v60, %v14141_v1  ;;  %v14151_v29 = vsel %vm12481_vm12, %v6447_v51, %v6448_v41  ;;  %v9102_v20 = vrot.slane %v13816_v8, 9  ;;  %v6434_v42 = vrot.slane %v13785_v10, 5  ;;  %v3509_v9 = vld [vmem:[#allocation3 + $0x70] sm:$0xff]  ;;  %v2974_v31 = vld [vmem:[#allocation3 + $0xa0] sm:$0xff] }
 0x423   : > { %3862 = vst.msk [vmem:[#allocation3 + $0x48] sm:$0xff] %vm1735_vm5, %v3830_v0  ;;  %v9117_v55 = vcombine.low %v14136_v46, %v14151_v29  ;;  %3427 = vst.msk [vmem:[#allocation3 + $0x80] sm:$0xff] %vm1735_vm5, %v3395_v5  ;;  %v6452_v63 = vrot.slane %v13820_v27, 5  ;;  %v6455_v40 = vrot.slane %v13917_v19, 5  ;;  %v9098_v25 = vrot.slane %v10692_v47, 9  ;;  %v2980_v17 = vld [vmem:[#allocation3 + $0xd0] sm:$0xff] }
 0x424   : > { %3430 = vst.msk [vmem:[#allocation3 + $0x98] sm:$0xff] %vm1735_vm5, %v3398_v44  ;;  %v6428_v10 = vsel %vm12481_vm12, %v6426_v15, %v6427_v33  ;;  %v10693_v8 = vld [vmem:[#allocation2 + $0xa8] sm:$0xf]  ;;  %v3507_v61 = vld [vmem:[#allocation3 + $0x60] sm:$0xff]  ;;  %3428 = vst.msk [vmem:[#allocation3 + $0x88] sm:$0xff] %vm1735_vm5, %v3396_v43  ;;  %v6435_v38 = vsel %vm12481_vm12, %v14119_v53, %v6434_v42  ;;  %v3835_v57 = vadd.f32 %v9732_v23, %v3509_v9  ;;  %v3742_v15 = vpop.f32.mrb[77].mxu0 }
 0x425   : > { %v9099_v2 = vrot.slane %v10693_v8, 9  ;;  %v3510_v27 = vld [vmem:[#allocation3 + $0x78] sm:$0xff]  ;;  %v14172_v19 = vsel %vm12481_vm12, %v9102_v20, %v6452_v63  ;;  %v6454_v26 = vrot.slane %v6452_v63, 4  ;;  %v6425_v59 = vsel %vm12481_vm12, %v9098_v25, %v6424_v50  ;;  %v3508_v53 = vld [vmem:[#allocation3 + $0x68] sm:$0xff]  ;;  %v9733_v58 = vpop.f32.mrb[78].mxu0  ;;  %v3332_v50 = vpop.f32.mrb[53].mxu1 }
 0x426   : > { %v9114_v21 = vcombine.low %v6425_v59, %v6428_v10  ;;  %v3833_v54 = vadd.f32 %v3742_v15, %v3507_v61  ;;  %v3401_v14 = vadd.f32 %v9706_v52, %v2976_v35  ;;  %3867 = vst.msk [vmem:[#allocation3 + $0x70] sm:$0xff] %vm1735_vm5, %v3835_v57  ;;  %v3836_v37 = vadd.f32 %v9733_v58, %v3510_v27  ;;  %v9707_v49 = vpop.f32.mrb[54].mxu1  ;;  %v2978_v44 = vld [vmem:[#allocation3 + $0xc0] sm:$0xff]  ;;  %v2981_v42 = vld [vmem:[#allocation3 + $0xd8] sm:$0xff]  ;;  %v2979_v47 = vld [vmem:[#allocation3 + $0xc8] sm:$0xff] }
 0x427   : > { %v6432_v33 = vsel %vm12481_vm12, %v9099_v2, %v6431_v16  ;;  %v14184_v22 = vsel %vm12481_vm12, %v6454_v26, %v6455_v40  ;;  %v3745_v16 = vpop.f32.mrb[79].mxu0  ;;  %v3399_v7 = vadd.f32 %v3332_v50, %v2974_v31  ;;  %v3402_v24 = vadd.f32 %v9707_v49, %v2977_v12  ;;  %v3335_v13 = vpop.f32.mrb[55].mxu1  ;;  %v3513_v11 = vld [vmem:[#allocation3 + $0x90] sm:$0xff]  ;;  %v2982_v26 = vld [vmem:[#allocation3 + $0xe0] sm:$0xff]  ;;  %v7278_v12 = vld [vmem:[#allocation16] sm:$0x3] }
 0x428   : > { %v9115_v62 = vcombine.low %v6432_v33, %v6435_v38  ;;  %v9118_v45 = vcombine.low %v14172_v19, %v14184_v22  ;;  %9909 = vmatmul.mubr.msk.bf16.gmra.mrb[148].mxu1 %vm1735_vm5, %v9114_v21  ;;  %3865 = vst.msk [vmem:[#allocation3 + $0x60] sm:$0xff] %vm1735_vm5, %v3833_v54  ;;  %v3834_v18 = vadd.f32 %v3745_v16, %v3508_v53  ;;  %3433 = vst.msk [vmem:[#allocation3 + $0xb0] sm:$0xff] %vm1735_vm5, %v3401_v14  ;;  %v9736_v28 = vpop.f32.mrb[80].mxu0  ;;  %v9710_v32 = vpop.f32.mrb[56].mxu1  ;;  %v2984_v29 = vld [vmem:[#allocation3 + $0xf0] sm:$0xff]  ;;  %v2985_v53 = vld [vmem:[#allocation3 + $0xf8] sm:$0xff] }
 0x429   : > { %3868 = vst.msk [vmem:[#allocation3 + $0x78] sm:$0xff] %vm1735_vm5, %v3836_v37  ;;  %3431 = vst.msk [vmem:[#allocation3 + $0xa0] sm:$0xff] %vm1735_vm5, %v3399_v7  ;;  %v3400_v41 = vadd.f32 %v3335_v13, %v2975_v6  ;;  %v3839_v4 = vadd.f32 %v9736_v28, %v3513_v11  ;;  %v3758_v3 = vpop.f32.mrb[81].mxu0  ;;  %v3405_v5 = vadd.f32 %v9710_v32, %v2980_v17  ;;  %v3348_v36 = vpop.f32.mrb[57].mxu1  ;;  %v2983_v54 = vld [vmem:[#allocation3 + $0xe8] sm:$0xff]  ;;  %v3887_v37 = vld [vmem:[#allocation3 + $0x10] sm:$0xff]  ;;  %9998 = vmatprep.subr.msk.bf16.mxu0 %vm1980_vm4, %v7278_v12 }
 0x42a   : > { %9912 = vmatprep.mubr.msk.bf16.mxu1 %vm1735_vm5, %v9115_v62  ;;  %3866 = vst.msk [vmem:[#allocation3 + $0x68] sm:$0xff] %vm1735_vm5, %v3834_v18  ;;  %3434 = vst.msk [vmem:[#allocation3 + $0xb8] sm:$0xff] %vm1735_vm5, %v3402_v24  ;;  %v3511_v39 = vld [vmem:[#allocation3 + $0x80] sm:$0xff]  ;;  %v9737_v0 = vpop.f32.mrb[82].mxu0  ;;  %v3403_v20 = vadd.f32 %v3348_v36, %v2978_v44  ;;  %v9711_v9 = vpop.f32.mrb[58].mxu1  ;;  %v3886_v17 = vld [vmem:[#allocation3 + $0x8] sm:$0xff] }
 0x42b   : > { %3432 = vst.msk [vmem:[#allocation3 + $0xa8] sm:$0xff] %vm1735_vm5, %v3400_v41  ;;  %v3514_v48 = vld [vmem:[#allocation3 + $0x98] sm:$0xff]  ;;  %v3512_v51 = vld [vmem:[#allocation3 + $0x88] sm:$0xff]  ;;  %v3837_v56 = vadd.f32 %v3758_v3, %v3511_v39  ;;  %3871 = vst.msk [vmem:[#allocation3 + $0x90] sm:$0xff] %vm1735_vm5, %v3839_v4  ;;  %v3761_v43 = vpop.f32.mrb[83].mxu0  ;;  %v3406_v40 = vadd.f32 %v9711_v9, %v2981_v42  ;;  %v3351_v25 = vpop.f32.mrb[59].mxu1 }
 0x42c   : > { %v3840_v34 = vadd.f32 %v9737_v0, %v3514_v48  ;;  %v3838_v63 = vadd.f32 %v3761_v43, %v3512_v51  ;;  %3437 = vst.msk [vmem:[#allocation3 + $0xd0] sm:$0xff] %vm1735_vm5, %v3405_v5  ;;  %3435 = vst.msk [vmem:[#allocation3 + $0xc0] sm:$0xff] %vm1735_vm5, %v3403_v20  ;;  %v3404_v60 = vadd.f32 %v3351_v25, %v2979_v47  ;;  %v9740_v10 = vpop.f32.mrb[84].mxu0  ;;  %v7604_v49 = vld [vmem:[#allocation21] sm:$0xf]  ;;  %v3888_v48 = vld [vmem:[#allocation3 + $0x18] sm:$0xff] }
 0x42d   : > { %3869 = vst.msk [vmem:[#allocation3 + $0x80] sm:$0xff] %vm1735_vm5, %v3837_v56  ;;  %3438 = vst.msk [vmem:[#allocation3 + $0xd8] sm:$0xff] %vm1735_vm5, %v3406_v40  ;;  %v3774_v61 = vpop.f32.mrb[85].mxu0  ;;  %v3885_v13 = vld [vmem:[#allocation3] sm:$0xff]  ;;  %9999 = vmatprep.subr.msk.bf16.mxu1 %vm834_vm0, %v7604_v49  ;;  %v3891_v42 = vld [vmem:[#allocation3 + $0x30] sm:$0xff]  ;;  %v7736_v40 = vsel %vm834_vm0, %v7604_v49, 0 }
 0x42e   : > { %3872 = vst.msk [vmem:[#allocation3 + $0x98] sm:$0xff] %vm1735_vm5, %v3840_v34  ;;  %3870 = vst.msk [vmem:[#allocation3 + $0x88] sm:$0xff] %vm1735_vm5, %v3838_v63  ;;  %v9741_v23 = vpop.f32.mrb[86].mxu0  ;;  %v7328_v63 = vsel %vm1980_vm4, %v7278_v12, 0  ;;  %9955 = vmatpush3.bf16.msra.mxu1 %v7736_v40  ;;  %v3894_v12 = vld [vmem:[#allocation3 + $0x48] sm:$0xff] }
 0x42f   : > { %v3517_v1 = vld [vmem:[#allocation3 + $0xb0] sm:$0xff]  ;;  %3436 = vst.msk [vmem:[#allocation3 + $0xc8] sm:$0xff] %vm1735_vm5, %v3404_v60  ;;  %v3777_v57 = vpop.f32.mrb[87].mxu0  ;;  %9921 = vmatpush3.bf16.msra.mxu0 %v7328_v63 }
 0x430   : > { %9913 = vmatmul.mubr.msk.bf16.gmra.mrb[152].mxu1 %vm1735_vm5, %v9116_v30  ;;  %v3515_v30 = vld [vmem:[#allocation3 + $0xa0] sm:$0xff]  ;;  %v3843_v2 = vadd.f32 %v9740_v10, %v3517_v1  ;;  %v9744_v22 = vpop.f32.mrb[88].mxu0 }
 0x431   : > { %9916 = vmatprep.mubr.msk.bf16.mxu1 %vm1735_vm5, %v9117_v55  ;;  %v3518_v8 = vld [vmem:[#allocation3 + $0xb8] sm:$0xff]  ;;  %v9714_v55 = vpop.f32.mrb[60].mxu1  ;;  %v3841_v38 = vadd.f32 %v3774_v61, %v3515_v30  ;;  %v3889_v1 = vld [vmem:[#allocation3 + $0x20] sm:$0xff] }
 0x432   : > { %v3516_v46 = vld [vmem:[#allocation3 + $0xa8] sm:$0xff]  ;;  %v3409_v27 = vadd.f32 %v9714_v55, %v2984_v29  ;;  %v3364_v59 = vpop.f32.mrb[61].mxu1  ;;  %3875 = vst.msk [vmem:[#allocation3 + $0xb0] sm:$0xff] %vm1735_vm5, %v3843_v2  ;;  %v3844_v33 = vadd.f32 %v9741_v23, %v3518_v8  ;;  %v3892_v61 = vld [vmem:[#allocation3 + $0x38] sm:$0xff] }
 0x433   : > { %v3407_v15 = vadd.f32 %v3364_v59, %v2982_v26  ;;  %v9715_v35 = vpop.f32.mrb[62].mxu1  ;;  %3873 = vst.msk [vmem:[#allocation3 + $0xa0] sm:$0xff] %vm1735_vm5, %v3841_v38  ;;  %v3842_v52 = vadd.f32 %v3777_v57, %v3516_v46  ;;  %v3521_v31 = vld [vmem:[#allocation3 + $0xd0] sm:$0xff]  ;;  %v3519_v19 = vld [vmem:[#allocation3 + $0xc0] sm:$0xff]  ;;  %v3890_v38 = vld [vmem:[#allocation3 + $0x28] sm:$0xff] }
 0x434   : > { %3441 = vst.msk [vmem:[#allocation3 + $0xf0] sm:$0xff] %vm1735_vm5, %v3409_v27  ;;  %v3410_v21 = vadd.f32 %v9715_v35, %v2985_v53  ;;  %v3367_v58 = vpop.f32.mrb[63].mxu1  ;;  %3876 = vst.msk [vmem:[#allocation3 + $0xb8] sm:$0xff] %vm1735_vm5, %v3844_v33  ;;  %v3522_v50 = vld [vmem:[#allocation3 + $0xd8] sm:$0xff]  ;;  %v3847_v16 = vadd.f32 %v9744_v22, %v3521_v31  ;;  %v3893_v31 = vld [vmem:[#allocation3 + $0x40] sm:$0xff] }
 0x435   : > { %3439 = vst.msk [vmem:[#allocation3 + $0xe0] sm:$0xff] %vm1735_vm5, %v3407_v15  ;;  %v3408_v14 = vadd.f32 %v3367_v58, %v2983_v54  ;;  %3874 = vst.msk [vmem:[#allocation3 + $0xa8] sm:$0xff] %vm1735_vm5, %v3842_v52  ;;  %v9754_v7 = vpop.f32.mrb[64].mxu1  ;;  %v3895_v52 = vld [vmem:[#allocation3 + $0x50] sm:$0xff] }
 0x436   : > { %3442 = vst.msk [vmem:[#allocation3 + $0xf8] sm:$0xff] %vm1735_vm5, %v3410_v21  ;;  %v3520_v62 = vld [vmem:[#allocation3 + $0xc8] sm:$0xff]  ;;  %v4565_v6 = vadd.f32 %v9754_v7, %v3887_v37  ;;  %v4436_v41 = vpop.f32.mrb[65].mxu1  ;;  %3879 = vst.msk [vmem:[#allocation3 + $0xd0] sm:$0xff] %vm1735_vm5, %v3847_v16  ;;  %v3896_v37 = vld [vmem:[#allocation3 + $0x58] sm:$0xff] }
 0x437   : > { %3440 = vst.msk [vmem:[#allocation3 + $0xe8] sm:$0xff] %vm1735_vm5, %v3408_v14  ;;  %v4563_v28 = vadd.f32 %v4436_v41, %v3885_v13  ;;  %v9755_v4 = vpop.f32.mrb[66].mxu1 }
 0x438   : > { %9917 = vmatmul.mubr.msk.bf16.gmra.mrb[156].mxu1 %vm1735_vm5, %v9118_v45  ;;  %v3790_v45 = vpop.f32.mrb[89].mxu0  ;;  %4597 = vst.msk [vmem:[#allocation3 + $0x10] sm:$0xff] %vm1735_vm5, %v4565_v6  ;;  %v4566_v51 = vadd.f32 %v9755_v4, %v3888_v48  ;;  %v4439_v32 = vpop.f32.mrb[67].mxu1  ;;  %v3899_v48 = vld [vmem:[#allocation3 + $0x70] sm:$0xff] }
 0x439   : > { %v3845_v18 = vadd.f32 %v3790_v45, %v3519_v19  ;;  %v9745_v24 = vpop.f32.mrb[90].mxu0  ;;  %4595 = vst.msk [vmem:[#allocation3] sm:$0xff] %vm1735_vm5, %v4563_v28  ;;  %v4564_v56 = vadd.f32 %v4439_v32, %v3886_v17  ;;  %v9758_v9 = vpop.f32.mrb[68].mxu1  ;;  %v3897_v32 = vld [vmem:[#allocation3 + $0x60] sm:$0xff] }
 0x43a   : > { %v3848_v11 = vadd.f32 %v9745_v24, %v3522_v50  ;;  %v3793_v39 = vpop.f32.mrb[91].mxu0  ;;  %4598 = vst.msk [vmem:[#allocation3 + $0x18] sm:$0xff] %vm1735_vm5, %v4566_v51  ;;  %v4569_v60 = vadd.f32 %v9758_v9, %v3891_v42  ;;  %v4452_v30 = vpop.f32.mrb[69].mxu1  ;;  %v3898_v42 = vld [vmem:[#allocation3 + $0x68] sm:$0xff] }
 0x43b   : > { %3877 = vst.msk [vmem:[#allocation3 + $0xc0] sm:$0xff] %vm1735_vm5, %v3845_v18  ;;  %v3846_v3 = vadd.f32 %v3793_v39, %v3520_v62  ;;  %v3525_v0 = vld [vmem:[#allocation3 + $0xf0] sm:$0xff]  ;;  %4596 = vst.msk [vmem:[#allocation3 + $0x8] sm:$0xff] %vm1735_vm5, %v4564_v56  ;;  %v9748_v44 = vpop.f32.mrb[92].mxu0  ;;  %v4567_v2 = vadd.f32 %v4452_v30, %v3889_v1  ;;  %v9759_v46 = vpop.f32.mrb[70].mxu1 }
 0x43c   : > { %3880 = vst.msk [vmem:[#allocation3 + $0xd8] sm:$0xff] %vm1735_vm5, %v3848_v11  ;;  %v3523_v5 = vld [vmem:[#allocation3 + $0xe0] sm:$0xff]  ;;  %v3851_v34 = vadd.f32 %v9748_v44, %v3525_v0  ;;  %v3806_v43 = vpop.f32.mrb[93].mxu0  ;;  %4601 = vst.msk [vmem:[#allocation3 + $0x30] sm:$0xff] %vm1735_vm5, %v4569_v60  ;;  %v4570_v55 = vadd.f32 %v9759_v46, %v3892_v61  ;;  %v4455_v23 = vpop.f32.mrb[71].mxu1 }
 0x43d   : > { %3878 = vst.msk [vmem:[#allocation3 + $0xc8] sm:$0xff] %vm1735_vm5, %v3846_v3  ;;  %v3526_v36 = vld [vmem:[#allocation3 + $0xf8] sm:$0xff]  ;;  %v3849_v47 = vadd.f32 %v3806_v43, %v3523_v5  ;;  %v9749_v25 = vpop.f32.mrb[94].mxu0  ;;  %4599 = vst.msk [vmem:[#allocation3 + $0x20] sm:$0xff] %vm1735_vm5, %v4567_v2  ;;  %v4568_v27 = vadd.f32 %v4455_v23, %v3890_v38 }
 0x43e   : > { %v3524_v20 = vld [vmem:[#allocation3 + $0xe8] sm:$0xff]  ;;  %3883 = vst.msk [vmem:[#allocation3 + $0xf0] sm:$0xff] %vm1735_vm5, %v3851_v34  ;;  %v3852_v10 = vadd.f32 %v9749_v25, %v3526_v36  ;;  %v3809_v8 = vpop.f32.mrb[95].mxu0  ;;  %4602 = vst.msk [vmem:[#allocation3 + $0x38] sm:$0xff] %vm1735_vm5, %v4570_v55  ;;  %v3900_v36 = vld [vmem:[#allocation3 + $0x78] sm:$0xff] }
 0x43f   : > { %3881 = vst.msk [vmem:[#allocation3 + $0xe0] sm:$0xff] %vm1735_vm5, %v3849_v47  ;;  %v3850_v29 = vadd.f32 %v3809_v8, %v3524_v20  ;;  %v4629_v26 = vld [vmem:[#allocation3 + $0x10] sm:$0xff]  ;;  %4600 = vst.msk [vmem:[#allocation3 + $0x28] sm:$0xff] %vm1735_vm5, %v4568_v27  ;;  %v3901_v55 = vld [vmem:[#allocation3 + $0x80] sm:$0xff] }
 0x440   : > { %3884 = vst.msk [vmem:[#allocation3 + $0xf8] sm:$0xff] %vm1735_vm5, %v3852_v10  ;;  %v4627_v59 = vld [vmem:[#allocation3] sm:$0xff]  ;;  %v9762_v21 = vpop.f32.mrb[72].mxu1  ;;  %v3903_v8 = vld [vmem:[#allocation3 + $0x90] sm:$0xff] }
 0x441   : > { %3882 = vst.msk [vmem:[#allocation3 + $0xe8] sm:$0xff] %vm1735_vm5, %v3850_v29  ;;  %v9788_v33 = vpop.f32.mrb[96].mxu0  ;;  %v4630_v57 = vld [vmem:[#allocation3 + $0x18] sm:$0xff]  ;;  %v4573_v14 = vadd.f32 %v9762_v21, %v3895_v52  ;;  %v4468_v19 = vpop.f32.mrb[73].mxu1 }
 0x442   : > { %v5051_v15 = vadd.f32 %v9788_v33, %v4629_v26  ;;  %v4922_v53 = vpop.f32.mrb[97].mxu0  ;;  %v4628_v35 = vld [vmem:[#allocation3 + $0x8] sm:$0xff]  ;;  %v4571_v62 = vadd.f32 %v4468_v19, %v3893_v31  ;;  %v9763_v16 = vpop.f32.mrb[74].mxu1 }
 0x443   : > { %v5049_v54 = vadd.f32 %v4922_v53, %v4627_v59  ;;  %v9789_v58 = vpop.f32.mrb[98].mxu0  ;;  %4605 = vst.msk [vmem:[#allocation3 + $0x50] sm:$0xff] %vm1735_vm5, %v4573_v14  ;;  %v4574_v7 = vadd.f32 %v9763_v16, %v3896_v37  ;;  %v4471_v49 = vpop.f32.mrb[75].mxu1  ;;  %v4633_v24 = vld [vmem:[#allocation3 + $0x30] sm:$0xff]  ;;  %v3904_v59 = vld [vmem:[#allocation3 + $0x98] sm:$0xff]  ;;  %v3902_v53 = vld [vmem:[#allocation3 + $0x88] sm:$0xff] }
 0x444   : > { %5083 = vst.msk [vmem:[#allocation3 + $0x10] sm:$0xff] %vm1735_vm5, %v5051_v15  ;;  %v5052_v22 = vadd.f32 %v9789_v58, %v4630_v57  ;;  %v4925_v50 = vpop.f32.mrb[99].mxu0  ;;  %4603 = vst.msk [vmem:[#allocation3 + $0x40] sm:$0xff] %vm1735_vm5, %v4571_v62  ;;  %v4572_v18 = vadd.f32 %v4471_v49, %v3894_v12  ;;  %v4631_v6 = vld [vmem:[#allocation3 + $0x20] sm:$0xff]  ;;  %v3907_v37 = vld [vmem:[#allocation3 + $0xb0] sm:$0xff] }
 0x445   : > { %5081 = vst.msk [vmem:[#allocation3] sm:$0xff] %vm1735_vm5, %v5049_v54  ;;  %v5050_v45 = vadd.f32 %v4925_v50, %v4628_v35  ;;  %4606 = vst.msk [vmem:[#allocation3 + $0x58] sm:$0xff] %vm1735_vm5, %v4574_v7  ;;  %v4634_v41 = vld [vmem:[#allocation3 + $0x38] sm:$0xff]  ;;  %v3905_v49 = vld [vmem:[#allocation3 + $0xa0] sm:$0xff] }
 0x446   : > { %5084 = vst.msk [vmem:[#allocation3 + $0x18] sm:$0xff] %vm1735_vm5, %v5052_v22  ;;  %4604 = vst.msk [vmem:[#allocation3 + $0x48] sm:$0xff] %vm1735_vm5, %v4572_v18  ;;  %v4632_v28 = vld [vmem:[#allocation3 + $0x28] sm:$0xff] }
 0x447   : > { %5082 = vst.msk [vmem:[#allocation3 + $0x8] sm:$0xff] %vm1735_vm5, %v5050_v45 }
 0x448   : > { %v9766_v4 = vpop.f32.mrb[76].mxu1 }
 0x449   : > { %v9792_v13 = vpop.f32.mrb[100].mxu0  ;;  %v4577_v17 = vadd.f32 %v9766_v4, %v3899_v48  ;;  %v4484_v56 = vpop.f32.mrb[77].mxu1 }
 0x44a   : > { %v5055_v11 = vadd.f32 %v9792_v13, %v4633_v24  ;;  %v4938_v39 = vpop.f32.mrb[101].mxu0  ;;  %v4575_v44 = vadd.f32 %v4484_v56, %v3897_v32  ;;  %v9767_v34 = vpop.f32.mrb[78].mxu1  ;;  %v4637_v40 = vld [vmem:[#allocation3 + $0x50] sm:$0xff]  ;;  %v3908_v13 = vld [vmem:[#allocation3 + $0xb8] sm:$0xff] }
 0x44b   : > { %v5053_v3 = vadd.f32 %v4938_v39, %v4631_v6  ;;  %v9793_v51 = vpop.f32.mrb[102].mxu0  ;;  %4609 = vst.msk [vmem:[#allocation3 + $0x70] sm:$0xff] %vm1735_vm5, %v4577_v17  ;;  %v4578_v20 = vadd.f32 %v9767_v34, %v3900_v36  ;;  %v4487_v9 = vpop.f32.mrb[79].mxu1  ;;  %v4635_v47 = vld [vmem:[#allocation3 + $0x40] sm:$0xff]  ;;  %v3906_v39 = vld [vmem:[#allocation3 + $0xa8] sm:$0xff] }
 0x44c   : > { %5087 = vst.msk [vmem:[#allocation3 + $0x30] sm:$0xff] %vm1735_vm5, %v5055_v11  ;;  %v5056_v0 = vadd.f32 %v9793_v51, %v4634_v41  ;;  %v4941_v5 = vpop.f32.mrb[103].mxu0  ;;  %4607 = vst.msk [vmem:[#allocation3 + $0x60] sm:$0xff] %vm1735_vm5, %v4575_v44  ;;  %v4576_v63 = vadd.f32 %v4487_v9, %v3898_v42  ;;  %v4638_v60 = vld [vmem:[#allocation3 + $0x58] sm:$0xff] }
 0x44d   : > { %5085 = vst.msk [vmem:[#allocation3 + $0x20] sm:$0xff] %vm1735_vm5, %v5053_v3  ;;  %v5054_v43 = vadd.f32 %v4941_v5, %v4632_v28  ;;  %4610 = vst.msk [vmem:[#allocation3 + $0x78] sm:$0xff] %vm1735_vm5, %v4578_v20  ;;  %v4636_v10 = vld [vmem:[#allocation3 + $0x48] sm:$0xff]  ;;  %v3911_v20 = vld [vmem:[#allocation3 + $0xd0] sm:$0xff] }
 0x44e   : > { %5088 = vst.msk [vmem:[#allocation3 + $0x38] sm:$0xff] %vm1735_vm5, %v5056_v0  ;;  %4608 = vst.msk [vmem:[#allocation3 + $0x68] sm:$0xff] %vm1735_vm5, %v4576_v63  ;;  %v3909_v63 = vld [vmem:[#allocation3 + $0xc0] sm:$0xff] }
 0x44f   : > { %5086 = vst.msk [vmem:[#allocation3 + $0x28] sm:$0xff] %vm1735_vm5, %v5054_v43 }
 0x451   : > { %v9796_v25 = vpop.f32.mrb[104].mxu0 }
 0x452   : > { %v5059_v1 = vadd.f32 %v9796_v25, %v4637_v40  ;;  %v4954_v30 = vpop.f32.mrb[105].mxu0  ;;  %v4641_v21 = vld [vmem:[#allocation3 + $0x70] sm:$0xff] }
 0x453   : > { %v9770_v2 = vpop.f32.mrb[80].mxu1  ;;  %v5057_v61 = vadd.f32 %v4954_v30, %v4635_v47  ;;  %v9797_v46 = vpop.f32.mrb[106].mxu0  ;;  %v4639_v54 = vld [vmem:[#allocation3 + $0x60] sm:$0xff] }
 0x454   : > { %v4581_v29 = vadd.f32 %v9770_v2, %v3903_v8  ;;  %v4500_v38 = vpop.f32.mrb[81].mxu1  ;;  %5091 = vst.msk [vmem:[#allocation3 + $0x50] sm:$0xff] %vm1735_vm5, %v5059_v1  ;;  %v5060_v23 = vadd.f32 %v9797_v46, %v4638_v60  ;;  %v4957_v27 = vpop.f32.mrb[107].mxu0  ;;  %v4642_v14 = vld [vmem:[#allocation3 + $0x78] sm:$0xff]  ;;  %v3910_v2 = vld [vmem:[#allocation3 + $0xc8] sm:$0xff] }
 0x455   : > { %v4579_v26 = vadd.f32 %v4500_v38, %v3901_v55  ;;  %v9771_v33 = vpop.f32.mrb[82].mxu1  ;;  %5089 = vst.msk [vmem:[#allocation3 + $0x40] sm:$0xff] %vm1735_vm5, %v5057_v61  ;;  %v5058_v57 = vadd.f32 %v4957_v27, %v4636_v10  ;;  %v4640_v22 = vld [vmem:[#allocation3 + $0x68] sm:$0xff]  ;;  %v3912_v60 = vld [vmem:[#allocation3 + $0xd8] sm:$0xff] }
 0x456   : > { %4613 = vst.msk [vmem:[#allocation3 + $0x90] sm:$0xff] %vm1735_vm5, %v4581_v29  ;;  %v4582_v15 = vadd.f32 %v9771_v33, %v3904_v59  ;;  %v4503_v35 = vpop.f32.mrb[83].mxu1  ;;  %5092 = vst.msk [vmem:[#allocation3 + $0x58] sm:$0xff] %vm1735_vm5, %v5060_v23 }
 0x457   : > { %4611 = vst.msk [vmem:[#allocation3 + $0x80] sm:$0xff] %vm1735_vm5, %v4579_v26  ;;  %v4580_v52 = vadd.f32 %v4503_v35, %v3902_v53  ;;  %5090 = vst.msk [vmem:[#allocation3 + $0x48] sm:$0xff] %vm1735_vm5, %v5058_v57  ;;  %v3915_v53 = vld [vmem:[#allocation3 + $0xf0] sm:$0xff] }
 0x458   : > { %4614 = vst.msk [vmem:[#allocation3 + $0x98] sm:$0xff] %vm1735_vm5, %v4582_v15 }
 0x459   : > { %4612 = vst.msk [vmem:[#allocation3 + $0x88] sm:$0xff] %vm1735_vm5, %v4580_v52  ;;  %v9800_v58 = vpop.f32.mrb[108].mxu0 }
 0x45a   : > { %v5063_v31 = vadd.f32 %v9800_v58, %v4641_v21  ;;  %v4970_v19 = vpop.f32.mrb[109].mxu0  ;;  %v3913_v58 = vld [vmem:[#allocation3 + $0xe0] sm:$0xff] }
 0x45b   : > { %v5061_v50 = vadd.f32 %v4970_v19, %v4639_v54  ;;  %v9801_v62 = vpop.f32.mrb[110].mxu0 }
 0x45c   : > { %5095 = vst.msk [vmem:[#allocation3 + $0x70] sm:$0xff] %vm1735_vm5, %v5063_v31  ;;  %v5064_v45 = vadd.f32 %v9801_v62, %v4642_v14  ;;  %v4973_v7 = vpop.f32.mrb[111].mxu0  ;;  %v3916_v62 = vld [vmem:[#allocation3 + $0xf8] sm:$0xff] }
 0x45d   : > { %5093 = vst.msk [vmem:[#allocation3 + $0x60] sm:$0xff] %vm1735_vm5, %v5061_v50  ;;  %v5062_v24 = vadd.f32 %v4973_v7, %v4640_v22  ;;  %v4645_v48 = vld [vmem:[#allocation3 + $0x90] sm:$0xff] }
 0x45e   : > { %v9774_v16 = vpop.f32.mrb[84].mxu1  ;;  %5096 = vst.msk [vmem:[#allocation3 + $0x78] sm:$0xff] %vm1735_vm5, %v5064_v45  ;;  %v4643_v3 = vld [vmem:[#allocation3 + $0x80] sm:$0xff] }
 0x45f   : > { %v4585_v12 = vadd.f32 %v9774_v16, %v3907_v37  ;;  %v4516_v18 = vpop.f32.mrb[85].mxu1  ;;  %5094 = vst.msk [vmem:[#allocation3 + $0x68] sm:$0xff] %vm1735_vm5, %v5062_v24  ;;  %v4646_v17 = vld [vmem:[#allocation3 + $0x98] sm:$0xff] }
 0x460   : > { %v4583_v6 = vadd.f32 %v4516_v18, %v3905_v49  ;;  %v9775_v41 = vpop.f32.mrb[86].mxu1  ;;  %v4644_v0 = vld [vmem:[#allocation3 + $0x88] sm:$0xff] }
 0x461   : > { %4617 = vst.msk [vmem:[#allocation3 + $0xb0] sm:$0xff] %vm1735_vm5, %v4585_v12  ;;  %v4586_v11 = vadd.f32 %v9775_v41, %v3908_v13  ;;  %v4519_v28 = vpop.f32.mrb[87].mxu1  ;;  %v9804_v51 = vpop.f32.mrb[112].mxu0  ;;  %v3914_v49 = vld [vmem:[#allocation3 + $0xe8] sm:$0xff] }
 0x462   : > { %4615 = vst.msk [vmem:[#allocation3 + $0xa0] sm:$0xff] %vm1735_vm5, %v4583_v6  ;;  %v4584_v4 = vadd.f32 %v4519_v28, %v3906_v39  ;;  %v5067_v32 = vadd.f32 %v9804_v51, %v4645_v48  ;;  %v4986_v56 = vpop.f32.mrb[113].mxu0  ;;  %v10263_v39 = vld [vmem:[%s11694_s19 + $0x8] sm:$0xff]   ;;  %v5167_v28 = vld [vmem:[#allocation3 + $0x10] sm:$0xff]  ;;  %v5165_v51 = vld [vmem:[#allocation3] sm:$0xff] }
 0x463   : > { %4618 = vst.msk [vmem:[#allocation3 + $0xb8] sm:$0xff] %vm1735_vm5, %v4586_v11  ;;  %v5065_v5 = vadd.f32 %v4986_v56, %v4643_v3  ;;  %v9805_v44 = vpop.f32.mrb[114].mxu0  ;;  %v10262_v11 = vld [vmem:[%s11694_s19] sm:$0xff]  }
 0x464   : > { %4616 = vst.msk [vmem:[#allocation3 + $0xa8] sm:$0xff] %vm1735_vm5, %v4584_v4  ;;  %5099 = vst.msk [vmem:[#allocation3 + $0x90] sm:$0xff] %vm1735_vm5, %v5067_v32  ;;  %v5068_v36 = vadd.f32 %v9805_v44, %v4646_v17  ;;  %v4989_v34 = vpop.f32.mrb[115].mxu0  ;;  %9956 = vmatprep.mubr.msk.bf16.mxu1 %vm785_vm1, %v10262_v11 }
 0x465   : > { %5097 = vst.msk [vmem:[#allocation3 + $0x80] sm:$0xff] %vm1735_vm5, %v5065_v5  ;;  %v5066_v43 = vadd.f32 %v4989_v34, %v4644_v0  ;;  %9957 = vmatmul.mubr.msk.bf16.vlgmr.msra.gmra.mrb[160].mxu1 %vm785_vm1, %v10263_v39  ;;  %v5168_v5 = vld [vmem:[#allocation3 + $0x18] sm:$0xff] }
 0x466   : > { %5100 = vst.msk [vmem:[#allocation3 + $0x98] sm:$0xff] %vm1735_vm5, %v5068_v36 }
 0x467   : > { %5098 = vst.msk [vmem:[#allocation3 + $0x88] sm:$0xff] %vm1735_vm5, %v5066_v43 }
 0x468   : > { %v4649_v47 = vld [vmem:[#allocation3 + $0xb0] sm:$0xff] }
 0x469   : > { %v4647_v30 = vld [vmem:[#allocation3 + $0xa0] sm:$0xff] }
 0x46a   : > { %v4650_v46 = vld [vmem:[#allocation3 + $0xb8] sm:$0xff] }
 0x46b   : > { %v9778_v42 = vpop.f32.mrb[88].mxu1  ;;  %v4648_v23 = vld [vmem:[#allocation3 + $0xa8] sm:$0xff] }
 0x46c   : > { %v4589_v9 = vadd.f32 %v9778_v42, %v3911_v20  ;;  %v4532_v40 = vpop.f32.mrb[89].mxu1  ;;  %v9808_v10 = vpop.f32.mrb[116].mxu0  ;;  %v5166_v42 = vld [vmem:[#allocation3 + $0x8] sm:$0xff] }
 0x46d   : > { %v4587_v25 = vadd.f32 %v4532_v40, %v3909_v63  ;;  %v9779_v1 = vpop.f32.mrb[90].mxu1  ;;  %v5071_v29 = vadd.f32 %v9808_v10, %v4649_v47  ;;  %v5002_v55 = vpop.f32.mrb[117].mxu0 }
 0x46e   : > { %4621 = vst.msk [vmem:[#allocation3 + $0xd0] sm:$0xff] %vm1735_vm5, %v4589_v9  ;;  %v4590_v8 = vadd.f32 %v9779_v1, %v3912_v60  ;;  %v4535_v61 = vpop.f32.mrb[91].mxu1  ;;  %v5069_v27 = vadd.f32 %v5002_v55, %v4647_v30  ;;  %v9809_v26 = vpop.f32.mrb[118].mxu0  ;;  %v10264_v30 = vld [vmem:[%s11694_s19 + $0x10] sm:$0xff]  }
 0x46f   : > { %4619 = vst.msk [vmem:[#allocation3 + $0xc0] sm:$0xff] %vm1735_vm5, %v4587_v25  ;;  %v4588_v38 = vadd.f32 %v4535_v61, %v3910_v2  ;;  %5103 = vst.msk [vmem:[#allocation3 + $0xb0] sm:$0xff] %vm1735_vm5, %v5071_v29  ;;  %v5072_v59 = vadd.f32 %v9809_v26, %v4650_v46  ;;  %v5005_v33 = vpop.f32.mrb[119].mxu0  ;;  %9960 = vmatprep.mubr.msk.bf16.mxu1 %vm785_vm1, %v10264_v30  ;;  %v5171_v2 = vld [vmem:[#allocation3 + $0x30] sm:$0xff]  ;;  %v5169_v29 = vld [vmem:[#allocation3 + $0x20] sm:$0xff] }
 0x470   : > { %4622 = vst.msk [vmem:[#allocation3 + $0xd8] sm:$0xff] %vm1735_vm5, %v4590_v8  ;;  %5101 = vst.msk [vmem:[#allocation3 + $0xa0] sm:$0xff] %vm1735_vm5, %v5069_v27  ;;  %v5070_v57 = vadd.f32 %v5005_v33, %v4648_v23  ;;  %v10265_v8 = vld [vmem:[%s11694_s19 + $0x18] sm:$0xff]  }
 0x471   : > { %4620 = vst.msk [vmem:[#allocation3 + $0xc8] sm:$0xff] %vm1735_vm5, %v4588_v38  ;;  %5104 = vst.msk [vmem:[#allocation3 + $0xb8] sm:$0xff] %vm1735_vm5, %v5072_v59  ;;  %9961 = vmatmul.mubr.msk.bf16.gmra.mrb[164].mxu1 %vm785_vm1, %v10265_v8  ;;  %v5172_v26 = vld [vmem:[#allocation3 + $0x38] sm:$0xff]  ;;  %v5178_v8 = vld [vmem:[#allocation3 + $0x68] sm:$0xff] }
 0x472   : > { %5102 = vst.msk [vmem:[#allocation3 + $0xa8] sm:$0xff] %vm1735_vm5, %v5070_v57 }
 0x475   : > { %v4653_v15 = vld [vmem:[#allocation3 + $0xd0] sm:$0xff]  ;;  %v9812_v52 = vpop.f32.mrb[120].mxu0 }
 0x476   : > { %v4651_v21 = vld [vmem:[#allocation3 + $0xc0] sm:$0xff]  ;;  %v5075_v31 = vadd.f32 %v9812_v52, %v4653_v15  ;;  %v5018_v19 = vpop.f32.mrb[121].mxu0 }
 0x477   : > { %v9782_v35 = vpop.f32.mrb[92].mxu1  ;;  %v4654_v22 = vld [vmem:[#allocation3 + $0xd8] sm:$0xff]  ;;  %v5073_v16 = vadd.f32 %v5018_v19, %v4651_v21  ;;  %v9813_v45 = vpop.f32.mrb[122].mxu0 }
 0x478   : > { %v4593_v54 = vadd.f32 %v9782_v35, %v3915_v53  ;;  %v4548_v14 = vpop.f32.mrb[93].mxu1  ;;  %v4652_v7 = vld [vmem:[#allocation3 + $0xc8] sm:$0xff]  ;;  %5107 = vst.msk [vmem:[#allocation3 + $0xd0] sm:$0xff] %vm1735_vm5, %v5075_v31  ;;  %v5076_v24 = vadd.f32 %v9813_v45, %v4654_v22  ;;  %v5021_v6 = vpop.f32.mrb[123].mxu0 }
 0x479   : > { %v4591_v50 = vadd.f32 %v4548_v14, %v3913_v58  ;;  %v9783_v37 = vpop.f32.mrb[94].mxu1  ;;  %5105 = vst.msk [vmem:[#allocation3 + $0xc0] sm:$0xff] %vm1735_vm5, %v5073_v16  ;;  %v5074_v41 = vadd.f32 %v5021_v6, %v4652_v7  ;;  %v5170_v35 = vld [vmem:[#allocation3 + $0x28] sm:$0xff]  ;;  %v5175_v16 = vld [vmem:[#allocation3 + $0x50] sm:$0xff] }
 0x47a   : > { %4625 = vst.msk [vmem:[#allocation3 + $0xf0] sm:$0xff] %vm1735_vm5, %v4593_v54  ;;  %v4594_v12 = vadd.f32 %v9783_v37, %v3916_v62  ;;  %v4551_v18 = vpop.f32.mrb[95].mxu1  ;;  %5108 = vst.msk [vmem:[#allocation3 + $0xd8] sm:$0xff] %vm1735_vm5, %v5076_v24  ;;  %v10267_v37 = vld [vmem:[%s11694_s19 + $0x28] sm:$0xff]   ;;  %v10268_v7 = vld [vmem:[%s11694_s19 + $0x30] sm:$0xff]  }
 0x47b   : > { %4623 = vst.msk [vmem:[#allocation3 + $0xe0] sm:$0xff] %vm1735_vm5, %v4591_v50  ;;  %v4592_v13 = vadd.f32 %v4551_v18, %v3914_v49  ;;  %5106 = vst.msk [vmem:[#allocation3 + $0xc8] sm:$0xff] %vm1735_vm5, %v5074_v41  ;;  %v10266_v50 = vld [vmem:[%s11694_s19 + $0x20] sm:$0xff]  }
 0x47c   : > { %4626 = vst.msk [vmem:[#allocation3 + $0xf8] sm:$0xff] %vm1735_vm5, %v4594_v12  ;;  %9964 = vmatprep.mubr.msk.bf16.mxu1 %vm785_vm1, %v10266_v50  ;;  %v5173_v49 = vld [vmem:[#allocation3 + $0x40] sm:$0xff]  ;;  %v5182_v50 = vld [vmem:[#allocation3 + $0x88] sm:$0xff] }
 0x47d   : > { %4624 = vst.msk [vmem:[#allocation3 + $0xe8] sm:$0xff] %vm1735_vm5, %v4592_v13  ;;  %v9816_v4 = vpop.f32.mrb[124].mxu0  ;;  %9965 = vmatmul.mubr.msk.bf16.gmra.mrb[168].mxu1 %vm785_vm1, %v10267_v37  ;;  %v5176_v13 = vld [vmem:[#allocation3 + $0x58] sm:$0xff] }
 0x47e   : > { %v5034_v32 = vpop.f32.mrb[125].mxu0  ;;  %9968 = vmatprep.mubr.msk.bf16.mxu1 %vm785_vm1, %v10268_v7  ;;  %v10272_v7 = vld [vmem:[%s11694_s19 + $0x50] sm:$0xff]  }
 0x47f   : > { %v9822_v48 = vpop.f32.mrb[96].mxu1  ;;  %v9817_v36 = vpop.f32.mrb[126].mxu0 }
 0x480   : > { %v5493_v3 = vadd.f32 %v9822_v48, %v5167_v28  ;;  %v5364_v17 = vpop.f32.mrb[97].mxu1  ;;  %v5037_v63 = vpop.f32.mrb[127].mxu0  ;;  %v5174_v48 = vld [vmem:[#allocation3 + $0x48] sm:$0xff] }
 0x481   : > { %v4657_v56 = vld [vmem:[#allocation3 + $0xf0] sm:$0xff]  ;;  %v5491_v0 = vadd.f32 %v5364_v17, %v5165_v51  ;;  %v9823_v44 = vpop.f32.mrb[98].mxu1 }
 0x482   : > { %5525 = vst.msk [vmem:[#allocation3 + $0x10] sm:$0xff] %vm1735_vm5, %v5493_v3  ;;  %v5079_v34 = vadd.f32 %v9816_v4, %v4657_v56  ;;  %v4655_v43 = vld [vmem:[#allocation3 + $0xe0] sm:$0xff]  ;;  %v5494_v20 = vadd.f32 %v9823_v44, %v5168_v5  ;;  %v5367_v9 = vpop.f32.mrb[99].mxu1  ;;  %v10269_v56 = vld [vmem:[%s11694_s19 + $0x38] sm:$0xff]  }
 0x483   : > { %5523 = vst.msk [vmem:[#allocation3] sm:$0xff] %vm1735_vm5, %v5491_v0  ;;  %v5077_v40 = vadd.f32 %v5034_v32, %v4655_v43  ;;  %v4658_v47 = vld [vmem:[#allocation3 + $0xf8] sm:$0xff]  ;;  %v5492_v25 = vadd.f32 %v5367_v9, %v5166_v42 }
 0x484   : > { %5111 = vst.msk [vmem:[#allocation3 + $0xf0] sm:$0xff] %vm1735_vm5, %v5079_v34  ;;  %5526 = vst.msk [vmem:[#allocation3 + $0x18] sm:$0xff] %vm1735_vm5, %v5494_v20  ;;  %v5080_v60 = vadd.f32 %v9817_v36, %v4658_v47  ;;  %v4656_v1 = vld [vmem:[#allocation3 + $0xe8] sm:$0xff]  ;;  %v5179_v20 = vld [vmem:[#allocation3 + $0x70] sm:$0xff] }
 0x485   : > { %5109 = vst.msk [vmem:[#allocation3 + $0xe0] sm:$0xff] %vm1735_vm5, %v5077_v40  ;;  %5524 = vst.msk [vmem:[#allocation3 + $0x8] sm:$0xff] %vm1735_vm5, %v5492_v25  ;;  %v5078_v10 = vadd.f32 %v5037_v63, %v4656_v1  ;;  %9969 = vmatmul.mubr.msk.bf16.gmra.mrb[172].mxu1 %vm785_vm1, %v10269_v56  ;;  %v5177_v63 = vld [vmem:[#allocation3 + $0x60] sm:$0xff]  ;;  %v5188_v56 = vld [vmem:[#allocation3 + $0xb8] sm:$0xff] }
 0x486   : > { %5112 = vst.msk [vmem:[#allocation3 + $0xf8] sm:$0xff] %vm1735_vm5, %v5080_v60  ;;  %v5180_v60 = vld [vmem:[#allocation3 + $0x78] sm:$0xff] }
 0x487   : > { %5110 = vst.msk [vmem:[#allocation3 + $0xe8] sm:$0xff] %vm1735_vm5, %v5078_v10  ;;  %v9826_v61 = vpop.f32.mrb[100].mxu1 }
 0x488   : > { %v5497_v46 = vadd.f32 %v9826_v61, %v5171_v2  ;;  %v5380_v55 = vpop.f32.mrb[101].mxu1  ;;  %v9856_v38 = vpop.f32.mrb[128].mxu0 }
 0x489   : > { %v5495_v23 = vadd.f32 %v5380_v55, %v5169_v29  ;;  %v5557_v27 = vld [vmem:[#allocation3 + $0x10] sm:$0xff]  ;;  %v9827_v59 = vpop.f32.mrb[102].mxu1  ;;  %v6106_v33 = vpop.f32.mrb[129].mxu0 }
 0x48a   : > { %5529 = vst.msk [vmem:[#allocation3 + $0x30] sm:$0xff] %vm1735_vm5, %v5497_v46  ;;  %v6235_v57 = vadd.f32 %v9856_v38, %v5557_v27  ;;  %v5498_v15 = vadd.f32 %v9827_v59, %v5172_v26  ;;  %v5555_v53 = vld [vmem:[#allocation3] sm:$0xff]  ;;  %v5383_v52 = vpop.f32.mrb[103].mxu1  ;;  %v9857_v21 = vpop.f32.mrb[130].mxu0 }
 0x48b   : > { %5527 = vst.msk [vmem:[#allocation3 + $0x20] sm:$0xff] %vm1735_vm5, %v5495_v23  ;;  %v6233_v54 = vadd.f32 %v6106_v33, %v5555_v53  ;;  %v5496_v58 = vadd.f32 %v5383_v52, %v5170_v35  ;;  %v5558_v14 = vld [vmem:[#allocation3 + $0x18] sm:$0xff]  ;;  %v6109_v31 = vpop.f32.mrb[131].mxu0  ;;  %v10270_v59 = vld [vmem:[%s11694_s19 + $0x40] sm:$0xff]   ;;  %v10271_v33 = vld [vmem:[%s11694_s19 + $0x48] sm:$0xff]  }
 0x48c   : > { %6267 = vst.msk [vmem:[#allocation3 + $0x10] sm:$0xff] %vm1735_vm5, %v6235_v57  ;;  %5530 = vst.msk [vmem:[#allocation3 + $0x38] sm:$0xff] %vm1735_vm5, %v5498_v15  ;;  %v6236_v19 = vadd.f32 %v9857_v21, %v5558_v14  ;;  %v5556_v22 = vld [vmem:[#allocation3 + $0x8] sm:$0xff]  ;;  %v5183_v35 = vld [vmem:[#allocation3 + $0x90] sm:$0xff]  ;;  %9972 = vmatprep.mubr.msk.bf16.mxu1 %vm785_vm1, %v10270_v59 }
 0x48d   : > { %6265 = vst.msk [vmem:[#allocation3] sm:$0xff] %vm1735_vm5, %v6233_v54  ;;  %5528 = vst.msk [vmem:[#allocation3 + $0x28] sm:$0xff] %vm1735_vm5, %v5496_v58  ;;  %v6234_v62 = vadd.f32 %v6109_v31, %v5556_v22  ;;  %v5181_v54 = vld [vmem:[#allocation3 + $0x80] sm:$0xff]  ;;  %9973 = vmatmul.mubr.msk.bf16.gmra.mrb[176].mxu1 %vm785_vm1, %v10271_v33  ;;  %v5184_v31 = vld [vmem:[#allocation3 + $0x98] sm:$0xff] }
 0x48e   : > { %6268 = vst.msk [vmem:[#allocation3 + $0x18] sm:$0xff] %vm1735_vm5, %v6236_v19  ;;  %9976 = vmatprep.mubr.msk.bf16.mxu1 %vm785_vm1, %v10272_v7 }
 0x48f   : > { %6266 = vst.msk [vmem:[#allocation3 + $0x8] sm:$0xff] %vm1735_vm5, %v6234_v62  ;;  %v9830_v45 = vpop.f32.mrb[104].mxu1 }
 0x490   : > { %v5501_v12 = vadd.f32 %v9830_v45, %v5175_v16  ;;  %v5396_v18 = vpop.f32.mrb[105].mxu1 }
 0x491   : > { %v5499_v24 = vadd.f32 %v5396_v18, %v5173_v49  ;;  %v5561_v6 = vld [vmem:[#allocation3 + $0x30] sm:$0xff]  ;;  %v9831_v41 = vpop.f32.mrb[106].mxu1 }
 0x492   : > { %5533 = vst.msk [vmem:[#allocation3 + $0x50] sm:$0xff] %vm1735_vm5, %v5501_v12  ;;  %v9860_v11 = vpop.f32.mrb[132].mxu0  ;;  %v5502_v39 = vadd.f32 %v9831_v41, %v5176_v13  ;;  %v5559_v28 = vld [vmem:[#allocation3 + $0x20] sm:$0xff]  ;;  %v5399_v4 = vpop.f32.mrb[107].mxu1  ;;  %v10273_v12 = vld [vmem:[%s11694_s19 + $0x58] sm:$0xff]   ;;  %v5187_v41 = vld [vmem:[#allocation3 + $0xb0] sm:$0xff] }
 0x493   : > { %5531 = vst.msk [vmem:[#allocation3 + $0x40] sm:$0xff] %vm1735_vm5, %v5499_v24  ;;  %v6239_v3 = vadd.f32 %v9860_v11, %v5561_v6  ;;  %v6122_v51 = vpop.f32.mrb[133].mxu0  ;;  %v5500_v17 = vadd.f32 %v5399_v4, %v5174_v48  ;;  %v5562_v32 = vld [vmem:[#allocation3 + $0x38] sm:$0xff]  ;;  %v5185_v4 = vld [vmem:[#allocation3 + $0xa0] sm:$0xff] }
 0x494   : > { %5534 = vst.msk [vmem:[#allocation3 + $0x58] sm:$0xff] %vm1735_vm5, %v5502_v39  ;;  %v6237_v0 = vadd.f32 %v6122_v51, %v5559_v28  ;;  %v9861_v5 = vpop.f32.mrb[134].mxu0  ;;  %v5560_v44 = vld [vmem:[#allocation3 + $0x28] sm:$0xff] }
 0x495   : > { %6271 = vst.msk [vmem:[#allocation3 + $0x30] sm:$0xff] %vm1735_vm5, %v6239_v3  ;;  %5532 = vst.msk [vmem:[#allocation3 + $0x48] sm:$0xff] %vm1735_vm5, %v5500_v17  ;;  %v6240_v36 = vadd.f32 %v9861_v5, %v5562_v32  ;;  %v6125_v34 = vpop.f32.mrb[135].mxu0  ;;  %9977 = vmatmul.mubr.msk.bf16.gmra.mrb[180].mxu1 %vm785_vm1, %v10273_v12  ;;  %v5196_v12 = vld [vmem:[#allocation3 + $0xf8] sm:$0xff] }
 0x496   : > { %6269 = vst.msk [vmem:[#allocation3 + $0x20] sm:$0xff] %vm1735_vm5, %v6237_v0  ;;  %v6238_v43 = vadd.f32 %v6125_v34, %v5560_v44 }
 0x497   : > { %6272 = vst.msk [vmem:[#allocation3 + $0x38] sm:$0xff] %vm1735_vm5, %v6240_v36  ;;  %v9834_v42 = vpop.f32.mrb[108].mxu1  ;;  %v5186_v36 = vld [vmem:[#allocation3 + $0xa8] sm:$0xff] }
 0x498   : > { %6270 = vst.msk [vmem:[#allocation3 + $0x28] sm:$0xff] %vm1735_vm5, %v6238_v43  ;;  %v5505_v9 = vadd.f32 %v9834_v42, %v5179_v20  ;;  %v5412_v40 = vpop.f32.mrb[109].mxu1  ;;  %v10274_v20 = vld [vmem:[%s11694_s19 + $0x60] sm:$0xff]   ;;  %v10275_v42 = vld [vmem:[%s11694_s19 + $0x68] sm:$0xff]  }
 0x499   : > { %v5503_v47 = vadd.f32 %v5412_v40, %v5177_v63  ;;  %v5565_v25 = vld [vmem:[#allocation3 + $0x50] sm:$0xff]  ;;  %v9835_v1 = vpop.f32.mrb[110].mxu1  ;;  %9980 = vmatprep.mubr.msk.bf16.mxu1 %vm785_vm1, %v10274_v20 }
 0x49a   : > { %5537 = vst.msk [vmem:[#allocation3 + $0x70] sm:$0xff] %vm1735_vm5, %v5505_v9  ;;  %v5506_v30 = vadd.f32 %v9835_v1, %v5180_v60  ;;  %v5563_v10 = vld [vmem:[#allocation3 + $0x40] sm:$0xff]  ;;  %v5415_v2 = vpop.f32.mrb[111].mxu1  ;;  %v5191_v40 = vld [vmem:[#allocation3 + $0xd0] sm:$0xff] }
 0x49b   : > { %5535 = vst.msk [vmem:[#allocation3 + $0x60] sm:$0xff] %vm1735_vm5, %v5503_v47  ;;  %v5504_v46 = vadd.f32 %v5415_v2, %v5178_v8  ;;  %v5566_v29 = vld [vmem:[#allocation3 + $0x58] sm:$0xff]  ;;  %v6299_v20 = vld [vmem:[#allocation3 + $0x10] sm:$0xff] }
 0x49c   : > { %5538 = vst.msk [vmem:[#allocation3 + $0x78] sm:$0xff] %vm1735_vm5, %v5506_v30  ;;  %v5564_v23 = vld [vmem:[#allocation3 + $0x48] sm:$0xff]  ;;  %v5189_v30 = vld [vmem:[#allocation3 + $0xc0] sm:$0xff] }
 0x49d   : > { %5536 = vst.msk [vmem:[#allocation3 + $0x68] sm:$0xff] %vm1735_vm5, %v5504_v46  ;;  %9981 = vmatmul.mubr.msk.bf16.gmra.mrb[184].mxu1 %vm785_vm1, %v10275_v42 }
 0x49f   : > { %v9838_v52 = vpop.f32.mrb[112].mxu1 }
 0x4a0   : > { %v9864_v61 = vpop.f32.mrb[136].mxu0  ;;  %v5509_v21 = vadd.f32 %v9838_v52, %v5183_v35  ;;  %v5428_v58 = vpop.f32.mrb[113].mxu1  ;;  %v10276_v35 = vld [vmem:[%s11694_s19 + $0x70] sm:$0xff]   ;;  %v10277_v52 = vld [vmem:[%s11694_s19 + $0x78] sm:$0xff]   ;;  %s11060_s19 = scalar_lea.vmem %s14784_s23, 2048 }
 0x4a1   : > { %v6243_v55 = vadd.f32 %v9864_v61, %v5565_v25  ;;  %v6138_v38 = vpop.f32.mrb[137].mxu0  ;;  %v5507_v14 = vadd.f32 %v5428_v58, %v5181_v54  ;;  %v9839_v19 = vpop.f32.mrb[114].mxu1  ;;  %v5569_v16 = vld [vmem:[#allocation3 + $0x70] sm:$0xff]  ;;  %9984 = vmatprep.mubr.msk.bf16.mxu1 %vm785_vm1, %v10276_v35  ;;  %p11061_p11 = scmp.ne.s32.totalorder %s14784_s23, %s11060_s19 }
 0x4a2   : > { %v6241_v27 = vadd.f32 %v6138_v38, %v5563_v10  ;;  %v9865_v26 = vpop.f32.mrb[138].mxu0  ;;  %5541 = vst.msk [vmem:[#allocation3 + $0x90] sm:$0xff] %vm1735_vm5, %v5509_v21  ;;  %v5510_v22 = vadd.f32 %v9839_v19, %v5184_v31  ;;  %v5431_v62 = vpop.f32.mrb[115].mxu1  ;;  %v5567_v45 = vld [vmem:[#allocation3 + $0x60] sm:$0xff]  ;;  %v5195_v58 = vld [vmem:[#allocation3 + $0xf0] sm:$0xff] }
 0x4a3   : > { %6275 = vst.msk [vmem:[#allocation3 + $0x50] sm:$0xff] %vm1735_vm5, %v6243_v55  ;;  %v6244_v57 = vadd.f32 %v9865_v26, %v5566_v29  ;;  %v6141_v15 = vpop.f32.mrb[139].mxu0  ;;  %5539 = vst.msk [vmem:[#allocation3 + $0x80] sm:$0xff] %vm1735_vm5, %v5507_v14  ;;  %v5508_v37 = vadd.f32 %v5431_v62, %v5182_v50  ;;  %v5570_v18 = vld [vmem:[#allocation3 + $0x78] sm:$0xff]  ;;  %v5190_v26 = vld [vmem:[#allocation3 + $0xc8] sm:$0xff]  ;;  %p11062_p5 = pnand %p11061_p11, %p15440_p0 }
 0x4a4   : > { %6273 = vst.msk [vmem:[#allocation3 + $0x40] sm:$0xff] %vm1735_vm5, %v6241_v27  ;;  %v6242_v53 = vadd.f32 %v6141_v15, %v5564_v23  ;;  %5542 = vst.msk [vmem:[#allocation3 + $0x98] sm:$0xff] %vm1735_vm5, %v5510_v22  ;;  %v5568_v13 = vld [vmem:[#allocation3 + $0x68] sm:$0xff]  ;;  %v5192_v29 = vld [vmem:[#allocation3 + $0xd8] sm:$0xff] }
 0x4a5   : > { %6276 = vst.msk [vmem:[#allocation3 + $0x58] sm:$0xff] %vm1735_vm5, %v6244_v57  ;;  %5540 = vst.msk [vmem:[#allocation3 + $0x88] sm:$0xff] %vm1735_vm5, %v5508_v37  ;;  %9985 = vmatmul.mubr.msk.bf16.gmra.mrb[188].mxu1 %vm785_vm1, %v10277_v52  ;;  %v5193_v50 = vld [vmem:[#allocation3 + $0xe0] sm:$0xff]  ;;  %v14400_v52 = vld [vmem:[#allocation15] ss:$0 sm:$0xff]  ;;  %p11063_p1 = pneg %p11062_p5 }
 0x4a6   : > { %6274 = vst.msk [vmem:[#allocation3 + $0x48] sm:$0xff] %vm1735_vm5, %v6242_v53 }
 0x4a9   : > { %v5573_v9 = vld [vmem:[#allocation3 + $0x90] sm:$0xff] }
 0x4aa   : > { %v9868_v49 = vpop.f32.mrb[140].mxu0  ;;  %v5571_v63 = vld [vmem:[#allocation3 + $0x80] sm:$0xff] }
 0x4ab   : > { %v6247_v24 = vadd.f32 %v9868_v49, %v5569_v16  ;;  %v6154_v6 = vpop.f32.mrb[141].mxu0  ;;  %v9842_v11 = vpop.f32.mrb[116].mxu1  ;;  %v5574_v60 = vld [vmem:[#allocation3 + $0x98] sm:$0xff] }
 0x4ac   : > { %v6245_v39 = vadd.f32 %v6154_v6, %v5567_v45  ;;  %v9869_v28 = vpop.f32.mrb[142].mxu0  ;;  %v5513_v48 = vadd.f32 %v9842_v11, %v5187_v41  ;;  %v5444_v3 = vpop.f32.mrb[117].mxu1  ;;  %v5572_v61 = vld [vmem:[#allocation3 + $0x88] sm:$0xff] }
 0x4ad   : > { %6279 = vst.msk [vmem:[#allocation3 + $0x70] sm:$0xff] %vm1735_vm5, %v6247_v24  ;;  %v6248_v51 = vadd.f32 %v9869_v28, %v5570_v18  ;;  %v6157_v17 = vpop.f32.mrb[143].mxu0  ;;  %v5511_v32 = vadd.f32 %v5444_v3, %v5185_v4  ;;  %v9843_v0 = vpop.f32.mrb[118].mxu1 }
 0x4ae   : > { %6277 = vst.msk [vmem:[#allocation3 + $0x60] sm:$0xff] %vm1735_vm5, %v6245_v39  ;;  %v6246_v5 = vadd.f32 %v6157_v17, %v5568_v13  ;;  %5545 = vst.msk [vmem:[#allocation3 + $0xb0] sm:$0xff] %vm1735_vm5, %v5513_v48  ;;  %v5514_v44 = vadd.f32 %v9843_v0, %v5188_v56  ;;  %v5447_v34 = vpop.f32.mrb[119].mxu1  ;;  %v5194_v13 = vld [vmem:[#allocation3 + $0xe8] sm:$0xff] }
 0x4af   : > { %6280 = vst.msk [vmem:[#allocation3 + $0x78] sm:$0xff] %vm1735_vm5, %v6248_v51  ;;  %5543 = vst.msk [vmem:[#allocation3 + $0xa0] sm:$0xff] %vm1735_vm5, %v5511_v32  ;;  %v5512_v43 = vadd.f32 %v5447_v34, %v5186_v36 }
 0x4b0   : > { %6278 = vst.msk [vmem:[#allocation3 + $0x68] sm:$0xff] %vm1735_vm5, %v6246_v5  ;;  %5546 = vst.msk [vmem:[#allocation3 + $0xb8] sm:$0xff] %vm1735_vm5, %v5514_v44 }
 0x4b1   : > { %5544 = vst.msk [vmem:[#allocation3 + $0xa8] sm:$0xff] %vm1735_vm5, %v5512_v43 }
 0x4b5   : > { %v9846_v47 = vpop.f32.mrb[120].mxu1  ;;  %v5577_v21 = vld [vmem:[#allocation3 + $0xb0] sm:$0xff] }
 0x4b6   : > { %v5517_v1 = vadd.f32 %v9846_v47, %v5191_v40  ;;  %v5460_v10 = vpop.f32.mrb[121].mxu1  ;;  %v5575_v54 = vld [vmem:[#allocation3 + $0xa0] sm:$0xff] }
 0x4b7   : > { %v9872_v25 = vpop.f32.mrb[144].mxu0  ;;  %v5515_v46 = vadd.f32 %v5460_v10, %v5189_v30  ;;  %v9847_v55 = vpop.f32.mrb[122].mxu1  ;;  %v5578_v19 = vld [vmem:[#allocation3 + $0xb8] sm:$0xff]  ;;  %v6298_v30 = vld [vmem:[#allocation3 + $0x8] sm:$0xff] }
 0x4b8   : > { %v6251_v8 = vadd.f32 %v9872_v25, %v5573_v9  ;;  %v6170_v2 = vpop.f32.mrb[145].mxu0  ;;  %5549 = vst.msk [vmem:[#allocation3 + $0xd0] sm:$0xff] %vm1735_vm5, %v5517_v1  ;;  %v5518_v27 = vadd.f32 %v9847_v55, %v5192_v29  ;;  %v5463_v59 = vpop.f32.mrb[123].mxu1  ;;  %v5576_v45 = vld [vmem:[#allocation3 + $0xa8] sm:$0xff]  ;;  %v6300_v25 = vld [vmem:[#allocation3 + $0x18] sm:$0xff] }
 0x4b9   : > { %v6249_v38 = vadd.f32 %v6170_v2, %v5571_v63  ;;  %v9873_v23 = vpop.f32.mrb[146].mxu0  ;;  %5547 = vst.msk [vmem:[#allocation3 + $0xc0] sm:$0xff] %vm1735_vm5, %v5515_v46  ;;  %v5516_v15 = vadd.f32 %v5463_v59, %v5190_v26  ;;  %v6297_v63 = vld [vmem:[#allocation3] sm:$0xff]  ;;  %v14398_v55 = vld [vmem:[#allocation13] ss:$0 sm:$0xff]  ;;  %v6303_v26 = vld [vmem:[#allocation3 + $0x30] sm:$0xff] }
 0x4ba   : > { %6283 = vst.msk [vmem:[#allocation3 + $0x90] sm:$0xff] %vm1735_vm5, %v6251_v8  ;;  %v6252_v33 = vadd.f32 %v9873_v23, %v5574_v60  ;;  %v6173_v57 = vpop.f32.mrb[147].mxu0  ;;  %5550 = vst.msk [vmem:[#allocation3 + $0xd8] sm:$0xff] %vm1735_vm5, %v5518_v27 }
 0x4bb   : > { %6281 = vst.msk [vmem:[#allocation3 + $0x80] sm:$0xff] %vm1735_vm5, %v6249_v38  ;;  %v6250_v53 = vadd.f32 %v6173_v57, %v5572_v61  ;;  %5548 = vst.msk [vmem:[#allocation3 + $0xc8] sm:$0xff] %vm1735_vm5, %v5516_v15 }
 0x4bc   : > { %6284 = vst.msk [vmem:[#allocation3 + $0x98] sm:$0xff] %vm1735_vm5, %v6252_v33 }
 0x4bd   : > { %6282 = vst.msk [vmem:[#allocation3 + $0x88] sm:$0xff] %vm1735_vm5, %v6250_v53  ;;  %v6301_v53 = vld [vmem:[#allocation3 + $0x20] sm:$0xff] }
 0x4bf   : > { %v5581_v4 = vld [vmem:[#allocation3 + $0xd0] sm:$0xff] }
 0x4c0   : > { %v9850_v14 = vpop.f32.mrb[124].mxu1  ;;  %v5579_v3 = vld [vmem:[#allocation3 + $0xc0] sm:$0xff] }
 0x4c1   : > { %v5521_v22 = vadd.f32 %v9850_v14, %v5195_v58  ;;  %v5476_v62 = vpop.f32.mrb[125].mxu1  ;;  %v5582_v17 = vld [vmem:[#allocation3 + $0xd8] sm:$0xff] }
 0x4c2   : > { %v9876_v31 = vpop.f32.mrb[148].mxu0  ;;  %v5519_v7 = vadd.f32 %v5476_v62, %v5193_v50  ;;  %v9851_v49 = vpop.f32.mrb[126].mxu1  ;;  %v5580_v0 = vld [vmem:[#allocation3 + $0xc8] sm:$0xff] }
 0x4c3   : > { %v6255_v37 = vadd.f32 %v9876_v31, %v5577_v21  ;;  %v6186_v16 = vpop.f32.mrb[149].mxu0  ;;  %5553 = vst.msk [vmem:[#allocation3 + $0xf0] sm:$0xff] %vm1735_vm5, %v5521_v22  ;;  %v5522_v6 = vadd.f32 %v9851_v49, %v5196_v12  ;;  %v5479_v41 = vpop.f32.mrb[127].mxu1  ;;  %v6304_v31 = vld [vmem:[#allocation3 + $0x38] sm:$0xff] }
 0x4c4   : > { %v6253_v18 = vadd.f32 %v6186_v16, %v5575_v54  ;;  %v9877_v24 = vpop.f32.mrb[150].mxu0  ;;  %5551 = vst.msk [vmem:[#allocation3 + $0xe0] sm:$0xff] %vm1735_vm5, %v5519_v7  ;;  %v5520_v28 = vadd.f32 %v5479_v41, %v5194_v13  ;;  %v6302_v16 = vld [vmem:[#allocation3 + $0x28] sm:$0xff] }
 0x4c5   : > { %6287 = vst.msk [vmem:[#allocation3 + $0xb0] sm:$0xff] %vm1735_vm5, %v6255_v37  ;;  %v6256_v11 = vadd.f32 %v9877_v24, %v5578_v19  ;;  %v6189_v39 = vpop.f32.mrb[151].mxu0  ;;  %5554 = vst.msk [vmem:[#allocation3 + $0xf8] sm:$0xff] %vm1735_vm5, %v5522_v6 }
 0x4c6   : > { %6285 = vst.msk [vmem:[#allocation3 + $0xa0] sm:$0xff] %vm1735_vm5, %v6253_v18  ;;  %v6254_v48 = vadd.f32 %v6189_v39, %v5576_v45  ;;  %5552 = vst.msk [vmem:[#allocation3 + $0xe8] sm:$0xff] %vm1735_vm5, %v5520_v28 }
 0x4c7   : > { %6288 = vst.msk [vmem:[#allocation3 + $0xb8] sm:$0xff] %vm1735_vm5, %v6256_v11 }
 0x4c8   : > { %6286 = vst.msk [vmem:[#allocation3 + $0xa8] sm:$0xff] %vm1735_vm5, %v6254_v48 }
 0x4ca   : > { %v5585_v2 = vld [vmem:[#allocation3 + $0xf0] sm:$0xff] }
 0x4cb   : > { %v9880_v51 = vpop.f32.mrb[152].mxu0  ;;  %v5583_v61 = vld [vmem:[#allocation3 + $0xe0] sm:$0xff] }
 0x4cc   : > { %v6259_v32 = vadd.f32 %v9880_v51, %v5581_v4  ;;  %v6202_v56 = vpop.f32.mrb[153].mxu0  ;;  %v5586_v29 = vld [vmem:[#allocation3 + $0xf8] sm:$0xff]  ;;  %v6307_v4 = vld [vmem:[#allocation3 + $0x50] sm:$0xff] }
 0x4cd   : > { %v6257_v5 = vadd.f32 %v6202_v56, %v5579_v3  ;;  %v9881_v44 = vpop.f32.mrb[154].mxu0  ;;  %v5584_v27 = vld [vmem:[#allocation3 + $0xe8] sm:$0xff] }
 0x4ce   : > { %6291 = vst.msk [vmem:[#allocation3 + $0xd0] sm:$0xff] %vm1735_vm5, %v6259_v32  ;;  %v6260_v36 = vadd.f32 %v9881_v44, %v5582_v17  ;;  %v6205_v34 = vpop.f32.mrb[155].mxu0  ;;  %v6305_v32 = vld [vmem:[#allocation3 + $0x40] sm:$0xff]  ;;  %v6308_v44 = vld [vmem:[#allocation3 + $0x58] sm:$0xff] }
 0x4cf   : > { %6289 = vst.msk [vmem:[#allocation3 + $0xc0] sm:$0xff] %vm1735_vm5, %v6257_v5  ;;  %v6258_v43 = vadd.f32 %v6205_v34, %v5580_v0 }
 0x4d0   : > { %6292 = vst.msk [vmem:[#allocation3 + $0xd8] sm:$0xff] %vm1735_vm5, %v6260_v36 }
 0x4d1   : > { %6290 = vst.msk [vmem:[#allocation3 + $0xc8] sm:$0xff] %vm1735_vm5, %v6258_v43  ;;  %v9890_v42 = vpop.f32.mrb[128].mxu1 }
 0x4d2   : > { %v6721_v9 = vadd.f32 %v9890_v42, %v6299_v20  ;;  %v6592_v40 = vpop.f32.mrb[129].mxu1  ;;  %v6306_v20 = vld [vmem:[#allocation3 + $0x48] sm:$0xff] }
 0x4d3   : > { %v6719_v47 = vadd.f32 %v6592_v40, %v6297_v63  ;;  %v9891_v60 = vpop.f32.mrb[130].mxu1 }
 0x4d4   : > { %6753 = vst.msk [vmem:[#allocation3 + $0x10] sm:$0xff] %vm1735_vm5, %v6721_v9  ;;  %v6722_v1 = vadd.f32 %v9891_v60, %v6300_v25  ;;  %v6595_v10 = vpop.f32.mrb[131].mxu1 }
 0x4d5   : > { %6751 = vst.msk [vmem:[#allocation3] sm:$0xff] %vm1735_vm5, %v6719_v47  ;;  %v6720_v8 = vadd.f32 %v6595_v10, %v6298_v30 }
 0x4d6   : > { %6754 = vst.msk [vmem:[#allocation3 + $0x18] sm:$0xff] %vm1735_vm5, %v6722_v1 }
 0x4d7   : > { %6752 = vst.msk [vmem:[#allocation3 + $0x8] sm:$0xff] %vm1735_vm5, %v6720_v8 }
 0x4d9   : > { %v9884_v46 = vpop.f32.mrb[156].mxu0 }
 0x4da   : > { %v6263_v38 = vadd.f32 %v9884_v46, %v5585_v2  ;;  %v6218_v23 = vpop.f32.mrb[157].mxu0  ;;  %v6311_v46 = vld [vmem:[#allocation3 + $0x70] sm:$0xff] }
 0x4db   : > { %v9894_v59 = vpop.f32.mrb[132].mxu1  ;;  %v6261_v33 = vadd.f32 %v6218_v23, %v5583_v61  ;;  %v9885_v57 = vpop.f32.mrb[158].mxu0  ;;  %v6785_v21 = vld [vmem:[#allocation3 + $0x10] sm:$0xff] }
 0x4dc   : > { %v6725_v15 = vadd.f32 %v9894_v59, %v6303_v26  ;;  %v6608_v35 = vpop.f32.mrb[133].mxu1  ;;  %6295 = vst.msk [vmem:[#allocation3 + $0xf0] sm:$0xff] %vm1735_vm5, %v6263_v38  ;;  %v6264_v54 = vadd.f32 %v9885_v57, %v5586_v29  ;;  %v6221_v58 = vpop.f32.mrb[159].mxu0  ;;  %v6783_v22 = vld [vmem:[#allocation3] sm:$0xff]  ;;  %v6824_v50 = vmul.f32 %v14398_v55, %v6785_v21 }
 0x4dd   : > { %v6723_v14 = vadd.f32 %v6608_v35, %v6301_v53  ;;  %v9895_v19 = vpop.f32.mrb[134].mxu1  ;;  %6293 = vst.msk [vmem:[#allocation3 + $0xe0] sm:$0xff] %vm1735_vm5, %v6261_v33  ;;  %v6262_v62 = vadd.f32 %v6221_v58, %v5584_v27  ;;  %v6822_v7 = vmul.f32 %v14398_v55, %v6783_v22  ;;  %v6786_v12 = vld [vmem:[#allocation3 + $0x18] sm:$0xff]  ;;  %v6309_v26 = vld [vmem:[#allocation3 + $0x60] sm:$0xff] }
 0x4de   : > { %6757 = vst.msk [vmem:[#allocation3 + $0x30] sm:$0xff] %vm1735_vm5, %v6725_v15  ;;  %v6726_v37 = vadd.f32 %v9895_v19, %v6304_v31  ;;  %v6611_v45 = vpop.f32.mrb[135].mxu1  ;;  %6296 = vst.msk [vmem:[#allocation3 + $0xf8] sm:$0xff] %vm1735_vm5, %v6264_v54  ;;  %v6784_v18 = vld [vmem:[#allocation3 + $0x8] sm:$0xff]  ;;  %v6825_v24 = vmul.f32 %v14398_v55, %v6786_v12  ;;  %v14411_v6 = vadd.f32 %v14400_v52, %v6824_v50  ;;  %v6312_v53 = vld [vmem:[#allocation3 + $0x78] sm:$0xff] }
 0x4df   : > { %6755 = vst.msk [vmem:[#allocation3 + $0x20] sm:$0xff] %vm1735_vm5, %v6723_v14  ;;  %v6724_v49 = vadd.f32 %v6611_v45, %v6302_v16  ;;  %6294 = vst.msk [vmem:[#allocation3 + $0xe8] sm:$0xff] %vm1735_vm5, %v6262_v62  ;;  %v6823_v13 = vmul.f32 %v14398_v55, %v6784_v18  ;;  %v14417_v41 = vadd.f32 %v14400_v52, %v6822_v7  ;;  %v6310_v31 = vld [vmem:[#allocation3 + $0x68] sm:$0xff] }
 0x4e0   : > { %6758 = vst.msk [vmem:[#allocation3 + $0x38] sm:$0xff] %vm1735_vm5, %v6726_v37  ;;  %v14421_v11 = vadd.f32 %v14400_v52, %v6825_v24  ;;  %v9139_v39 = vmul.f32 -1.442695, %v14411_v6 }
 0x4e1   : > { %6756 = vst.msk [vmem:[#allocation3 + $0x28] sm:$0xff] %vm1735_vm5, %v6724_v49  ;;  %v14425_v28 = vadd.f32 %v14400_v52, %v6823_v13  ;;  %v9137_v48 = vmul.f32 -1.442695, %v14417_v41 }
 0x4e2   : > { %10406 = vpow2.f32 %v9139_v39  ;;  %v9140_v51 = vmul.f32 -1.442695, %v14421_v11 }
 0x4e3   : > { %v9898_v3 = vpop.f32.mrb[136].mxu1  ;;  %10408 = vpow2.f32 %v9137_v48  ;;  %v9138_v0 = vmul.f32 -1.442695, %v14425_v28 }
 0x4e4   : > { %v6729_v17 = vadd.f32 %v9898_v3, %v6307_v4  ;;  %v6624_v56 = vpop.f32.mrb[137].mxu1  ;;  %10410 = vpow2.f32 %v9140_v51 }
 0x4e5   : > { %v6727_v5 = vadd.f32 %v6624_v56, %v6305_v32  ;;  %v9899_v36 = vpop.f32.mrb[138].mxu1  ;;  %v6789_v34 = vld [vmem:[#allocation3 + $0x30] sm:$0xff]  ;;  %10412 = vpow2.f32 %v9138_v0 }
 0x4e6   : > { %6761 = vst.msk [vmem:[#allocation3 + $0x50] sm:$0xff] %vm1735_vm5, %v6729_v17  ;;  %v6730_v43 = vadd.f32 %v9899_v36, %v6308_v44  ;;  %v6627_v42 = vpop.f32.mrb[139].mxu1  ;;  %v6787_v9 = vld [vmem:[#allocation3 + $0x20] sm:$0xff]  ;;  %v6828_v63 = vmul.f32 %v14398_v55, %v6789_v34  ;;  %v6315_v32 = vld [vmem:[#allocation3 + $0x90] sm:$0xff] }
 0x4e7   : > { %6759 = vst.msk [vmem:[#allocation3 + $0x40] sm:$0xff] %vm1735_vm5, %v6727_v5  ;;  %v6728_v40 = vadd.f32 %v6627_v42, %v6306_v20  ;;  %v6826_v47 = vmul.f32 %v14398_v55, %v6787_v9  ;;  %v6790_v25 = vld [vmem:[#allocation3 + $0x38] sm:$0xff]  ;;  %v6313_v36 = vld [vmem:[#allocation3 + $0x80] sm:$0xff] }
 0x4e8   : > { %6762 = vst.msk [vmem:[#allocation3 + $0x58] sm:$0xff] %vm1735_vm5, %v6730_v43  ;;  %v6788_v60 = vld [vmem:[#allocation3 + $0x28] sm:$0xff]  ;;  %v6829_v1 = vmul.f32 %v14398_v55, %v6790_v25  ;;  %v14437_v30 = vadd.f32 %v14400_v52, %v6828_v63  ;;  %v6316_v42 = vld [vmem:[#allocation3 + $0x98] sm:$0xff] }
 0x4e9   : > { %6760 = vst.msk [vmem:[#allocation3 + $0x48] sm:$0xff] %vm1735_vm5, %v6728_v40  ;;  %v6827_v10 = vmul.f32 %v14398_v55, %v6788_v60  ;;  %v14442_v8 = vadd.f32 %v14400_v52, %v6826_v47  ;;  %v6314_v60 = vld [vmem:[#allocation3 + $0x88] sm:$0xff] }
 0x4ea   : > { %v14445_v2 = vadd.f32 %v14400_v52, %v6829_v1  ;;  %v9143_v61 = vmul.f32 -1.442695, %v14437_v30 }
 0x4eb   : > { %v9902_v29 = vpop.f32.mrb[140].mxu1  ;;  %v14449_v38 = vadd.f32 %v14400_v52, %v6827_v10  ;;  %v9141_v23 = vmul.f32 -1.442695, %v14442_v8 }
 0x4ec   : > { %v6733_v27 = vadd.f32 %v9902_v29, %v6311_v46  ;;  %v6640_v59 = vpop.f32.mrb[141].mxu1  ;;  %10414 = vpow2.f32 %v9143_v61  ;;  %v9144_v33 = vmul.f32 -1.442695, %v14445_v2  ;;  %v10407_v57 = vpop.eup %10406 }
 0x4ed   : > { %v6731_v15 = vadd.f32 %v6640_v59, %v6309_v26  ;;  %v9903_v35 = vpop.f32.mrb[142].mxu1  ;;  %10416 = vpow2.f32 %v9141_v23  ;;  %v9142_v21 = vmul.f32 -1.442695, %v14449_v38  ;;  %v6793_v54 = vld [vmem:[#allocation3 + $0x50] sm:$0xff]  ;;  %v10409_v58 = vpop.eup %10408  ;;  %v6991_v22 = vadd.f32 1.0, %v10407_v57 }
 0x4ee   : > { %6765 = vst.msk [vmem:[#allocation3 + $0x70] sm:$0xff] %vm1735_vm5, %v6733_v27  ;;  %v6734_v14 = vadd.f32 %v9903_v35, %v6312_v53  ;;  %v6643_v19 = vpop.f32.mrb[143].mxu1  ;;  %10418 = vpow2.f32 %v9144_v33  ;;  %v6791_v50 = vld [vmem:[#allocation3 + $0x40] sm:$0xff]  ;;  %v6832_v62 = vmul.f32 %v14398_v55, %v6793_v54  ;;  %v10411_v37 = vpop.eup %10410  ;;  %v6989_v45 = vadd.f32 1.0, %v10409_v58 }
 0x4ef   : > { %6763 = vst.msk [vmem:[#allocation3 + $0x60] sm:$0xff] %vm1735_vm5, %v6731_v15  ;;  %v6732_v16 = vadd.f32 %v6643_v19, %v6310_v31  ;;  %10420 = vpow2.f32 %v9142_v21  ;;  %v6830_v7 = vmul.f32 %v14398_v55, %v6791_v50  ;;  %v6794_v12 = vld [vmem:[#allocation3 + $0x58] sm:$0xff]  ;;  %v10413_v49 = vpop.eup %10412  ;;  %v6992_v18 = vadd.f32 1.0, %v10411_v37  ;;  %v6319_v50 = vld [vmem:[#allocation3 + $0xb0] sm:$0xff] }
 0x4f0   : > { %6766 = vst.msk [vmem:[#allocation3 + $0x78] sm:$0xff] %vm1735_vm5, %v6734_v14  ;;  %10422 = vrcp.f32 %v6991_v22  ;;  %v6792_v24 = vld [vmem:[#allocation3 + $0x48] sm:$0xff]  ;;  %v6833_v13 = vmul.f32 %v14398_v55, %v6794_v12  ;;  %v14461_v39 = vadd.f32 %v14400_v52, %v6832_v62  ;;  %v6990_v48 = vadd.f32 1.0, %v10413_v49  ;;  %v6317_v49 = vld [vmem:[#allocation3 + $0xa0] sm:$0xff] }
 0x4f1   : > { %6764 = vst.msk [vmem:[#allocation3 + $0x68] sm:$0xff] %vm1735_vm5, %v6732_v16  ;;  %10424 = vrcp.f32 %v6989_v45  ;;  %v6831_v4 = vmul.f32 %v14398_v55, %v6792_v24  ;;  %v14466_v3 = vadd.f32 %v14400_v52, %v6830_v7 }
 0x4f2   : > { %10426 = vrcp.f32 %v6992_v18  ;;  %v14469_v51 = vadd.f32 %v14400_v52, %v6833_v13  ;;  %v9147_v17 = vmul.f32 -1.442695, %v14461_v39 }
 0x4f3   : > { %v9906_v56 = vpop.f32.mrb[144].mxu1  ;;  %10428 = vrcp.f32 %v6990_v48  ;;  %v14473_v0 = vadd.f32 %v14400_v52, %v6831_v4  ;;  %v9145_v5 = vmul.f32 -1.442695, %v14466_v3 }
 0x4f4   : > { %v6737_v44 = vadd.f32 %v9906_v56, %v6315_v32  ;;  %v6656_v34 = vpop.f32.mrb[145].mxu1  ;;  %10430 = vpow2.f32 %v9147_v17  ;;  %v9148_v43 = vmul.f32 -1.442695, %v14469_v51  ;;  %v6320_v17 = vld [vmem:[#allocation3 + $0xb8] sm:$0xff] }
 0x4f5   : > { %v6735_v20 = vadd.f32 %v6656_v34, %v6313_v36  ;;  %v9907_v9 = vpop.f32.mrb[146].mxu1  ;;  %10432 = vpow2.f32 %v9145_v5  ;;  %v9146_v63 = vmul.f32 -1.442695, %v14473_v0  ;;  %v6797_v40 = vld [vmem:[#allocation3 + $0x70] sm:$0xff]  ;;  %v6318_v36 = vld [vmem:[#allocation3 + $0xa8] sm:$0xff] }
 0x4f6   : > { %v10415_v47 = vpop.eup %10414  ;;  %6769 = vst.msk [vmem:[#allocation3 + $0x90] sm:$0xff] %vm1735_vm5, %v6737_v44  ;;  %v6738_v25 = vadd.f32 %v9907_v9, %v6316_v42  ;;  %v6659_v1 = vpop.f32.mrb[147].mxu1  ;;  %10434 = vpow2.f32 %v9148_v43  ;;  %v6795_v10 = vld [vmem:[#allocation3 + $0x60] sm:$0xff]  ;;  %v6836_v61 = vmul.f32 %v14398_v55, %v6797_v40 }
 0x4f7   : > { %v10417_v46 = vpop.eup %10416  ;;  %6767 = vst.msk [vmem:[#allocation3 + $0x80] sm:$0xff] %vm1735_vm5, %v6735_v20  ;;  %v6736_v29 = vadd.f32 %v6659_v1, %v6314_v60  ;;  %v6995_v23 = vadd.f32 1.0, %v10415_v47  ;;  %10436 = vpow2.f32 %v9146_v63  ;;  %v6834_v27 = vmul.f32 %v14398_v55, %v6795_v10  ;;  %v6798_v26 = vld [vmem:[#allocation3 + $0x78] sm:$0xff] }
 0x4f8   : > { %v10419_v59 = vpop.eup %10418  ;;  %6770 = vst.msk [vmem:[#allocation3 + $0x98] sm:$0xff] %vm1735_vm5, %v6738_v25  ;;  %v6993_v33 = vadd.f32 1.0, %v10417_v46  ;;  %v6796_v57 = vld [vmem:[#allocation3 + $0x68] sm:$0xff]  ;;  %v6837_v15 = vmul.f32 %v14398_v55, %v6798_v26  ;;  %v14485_v53 = vadd.f32 %v14400_v52, %v6836_v61 }
 0x4f9   : > { %v10421_v35 = vpop.eup %10420  ;;  %6768 = vst.msk [vmem:[#allocation3 + $0x88] sm:$0xff] %vm1735_vm5, %v6736_v29  ;;  %v6996_v21 = vadd.f32 1.0, %v10419_v59  ;;  %10438 = vrcp.f32 %v6995_v23  ;;  %v6835_v54 = vmul.f32 %v14398_v55, %v6796_v57  ;;  %v14490_v58 = vadd.f32 %v14400_v52, %v6834_v27 }
 0x4fa   : > { %v10423_v14 = vpop.eup %10422  ;;  %v6994_v31 = vadd.f32 1.0, %v10421_v35  ;;  %10440 = vrcp.f32 %v6993_v33  ;;  %v14493_v19 = vadd.f32 %v14400_v52, %v6837_v15  ;;  %v14502_v13 = vmul.f32 -1.442695, %v14485_v53  ;;  %v6323_v35 = vld [vmem:[#allocation3 + $0xd0] sm:$0xff] }
 0x4fb   : > { %v10425_v22 = vpop.eup %10424  ;;  %v9910_v62 = vpop.f32.mrb[148].mxu1  ;;  %v7087_v37 = vmul.f32 %v10423_v14, %v14411_v6  ;;  %10442 = vrcp.f32 %v6996_v21  ;;  %v14497_v16 = vadd.f32 %v14400_v52, %v6835_v54  ;;  %v9149_v45 = vmul.f32 -1.442695, %v14490_v58 }
 0x4fc   : > { %v10427_v7 = vpop.eup %10426  ;;  %v6741_v12 = vadd.f32 %v9910_v62, %v6319_v50  ;;  %v6672_v18 = vpop.f32.mrb[149].mxu1  ;;  %v7085_v24 = vmul.f32 %v10425_v22, %v14417_v41  ;;  %10444 = vrcp.f32 %v6994_v31  ;;  %v9152_v33 = vmul.f32 -1.442695, %v14493_v19  ;;  %v6321_v62 = vld [vmem:[#allocation3 + $0xc0] sm:$0xff] }
 0x4fd   : > { %v10429_v48 = vpop.eup %10428  ;;  %v6739_v4 = vadd.f32 %v6672_v18, %v6317_v49  ;;  %v9911_v6 = vpop.f32.mrb[150].mxu1  ;;  %v7088_v32 = vmul.f32 %v10427_v7, %v14421_v11  ;;  %v9344_v56 = vpack.c.bf16 %v7087_v37, %v7087_v37  ;;  %10446 = vpow2.f32 %v9149_v45  ;;  %v6324_v18 = vld [vmem:[#allocation3 + $0xd8] sm:$0xff] }
 0x4fe   : > { %v10431_v5 = vpop.eup %10430  ;;  %6773 = vst.msk [vmem:[#allocation3 + $0xb0] sm:$0xff] %vm1735_vm5, %v6741_v12  ;;  %v6742_v44 = vadd.f32 %v9911_v6, %v6320_v17  ;;  %v6675_v34 = vpop.f32.mrb[151].mxu1  ;;  %v7086_v41 = vmul.f32 %v10429_v48, %v14425_v28  ;;  %v9342_v43 = vpack.c.bf16 %v7085_v24, %v7085_v24  ;;  %v9150_v20 = vmul.f32 -1.442695, %v14497_v16  ;;  %v6799_v42 = vld [vmem:[#allocation3 + $0x80] sm:$0xff]  ;;  %v6801_v28 = vld [vmem:[#allocation3 + $0x90] sm:$0xff] }
 0x4ff   : > { %v10433_v9 = vpop.eup %10432  ;;  %6771 = vst.msk [vmem:[#allocation3 + $0xa0] sm:$0xff] %vm1735_vm5, %v6739_v4  ;;  %v6740_v63 = vadd.f32 %v6675_v34, %v6318_v36  ;;  %v7118_v11 = vpack.c.bf16 %v7088_v32, %v7087_v37  ;;  %v9345_v40 = vpack.c.bf16 %v7088_v32, %v7088_v32  ;;  %v6999_v47 = vadd.f32 1.0, %v10431_v5  ;;  %v6802_v46 = vld [vmem:[#allocation3 + $0x98] sm:$0xff]  ;;  %v6322_v32 = vld [vmem:[#allocation3 + $0xc8] sm:$0xff] }
 0x500   : > { %7248 = vst.msk [vmem:[%s14511_s13 + $0x8] sm:$0xf] %vm1678_vm2, %v9344_v56  ;;  %v10435_v25 = vpop.eup %10434  ;;  %v7117_v60 = vpack.c.bf16 %v7086_v41, %v7085_v24  ;;  %v9343_v1 = vpack.c.bf16 %v7086_v41, %v7086_v41  ;;  %7246 = vst.msk [vmem:[%s14511_s13] sm:$0xf] %vm1678_vm2, %v9342_v43  ;;  %v6997_v10 = vadd.f32 1.0, %v10433_v9  ;;  %10448 = vpow2.f32 %v9150_v20  ;;  %v6800_v61 = vld [vmem:[#allocation3 + $0x88] sm:$0xff] }
 0x501   : > { %6774 = vst.msk [vmem:[#allocation3 + $0xb8] sm:$0xff] %vm1735_vm5, %v6742_v44  ;;  %v10437_v29 = vpop.eup %10436  ;;  %6772 = vst.msk [vmem:[#allocation3 + $0xa8] sm:$0xff] %vm1735_vm5, %v6740_v63  ;;  %v7000_v23 = vadd.f32 1.0, %v10435_v25  ;;  %10450 = vrcp.f32 %v6999_v47  ;;  %v6838_v27 = vmul.f32 %v14398_v55, %v6799_v42  ;;  %v6839_v26 = vmul.f32 %v14398_v55, %v6800_v61  ;;  %v6327_v61 = vld [vmem:[#allocation3 + $0xf0] sm:$0xff] }
 0x502   : > { %7249 = vst.msk [vmem:[%s14511_s13 + $0xc] sm:$0xf] %vm1678_vm2, %v9345_v40  ;;  %7247 = vst.msk [vmem:[%s14511_s13 + $0x4] sm:$0xf] %vm1678_vm2, %v9343_v1  ;;  %9922 = vmatprep.mubr.msk.bf16.mxu0 %vm1735_vm5, %v7117_v60  ;;  %v6998_v59 = vadd.f32 1.0, %v10437_v29  ;;  %10452 = vrcp.f32 %v6997_v10  ;;  %v6840_v57 = vmul.f32 %v14398_v55, %v6801_v28  ;;  %v6841_v31 = vmul.f32 %v14398_v55, %v6802_v46 }
 0x503   : > { %v10439_v15 = vpop.eup %10438  ;;  %v9914_v21 = vpop.f32.mrb[152].mxu1  ;;  %9923 = vmatmul.mubr.msk.bf16.vlgmr.msra.gmra.mrb[160].mxu0 %vm1735_vm5, %v7118_v11  ;;  %10454 = vrcp.f32 %v7000_v23  ;;  %v14530_v54 = vadd.f32 %v14400_v52, %v6838_v27  ;;  %v14533_v14 = vadd.f32 %v14400_v52, %v6839_v26 }
 0x504   : > { %v10441_v22 = vpop.eup %10440  ;;  %v6745_v50 = vadd.f32 %v9914_v21, %v6323_v35  ;;  %v6688_v37 = vpop.f32.mrb[153].mxu1  ;;  %v7091_v45 = vmul.f32 %v10439_v15, %v14437_v30  ;;  %10456 = vrcp.f32 %v6998_v59  ;;  %v14538_v7 = vadd.f32 %v14400_v52, %v6840_v57 }
 0x505   : > { %v10443_v12 = vpop.eup %10442  ;;  %v6743_v49 = vadd.f32 %v6688_v37, %v6321_v62  ;;  %v9915_v24 = vpop.f32.mrb[154].mxu1  ;;  %v7089_v48 = vmul.f32 %v10441_v22, %v14442_v8  ;;  %10458 = vpow2.f32 %v14502_v13  ;;  %v9153_v4 = vmul.f32 -1.442695, %v14530_v54  ;;  %v6805_v41 = vld [vmem:[#allocation3 + $0xb0] sm:$0xff]  ;;  %v6328_v22 = vld [vmem:[#allocation3 + $0xf8] sm:$0xff] }
 0x506   : > { %v10445_v17 = vpop.eup %10444  ;;  %6777 = vst.msk [vmem:[#allocation3 + $0xd0] sm:$0xff] %vm1735_vm5, %v6745_v50  ;;  %v6746_v6 = vadd.f32 %v9915_v24, %v6324_v18  ;;  %v6691_v30 = vpop.f32.mrb[155].mxu1  ;;  %v7092_v56 = vmul.f32 %v10443_v12, %v14445_v2  ;;  %v9348_v5 = vpack.c.bf16 %v7091_v45, %v7091_v45  ;;  %10460 = vpow2.f32 %v9152_v33  ;;  %v6803_v34 = vld [vmem:[#allocation3 + $0xa0] sm:$0xff] }
 0x507   : > { %v10447_v44 = vpop.eup %10446  ;;  %6775 = vst.msk [vmem:[#allocation3 + $0xc0] sm:$0xff] %vm1735_vm5, %v6743_v49  ;;  %v6744_v36 = vadd.f32 %v6691_v30, %v6322_v32  ;;  %v7090_v8 = vmul.f32 %v10445_v17, %v14449_v38  ;;  %v9346_v13 = vpack.c.bf16 %v7089_v48, %v7089_v48  ;;  %10462 = vpow2.f32 %v9153_v4  ;;  %v6325_v33 = vld [vmem:[#allocation3 + $0xe0] sm:$0xff] }
 0x508   : > { %6778 = vst.msk [vmem:[#allocation3 + $0xd8] sm:$0xff] %vm1735_vm5, %v6746_v6  ;;  %v7120_v43 = vpack.c.bf16 %v7092_v56, %v7091_v45  ;;  %v9349_v20 = vpack.c.bf16 %v7092_v56, %v7092_v56  ;;  %v7001_v2 = vadd.f32 1.0, %v10447_v44  ;;  %v9154_v42 = vmul.f32 -1.442695, %v14533_v14  ;;  %v6804_v9 = vld [vmem:[#allocation3 + $0xa8] sm:$0xff]  ;;  %v6806_v63 = vld [vmem:[#allocation3 + $0xb8] sm:$0xff] }
 0x509   : > { %7252 = vst.msk [vmem:[%s14511_s13 + $0x18] sm:$0xf] %vm1678_vm2, %v9348_v5  ;;  %v7119_v38 = vpack.c.bf16 %v7090_v8, %v7089_v48  ;;  %v9347_v11 = vpack.c.bf16 %v7090_v8, %v7090_v8  ;;  %7250 = vst.msk [vmem:[%s14511_s13 + $0x10] sm:$0xf] %vm1678_vm2, %v9346_v13  ;;  %v14555_v40 = vadd.f32 %v14400_v52, %v6841_v31  ;;  %v9155_v47 = vmul.f32 -1.442695, %v14538_v7 }
 0x50a   : > { %6776 = vst.msk [vmem:[#allocation3 + $0xc8] sm:$0xff] %vm1735_vm5, %v6744_v36  ;;  %v10449_v28 = vpop.eup %10448  ;;  %10464 = vrcp.f32 %v7001_v2  ;;  %v6842_v25 = vmul.f32 %v14398_v55, %v6803_v34  ;;  %v6843_v60 = vmul.f32 %v14398_v55, %v6804_v9  ;;  %v6844_v1 = vmul.f32 %v14398_v55, %v6805_v41 }
 0x50b   : > { %7253 = vst.msk [vmem:[%s14511_s13 + $0x1c] sm:$0xf] %vm1678_vm2, %v9349_v20  ;;  %v10451_v10 = vpop.eup %10450  ;;  %v9918_v46 = vpop.f32.mrb[156].mxu1  ;;  %7251 = vst.msk [vmem:[%s14511_s13 + $0x14] sm:$0xf] %vm1678_vm2, %v9347_v11  ;;  %9926 = vmatprep.mubr.msk.bf16.mxu0 %vm1735_vm5, %v7119_v38  ;;  %v7002_v29 = vadd.f32 1.0, %v10449_v28  ;;  %10466 = vpow2.f32 %v9154_v42  ;;  %v6845_v27 = vmul.f32 %v14398_v55, %v6806_v63 }
 0x50c   : > { %v9156_v23 = vmul.f32 -1.442695, %v14555_v40  ;;  %v10453_v26 = vpop.eup %10452  ;;  %v6749_v59 = vadd.f32 %v9918_v46, %v6327_v61  ;;  %v6704_v57 = vpop.f32.mrb[157].mxu1  ;;  %9927 = vmatmul.mubr.msk.bf16.gmra.mrb[164].mxu0 %vm1735_vm5, %v7120_v43  ;;  %v7095_v15 = vmul.f32 %v10451_v10, %v14461_v39  ;;  %10468 = vpow2.f32 %v9155_v47  ;;  %v6326_v39 = vld [vmem:[#allocation3 + $0xe8] sm:$0xff] }
 0x50d   : > { %v14571_v35 = vadd.f32 %v14400_v52, %v6842_v25  ;;  %v10455_v21 = vpop.eup %10454  ;;  %v6747_v31 = vadd.f32 %v6704_v57, %v6325_v33  ;;  %v9919_v50 = vpop.f32.mrb[158].mxu1  ;;  %v7093_v62 = vmul.f32 %v10453_v26, %v14466_v3  ;;  %10470 = vrcp.f32 %v7002_v29  ;;  %v6809_v8 = vld [vmem:[#allocation3 + $0xd0] sm:$0xff] }
 0x50e   : > { %v14575_v37 = vadd.f32 %v14400_v52, %v6843_v60  ;;  %v10457_v45 = vpop.eup %10456  ;;  %6781 = vst.msk [vmem:[#allocation3 + $0xf0] sm:$0xff] %vm1735_vm5, %v6749_v59  ;;  %v6750_v12 = vadd.f32 %v9919_v50, %v6328_v22  ;;  %v6707_v49 = vpop.f32.mrb[159].mxu1  ;;  %v7096_v18 = vmul.f32 %v10455_v21, %v14469_v51  ;;  %v9352_v24 = vpack.c.bf16 %v7095_v15, %v7095_v15  ;;  %v6807_v44 = vld [vmem:[#allocation3 + $0xc0] sm:$0xff] }
 0x50f   : > { %10472 = vpow2.f32 %v9156_v23  ;;  %v10459_v48 = vpop.eup %10458  ;;  %6779 = vst.msk [vmem:[#allocation3 + $0xe0] sm:$0xff] %vm1735_vm5, %v6747_v31  ;;  %v6748_v4 = vadd.f32 %v6707_v49, %v6326_v39  ;;  %v7094_v3 = vmul.f32 %v10457_v45, %v14473_v0  ;;  %v9350_v17 = vpack.c.bf16 %v7093_v62, %v7093_v62  ;;  %v6810_v43 = vld [vmem:[#allocation3 + $0xd8] sm:$0xff] }
 0x510   : > { %v9157_v6 = vmul.f32 -1.442695, %v14571_v35  ;;  %v10461_v32 = vpop.eup %10460  ;;  %6782 = vst.msk [vmem:[#allocation3 + $0xf8] sm:$0xff] %vm1735_vm5, %v6750_v12  ;;  %v7122_v30 = vpack.c.bf16 %v7096_v18, %v7095_v15  ;;  %v9353_v56 = vpack.c.bf16 %v7096_v18, %v7096_v18  ;;  %v7003_v51 = vadd.f32 1.0, %v10459_v48 }
 0x511   : > { %7256 = vst.msk [vmem:[%s14511_s13 + $0x28] sm:$0xf] %vm1678_vm2, %v9352_v24  ;;  %v9158_v5 = vmul.f32 -1.442695, %v14575_v37  ;;  %v6808_v36 = vld [vmem:[#allocation3 + $0xc8] sm:$0xff]  ;;  %v10463_v0 = vpop.eup %10462  ;;  %v7121_v13 = vpack.c.bf16 %v7094_v3, %v7093_v62  ;;  %v9351_v34 = vpack.c.bf16 %v7094_v3, %v7094_v3  ;;  %v7004_v41 = vadd.f32 1.0, %v10461_v32 }
 0x512   : > { %6780 = vst.msk [vmem:[#allocation3 + $0xe8] sm:$0xff] %vm1735_vm5, %v6748_v4  ;;  %10474 = vpow2.f32 %v9157_v6  ;;  %v7005_v20 = vadd.f32 1.0, %v10463_v0  ;;  %v14592_v2 = vadd.f32 %v14400_v52, %v6844_v1  ;;  %v14595_v42 = vadd.f32 %v14400_v52, %v6845_v27 }
 0x513   : > { %7254 = vst.msk [vmem:[%s14511_s13 + $0x20] sm:$0xf] %vm1678_vm2, %v9350_v17  ;;  %7257 = vst.msk [vmem:[%s14511_s13 + $0x2c] sm:$0xf] %vm1678_vm2, %v9353_v56  ;;  %10476 = vrcp.f32 %v7003_v51  ;;  %9930 = vmatprep.mubr.msk.bf16.mxu0 %vm1735_vm5, %v7121_v13  ;;  %v6846_v9 = vmul.f32 %v14398_v55, %v6807_v44  ;;  %v6847_v63 = vmul.f32 %v14398_v55, %v6808_v36 }
 0x514   : > { %7255 = vst.msk [vmem:[%s14511_s13 + $0x24] sm:$0xf] %vm1678_vm2, %v9351_v34  ;;  %10478 = vrcp.f32 %v7004_v41  ;;  %v6848_v38 = vmul.f32 %v14398_v55, %v6809_v8  ;;  %v10465_v11 = vpop.eup %10464  ;;  %9931 = vmatmul.mubr.msk.bf16.gmra.mrb[168].mxu0 %vm1735_vm5, %v7122_v30  ;;  %v9159_v47 = vmul.f32 -1.442695, %v14592_v2  ;;  %v9160_v28 = vmul.f32 -1.442695, %v14595_v42 }
 0x515   : > { %10480 = vrcp.f32 %v7005_v20  ;;  %v6849_v25 = vmul.f32 %v14398_v55, %v6810_v43  ;;  %v10467_v60 = vpop.eup %10466  ;;  %v7097_v1 = vmul.f32 %v10465_v11, %v14490_v58  ;;  %v14609_v10 = vadd.f32 %v14400_v52, %v6846_v9  ;;  %v6813_v15 = vld [vmem:[#allocation3 + $0xf0] sm:$0xff] }
 0x516   : > { %10482 = vpow2.f32 %v9158_v5  ;;  %v14612_v61 = vadd.f32 %v14400_v52, %v6847_v63  ;;  %v10469_v46 = vpop.eup %10468  ;;  %v7006_v29 = vadd.f32 1.0, %v10467_v60  ;;  %v14615_v23 = vadd.f32 %v14400_v52, %v6848_v38  ;;  %v6811_v26 = vld [vmem:[#allocation3 + $0xe0] sm:$0xff] }
 0x517   : > { %10484 = vpow2.f32 %v9159_v47  ;;  %v14618_v27 = vadd.f32 %v14400_v52, %v6849_v25  ;;  %v10471_v59 = vpop.eup %10470  ;;  %v9354_v58 = vpack.c.bf16 %v7097_v1, %v7097_v1  ;;  %v7007_v33 = vadd.f32 1.0, %v10469_v46  ;;  %v6814_v45 = vld [vmem:[#allocation3 + $0xf8] sm:$0xff] }
 0x518   : > { %10486 = vpow2.f32 %v9160_v28  ;;  %v9161_v57 = vmul.f32 -1.442695, %v14609_v10  ;;  %v7098_v31 = vmul.f32 %v10471_v59, %v14497_v16  ;;  %v9162_v22 = vmul.f32 -1.442695, %v14612_v61 }
 0x519   : > { %v10473_v21 = vpop.eup %10472  ;;  %10488 = vrcp.f32 %v7006_v29  ;;  %v9163_v50 = vmul.f32 -1.442695, %v14615_v23  ;;  %v6812_v62 = vld [vmem:[#allocation3 + $0xe8] sm:$0xff]  ;;  %7258 = vst.msk [vmem:[%s14511_s13 + $0x30] sm:$0xf] %vm1678_vm2, %v9354_v58  ;;  %v6850_v49 = vmul.f32 %v14398_v55, %v6811_v26  ;;  %v6852_v3 = vmul.f32 %v14398_v55, %v6813_v15 }
 0x51a   : > { %v7008_v12 = vadd.f32 1.0, %v10473_v21  ;;  %10490 = vrcp.f32 %v7007_v33  ;;  %v9164_v39 = vmul.f32 -1.442695, %v14618_v27  ;;  %v7123_v18 = vpack.c.bf16 %v7098_v31, %v7097_v1 }
 0x51b   : > { %v9355_v24 = vpack.c.bf16 %v7098_v31, %v7098_v31  ;;  %10492 = vpow2.f32 %v9161_v57  ;;  %v6851_v16 = vmul.f32 %v14398_v55, %v6812_v62  ;;  %v14630_v4 = vadd.f32 %v14400_v52, %v6850_v49 }
 0x51c   : > { %v10475_v48 = vpop.eup %10474  ;;  %10494 = vrcp.f32 %v7008_v12  ;;  %v6853_v17 = vmul.f32 %v14398_v55, %v6814_v45  ;;  %9934 = vmatprep.mubr.msk.bf16.mxu0 %vm1735_vm5, %v7123_v18  ;;  %v14643_v44 = vadd.f32 %v14400_v52, %v6852_v3 }
 0x51d   : > { %v10477_v6 = vpop.eup %10476  ;;  %7259 = vst.msk [vmem:[%s14511_s13 + $0x34] sm:$0xf] %vm1678_vm2, %v9355_v24  ;;  %v7009_v32 = vadd.f32 1.0, %v10475_v48  ;;  %10496 = vpow2.f32 %v9162_v22  ;;  %v14638_v30 = vadd.f32 %v14400_v52, %v6851_v16  ;;  %v9165_v5 = vmul.f32 -1.442695, %v14630_v4 }
 0x51e   : > { %v10479_v56 = vpop.eup %10478  ;;  %v7099_v51 = vmul.f32 %v10477_v6, %v14485_v53  ;;  %10498 = vpow2.f32 %v9163_v50  ;;  %v14648_v0 = vadd.f32 %v14400_v52, %v6853_v17  ;;  %v9167_v52 = vmul.f32 -1.442695, %v14643_v44 }
 0x51f   : > { %v10481_v55 = vpop.eup %10480  ;;  %v7100_v36 = vmul.f32 %v10479_v56, %v14493_v19  ;;  %10500 = vrcp.f32 %v7009_v32  ;;  %v9166_v8 = vmul.f32 -1.442695, %v14638_v30 }
 0x520   : > { %v10483_v13 = vpop.eup %10482  ;;  %v9356_v34 = vpack.c.bf16 %v7099_v51, %v7099_v51  ;;  %v7101_v53 = vmul.f32 %v10481_v55, %v14530_v54  ;;  %10502 = vpow2.f32 %v9164_v39  ;;  %v9168_v47 = vmul.f32 -1.442695, %v14648_v0 }
 0x521   : > { %v10485_v41 = vpop.eup %10484  ;;  %v7124_v43 = vpack.c.bf16 %v7100_v36, %v7099_v51  ;;  %v9357_v20 = vpack.c.bf16 %v7100_v36, %v7100_v36  ;;  %v7010_v9 = vadd.f32 1.0, %v10483_v13  ;;  %10504 = vpow2.f32 %v9165_v5 }
 0x522   : > { %v10487_v63 = vpop.eup %10486  ;;  %7260 = vst.msk [vmem:[%s14511_s13 + $0x38] sm:$0xf] %vm1678_vm2, %v9356_v34  ;;  %v9358_v19 = vpack.c.bf16 %v7101_v53, %v7101_v53  ;;  %v7011_v38 = vadd.f32 1.0, %v10485_v41  ;;  %10506 = vpow2.f32 %v9166_v8 }
 0x523   : > { %v10489_v11 = vpop.eup %10488  ;;  %7261 = vst.msk [vmem:[%s14511_s13 + $0x3c] sm:$0xf] %vm1678_vm2, %v9357_v20  ;;  %9935 = vmatmul.mubr.msk.bf16.gmra.mrb[172].mxu0 %vm1735_vm5, %v7124_v43  ;;  %10508 = vrcp.f32 %v7010_v9  ;;  %v7012_v54 = vadd.f32 1.0, %v10487_v63 }
 0x524   : > { %v10491_v28 = vpop.eup %10490  ;;  %v7102_v25 = vmul.f32 %v10489_v11, %v14533_v14  ;;  %7262 = vst.msk [vmem:[%s14511_s13 + $0x40] sm:$0xf] %vm1678_vm2, %v9358_v19  ;;  %10510 = vrcp.f32 %v7011_v38 }
 0x525   : > { %v10493_v60 = vpop.eup %10492  ;;  %v7103_v1 = vmul.f32 %v10491_v28, %v14538_v7  ;;  %10512 = vrcp.f32 %v7012_v54 }
 0x526   : > { %v10495_v46 = vpop.eup %10494  ;;  %v7125_v29 = vpack.c.bf16 %v7102_v25, %v7101_v53  ;;  %v9359_v26 = vpack.c.bf16 %v7102_v25, %v7102_v25  ;;  %v7013_v59 = vadd.f32 1.0, %v10493_v60  ;;  %10514 = vpow2.f32 %v9167_v52 }
 0x527   : > { %v10497_v58 = vpop.eup %10496  ;;  %v7104_v33 = vmul.f32 %v10495_v46, %v14555_v40  ;;  %v9360_v57 = vpack.c.bf16 %v7103_v1, %v7103_v1  ;;  %10516 = vpow2.f32 %v9168_v47 }
 0x528   : > { %v10499_v14 = vpop.eup %10498  ;;  %7263 = vst.msk [vmem:[%s14511_s13 + $0x44] sm:$0xf] %vm1678_vm2, %v9359_v26  ;;  %9938 = vmatprep.mubr.msk.bf16.mxu0 %vm1735_vm5, %v7125_v29  ;;  %v7014_v15 = vadd.f32 1.0, %v10497_v58  ;;  %10518 = vrcp.f32 %v7013_v59 }
 0x529   : > { %v10501_v7 = vpop.eup %10500  ;;  %v7126_v21 = vpack.c.bf16 %v7104_v33, %v7103_v1  ;;  %v9361_v31 = vpack.c.bf16 %v7104_v33, %v7104_v33  ;;  %7264 = vst.msk [vmem:[%s14511_s13 + $0x48] sm:$0xf] %vm1678_vm2, %v9360_v57  ;;  %v7015_v22 = vadd.f32 1.0, %v10499_v14 }
 0x52a   : > { %v10503_v50 = vpop.eup %10502  ;;  %v7105_v40 = vmul.f32 %v10501_v7, %v14571_v35  ;;  %10520 = vrcp.f32 %v7014_v15 }
 0x52b   : > { %v10505_v62 = vpop.eup %10504  ;;  %7265 = vst.msk [vmem:[%s14511_s13 + $0x4c] sm:$0xf] %vm1678_vm2, %v9361_v31  ;;  %9939 = vmatmul.mubr.msk.bf16.gmra.mrb[176].mxu0 %vm1735_vm5, %v7126_v21  ;;  %v7016_v45 = vadd.f32 1.0, %v10503_v50  ;;  %10522 = vrcp.f32 %v7015_v22 }
 0x52c   : > { %v10507_v12 = vpop.eup %10506  ;;  %v9362_v39 = vpack.c.bf16 %v7105_v40, %v7105_v40  ;;  %v7017_v49 = vadd.f32 1.0, %v10505_v62 }
 0x52d   : > { %v10509_v18 = vpop.eup %10508  ;;  %10524 = vrcp.f32 %v7016_v45  ;;  %v7018_v24 = vadd.f32 1.0, %v10507_v12 }
 0x52e   : > { %v10511_v16 = vpop.eup %10510  ;;  %v7106_v48 = vmul.f32 %v10509_v18, %v14575_v37  ;;  %7266 = vst.msk [vmem:[%s14511_s13 + $0x50] sm:$0xf] %vm1678_vm2, %v9362_v39  ;;  %10526 = vrcp.f32 %v7017_v49 }
 0x52f   : > { %v10513_v35 = vpop.eup %10512  ;;  %v7107_v3 = vmul.f32 %v10511_v16, %v14592_v2  ;;  %10528 = vrcp.f32 %v7018_v24 }
 0x530   : > { %v10515_v17 = vpop.eup %10514  ;;  %v7127_v6 = vpack.c.bf16 %v7106_v48, %v7105_v40  ;;  %v9363_v32 = vpack.c.bf16 %v7106_v48, %v7106_v48  ;;  %v7108_v56 = vmul.f32 %v10513_v35, %v14595_v42 }
 0x531   : > { %v10517_v51 = vpop.eup %10516  ;;  %v9364_v5 = vpack.c.bf16 %v7107_v3, %v7107_v3  ;;  %v7019_v55 = vadd.f32 1.0, %v10515_v17 }
 0x532   : > { %v10519_v36 = vpop.eup %10518  ;;  %7267 = vst.msk [vmem:[%s14511_s13 + $0x54] sm:$0xf] %vm1678_vm2, %v9363_v32  ;;  %9942 = vmatprep.mubr.msk.bf16.mxu0 %vm1735_vm5, %v7127_v6  ;;  %v7128_v37 = vpack.c.bf16 %v7108_v56, %v7107_v3  ;;  %v9365_v8 = vpack.c.bf16 %v7108_v56, %v7108_v56  ;;  %v7020_v13 = vadd.f32 1.0, %v10517_v51 }
 0x533   : > { %7268 = vst.msk [vmem:[%s14511_s13 + $0x58] sm:$0xf] %vm1678_vm2, %v9364_v5  ;;  %v7109_v2 = vmul.f32 %v10519_v36, %v14609_v10  ;;  %10530 = vrcp.f32 %v7019_v55 }
 0x534   : > { %v10521_v34 = vpop.eup %10520  ;;  %7269 = vst.msk [vmem:[%s14511_s13 + $0x5c] sm:$0xf] %vm1678_vm2, %v9365_v8  ;;  %9943 = vmatmul.mubr.msk.bf16.gmra.mrb[180].mxu0 %vm1735_vm5, %v7128_v37  ;;  %10532 = vrcp.f32 %v7020_v13 }
 0x535   : > { %v10523_v42 = vpop.eup %10522  ;;  %v7110_v53 = vmul.f32 %v10521_v34, %v14612_v61  ;;  %v9366_v41 = vpack.c.bf16 %v7109_v2, %v7109_v2 }
 0x536   : > { %v7111_v43 = vmul.f32 %v10523_v42, %v14615_v23 }
 0x537   : > { %v10525_v20 = vpop.eup %10524  ;;  %v7129_v9 = vpack.c.bf16 %v7110_v53, %v7109_v2  ;;  %v9367_v63 = vpack.c.bf16 %v7110_v53, %v7110_v53  ;;  %7270 = vst.msk [vmem:[%s14511_s13 + $0x60] sm:$0xf] %vm1678_vm2, %v9366_v41 }
 0x538   : > { %v10527_v10 = vpop.eup %10526  ;;  %v7112_v19 = vmul.f32 %v10525_v20, %v14618_v27  ;;  %v9368_v38 = vpack.c.bf16 %v7111_v43, %v7111_v43  ;;  %v14713_v26 = vpop.f32.mrb[160].mxu1 }
 0x539   : > { %v10529_v52 = vpop.eup %10528  ;;  %7271 = vst.msk [vmem:[%s14511_s13 + $0x64] sm:$0xf] %vm1678_vm2, %v9367_v63  ;;  %9946 = vmatprep.mubr.msk.bf16.mxu0 %vm1735_vm5, %v7129_v9  ;;  %v7113_v61 = vmul.f32 %v10527_v10, %v14630_v4  ;;  %v14715_v59 = vpop.f32.mrb[161].mxu1 }
 0x53a   : > { %v7130_v23 = vpack.c.bf16 %v7112_v19, %v7111_v43  ;;  %v9369_v11 = vpack.c.bf16 %v7112_v19, %v7112_v19  ;;  %7272 = vst.msk [vmem:[%s14511_s13 + $0x68] sm:$0xf] %vm1678_vm2, %v9368_v38  ;;  %v7114_v54 = vmul.f32 %v10529_v52, %v14638_v30  ;;  %v14717_v58 = vpop.f32.mrb[162].mxu1 }
 0x53b   : > { %v9370_v47 = vpack.c.bf16 %v7113_v61, %v7113_v61  ;;  %v14719_v33 = vpop.f32.mrb[163].mxu1 }
 0x53c   : > { %7273 = vst.msk [vmem:[%s14511_s13 + $0x6c] sm:$0xf] %vm1678_vm2, %v9369_v11  ;;  %9947 = vmatmul.mubr.msk.bf16.gmra.mrb[184].mxu0 %vm1735_vm5, %v7130_v23  ;;  %v7131_v27 = vpack.c.bf16 %v7114_v54, %v7113_v61  ;;  %v9371_v28 = vpack.c.bf16 %v7114_v54, %v7114_v54 }
 0x53d   : > { %v10531_v25 = vpop.eup %10530  ;;  %7274 = vst.msk [vmem:[%s14511_s13 + $0x70] sm:$0xf] %vm1678_vm2, %v9370_v47 }
 0x53e   : > { %v10533_v60 = vpop.eup %10532  ;;  %7275 = vst.msk [vmem:[%s14511_s13 + $0x74] sm:$0xf] %vm1678_vm2, %v9371_v28  ;;  %9950 = vmatprep.mubr.msk.bf16.mxu0 %vm1735_vm5, %v7131_v27  ;;  %v7115_v4 = vmul.f32 %v10531_v25, %v14643_v44 }
 0x53f   : > { %v7116_v30 = vmul.f32 %v10533_v60, %v14648_v0 }
 0x540   : > { %v9372_v1 = vpack.c.bf16 %v7115_v4, %v7115_v4 }
 0x541   : > { %v7132_v46 = vpack.c.bf16 %v7116_v30, %v7115_v4  ;;  %v9373_v29 = vpack.c.bf16 %v7116_v30, %v7116_v30 }
 0x542   : > { %7276 = vst.msk [vmem:[%s14511_s13 + $0x78] sm:$0xf] %vm1678_vm2, %v9372_v1 }
 0x543   : > { %7277 = vst.msk [vmem:[%s14511_s13 + $0x7c] sm:$0xf] %vm1678_vm2, %v9373_v29  ;;  %s11066_s13 = scalar_lea.vmem %s11065_s4, 4096 }
 0x544   : > { %9951 = vmatmul.mubr.msk.bf16.gmra.mrb[188].mxu0 %vm1735_vm5, %v7132_v46  ;;  %v14721_v44 = vpop.f32.mrb[164].mxu1  ;;  %p11068_p13 = scmp.lt.s32.totalorder %s11066_s13, %s11060_s19 }
 0x545   : > { %v14723_v0 = vpop.f32.mrb[165].mxu1 }
 0x546   : > { %v14725_v57 = vpop.f32.mrb[166].mxu1  ;;  %p11069_p2 = por %p11068_p13, %p11067_p10 }
 0x547   : > { %v14727_v14 = vpop.f32.mrb[167].mxu1 }
 0x548   : > { %p11070_p8 = pnand %p11069_p2, %p11063_p1 }
 0x550   : > { %v14729_v15 = vpop.f32.mrb[168].mxu1 }
 0x551   : > { %v14731_v7 = vpop.f32.mrb[169].mxu1 }
 0x552   : > { %v14733_v21 = vpop.f32.mrb[170].mxu1 }
 0x553   : > { %v14735_v31 = vpop.f32.mrb[171].mxu1 }
 0x558   : > { %v14737_v22 = vpop.f32.mrb[172].mxu1 }
 0x559   : > { %v14739_v50 = vpop.f32.mrb[173].mxu1 }
 0x55a   : > { %v14741_v40 = vpop.f32.mrb[174].mxu1 }
 0x55b   : > { %v14743_v62 = vpop.f32.mrb[175].mxu1 }
 0x560   : > { %v14745_v45 = vpop.f32.mrb[176].mxu1 }
 0x561   : > { %v14747_v12 = vpop.f32.mrb[177].mxu1 }
 0x562   : > { %v14749_v39 = vpop.f32.mrb[178].mxu1 }
 0x563   : > { %v14751_v49 = vpop.f32.mrb[179].mxu1 }
 0x568   : > { %v14753_v18 = vpop.f32.mrb[180].mxu1 }
 0x569   : > { %v14755_v24 = vpop.f32.mrb[181].mxu1 }
 0x56a   : > { %v14757_v16 = vpop.f32.mrb[182].mxu1 }
 0x56b   : > { %v14759_v48 = vpop.f32.mrb[183].mxu1 }
 0x570   : > { %v14761_v35 = vpop.f32.mrb[184].mxu1 }
 0x571   : > { %v14763_v3 = vpop.f32.mrb[185].mxu1 }
 0x572   : > { %v14765_v17 = vpop.f32.mrb[186].mxu1 }
 0x573   : > { %v14767_v6 = vpop.f32.mrb[187].mxu1 }
 0x578   : > { %v14769_v32 = vpop.f32.mrb[188].mxu1 }
 0x579   : > { %v14771_v56 = vpop.f32.mrb[189].mxu1 }
 0x57a   : > { %v14773_v51 = vpop.f32.mrb[190].mxu1 }
 0x57b   : > { %v14775_v5 = vpop.f32.mrb[191].mxu1 }
 0x57c   : > { %11073 = shalt.err (!%p11070_p8)
}
 0x57d   : > { %s11074_s26 = scalar_lea.hbm %s14782_s16, 2048  ;;  %s11078_s3 = scalar_lea.hbm %s15439_s1, 4096 }
 0x57e   : > { %p11075_p9 = scmp.ne.s32.totalorder %s14782_s16, %s11074_s26  ;;  %p11079_p3 = scmp.lt.u32.totalorder %s14782_s16, %s15439_s1 }
 0x57f   : > { %p11080_p7 = scmp.lt.u32.totalorder %s11078_s3, %s11074_s26  ;;  %p11082_p11 = scmp.lt.u32.totalorder %s11074_s26, %s14782_s16 }
 0x580   : > { %p11076_p4 = pnand %p11075_p9, %p15440_p0 }
 0x581   : > { %p11081_p12 = por %p11080_p7, %p11079_p3 }
 0x582   : > { %p11077_p6 = pneg %p11076_p4 }
 0x583   : > { %p11083_p5 = por %p11082_p11, %p11081_p12 }
 0x585   : > { %p11084_p1 = pnand %p11083_p5, %p11077_p6 }
 0x587   : > { %11087 = shalt.err (!%p11084_p1)
}
 0x588   : > { %s11220_s19 = smov 64   ;;  %s11221_s13 = smov 4   ;;  %v14810_v55 = vld [vmem:[#allocation22] ss:$0 sm:$0xff]  ;;  %v14814_v37 = vld [vmem:[#allocation24] ss:$0 sm:$0xff] }
 0x589   : > { %s15441_s5 = scalar_lea.sflag [#allocation27], %s11688_s21  ;;  %v7908_v36 = vmul.f32 %v14713_v26, %v14810_v55  ;;  %v7906_v8 = vmul.f32 %v14810_v55, %v14715_v59  ;;  %v14818_v13 = vld [vmem:[#allocation18] ss:$0 sm:$0xff]  ;;  %v14820_v34 = vld [vmem:[#allocation19] ss:$0 sm:$0xff]  ;;  %v7909_v53 = vmul.f32 %v14717_v58, %v14810_v55  ;;  %v7907_v9 = vmul.f32 %v14810_v55, %v14719_v33  ;;  %s15442_s25 = sld [smem:[#allocation60_spill]] }
 0x58a   : > { %10051 = dma.vmem_to_hbm [thread:$0]  (%p15440_p0), %s14784_s23, 2048, %s14782_s16, %s15441_s5, %s11220_s19, %s11220_s19, %s11221_s13   ;;  %v7912_v27 = vmul.f32 %v14721_v44, %v14810_v55  ;;  %v7910_v4 = vmul.f32 %v14810_v55, %v14723_v0  ;;  %v7913_v58 = vmul.f32 %v14725_v57, %v14810_v55  ;;  %vm8233_vm13 = vcmask 130048  }
 0x58b   : > { %v7947_v42 = vadd.f32 %v14814_v37, %v7908_v36  ;;  %v7945_v20 = vadd.f32 %v14814_v37, %v7906_v8  ;;  %v7948_v11 = vadd.f32 %v14814_v37, %v7909_v53  ;;  %v7946_v28 = vadd.f32 %v14814_v37, %v7907_v9  ;;  %s8585_s5 = sshll.u32 %s11688_s21, 8  ;;  %s9374_s16 = sshll.u32 %s15438_s0, 12 }
 0x58c   : > { %v7951_v59 = vadd.f32 %v14814_v37, %v7912_v27  ;;  %v7949_v0 = vadd.f32 %v14814_v37, %v7910_v4  ;;  %v7914_v9 = vmul.f32 %v14810_v55, %v14731_v7  ;;  %s14962_s23 = scalar_lea.vmem [#allocation25], %s8585_s5  ;;  %s8267_s0 = scalar_lea.sflag [#allocation6], %s11688_s21 }
 0x58d   : > { %s8288_s2 = sshll.u32 %s14962_s23, 4  ;;  %s11222_s19 = smov [#allocation25]   ;;  %s15202_s2 = int_to_ptr.vmem [resolvable:$true] %s8288_s2 }
 0x58e   : > { %s11088_s4 = scalar_lea.vmem %s15202_s2, 4096  ;;  %s11092_s13 = sshll.u32 %s11222_s19, 4  ;;  %s11093_s13 = int_to_ptr.vmem [resolvable:$false] %s11092_s13 }
 0x58f   : > { %s15200_s3 = scalar_lea.hbm %s15442_s25, %s9374_s16  ;;  %p11089_p10 = scmp.ne.s32.totalorder %s15202_s2, %s11088_s4 }
 0x590   : > { %s11094_s5 = scalar_lea.vmem %s11093_s13, 8192  ;;  %p11095_p8 = scmp.lt.s32.totalorder %s15202_s2, %s11093_s13 }
 0x591   : > { %p11090_p13 = pnand %p11089_p10, %p15440_p0  ;;  %p11096_p9 = scmp.lt.s32.totalorder %s11094_s5, %s11088_s4 }
 0x593   : > { %p11091_p2 = pneg %p11090_p13  ;;  %p11097_p4 = por %p11096_p9, %p11095_p8 }
 0x595   : > { %p11098_p6 = pnand %p11097_p4, %p11091_p2 }
 0x5d6   : > { %v9924_v2 = vpop.f32.mrb[160].mxu0 }
 0x5d7   : > { %v7500_v41 = vmul.f32 %v9924_v2, %v14818_v13  ;;  %v7364_v43 = vpop.f32.mrb[161].mxu0  ;;  %v7911_v2 = vmul.f32 %v14810_v55, %v14727_v14  ;;  %v7917_v14 = vmul.f32 %v14733_v21, %v14810_v55 }
 0x5d8   : > { %v7498_v63 = vmul.f32 %v14818_v13, %v7364_v43  ;;  %v9925_v10 = vpop.f32.mrb[162].mxu0 }
 0x5d9   : > { %v7539_v19 = vadd.f32 %v14820_v34, %v7500_v41  ;;  %v7501_v38 = vmul.f32 %v9925_v10, %v14818_v13  ;;  %v7367_v52 = vpop.f32.mrb[163].mxu0  ;;  %v7916_v41 = vmul.f32 %v14729_v15, %v14810_v55  ;;  %v7952_v15 = vadd.f32 %v14814_v37, %v7913_v58 }
 0x5da   : > { %v7537_v61 = vadd.f32 %v14820_v34, %v7498_v63  ;;  %v7499_v23 = vmul.f32 %v14818_v13, %v7367_v52  ;;  %v7920_v58 = vmul.f32 %v14737_v22, %v14810_v55 }
 0x5db   : > { %v14835_v54 = vadd.f32 %v7947_v42, %v7539_v19  ;;  %v7540_v47 = vadd.f32 %v14820_v34, %v7501_v38  ;;  %v7915_v19 = vmul.f32 %v14810_v55, %v14735_v31  ;;  %v7955_v21 = vadd.f32 %v14814_v37, %v7916_v41 }
 0x5dc   : > { %v14841_v25 = vadd.f32 %v7945_v20, %v7537_v61  ;;  %v7538_v60 = vadd.f32 %v14820_v34, %v7499_v23  ;;  %v7950_v61 = vadd.f32 %v14814_v37, %v7911_v2  ;;  %v7953_v31 = vadd.f32 %v14814_v37, %v7914_v9 }
 0x5dd   : > { %v9255_v30 = vmul.f32 -1.442695, %v14835_v54  ;;  %v14847_v1 = vadd.f32 %v7948_v11, %v7540_v47 }
 0x5de   : > { %v9253_v46 = vmul.f32 -1.442695, %v14841_v25  ;;  %v14850_v29 = vadd.f32 %v7946_v28, %v7538_v60  ;;  %v7956_v60 = vadd.f32 %v14814_v37, %v7917_v14 }
 0x5df   : > { %10534 = vpow2.f32 %v9255_v30  ;;  %v9256_v26 = vmul.f32 -1.442695, %v14847_v1  ;;  %v9928_v33 = vpop.f32.mrb[164].mxu0  ;;  %v7954_v30 = vadd.f32 %v14814_v37, %v7915_v19 }
 0x5e0   : > { %10536 = vpow2.f32 %v9253_v46  ;;  %v9254_v44 = vmul.f32 -1.442695, %v14850_v29  ;;  %v7504_v36 = vmul.f32 %v9928_v33, %v14818_v13  ;;  %v7380_v8 = vpop.f32.mrb[165].mxu0 }
 0x5e1   : > { %10538 = vpow2.f32 %v9256_v26  ;;  %v7502_v42 = vmul.f32 %v14818_v13, %v7380_v8  ;;  %v9929_v53 = vpop.f32.mrb[166].mxu0  ;;  %v7918_v8 = vmul.f32 %v14810_v55, %v14739_v50 }
 0x5e2   : > { %10540 = vpow2.f32 %v9254_v44  ;;  %v7543_v57 = vadd.f32 %v14820_v34, %v7504_v36  ;;  %v7505_v43 = vmul.f32 %v9929_v53, %v14818_v13  ;;  %v7383_v20 = vpop.f32.mrb[167].mxu0 }
 0x5e3   : > { %v7541_v63 = vadd.f32 %v14820_v34, %v7502_v42  ;;  %v7503_v10 = vmul.f32 %v14818_v13, %v7383_v20 }
 0x5e4   : > { %v14875_v38 = vadd.f32 %v7951_v59, %v7543_v57  ;;  %v7544_v52 = vadd.f32 %v14820_v34, %v7505_v43 }
 0x5e5   : > { %v14879_v23 = vadd.f32 %v7949_v0, %v7541_v63  ;;  %v7542_v7 = vadd.f32 %v14820_v34, %v7503_v10 }
 0x5e6   : > { %v9259_v11 = vmul.f32 -1.442695, %v14875_v38  ;;  %v14883_v47 = vadd.f32 %v7952_v15, %v7544_v52 }
 0x5e7   : > { %v9257_v27 = vmul.f32 -1.442695, %v14879_v23  ;;  %v14888_v28 = vadd.f32 %v7950_v61, %v7542_v7  ;;  %v9932_v4 = vpop.f32.mrb[168].mxu0 }
 0x5e8   : > { %10542 = vpow2.f32 %v9259_v11  ;;  %v9260_v46 = vmul.f32 -1.442695, %v14883_v47  ;;  %v7508_v26 = vmul.f32 %v9932_v4, %v14818_v13  ;;  %v7396_v59 = vpop.f32.mrb[169].mxu0  ;;  %v7921_v11 = vmul.f32 %v14741_v40, %v14810_v55 }
 0x5e9   : > { %v10535_v33 = vpop.eup %10534  ;;  %10544 = vpow2.f32 %v9257_v27  ;;  %v9258_v44 = vmul.f32 -1.442695, %v14888_v28  ;;  %v7506_v0 = vmul.f32 %v14818_v13, %v7396_v59  ;;  %v9933_v36 = vpop.f32.mrb[170].mxu0 }
 0x5ea   : > { %v10537_v2 = vpop.eup %10536  ;;  %v8107_v42 = vadd.f32 1.0, %v10535_v33  ;;  %10546 = vpow2.f32 %v9260_v46  ;;  %v7547_v53 = vadd.f32 %v14820_v34, %v7508_v26  ;;  %v7509_v41 = vmul.f32 %v9933_v36, %v14818_v13  ;;  %v7399_v57 = vpop.f32.mrb[171].mxu0 }
 0x5eb   : > { %v10539_v43 = vpop.eup %10538  ;;  %v8105_v22 = vadd.f32 1.0, %v10537_v2  ;;  %10548 = vpow2.f32 %v9258_v44  ;;  %v7545_v20 = vadd.f32 %v14820_v34, %v7506_v0  ;;  %v7507_v9 = vmul.f32 %v14818_v13, %v7399_v57 }
 0x5ec   : > { %v10541_v63 = vpop.eup %10540  ;;  %10550 = vrcp.f32 %v8107_v42  ;;  %v8108_v10 = vadd.f32 1.0, %v10539_v43  ;;  %v14904_v14 = vadd.f32 %v7955_v21, %v7547_v53  ;;  %v7548_v50 = vadd.f32 %v14820_v34, %v7509_v41 }
 0x5ed   : > { %10552 = vrcp.f32 %v8105_v22  ;;  %v8106_v19 = vadd.f32 1.0, %v10541_v63  ;;  %v14907_v15 = vadd.f32 %v7953_v31, %v7545_v20  ;;  %v7546_v52 = vadd.f32 %v14820_v34, %v7507_v9 }
 0x5ee   : > { %10554 = vrcp.f32 %v8108_v10  ;;  %v9263_v61 = vmul.f32 -1.442695, %v14904_v14  ;;  %v14911_v7 = vadd.f32 %v7956_v60, %v7548_v50  ;;  %v7919_v31 = vmul.f32 %v14810_v55, %v14743_v62 }
 0x5ef   : > { %10556 = vrcp.f32 %v8106_v19  ;;  %v9261_v21 = vmul.f32 -1.442695, %v14907_v15  ;;  %v14916_v27 = vadd.f32 %v7954_v30, %v7546_v52  ;;  %v7924_v46 = vmul.f32 %v14745_v45, %v14810_v55 }
 0x5f0   : > { %10558 = vpow2.f32 %v9263_v61  ;;  %v9264_v4 = vmul.f32 -1.442695, %v14911_v7  ;;  %v7922_v60 = vmul.f32 %v14810_v55, %v14747_v12  ;;  %v7925_v30 = vmul.f32 %v14749_v39, %v14810_v55 }
 0x5f1   : > { %10560 = vpow2.f32 %v9261_v21  ;;  %v9262_v40 = vmul.f32 -1.442695, %v14916_v27  ;;  %v7923_v26 = vmul.f32 %v14810_v55, %v14751_v49  ;;  %v7959_v62 = vadd.f32 %v14814_v37, %v7920_v58 }
 0x5f2   : > { %v10543_v59 = vpop.eup %10542  ;;  %10562 = vpow2.f32 %v9264_v4  ;;  %v7957_v33 = vadd.f32 %v14814_v37, %v7918_v8  ;;  %v7960_v12 = vadd.f32 %v14814_v37, %v7921_v11  ;;  %v7928_v0 = vmul.f32 %v14753_v18, %v14810_v55 }
 0x5f3   : > { %v10545_v45 = vpop.eup %10544  ;;  %v8111_v44 = vadd.f32 1.0, %v10543_v59  ;;  %10564 = vpow2.f32 %v9262_v40  ;;  %v7958_v49 = vadd.f32 %v14814_v37, %v7919_v31  ;;  %v14938_v2 = vadd.f32 %v14814_v37, %v7924_v46 }
 0x5f4   : > { %v10547_v39 = vpop.eup %10546  ;;  %v8109_v36 = vadd.f32 1.0, %v10545_v45  ;;  %v14941_v58 = vadd.f32 %v14814_v37, %v7922_v60  ;;  %v14944_v41 = vadd.f32 %v14814_v37, %v7925_v30  ;;  %v14947_v57 = vadd.f32 %v14814_v37, %v7923_v26 }
 0x5f5   : > { %v10549_v8 = vpop.eup %10548  ;;  %10566 = vrcp.f32 %v8111_v44  ;;  %v8112_v42 = vadd.f32 1.0, %v10547_v39  ;;  %v7926_v9 = vmul.f32 %v14810_v55, %v14755_v24  ;;  %v14955_v52 = vadd.f32 %v14814_v37, %v7928_v0 }
 0x5f6   : > { %v9936_v53 = vpop.f32.mrb[172].mxu0  ;;  %v10551_v18 = vpop.eup %10550  ;;  %10568 = vrcp.f32 %v8109_v36  ;;  %v8110_v43 = vadd.f32 1.0, %v10549_v8  ;;  %v7929_v60 = vmul.f32 %v14757_v16, %v14810_v55  ;;  %v7927_v39 = vmul.f32 %v14810_v55, %v14759_v48 }
 0x5f7   : > { %v7512_v22 = vmul.f32 %v9936_v53, %v14818_v13  ;;  %v7412_v20 = vpop.f32.mrb[173].mxu0  ;;  %v10553_v63 = vpop.eup %10552  ;;  %v8203_v10 = vmul.f32 %v10551_v18, %v14835_v54  ;;  %10570 = vrcp.f32 %v8112_v42  ;;  %v14978_v45 = vadd.f32 %v14814_v37, %v7926_v9 }
 0x5f8   : > { %v7510_v50 = vmul.f32 %v14818_v13, %v7412_v20  ;;  %v9937_v19 = vpop.f32.mrb[174].mxu0  ;;  %v10555_v61 = vpop.eup %10554  ;;  %v8201_v11 = vmul.f32 %v10553_v63, %v14841_v25  ;;  %10572 = vrcp.f32 %v8110_v43  ;;  %v7932_v8 = vmul.f32 %v14761_v35, %v14810_v55 }
 0x5f9   : > { %v7551_v21 = vadd.f32 %v14820_v34, %v7512_v22  ;;  %v7513_v31 = vmul.f32 %v9937_v19, %v14818_v13  ;;  %v7415_v4 = vpop.f32.mrb[175].mxu0  ;;  %v10557_v24 = vpop.eup %10556  ;;  %8236 = vst.msk [vmem:[%s14962_s23 + $0x10] sm:$0xff] %vm8233_vm13, %v8203_v10  ;;  %v8204_v54 = vmul.f32 %v10555_v61, %v14847_v1  ;;  %v7930_v42 = vmul.f32 %v14810_v55, %v14763_v3 }
 0x5fa   : > { %v7549_v46 = vadd.f32 %v14820_v34, %v7510_v50  ;;  %v7511_v25 = vmul.f32 %v14818_v13, %v7415_v4  ;;  %v10559_v40 = vpop.eup %10558  ;;  %8234 = vst.msk [vmem:[%s14962_s23] sm:$0xff] %vm8233_vm13, %v8201_v11  ;;  %v8202_v30 = vmul.f32 %v10557_v24, %v14850_v29 }
 0x5fb   : > { %v14974_v26 = vadd.f32 %v7959_v62, %v7551_v21  ;;  %v7552_v59 = vadd.f32 %v14820_v34, %v7513_v31  ;;  %v10561_v1 = vpop.eup %10560  ;;  %8237 = vst.msk [vmem:[%s14962_s23 + $0x18] sm:$0xff] %vm8233_vm13, %v8204_v54  ;;  %v8115_v44 = vadd.f32 1.0, %v10559_v40 }
 0x5fc   : > { %v14982_v0 = vadd.f32 %v7957_v33, %v7549_v46  ;;  %v7550_v16 = vadd.f32 %v14820_v34, %v7511_v25  ;;  %v10563_v36 = vpop.eup %10562  ;;  %8235 = vst.msk [vmem:[%s14962_s23 + $0x8] sm:$0xff] %vm8233_vm13, %v8202_v30  ;;  %v8113_v29 = vadd.f32 1.0, %v10561_v1  ;;  %v7968_v1 = vadd.f32 %v14814_v37, %v7929_v60 }
 0x5fd   : > { %v14989_v62 = vadd.f32 %v7960_v12, %v7552_v59  ;;  %v10565_v53 = vpop.eup %10564  ;;  %10574 = vrcp.f32 %v8115_v44  ;;  %v8116_v33 = vadd.f32 1.0, %v10563_v36  ;;  %v9267_v18 = vmul.f32 -1.442695, %v14974_v26 }
 0x5fe   : > { %v14996_v43 = vadd.f32 %v7958_v49, %v7550_v16  ;;  %v9940_v48 = vpop.f32.mrb[176].mxu0  ;;  %10576 = vrcp.f32 %v8113_v29  ;;  %v8114_v22 = vadd.f32 1.0, %v10565_v53  ;;  %v9265_v20 = vmul.f32 -1.442695, %v14982_v0 }
 0x5ff   : > { %v7516_v12 = vmul.f32 %v9940_v48, %v14818_v13  ;;  %v7428_v9 = vpop.f32.mrb[177].mxu0  ;;  %v10567_v63 = vpop.eup %10566  ;;  %10578 = vrcp.f32 %v8116_v33  ;;  %v9268_v35 = vmul.f32 -1.442695, %v14989_v62  ;;  %v15038_v16 = vadd.f32 %v14814_v37, %v7932_v8 }
 0x600   : > { %v9266_v3 = vmul.f32 -1.442695, %v14996_v43  ;;  %v7514_v10 = vmul.f32 %v14818_v13, %v7428_v9  ;;  %v9941_v50 = vpop.f32.mrb[178].mxu0  ;;  %v10569_v49 = vpop.eup %10568  ;;  %v8207_v19 = vmul.f32 %v10567_v63, %v14875_v38  ;;  %10580 = vrcp.f32 %v8114_v22 }
 0x601   : > { %v7555_v61 = vadd.f32 %v14820_v34, %v7516_v12  ;;  %v7517_v11 = vmul.f32 %v9941_v50, %v14818_v13  ;;  %v7431_v21 = vpop.f32.mrb[179].mxu0  ;;  %v10571_v31 = vpop.eup %10570  ;;  %v8205_v4 = vmul.f32 %v10569_v49, %v14879_v23  ;;  %10582 = vpow2.f32 %v9267_v18 }
 0x602   : > { %v7553_v24 = vadd.f32 %v14820_v34, %v7514_v10  ;;  %v7515_v54 = vmul.f32 %v14818_v13, %v7431_v21  ;;  %v10573_v46 = vpop.eup %10572  ;;  %8240 = vst.msk [vmem:[%s14962_s23 + $0x30] sm:$0xff] %vm8233_vm13, %v8207_v19  ;;  %v8208_v38 = vmul.f32 %v10571_v31, %v14883_v47  ;;  %10584 = vpow2.f32 %v9265_v20 }
 0x603   : > { %v15013_v25 = vadd.f32 %v14938_v2, %v7555_v61  ;;  %v7556_v40 = vadd.f32 %v14820_v34, %v7517_v11  ;;  %8238 = vst.msk [vmem:[%s14962_s23 + $0x20] sm:$0xff] %vm8233_vm13, %v8205_v4  ;;  %v8206_v23 = vmul.f32 %v10573_v46, %v14888_v28  ;;  %10586 = vpow2.f32 %v9268_v35 }
 0x604   : > { %v15020_v30 = vadd.f32 %v14941_v58, %v7553_v24  ;;  %v7554_v59 = vadd.f32 %v14820_v34, %v7515_v54  ;;  %8241 = vst.msk [vmem:[%s14962_s23 + $0x38] sm:$0xff] %vm8233_vm13, %v8208_v38  ;;  %10588 = vpow2.f32 %v9266_v3  ;;  %v7966_v58 = vadd.f32 %v14814_v37, %v7927_v39 }
 0x605   : > { %v9271_v47 = vmul.f32 -1.442695, %v15013_v25  ;;  %v15027_v2 = vadd.f32 %v14944_v41, %v7556_v40  ;;  %8239 = vst.msk [vmem:[%s14962_s23 + $0x28] sm:$0xff] %vm8233_vm13, %v8206_v23  ;;  %v15042_v41 = vadd.f32 %v14814_v37, %v7930_v42  ;;  %v7933_v60 = vmul.f32 %v14765_v17, %v14810_v55 }
 0x606   : > { %v9269_v28 = vmul.f32 -1.442695, %v15020_v30  ;;  %v15034_v44 = vadd.f32 %v14947_v57, %v7554_v59  ;;  %v7931_v8 = vmul.f32 %v14810_v55, %v14767_v6  ;;  %v7936_v17 = vmul.f32 %v14769_v32, %v14810_v55 }
 0x607   : > { %10590 = vpow2.f32 %v9271_v47  ;;  %v9272_v36 = vmul.f32 -1.442695, %v15027_v2  ;;  %v9944_v29 = vpop.f32.mrb[180].mxu0  ;;  %v10575_v53 = vpop.eup %10574  ;;  %v7972_v10 = vadd.f32 %v14814_v37, %v7933_v60  ;;  %v7934_v4 = vmul.f32 %v14810_v55, %v14771_v56 }
 0x608   : > { %10592 = vpow2.f32 %v9269_v28  ;;  %v9270_v57 = vmul.f32 -1.442695, %v15034_v44  ;;  %v7520_v33 = vmul.f32 %v9944_v29, %v14818_v13  ;;  %v7444_v39 = vpop.f32.mrb[181].mxu0  ;;  %v10577_v18 = vpop.eup %10576  ;;  %v8211_v48 = vmul.f32 %v10575_v53, %v14904_v14 }
 0x609   : > { %10594 = vpow2.f32 %v9272_v36  ;;  %v7518_v42 = vmul.f32 %v14818_v13, %v7444_v39  ;;  %v9945_v22 = vpop.f32.mrb[182].mxu0  ;;  %v10579_v20 = vpop.eup %10578  ;;  %v8209_v12 = vmul.f32 %v10577_v18, %v14907_v15  ;;  %v7970_v61 = vadd.f32 %v14814_v37, %v7931_v8 }
 0x60a   : > { %10596 = vpow2.f32 %v9270_v57  ;;  %v7559_v9 = vadd.f32 %v14820_v34, %v7520_v33  ;;  %v7521_v6 = vmul.f32 %v9945_v22, %v14818_v13  ;;  %v7447_v63 = vpop.f32.mrb[183].mxu0  ;;  %v10581_v35 = vpop.eup %10580  ;;  %8244 = vst.msk [vmem:[%s14962_s23 + $0x50] sm:$0xff] %vm8233_vm13, %v8211_v48  ;;  %v8212_v14 = vmul.f32 %v10579_v20, %v14911_v7 }
 0x60b   : > { %v7557_v3 = vadd.f32 %v14820_v34, %v7518_v42  ;;  %v7519_v32 = vmul.f32 %v14818_v13, %v7447_v63  ;;  %v10583_v15 = vpop.eup %10582  ;;  %8242 = vst.msk [vmem:[%s14962_s23 + $0x40] sm:$0xff] %vm8233_vm13, %v8209_v12  ;;  %v8210_v50 = vmul.f32 %v10581_v35, %v14916_v27  ;;  %v15084_v54 = vadd.f32 %v14814_v37, %v7936_v17 }
 0x60c   : > { %v15067_v49 = vadd.f32 %v14955_v52, %v7559_v9  ;;  %v7560_v19 = vadd.f32 %v14820_v34, %v7521_v6  ;;  %v10585_v7 = vpop.eup %10584  ;;  %8245 = vst.msk [vmem:[%s14962_s23 + $0x58] sm:$0xff] %vm8233_vm13, %v8212_v14  ;;  %v8119_v11 = vadd.f32 1.0, %v10583_v15  ;;  %v7937_v46 = vmul.f32 %v14773_v51, %v14810_v55 }
 0x60d   : > { %v15074_v21 = vadd.f32 %v14978_v45, %v7557_v3  ;;  %v7558_v31 = vadd.f32 %v14820_v34, %v7519_v32  ;;  %v10587_v27 = vpop.eup %10586  ;;  %8243 = vst.msk [vmem:[%s14962_s23 + $0x48] sm:$0xff] %vm8233_vm13, %v8210_v50  ;;  %v8117_v52 = vadd.f32 1.0, %v10585_v7  ;;  %v7935_v28 = vmul.f32 %v14810_v55, %v14775_v5 }
 0x60e   : > { %v15081_v24 = vadd.f32 %v7968_v1, %v7560_v19  ;;  %v10589_v38 = vpop.eup %10588  ;;  %10598 = vrcp.f32 %v8119_v11  ;;  %v8120_v45 = vadd.f32 1.0, %v10587_v27  ;;  %v9275_v40 = vmul.f32 -1.442695, %v15067_v49 }
 0x60f   : > { %v15089_v23 = vadd.f32 %v7966_v58, %v7558_v31  ;;  %v9948_v56 = vpop.f32.mrb[184].mxu0  ;;  %10600 = vrcp.f32 %v8117_v52  ;;  %v8118_v59 = vadd.f32 1.0, %v10589_v38  ;;  %v9273_v51 = vmul.f32 -1.442695, %v15074_v21 }
 0x610   : > { %v7524_v47 = vmul.f32 %v9948_v56, %v14818_v13  ;;  %v7460_v1 = vpop.f32.mrb[185].mxu0  ;;  %10602 = vrcp.f32 %v8120_v45  ;;  %v9276_v29 = vmul.f32 -1.442695, %v15081_v24  ;;  %v7973_v14 = vadd.f32 %v14814_v37, %v7934_v4 }
 0x611   : > { %v10591_v36 = vpop.eup %10590  ;;  %v7522_v60 = vmul.f32 %v14818_v13, %v7460_v1  ;;  %v9949_v53 = vpop.f32.mrb[186].mxu0  ;;  %10604 = vrcp.f32 %v8118_v59  ;;  %v9274_v63 = vmul.f32 -1.442695, %v15089_v23  ;;  %v7976_v32 = vadd.f32 %v14814_v37, %v7937_v46 }
 0x612   : > { %v10593_v58 = vpop.eup %10592  ;;  %v8123_v57 = vadd.f32 1.0, %v10591_v36  ;;  %v7563_v33 = vadd.f32 %v14820_v34, %v7524_v47  ;;  %v7525_v39 = vmul.f32 %v9949_v53, %v14818_v13  ;;  %v7463_v8 = vpop.f32.mrb[187].mxu0  ;;  %10606 = vpow2.f32 %v9275_v40 }
 0x613   : > { %v10595_v18 = vpop.eup %10594  ;;  %v8121_v48 = vadd.f32 1.0, %v10593_v58  ;;  %v7561_v5 = vadd.f32 %v14820_v34, %v7522_v60  ;;  %v7523_v55 = vmul.f32 %v14818_v13, %v7463_v8  ;;  %v7974_v19 = vadd.f32 %v14814_v37, %v7935_v28 }
 0x614   : > { %v10597_v42 = vpop.eup %10596  ;;  %10608 = vrcp.f32 %v8123_v57  ;;  %v8124_v22 = vadd.f32 1.0, %v10595_v18  ;;  %v15102_v17 = vadd.f32 %v15038_v16, %v7563_v33  ;;  %v7564_v20 = vadd.f32 %v14820_v34, %v7525_v39 }
 0x615   : > { %10610 = vrcp.f32 %v8121_v48  ;;  %v8122_v12 = vadd.f32 1.0, %v10597_v42  ;;  %v15106_v9 = vadd.f32 %v15042_v41, %v7561_v5  ;;  %v7562_v6 = vadd.f32 %v14820_v34, %v7523_v55 }
 0x616   : > { %10612 = vrcp.f32 %v8124_v22  ;;  %v15110_v35 = vadd.f32 %v7972_v10, %v7564_v20  ;;  %v9279_v16 = vmul.f32 -1.442695, %v15102_v17 }
 0x617   : > { %10614 = vrcp.f32 %v8122_v12  ;;  %v15114_v3 = vadd.f32 %v7970_v61, %v7562_v6  ;;  %v9952_v15 = vpop.f32.mrb[188].mxu0  ;;  %v9277_v41 = vmul.f32 -1.442695, %v15106_v9 }
 0x618   : > { %10616 = vpow2.f32 %v9273_v51  ;;  %v7528_v50 = vmul.f32 %v9952_v15, %v14818_v13  ;;  %v7476_v7 = vpop.f32.mrb[189].mxu0  ;;  %v10599_v10 = vpop.eup %10598  ;;  %v9280_v11 = vmul.f32 -1.442695, %v15110_v35 }
 0x619   : > { %10618 = vpow2.f32 %v9276_v29  ;;  %v9278_v31 = vmul.f32 -1.442695, %v15114_v3  ;;  %v7526_v61 = vmul.f32 %v14818_v13, %v7476_v7  ;;  %v9953_v4 = vpop.f32.mrb[190].mxu0  ;;  %v10601_v27 = vpop.eup %10600  ;;  %v8215_v52 = vmul.f32 %v10599_v10, %v14974_v26 }
 0x61a   : > { %10620 = vpow2.f32 %v9274_v63  ;;  %v7567_v46 = vadd.f32 %v14820_v34, %v7528_v50  ;;  %v7529_v37 = vmul.f32 %v9953_v4, %v14818_v13  ;;  %v7479_v38 = vpop.f32.mrb[191].mxu0  ;;  %v10603_v45 = vpop.eup %10602  ;;  %v8213_v40 = vmul.f32 %v10601_v27, %v14982_v0 }
 0x61b   : > { %10622 = vpow2.f32 %v9279_v16  ;;  %v7565_v56 = vadd.f32 %v14820_v34, %v7526_v61  ;;  %v7527_v59 = vmul.f32 %v14818_v13, %v7479_v38  ;;  %v10605_v47 = vpop.eup %10604  ;;  %8248 = vst.msk [vmem:[%s14962_s23 + $0x70] sm:$0xff] %vm8233_vm13, %v8215_v52  ;;  %v8216_v26 = vmul.f32 %v10603_v45, %v14989_v62 }
 0x61c   : > { %10624 = vpow2.f32 %v9277_v41  ;;  %v15133_v1 = vadd.f32 %v15084_v54, %v7567_v46  ;;  %v7568_v28 = vadd.f32 %v14820_v34, %v7529_v37  ;;  %v10607_v36 = vpop.eup %10606  ;;  %8246 = vst.msk [vmem:[%s14962_s23 + $0x60] sm:$0xff] %vm8233_vm13, %v8213_v40  ;;  %v8214_v0 = vmul.f32 %v10605_v47, %v14996_v43 }
 0x61d   : > { %10626 = vpow2.f32 %v9280_v11  ;;  %v15139_v51 = vadd.f32 %v7973_v14, %v7565_v56  ;;  %v7566_v13 = vadd.f32 %v14820_v34, %v7527_v59  ;;  %8249 = vst.msk [vmem:[%s14962_s23 + $0x78] sm:$0xff] %vm8233_vm13, %v8216_v26  ;;  %v8127_v62 = vadd.f32 1.0, %v10607_v36 }
 0x61e   : > { %v10609_v29 = vpop.eup %10608  ;;  %10628 = vpow2.f32 %v9278_v31  ;;  %v9283_v54 = vmul.f32 -1.442695, %v15133_v1  ;;  %v15145_v60 = vadd.f32 %v7976_v32, %v7568_v28  ;;  %8247 = vst.msk [vmem:[%s14962_s23 + $0x68] sm:$0xff] %vm8233_vm13, %v8214_v0 }
 0x61f   : > { %v10611_v53 = vpop.eup %10610  ;;  %v8219_v43 = vmul.f32 %v10609_v29, %v15013_v25  ;;  %v9281_v58 = vmul.f32 -1.442695, %v15139_v51  ;;  %v15151_v34 = vadd.f32 %v7974_v19, %v7566_v13  ;;  %10630 = vrcp.f32 %v8127_v62 }
 0x620   : > { %v10613_v57 = vpop.eup %10612  ;;  %v8217_v33 = vmul.f32 %v10611_v53, %v15020_v30  ;;  %v9284_v39 = vmul.f32 -1.442695, %v15145_v60  ;;  %10632 = vpow2.f32 %v9283_v54 }
 0x621   : > { %v10615_v8 = vpop.eup %10614  ;;  %8252 = vst.msk [vmem:[%s14962_s23 + $0x90] sm:$0xff] %vm8233_vm13, %v8219_v43  ;;  %v8220_v18 = vmul.f32 %v10613_v57, %v15027_v2  ;;  %v9282_v25 = vmul.f32 -1.442695, %v15151_v34  ;;  %10634 = vpow2.f32 %v9281_v58 }
 0x622   : > { %v10617_v48 = vpop.eup %10616  ;;  %8250 = vst.msk [vmem:[%s14962_s23 + $0x80] sm:$0xff] %vm8233_vm13, %v8217_v33  ;;  %v8218_v5 = vmul.f32 %v10615_v8, %v15034_v44  ;;  %10636 = vpow2.f32 %v9284_v39 }
 0x623   : > { %v10619_v55 = vpop.eup %10618  ;;  %8253 = vst.msk [vmem:[%s14962_s23 + $0x98] sm:$0xff] %vm8233_vm13, %v8220_v18  ;;  %v8125_v30 = vadd.f32 1.0, %v10617_v48  ;;  %10638 = vpow2.f32 %v9282_v25 }
 0x624   : > { %v10621_v42 = vpop.eup %10620  ;;  %8251 = vst.msk [vmem:[%s14962_s23 + $0x88] sm:$0xff] %vm8233_vm13, %v8218_v5  ;;  %v8128_v22 = vadd.f32 1.0, %v10619_v55 }
 0x625   : > { %v10623_v2 = vpop.eup %10622  ;;  %10640 = vrcp.f32 %v8125_v30  ;;  %v8126_v20 = vadd.f32 1.0, %v10621_v42 }
 0x626   : > { %v10625_v12 = vpop.eup %10624  ;;  %10642 = vrcp.f32 %v8128_v22  ;;  %v8131_v6 = vadd.f32 1.0, %v10623_v2 }
 0x627   : > { %v10627_v63 = vpop.eup %10626  ;;  %10644 = vrcp.f32 %v8126_v20  ;;  %v8129_v44 = vadd.f32 1.0, %v10625_v12 }
 0x628   : > { %v10629_v14 = vpop.eup %10628  ;;  %10646 = vrcp.f32 %v8131_v6  ;;  %v8132_v16 = vadd.f32 1.0, %v10627_v63 }
 0x629   : > { %10648 = vrcp.f32 %v8129_v44  ;;  %v8130_v32 = vadd.f32 1.0, %v10629_v14  ;;  %v10631_v15 = vpop.eup %10630 }
 0x62a   : > { %10650 = vrcp.f32 %v8132_v16  ;;  %v10633_v41 = vpop.eup %10632  ;;  %v8223_v50 = vmul.f32 %v10631_v15, %v15067_v49 }
 0x62b   : > { %10652 = vrcp.f32 %v8130_v32  ;;  %v10635_v19 = vpop.eup %10634  ;;  %v8135_v7 = vadd.f32 1.0, %v10633_v41 }
 0x62c   : > { %v10637_v10 = vpop.eup %10636  ;;  %8256 = vst.msk [vmem:[%s14962_s23 + $0xb0] sm:$0xff] %vm8233_vm13, %v8223_v50  ;;  %v8133_v11 = vadd.f32 1.0, %v10635_v19 }
 0x62d   : > { %v10639_v31 = vpop.eup %10638  ;;  %10654 = vrcp.f32 %v8135_v7  ;;  %v8136_v61 = vadd.f32 1.0, %v10637_v10 }
 0x62e   : > { %10656 = vrcp.f32 %v8133_v11  ;;  %v8134_v27 = vadd.f32 1.0, %v10639_v31 }
 0x62f   : > { %v10641_v4 = vpop.eup %10640  ;;  %10658 = vrcp.f32 %v8136_v61 }
 0x630   : > { %v10643_v52 = vpop.eup %10642  ;;  %v8221_v49 = vmul.f32 %v10641_v4, %v15074_v21  ;;  %10660 = vrcp.f32 %v8134_v27 }
 0x631   : > { %v10645_v46 = vpop.eup %10644  ;;  %v8224_v37 = vmul.f32 %v10643_v52, %v15081_v24 }
 0x632   : > { %v10647_v38 = vpop.eup %10646  ;;  %8254 = vst.msk [vmem:[%s14962_s23 + $0xa0] sm:$0xff] %vm8233_vm13, %v8221_v49  ;;  %v8222_v45 = vmul.f32 %v10645_v46, %v15089_v23 }
 0x633   : > { %v10649_v40 = vpop.eup %10648  ;;  %8257 = vst.msk [vmem:[%s14962_s23 + $0xb8] sm:$0xff] %vm8233_vm13, %v8224_v37  ;;  %v8227_v21 = vmul.f32 %v10647_v38, %v15102_v17 }
 0x634   : > { %v10651_v56 = vpop.eup %10650  ;;  %8255 = vst.msk [vmem:[%s14962_s23 + $0xa8] sm:$0xff] %vm8233_vm13, %v8222_v45  ;;  %v8225_v24 = vmul.f32 %v10649_v40, %v15106_v9 }
 0x635   : > { %v10653_v59 = vpop.eup %10652  ;;  %8260 = vst.msk [vmem:[%s14962_s23 + $0xd0] sm:$0xff] %vm8233_vm13, %v8227_v21  ;;  %v8228_v47 = vmul.f32 %v10651_v56, %v15110_v35 }
 0x636   : > { %8258 = vst.msk [vmem:[%s14962_s23 + $0xc0] sm:$0xff] %vm8233_vm13, %v8225_v24  ;;  %v8226_v23 = vmul.f32 %v10653_v59, %v15114_v3 }
 0x637   : > { %8261 = vst.msk [vmem:[%s14962_s23 + $0xd8] sm:$0xff] %vm8233_vm13, %v8228_v47  ;;  %v10655_v17 = vpop.eup %10654 }
 0x638   : > { %8259 = vst.msk [vmem:[%s14962_s23 + $0xc8] sm:$0xff] %vm8233_vm13, %v8226_v23  ;;  %v10657_v9 = vpop.eup %10656  ;;  %v8231_v26 = vmul.f32 %v10655_v17, %v15133_v1 }
 0x639   : > { %v10659_v35 = vpop.eup %10658  ;;  %v8229_v28 = vmul.f32 %v10657_v9, %v15139_v51 }
 0x63a   : > { %v10661_v36 = vpop.eup %10660  ;;  %8264 = vst.msk [vmem:[%s14962_s23 + $0xf0] sm:$0xff] %vm8233_vm13, %v8231_v26  ;;  %v8232_v3 = vmul.f32 %v10659_v35, %v15145_v60 }
 0x63b   : > { %8262 = vst.msk [vmem:[%s14962_s23 + $0xe0] sm:$0xff] %vm8233_vm13, %v8229_v28  ;;  %v8230_v1 = vmul.f32 %v10661_v36, %v15151_v34 }
 0x63c   : > { %8265 = vst.msk [vmem:[%s14962_s23 + $0xf8] sm:$0xff] %vm8233_vm13, %v8232_v3 }
 0x63d   : > { %8263 = vst.msk [vmem:[%s14962_s23 + $0xe8] sm:$0xff] %vm8233_vm13, %v8230_v1 }
 0x63e   : > { %11101 = shalt.err (!%p11098_p6)
}
 0x63f   : > { %s11102_s23 = scalar_lea.hbm %s15200_s3, 4096  ;;  %s11106_s20 = scalar_lea.hbm %s15442_s25, 8192 }
 0x640   : > { %p11103_p3 = scmp.ne.s32.totalorder %s15200_s3, %s11102_s23  ;;  %p11107_p11 = scmp.lt.u32.totalorder %s15200_s3, %s15442_s25 }
 0x641   : > { %p11108_p5 = scmp.lt.u32.totalorder %s11106_s20, %s11102_s23  ;;  %p11110_p10 = scmp.lt.u32.totalorder %s11102_s23, %s15200_s3 }
 0x642   : > { %p11104_p7 = pnand %p11103_p3, %p15440_p0 }
 0x643   : > { %p11109_p1 = por %p11108_p5, %p11107_p11 }
 0x644   : > { %p11105_p12 = pneg %p11104_p7 }
 0x645   : > { %p11111_p13 = por %p11110_p10, %p11109_p1 }
 0x647   : > { %p11112_p2 = pnand %p11111_p13, %p11105_p12 }
 0x649   : > { %11115 = shalt.err (!%p11112_p2)
}
 0x64a   : > { %s11223_s4 = smov 128   ;;  %s11224_s5 = smov 8  }
 0x64b   : > { %10050 = dma.vmem_to_hbm [thread:$0]  (%p15440_p0), %s15202_s2, 4096, %s15200_s3, %s8267_s0, %s11223_s4, %s11223_s4, %s11224_s5  }
 0x64c PF: > { %s8322_s16 = sand.u32 1, %s11178_s29   ;;  %p15443_p8 = scmp.ne.s32.totalorder %s15330_s27, 0 }
 0x64d   : > { %p15444_p9 = scmp.ge.s32.totalorder %s11198_s18, 2  ;;  %s8323_s23 = scalar_lea.sflag [#allocation6], %s8322_s16 }
 0x64f   : > { %p10096_p4 = pnand %p15444_p9, %p15443_p8 }
 0x651   : > { %11169 = dma.done.wait (!%p10096_p4), %s8323_s23, 4096  }
 0x652   : > { %11171 = vsyncadd (!%p10096_p4), %s8323_s23, 4294963200  ;;  %s8332_s26 = scalar_lea.sflag [#allocation27], %s8322_s16 }
 0x653   : > { %11173 = dma.done.wait (!%p10096_p4), %s8332_s26, 2048  }
 0x654   : > { %11175 = vsyncadd (!%p10096_p4), %s8332_s26, 4294965248  ;;  %s40_s18 = sadd.s32 1, %s11198_s18   ;;  %s15445_s29 = smov %s11182_s30 }
 0x655   : > { %p37_p6 = scmp.ge.s32.totalorder %s40_s18, 4   ;;  %s15446_s30 = smov %s11186_s15 }
 0x656   : > { %s15447_s15 = smov %s11635_s22  ;;  %s15448_s16 = smov %s11194_s17 }
 0x657   : > { %s15449_s17 = smov %s15451_s14  ;;  %39 = sbr.rel (!%p37_p6) target bundleno = 23 (0x17), region = 198 }
 0x65e   :  { %8337 = vsyncpa [#allocation5], 1 }
 0x65f   :  { %8339 = vsyncpa [#allocation5 + $0x1], 1 }
 0x660   :  { %8340 = vsyncpa [#allocation8], 1 }
 0x661   :  { %8341 = vsyncpa [#allocation11], 1 }
 0x662   :  { %8342 = vsyncpa [#allocation14], 1 }
 0x663   :  { %8343 = vsyncpa [#allocation17], 1 }
 0x664   :  { %8344 = vsyncpa [#allocation20], 1 }
 0x665   :  { %8345 = vsyncpa [#allocation23], 1 }
 0x666   :  { %8346 = vsyncpa [#allocation6], 1 }
 0x667   :  { %8348 = vsyncpa [#allocation6 + $0x1], 1 }
 0x668   :  { %8349 = vsyncpa [#allocation27], 1 }
 0x669   :  { %8351 = vsyncpa [#allocation27 + $0x1], 1 }

</bundles_post_ra>
